<compile_context>
chip_gen: v7x
topology: tpu7x:2x2x1
jax: 0.10.0
libtpu: 0.0.40
codegen_flags: <defaults>
</compile_context>

<pallas_src>
import math
import numpy as np

import jax
import jax.numpy as jnp
from jax.experimental import pallas as pl
from jax.experimental.pallas import tpu as pltpu

# ---- model dimensions (fixed by the PyTorch module __init__) ----------------
D = 768       # embed_dim (LayerNorm(768) hard-codes this)
F = 1024      # dim_feedforward
H = 4         # nhead
HD = D // H   # head_dim = 192
HID = 128     # hidden_dim of the final fc
L = 3         # num encoder layers
EPS = 1e-5    # LayerNorm eps (PyTorch default)

# packed small-param row indices (rows of the (L, 16, F) array)
_R_QB, _R_KB, _R_VB, _R_OPB = 0, 1, 2, 3
_R_LN1G, _R_LN1B, _R_LN2G, _R_LN2B = 4, 5, 6, 7
_R_L2B, _R_L1B = 8, 9


# ----------------------------- in-kernel helpers -----------------------------
def _layernorm(v, g, b):
    mu = jnp.mean(v, axis=-1, keepdims=True)
    var = jnp.mean((v - mu) ** 2, axis=-1, keepdims=True)
    return (v - mu) * jax.lax.rsqrt(var + EPS) * g + b


# ------------------- fused encoder + head kernel (grid=L) --------------------
def align_kernel(x_ref, ipw_ref, opw_ref, l1w_ref, l2w_ref, sp_ref,
                 lnf_ref, fcw_ref, fcb_ref, xall_ref,
                 o_ref, x_scr):
    layer = pl.program_id(0)

    @pl.when(layer == 0)
    def _():
        x_scr[...] = x_ref[...]

    x = x_scr[...]                     # (S, D) f32 carried state
    sp = sp_ref[...]                   # (16, F) f32 packed small params

    # ---- multi-head self attention (post-norm layer, PyTorch order) ----
    xb = x.astype(jnp.bfloat16)
    qkv = jnp.dot(xb, ipw_ref[...], preferred_element_type=jnp.float32)  # (S, 3D)
    q = qkv[:, 0:D] + sp[_R_QB:_R_QB + 1, 0:D]
    k = qkv[:, D:2 * D] + sp[_R_KB:_R_KB + 1, 0:D]
    v = qkv[:, 2 * D:3 * D] + sp[_R_VB:_R_VB + 1, 0:D]

    scale = 1.0 / math.sqrt(HD)
    attn = None
    for h in range(H):
        sl = slice(h * HD, (h + 1) * HD)
        qh, kh, vh = q[:, sl], k[:, sl], v[:, sl]          # (S, HD)
        s = jax.lax.dot_general(qh, kh, (((1,), (1,)), ((), ())),
                                preferred_element_type=jnp.float32) * scale
        s = s - jnp.max(s, axis=-1, keepdims=True)
        p = jnp.exp(s)
        p = p * pl.reciprocal(jnp.sum(p, axis=-1, keepdims=True), approx=True)
        # TODO(synk): attention-weight dropout (p=0.1) omitted -> eval semantics.
        oh = jnp.dot(p, vh, preferred_element_type=jnp.float32)         # (S, HD)
        c = jnp.dot(oh.astype(jnp.bfloat16), opw_ref[sl, :],
                    preferred_element_type=jnp.float32)                 # (S, D)
        attn = c if attn is None else attn + c
    attn = attn + sp[_R_OPB:_R_OPB + 1, 0:D]

    x1 = _layernorm(x + attn, sp[_R_LN1G:_R_LN1G + 1, 0:D],
                    sp[_R_LN1B:_R_LN1B + 1, 0:D])

    # ---- feed-forward (relu activation) ----
    h1 = jnp.maximum(
        jnp.dot(x1.astype(jnp.bfloat16), l1w_ref[...],
                preferred_element_type=jnp.float32) + sp[_R_L1B:_R_L1B + 1, :],
        0.0)                                                            # (S, F)
    ff = jnp.dot(h1.astype(jnp.bfloat16), l2w_ref[...],
                 preferred_element_type=jnp.float32) + sp[_R_L2B:_R_L2B + 1, 0:D]
    x2 = _layernorm(x1 + ff, sp[_R_LN2G:_R_LN2G + 1, 0:D],
                    sp[_R_LN2B:_R_LN2B + 1, 0:D])

    x_scr[...] = x2

    # ---- fused head on the last layer: final LN, mean, fc, mean, relu ----
    @pl.when(layer == L - 1)
    def _():
        lnf = lnf_ref[...]                                   # (2, D)
        enc = _layernorm(x2, lnf[0:1, :], lnf[1:2, :])       # (S, D)
        m = jnp.mean(enc, axis=0, keepdims=True)             # (1, D)
        fcw = fcw_ref[...]                                   # (D, HID)
        fcb = fcb_ref[...]                                   # (1, HID)
        y0 = jnp.dot(m, fcw, preferred_element_type=jnp.float32) + fcb
        y1 = jnp.dot(xall_ref[...], fcw, preferred_element_type=jnp.float32) + fcb
        o_ref[0:1, :] = jnp.maximum(jnp.mean(y0, axis=1, keepdims=True), 0.0)
        o_ref[1:2, :] = jnp.maximum(jnp.mean(y1, axis=1, keepdims=True), 0.0)


# --------------------------------- wrapper -----------------------------------
def align_block_forward(x, kp):
    """x: (S_total, D) float32. Returns shape (2,) like the PyTorch module."""
    x_all = x[-1:, :]                  # (1, D)
    x_seq = x[:-1, :]                  # (S, D)
    S = x_seq.shape[0]

    def stacked(*dims):                # per-layer weight, stacked on leading L axis
        n = len(dims)
        return pl.BlockSpec((None,) + dims, lambda l, n=n: (l,) + (0,) * n)

    def const(*dims):                  # same block every grid step (VMEM-resident)
        n = len(dims)
        return pl.BlockSpec(dims, lambda l, n=n: (0,) * n)

    out2x1 = pl.pallas_call(
        align_kernel,
        out_shape=jax.ShapeDtypeStruct((2, 1), jnp.float32),
        grid=(L,),
        in_specs=[
            const(S, D),               # x (sequence tokens)
            stacked(D, 3 * D),         # in_proj weight, bf16
            stacked(D, D),             # out_proj weight, bf16
            stacked(D, F),             # linear1 weight, bf16
            stacked(F, D),             # linear2 weight, bf16
            stacked(16, F),            # packed small params, f32
            const(2, D),               # final layernorm gamma/beta
            const(D, HID),             # fc weight
            const(1, HID),             # fc bias
            const(1, D),               # x_all (last token)
        ],
        out_specs=const(2, 1),
        scratch_shapes=[pltpu.VMEM((S, D), jnp.float32)],
        compiler_params=pltpu.CompilerParams(
            dimension_semantics=("arbitrary",),
            vmem_limit_bytes=48 * 1024 * 1024),   # fits v7x's 64 MiB physical VMEM
    )(x_seq, kp['ipw'], kp['opw'], kp['l1w'], kp['l2w'], kp['sp'],
      kp['lnf'], kp['fcw'], kp['fcb'], x_all)

    return out2x1[:, 0]                # (2,)


# ------------------------ deterministic parameter init -----------------------
def init_params(key):
    ks = jax.random.split(key, 8)

    def w(k, shape, scale=0.02):
        return scale * jax.random.normal(k, shape, jnp.float32)

    return dict(
        # big matmul weights stored in bf16 (streamed to the MXU as bf16)
        ipw=w(ks[0], (L, D, 3 * D)).astype(jnp.bfloat16),    # (in, out) layout
        opw=w(ks[2], (L, D, D)).astype(jnp.bfloat16),
        l1w=w(ks[3], (L, D, F)).astype(jnp.bfloat16),
        l2w=w(ks[5], (L, F, D)).astype(jnp.bfloat16),
        # small vectors kept in f32
        ipb=w(ks[1], (L, 3, D)),
        opb=jnp.zeros((L, D), jnp.float32),
        ln1g=jnp.ones((L, D), jnp.float32),
        ln1b=jnp.zeros((L, D), jnp.float32),
        ln2g=jnp.ones((L, D), jnp.float32),
        ln2b=jnp.zeros((L, D), jnp.float32),
        l1b=w(ks[4], (L, F)),
        l2b=jnp.zeros((L, D), jnp.float32),
        lnfg=jnp.ones((D,), jnp.float32),
        lnfb=jnp.zeros((D,), jnp.float32),
        fcw=w(ks[6], (D, HID)),
        fcb=w(ks[7], (HID,)),
    )


def prepare_params(p):
    """Pack the 9 small per-layer vectors into one (L, 16, F) array (1 DMA/layer)."""
    sp = jnp.zeros((L, 16, F), jnp.float32)
    sp = sp.at[:, _R_QB:_R_VB + 1, 0:D].set(p['ipb'])        # rows 0..2: q/k/v bias
    sp = sp.at[:, _R_OPB, 0:D].set(p['opb'])
    sp = sp.at[:, _R_LN1G, 0:D].set(p['ln1g'])
    sp = sp.at[:, _R_LN1B, 0:D].set(p['ln1b'])
    sp = sp.at[:, _R_LN2G, 0:D].set(p['ln2g'])
    sp = sp.at[:, _R_LN2B, 0:D].set(p['ln2b'])
    sp = sp.at[:, _R_L2B, 0:D].set(p['l2b'])
    sp = sp.at[:, _R_L1B, :].set(p['l1b'])
    return dict(
        ipw=p['ipw'], opw=p['opw'], l1w=p['l1w'], l2w=p['l2w'],
        sp=sp,
        lnf=jnp.stack([p['lnfg'], p['lnfb']], axis=0),       # (2, D)
        fcw=p['fcw'],
        fcb=p['fcb'].reshape(1, HID),
    )


# ------------------------------ pure-JAX reference ---------------------------
def _ln_ref(v, g, b):
    mu = jnp.mean(v, -1, keepdims=True)
    var = jnp.mean((v - mu) ** 2, -1, keepdims=True)
    return (v - mu) / jnp.sqrt(var + EPS) * g + b


def reference(x, p):
    x_all = x[-1:, :]
    h = x[:-1, :]
    for l in range(L):
        ipw = p['ipw'][l].astype(jnp.float32)
        opw = p['opw'][l].astype(jnp.float32)
        l1w = p['l1w'][l].astype(jnp.float32)
        l2w = p['l2w'][l].astype(jnp.float32)
        q = h @ ipw[:, 0:D] + p['ipb'][l][0]
        k = h @ ipw[:, D:2 * D] + p['ipb'][l][1]
        v = h @ ipw[:, 2 * D:] + p['ipb'][l][2]
        heads = []
        for hh in range(H):
            sl = slice(hh * HD, (hh + 1) * HD)
            s = (q[:, sl] @ k[:, sl].T) / jnp.sqrt(jnp.float32(HD))
            a = jax.nn.softmax(s, axis=-1)
            heads.append(a @ v[:, sl])
        attn = jnp.concatenate(heads, -1) @ opw + p['opb'][l]
        h = _ln_ref(h + attn, p['ln1g'][l], p['ln1b'][l])
        ff = jax.nn.relu(h @ l1w + p['l1b'][l]) @ l2w + p['l2b'][l]
        h = _ln_ref(h + ff, p['ln2g'][l], p['ln2b'][l])
    h = _ln_ref(h, p['lnfg'], p['lnfb'])
    m = jnp.mean(h, axis=0, keepdims=True)
    comb = jnp.concatenate([m, x_all], axis=0)
    y = comb @ p['fcw'] + p['fcb']
    return jax.nn.relu(jnp.mean(y, axis=1))


# ----------------------------------- main ------------------------------------
if __name__ == "__main__":
    key = jax.random.PRNGKey(0)
    kx, kp = jax.random.split(key)

    S_TOTAL = 9                                   # 8 sequence tokens + 1 "x_all" token
    x = jax.random.normal(kx, (S_TOTAL, D), jnp.float32)
    raw = init_params(kp)
    kparams = prepare_params(raw)

    out = align_block_forward(x, kparams)
    out = jax.block_until_ready(out)

    ref = reference(x, raw)
    np.testing.assert_allclose(np.asarray(out), np.asarray(ref), rtol=2e-2, atol=2e-2)
    assert out.shape == (2,)
    print("KERNEL_OK")
</pallas_src>

<mosaic_0001>
module attributes {stable_mosaic.version = 11 : i64} {
  func.func @align_kernel(%arg0: i32, %arg1: memref<8x768xf32, #tpu.memory_space<vmem>>, %arg2: memref<1x768x2304xbf16, #tpu.memory_space<vmem>>, %arg3: memref<1x768x768xbf16, #tpu.memory_space<vmem>>, %arg4: memref<1x768x1024xbf16, #tpu.memory_space<vmem>>, %arg5: memref<1x1024x768xbf16, #tpu.memory_space<vmem>>, %arg6: memref<1x16x1024xf32, #tpu.memory_space<vmem>>, %arg7: memref<2x768xf32, #tpu.memory_space<vmem>>, %arg8: memref<768x128xf32, #tpu.memory_space<vmem>>, %arg9: memref<1x128xf32, #tpu.memory_space<vmem>>, %arg10: memref<1x768xf32, #tpu.memory_space<vmem>>, %arg11: memref<2x1xf32, #tpu.memory_space<vmem>>, %arg12: memref<8x768xf32, #tpu.memory_space<vmem>>) attributes {dimension_semantics = [#tpu.dimension_semantics<arbitrary>], iteration_bounds = array<i64: 3>, scalar_prefetch = 0 : i64, scratch_operands = 1 : i64, tpu.core_type = #tpu.core_type<tc>, window_params = [{pipeline_mode = #tpu.pipeline_mode<synchronous>, transform_indices = @transform_0, window_bounds = array<i64: 8, 768>}, {transform_indices = @transform_1, window_bounds = array<i64: 1, 768, 2304>}, {transform_indices = @transform_2, window_bounds = array<i64: 1, 768, 768>}, {transform_indices = @transform_3, window_bounds = array<i64: 1, 768, 1024>}, {transform_indices = @transform_4, window_bounds = array<i64: 1, 1024, 768>}, {transform_indices = @transform_5, window_bounds = array<i64: 1, 16, 1024>}, {pipeline_mode = #tpu.pipeline_mode<synchronous>, transform_indices = @transform_6, window_bounds = array<i64: 2, 768>}, {pipeline_mode = #tpu.pipeline_mode<synchronous>, transform_indices = @transform_7, window_bounds = array<i64: 768, 128>}, {pipeline_mode = #tpu.pipeline_mode<synchronous>, transform_indices = @transform_8, window_bounds = array<i64: 1, 128>}, {pipeline_mode = #tpu.pipeline_mode<synchronous>, transform_indices = @transform_9, window_bounds = array<i64: 1, 768>}, {pipeline_mode = #tpu.pipeline_mode<synchronous>, transform_indices = @transform_10, window_bounds = array<i64: 2, 1>}]} {
    %c0_i32 = arith.constant 0 : i32
    %0 = arith.cmpi eq, %arg0, %c0_i32 : i32
    %1 = arith.extui %0 : i1 to i32
    %c0_i32_0 = arith.constant 0 : i32
    %2 = arith.cmpi ne, %1, %c0_i32_0 : i32
    scf.if %2 {
      %c0_63 = arith.constant 0 : index
      %c0_64 = arith.constant 0 : index
      %182 = vector.load %arg1[%c0_63, %c0_64] : memref<8x768xf32, #tpu.memory_space<vmem>>, vector<8x768xf32>
      %c0_65 = arith.constant 0 : index
      %c0_66 = arith.constant 0 : index
      %183 = vector.load %arg12[%c0_65, %c0_66] : memref<8x768xf32, #tpu.memory_space<vmem>>, vector<8x768xf32>
      tpu.vector_store %arg12[%c0_65, %c0_66], %182 {strides = array<i32>} : memref<8x768xf32, #tpu.memory_space<vmem>>, vector<8x768xf32>,
    } else {
    }
    %c0 = arith.constant 0 : index
    %c0_1 = arith.constant 0 : index
    %3 = vector.load %arg12[%c0, %c0_1] : memref<8x768xf32, #tpu.memory_space<vmem>>, vector<8x768xf32>
    %c0_2 = arith.constant 0 : index
    %c0_3 = arith.constant 0 : index
    %c0_4 = arith.constant 0 : index
    %4 = vector.load %arg6[%c0_2, %c0_3, %c0_4] : memref<1x16x1024xf32, #tpu.memory_space<vmem>>, vector<1x16x1024xf32>
    %5 = vector.shape_cast %4 : vector<1x16x1024xf32> to vector<16x1024xf32>
    %6 = arith.truncf %3 : vector<8x768xf32> to vector<8x768xbf16>
    %c0_5 = arith.constant 0 : index
    %c0_6 = arith.constant 0 : index
    %c0_7 = arith.constant 0 : index
    %7 = vector.load %arg2[%c0_5, %c0_6, %c0_7] : memref<1x768x2304xbf16, #tpu.memory_space<vmem>>, vector<1x768x2304xbf16>
    %8 = vector.shape_cast %7 : vector<1x768x2304xbf16> to vector<768x2304xbf16>
    %cst = arith.constant dense<0.000000e+00> : vector<8x2304xf32>
    %9 = tpu.matmul %6, %8, %cst {dimension_numbers = #tpu.dot_dimension_numbers<[1], [0], [0], [1], [0, 0, 1, 1], [], []>} : vector<8x768xbf16>, vector<768x2304xbf16>, vector<8x2304xf32> -> vector<8x2304xf32>
    %10 = vector.extract_strided_slice %9 {offsets = [0, 0], sizes = [8, 768], strides = [1, 1]} : vector<8x2304xf32> to vector<8x768xf32>
    %11 = vector.extract_strided_slice %5 {offsets = [0, 0], sizes = [1, 768], strides = [1, 1]} : vector<16x1024xf32> to vector<1x768xf32>
    %12 = vector.broadcast %11 : vector<1x768xf32> to vector<8x768xf32>
    %13 = arith.addf %10, %12 : vector<8x768xf32>
    %14 = vector.extract_strided_slice %9 {offsets = [0, 768], sizes = [8, 768], strides = [1, 1]} : vector<8x2304xf32> to vector<8x768xf32>
    %15 = vector.extract_strided_slice %5 {offsets = [1, 0], sizes = [1, 768], strides = [1, 1]} : vector<16x1024xf32> to vector<1x768xf32>
    %16 = vector.broadcast %15 : vector<1x768xf32> to vector<8x768xf32>
    %17 = arith.addf %14, %16 : vector<8x768xf32>
    %18 = vector.extract_strided_slice %9 {offsets = [0, 1536], sizes = [8, 768], strides = [1, 1]} : vector<8x2304xf32> to vector<8x768xf32>
    %19 = vector.extract_strided_slice %5 {offsets = [2, 0], sizes = [1, 768], strides = [1, 1]} : vector<16x1024xf32> to vector<1x768xf32>
    %20 = vector.broadcast %19 : vector<1x768xf32> to vector<8x768xf32>
    %21 = arith.addf %18, %20 : vector<8x768xf32>
    %22 = vector.extract_strided_slice %13 {offsets = [0, 0], sizes = [8, 192], strides = [1, 1]} : vector<8x768xf32> to vector<8x192xf32>
    %23 = vector.extract_strided_slice %17 {offsets = [0, 0], sizes = [8, 192], strides = [1, 1]} : vector<8x768xf32> to vector<8x192xf32>
    %24 = vector.extract_strided_slice %21 {offsets = [0, 0], sizes = [8, 192], strides = [1, 1]} : vector<8x768xf32> to vector<8x192xf32>
    %cst_8 = arith.constant dense<0.000000e+00> : vector<8x8xf32>
    %25 = tpu.matmul %22, %23, %cst_8 {dimension_numbers = #tpu.dot_dimension_numbers<[1], [1], [0], [0], [0, 0, 1, 0], [], []>} : vector<8x192xf32>, vector<8x192xf32>, vector<8x8xf32> -> vector<8x8xf32>
    %cst_9 = arith.constant 0.0721687824 : f32
    %26 = vector.broadcast %cst_9 : f32 to vector<8x8xf32>
    %27 = arith.mulf %25, %26 : vector<8x8xf32>
    %cst_10 = arith.constant dense<0xFF800000> : vector<8xf32>
    %28 = vector.multi_reduction <maximumf>, %27, %cst_10 [1] : vector<8x8xf32> to vector<8xf32>
    %29 = vector.shape_cast %28 : vector<8xf32> to vector<8x1xf32>
    %30 = vector.broadcast %29 : vector<8x1xf32> to vector<8x8xf32>
    %31 = arith.subf %27, %30 : vector<8x8xf32>
    %32 = math.exp %31 : vector<8x8xf32>
    %cst_11 = arith.constant dense<0.000000e+00> : vector<8xf32>
    %33 = vector.multi_reduction <add>, %32, %cst_11 [1] : vector<8x8xf32> to vector<8xf32>
    %34 = vector.shape_cast %33 : vector<8xf32> to vector<8x1xf32>
    %35 = tpu.reciprocal %34 {approx = true} : vector<8x1xf32> -> vector<8x1xf32>
    %36 = vector.broadcast %35 : vector<8x1xf32> to vector<8x8xf32>
    %37 = arith.mulf %32, %36 : vector<8x8xf32>
    %cst_12 = arith.constant dense<0.000000e+00> : vector<8x192xf32>
    %38 = tpu.matmul %37, %24, %cst_12 {dimension_numbers = #tpu.dot_dimension_numbers<[1], [0], [0], [1], [0, 0, 1, 1], [], []>} : vector<8x8xf32>, vector<8x192xf32>, vector<8x192xf32> -> vector<8x192xf32>
    %39 = arith.truncf %38 : vector<8x192xf32> to vector<8x192xbf16>
    %c0_13 = arith.constant 0 : index
    %c0_14 = arith.constant 0 : index
    %c0_15 = arith.constant 0 : index
    %40 = vector.load %arg3[%c0_13, %c0_14, %c0_15] : memref<1x768x768xbf16, #tpu.memory_space<vmem>>, vector<1x192x768xbf16>
    %41 = vector.shape_cast %40 : vector<1x192x768xbf16> to vector<192x768xbf16>
    %cst_16 = arith.constant dense<0.000000e+00> : vector<8x768xf32>
    %42 = tpu.matmul %39, %41, %cst_16 {dimension_numbers = #tpu.dot_dimension_numbers<[1], [0], [0], [1], [0, 0, 1, 1], [], []>} : vector<8x192xbf16>, vector<192x768xbf16>, vector<8x768xf32> -> vector<8x768xf32>
    %43 = vector.extract_strided_slice %13 {offsets = [0, 192], sizes = [8, 192], strides = [1, 1]} : vector<8x768xf32> to vector<8x192xf32>
    %44 = vector.extract_strided_slice %17 {offsets = [0, 192], sizes = [8, 192], strides = [1, 1]} : vector<8x768xf32> to vector<8x192xf32>
    %45 = vector.extract_strided_slice %21 {offsets = [0, 192], sizes = [8, 192], strides = [1, 1]} : vector<8x768xf32> to vector<8x192xf32>
    %cst_17 = arith.constant dense<0.000000e+00> : vector<8x8xf32>
    %46 = tpu.matmul %43, %44, %cst_17 {dimension_numbers = #tpu.dot_dimension_numbers<[1], [1], [0], [0], [0, 0, 1, 0], [], []>} : vector<8x192xf32>, vector<8x192xf32>, vector<8x8xf32> -> vector<8x8xf32>
    %cst_18 = arith.constant 0.0721687824 : f32
    %47 = vector.broadcast %cst_18 : f32 to vector<8x8xf32>
    %48 = arith.mulf %46, %47 : vector<8x8xf32>
    %cst_19 = arith.constant dense<0xFF800000> : vector<8xf32>
    %49 = vector.multi_reduction <maximumf>, %48, %cst_19 [1] : vector<8x8xf32> to vector<8xf32>
    %50 = vector.shape_cast %49 : vector<8xf32> to vector<8x1xf32>
    %51 = vector.broadcast %50 : vector<8x1xf32> to vector<8x8xf32>
    %52 = arith.subf %48, %51 : vector<8x8xf32>
    %53 = math.exp %52 : vector<8x8xf32>
    %cst_20 = arith.constant dense<0.000000e+00> : vector<8xf32>
    %54 = vector.multi_reduction <add>, %53, %cst_20 [1] : vector<8x8xf32> to vector<8xf32>
    %55 = vector.shape_cast %54 : vector<8xf32> to vector<8x1xf32>
    %56 = tpu.reciprocal %55 {approx = true} : vector<8x1xf32> -> vector<8x1xf32>
    %57 = vector.broadcast %56 : vector<8x1xf32> to vector<8x8xf32>
    %58 = arith.mulf %53, %57 : vector<8x8xf32>
    %cst_21 = arith.constant dense<0.000000e+00> : vector<8x192xf32>
    %59 = tpu.matmul %58, %45, %cst_21 {dimension_numbers = #tpu.dot_dimension_numbers<[1], [0], [0], [1], [0, 0, 1, 1], [], []>} : vector<8x8xf32>, vector<8x192xf32>, vector<8x192xf32> -> vector<8x192xf32>
    %60 = arith.truncf %59 : vector<8x192xf32> to vector<8x192xbf16>
    %c0_22 = arith.constant 0 : index
    %c192 = arith.constant 192 : index
    %c0_23 = arith.constant 0 : index
    %61 = vector.load %arg3[%c0_22, %c192, %c0_23] : memref<1x768x768xbf16, #tpu.memory_space<vmem>>, vector<1x192x768xbf16>
    %62 = vector.shape_cast %61 : vector<1x192x768xbf16> to vector<192x768xbf16>
    %cst_24 = arith.constant dense<0.000000e+00> : vector<8x768xf32>
    %63 = tpu.matmul %60, %62, %cst_24 {dimension_numbers = #tpu.dot_dimension_numbers<[1], [0], [0], [1], [0, 0, 1, 1], [], []>} : vector<8x192xbf16>, vector<192x768xbf16>, vector<8x768xf32> -> vector<8x768xf32>
    %64 = arith.addf %42, %63 : vector<8x768xf32>
    %65 = vector.extract_strided_slice %13 {offsets = [0, 384], sizes = [8, 192], strides = [1, 1]} : vector<8x768xf32> to vector<8x192xf32>
    %66 = vector.extract_strided_slice %17 {offsets = [0, 384], sizes = [8, 192], strides = [1, 1]} : vector<8x768xf32> to vector<8x192xf32>
    %67 = vector.extract_strided_slice %21 {offsets = [0, 384], sizes = [8, 192], strides = [1, 1]} : vector<8x768xf32> to vector<8x192xf32>
    %cst_25 = arith.constant dense<0.000000e+00> : vector<8x8xf32>
    %68 = tpu.matmul %65, %66, %cst_25 {dimension_numbers = #tpu.dot_dimension_numbers<[1], [1], [0], [0], [0, 0, 1, 0], [], []>} : vector<8x192xf32>, vector<8x192xf32>, vector<8x8xf32> -> vector<8x8xf32>
    %cst_26 = arith.constant 0.0721687824 : f32
    %69 = vector.broadcast %cst_26 : f32 to vector<8x8xf32>
    %70 = arith.mulf %68, %69 : vector<8x8xf32>
    %cst_27 = arith.constant dense<0xFF800000> : vector<8xf32>
    %71 = vector.multi_reduction <maximumf>, %70, %cst_27 [1] : vector<8x8xf32> to vector<8xf32>
    %72 = vector.shape_cast %71 : vector<8xf32> to vector<8x1xf32>
    %73 = vector.broadcast %72 : vector<8x1xf32> to vector<8x8xf32>
    %74 = arith.subf %70, %73 : vector<8x8xf32>
    %75 = math.exp %74 : vector<8x8xf32>
    %cst_28 = arith.constant dense<0.000000e+00> : vector<8xf32>
    %76 = vector.multi_reduction <add>, %75, %cst_28 [1] : vector<8x8xf32> to vector<8xf32>
    %77 = vector.shape_cast %76 : vector<8xf32> to vector<8x1xf32>
    %78 = tpu.reciprocal %77 {approx = true} : vector<8x1xf32> -> vector<8x1xf32>
    %79 = vector.broadcast %78 : vector<8x1xf32> to vector<8x8xf32>
    %80 = arith.mulf %75, %79 : vector<8x8xf32>
    %cst_29 = arith.constant dense<0.000000e+00> : vector<8x192xf32>
    %81 = tpu.matmul %80, %67, %cst_29 {dimension_numbers = #tpu.dot_dimension_numbers<[1], [0], [0], [1], [0, 0, 1, 1], [], []>} : vector<8x8xf32>, vector<8x192xf32>, vector<8x192xf32> -> vector<8x192xf32>
    %82 = arith.truncf %81 : vector<8x192xf32> to vector<8x192xbf16>
    %c0_30 = arith.constant 0 : index
    %c384 = arith.constant 384 : index
    %c0_31 = arith.constant 0 : index
    %83 = vector.load %arg3[%c0_30, %c384, %c0_31] : memref<1x768x768xbf16, #tpu.memory_space<vmem>>, vector<1x192x768xbf16>
    %84 = vector.shape_cast %83 : vector<1x192x768xbf16> to vector<192x768xbf16>
    %cst_32 = arith.constant dense<0.000000e+00> : vector<8x768xf32>
    %85 = tpu.matmul %82, %84, %cst_32 {dimension_numbers = #tpu.dot_dimension_numbers<[1], [0], [0], [1], [0, 0, 1, 1], [], []>} : vector<8x192xbf16>, vector<192x768xbf16>, vector<8x768xf32> -> vector<8x768xf32>
    %86 = arith.addf %64, %85 : vector<8x768xf32>
    %87 = vector.extract_strided_slice %13 {offsets = [0, 576], sizes = [8, 192], strides = [1, 1]} : vector<8x768xf32> to vector<8x192xf32>
    %88 = vector.extract_strided_slice %17 {offsets = [0, 576], sizes = [8, 192], strides = [1, 1]} : vector<8x768xf32> to vector<8x192xf32>
    %89 = vector.extract_strided_slice %21 {offsets = [0, 576], sizes = [8, 192], strides = [1, 1]} : vector<8x768xf32> to vector<8x192xf32>
    %cst_33 = arith.constant dense<0.000000e+00> : vector<8x8xf32>
    %90 = tpu.matmul %87, %88, %cst_33 {dimension_numbers = #tpu.dot_dimension_numbers<[1], [1], [0], [0], [0, 0, 1, 0], [], []>} : vector<8x192xf32>, vector<8x192xf32>, vector<8x8xf32> -> vector<8x8xf32>
    %cst_34 = arith.constant 0.0721687824 : f32
    %91 = vector.broadcast %cst_34 : f32 to vector<8x8xf32>
    %92 = arith.mulf %90, %91 : vector<8x8xf32>
    %cst_35 = arith.constant dense<0xFF800000> : vector<8xf32>
    %93 = vector.multi_reduction <maximumf>, %92, %cst_35 [1] : vector<8x8xf32> to vector<8xf32>
    %94 = vector.shape_cast %93 : vector<8xf32> to vector<8x1xf32>
    %95 = vector.broadcast %94 : vector<8x1xf32> to vector<8x8xf32>
    %96 = arith.subf %92, %95 : vector<8x8xf32>
    %97 = math.exp %96 : vector<8x8xf32>
    %cst_36 = arith.constant dense<0.000000e+00> : vector<8xf32>
    %98 = vector.multi_reduction <add>, %97, %cst_36 [1] : vector<8x8xf32> to vector<8xf32>
    %99 = vector.shape_cast %98 : vector<8xf32> to vector<8x1xf32>
    %100 = tpu.reciprocal %99 {approx = true} : vector<8x1xf32> -> vector<8x1xf32>
    %101 = vector.broadcast %100 : vector<8x1xf32> to vector<8x8xf32>
    %102 = arith.mulf %97, %101 : vector<8x8xf32>
    %cst_37 = arith.constant dense<0.000000e+00> : vector<8x192xf32>
    %103 = tpu.matmul %102, %89, %cst_37 {dimension_numbers = #tpu.dot_dimension_numbers<[1], [0], [0], [1], [0, 0, 1, 1], [], []>} : vector<8x8xf32>, vector<8x192xf32>, vector<8x192xf32> -> vector<8x192xf32>
    %104 = arith.truncf %103 : vector<8x192xf32> to vector<8x192xbf16>
    %c0_38 = arith.constant 0 : index
    %c576 = arith.constant 576 : index
    %c0_39 = arith.constant 0 : index
    %105 = vector.load %arg3[%c0_38, %c576, %c0_39] : memref<1x768x768xbf16, #tpu.memory_space<vmem>>, vector<1x192x768xbf16>
    %106 = vector.shape_cast %105 : vector<1x192x768xbf16> to vector<192x768xbf16>
    %cst_40 = arith.constant dense<0.000000e+00> : vector<8x768xf32>
    %107 = tpu.matmul %104, %106, %cst_40 {dimension_numbers = #tpu.dot_dimension_numbers<[1], [0], [0], [1], [0, 0, 1, 1], [], []>} : vector<8x192xbf16>, vector<192x768xbf16>, vector<8x768xf32> -> vector<8x768xf32>
    %108 = arith.addf %86, %107 : vector<8x768xf32>
    %109 = vector.extract_strided_slice %5 {offsets = [3, 0], sizes = [1, 768], strides = [1, 1]} : vector<16x1024xf32> to vector<1x768xf32>
    %110 = vector.broadcast %109 : vector<1x768xf32> to vector<8x768xf32>
    %111 = arith.addf %108, %110 : vector<8x768xf32>
    %112 = arith.addf %3, %111 : vector<8x768xf32>
    %113 = vector.extract_strided_slice %5 {offsets = [4, 0], sizes = [1, 768], strides = [1, 1]} : vector<16x1024xf32> to vector<1x768xf32>
    %114 = vector.extract_strided_slice %5 {offsets = [5, 0], sizes = [1, 768], strides = [1, 1]} : vector<16x1024xf32> to vector<1x768xf32>
    %cst_41 = arith.constant dense<0.000000e+00> : vector<8xf32>
    %115 = vector.multi_reduction <add>, %112, %cst_41 [1] : vector<8x768xf32> to vector<8xf32>
    %116 = vector.shape_cast %115 : vector<8xf32> to vector<8x1xf32>
    %cst_42 = arith.constant 7.680000e+02 : f32
    %117 = vector.broadcast %cst_42 : f32 to vector<8x1xf32>
    %118 = arith.divf %116, %117 : vector<8x1xf32>
    %119 = vector.broadcast %118 : vector<8x1xf32> to vector<8x768xf32>
    %120 = arith.subf %112, %119 : vector<8x768xf32>
    %121 = arith.mulf %120, %120 : vector<8x768xf32>
    %cst_43 = arith.constant dense<0.000000e+00> : vector<8xf32>
    %122 = vector.multi_reduction <add>, %121, %cst_43 [1] : vector<8x768xf32> to vector<8xf32>
    %123 = vector.shape_cast %122 : vector<8xf32> to vector<8x1xf32>
    %cst_44 = arith.constant 7.680000e+02 : f32
    %124 = vector.broadcast %cst_44 : f32 to vector<8x1xf32>
    %125 = arith.divf %123, %124 : vector<8x1xf32>
    %126 = vector.broadcast %118 : vector<8x1xf32> to vector<8x768xf32>
    %127 = arith.subf %112, %126 : vector<8x768xf32>
    %cst_45 = arith.constant 9.99999974E-6 : f32
    %128 = vector.broadcast %cst_45 : f32 to vector<8x1xf32>
    %129 = arith.addf %125, %128 : vector<8x1xf32>
    %130 = math.rsqrt %129 : vector<8x1xf32>
    %131 = vector.broadcast %130 : vector<8x1xf32> to vector<8x768xf32>
    %132 = arith.mulf %127, %131 : vector<8x768xf32>
    %133 = vector.broadcast %113 : vector<1x768xf32> to vector<8x768xf32>
    %134 = arith.mulf %132, %133 : vector<8x768xf32>
    %135 = vector.broadcast %114 : vector<1x768xf32> to vector<8x768xf32>
    %136 = arith.addf %134, %135 : vector<8x768xf32>
    %137 = arith.truncf %136 : vector<8x768xf32> to vector<8x768xbf16>
    %c0_46 = arith.constant 0 : index
    %c0_47 = arith.constant 0 : index
    %c0_48 = arith.constant 0 : index
    %138 = vector.load %arg4[%c0_46, %c0_47, %c0_48] : memref<1x768x1024xbf16, #tpu.memory_space<vmem>>, vector<1x768x1024xbf16>
    %139 = vector.shape_cast %138 : vector<1x768x1024xbf16> to vector<768x1024xbf16>
    %cst_49 = arith.constant dense<0.000000e+00> : vector<8x1024xf32>
    %140 = tpu.matmul %137, %139, %cst_49 {dimension_numbers = #tpu.dot_dimension_numbers<[1], [0], [0], [1], [0, 0, 1, 1], [], []>} : vector<8x768xbf16>, vector<768x1024xbf16>, vector<8x1024xf32> -> vector<8x1024xf32>
    %141 = vector.extract_strided_slice %5 {offsets = [9, 0], sizes = [1, 1024], strides = [1, 1]} : vector<16x1024xf32> to vector<1x1024xf32>
    %142 = vector.broadcast %141 : vector<1x1024xf32> to vector<8x1024xf32>
    %143 = arith.addf %140, %142 : vector<8x1024xf32>
    %cst_50 = arith.constant 0.000000e+00 : f32
    %144 = vector.broadcast %cst_50 : f32 to vector<8x1024xf32>
    %145 = arith.maximumf %143, %144 : vector<8x1024xf32>
    %146 = arith.truncf %145 : vector<8x1024xf32> to vector<8x1024xbf16>
    %c0_51 = arith.constant 0 : index
    %c0_52 = arith.constant 0 : index
    %c0_53 = arith.constant 0 : index
    %147 = vector.load %arg5[%c0_51, %c0_52, %c0_53] : memref<1x1024x768xbf16, #tpu.memory_space<vmem>>, vector<1x1024x768xbf16>
    %148 = vector.shape_cast %147 : vector<1x1024x768xbf16> to vector<1024x768xbf16>
    %cst_54 = arith.constant dense<0.000000e+00> : vector<8x768xf32>
    %149 = tpu.matmul %146, %148, %cst_54 {dimension_numbers = #tpu.dot_dimension_numbers<[1], [0], [0], [1], [0, 0, 1, 1], [], []>} : vector<8x1024xbf16>, vector<1024x768xbf16>, vector<8x768xf32> -> vector<8x768xf32>
    %150 = vector.extract_strided_slice %5 {offsets = [8, 0], sizes = [1, 768], strides = [1, 1]} : vector<16x1024xf32> to vector<1x768xf32>
    %151 = vector.broadcast %150 : vector<1x768xf32> to vector<8x768xf32>
    %152 = arith.addf %149, %151 : vector<8x768xf32>
    %153 = arith.addf %136, %152 : vector<8x768xf32>
    %154 = vector.extract_strided_slice %5 {offsets = [6, 0], sizes = [1, 768], strides = [1, 1]} : vector<16x1024xf32> to vector<1x768xf32>
    %155 = vector.extract_strided_slice %5 {offsets = [7, 0], sizes = [1, 768], strides = [1, 1]} : vector<16x1024xf32> to vector<1x768xf32>
    %cst_55 = arith.constant dense<0.000000e+00> : vector<8xf32>
    %156 = vector.multi_reduction <add>, %153, %cst_55 [1] : vector<8x768xf32> to vector<8xf32>
    %157 = vector.shape_cast %156 : vector<8xf32> to vector<8x1xf32>
    %cst_56 = arith.constant 7.680000e+02 : f32
    %158 = vector.broadcast %cst_56 : f32 to vector<8x1xf32>
    %159 = arith.divf %157, %158 : vector<8x1xf32>
    %160 = vector.broadcast %159 : vector<8x1xf32> to vector<8x768xf32>
    %161 = arith.subf %153, %160 : vector<8x768xf32>
    %162 = arith.mulf %161, %161 : vector<8x768xf32>
    %cst_57 = arith.constant dense<0.000000e+00> : vector<8xf32>
    %163 = vector.multi_reduction <add>, %162, %cst_57 [1] : vector<8x768xf32> to vector<8xf32>
    %164 = vector.shape_cast %163 : vector<8xf32> to vector<8x1xf32>
    %cst_58 = arith.constant 7.680000e+02 : f32
    %165 = vector.broadcast %cst_58 : f32 to vector<8x1xf32>
    %166 = arith.divf %164, %165 : vector<8x1xf32>
    %167 = vector.broadcast %159 : vector<8x1xf32> to vector<8x768xf32>
    %168 = arith.subf %153, %167 : vector<8x768xf32>
    %cst_59 = arith.constant 9.99999974E-6 : f32
    %169 = vector.broadcast %cst_59 : f32 to vector<8x1xf32>
    %170 = arith.addf %166, %169 : vector<8x1xf32>
    %171 = math.rsqrt %170 : vector<8x1xf32>
    %172 = vector.broadcast %171 : vector<8x1xf32> to vector<8x768xf32>
    %173 = arith.mulf %168, %172 : vector<8x768xf32>
    %174 = vector.broadcast %154 : vector<1x768xf32> to vector<8x768xf32>
    %175 = arith.mulf %173, %174 : vector<8x768xf32>
    %176 = vector.broadcast %155 : vector<1x768xf32> to vector<8x768xf32>
    %177 = arith.addf %175, %176 : vector<8x768xf32>
    %c0_60 = arith.constant 0 : index
    %c0_61 = arith.constant 0 : index
    %178 = vector.load %arg12[%c0_60, %c0_61] : memref<8x768xf32, #tpu.memory_space<vmem>>, vector<8x768xf32>
    tpu.vector_store %arg12[%c0_60, %c0_61], %177 {strides = array<i32>} : memref<8x768xf32, #tpu.memory_space<vmem>>, vector<8x768xf32>,
    %c2_i32 = arith.constant 2 : i32
    %179 = arith.cmpi eq, %arg0, %c2_i32 : i32
    %180 = arith.extui %179 : i1 to i32
    %c0_i32_62 = arith.constant 0 : i32
    %181 = arith.cmpi ne, %180, %c0_i32_62 : i32
    scf.if %181 {
      %c0_63 = arith.constant 0 : index
      %c0_64 = arith.constant 0 : index
      %182 = vector.load %arg7[%c0_63, %c0_64] : memref<2x768xf32, #tpu.memory_space<vmem>>, vector<2x768xf32>
      %183 = vector.extract_strided_slice %182 {offsets = [0, 0], sizes = [1, 768], strides = [1, 1]} : vector<2x768xf32> to vector<1x768xf32>
      %184 = vector.extract_strided_slice %182 {offsets = [1, 0], sizes = [1, 768], strides = [1, 1]} : vector<2x768xf32> to vector<1x768xf32>
      %cst_65 = arith.constant dense<0.000000e+00> : vector<8xf32>
      %185 = vector.multi_reduction <add>, %177, %cst_65 [1] : vector<8x768xf32> to vector<8xf32>
      %186 = vector.shape_cast %185 : vector<8xf32> to vector<8x1xf32>
      %cst_66 = arith.constant 7.680000e+02 : f32
      %187 = vector.broadcast %cst_66 : f32 to vector<8x1xf32>
      %188 = arith.divf %186, %187 : vector<8x1xf32>
      %189 = vector.broadcast %188 : vector<8x1xf32> to vector<8x768xf32>
      %190 = arith.subf %177, %189 : vector<8x768xf32>
      %191 = arith.mulf %190, %190 : vector<8x768xf32>
      %cst_67 = arith.constant dense<0.000000e+00> : vector<8xf32>
      %192 = vector.multi_reduction <add>, %191, %cst_67 [1] : vector<8x768xf32> to vector<8xf32>
      %193 = vector.shape_cast %192 : vector<8xf32> to vector<8x1xf32>
      %cst_68 = arith.constant 7.680000e+02 : f32
      %194 = vector.broadcast %cst_68 : f32 to vector<8x1xf32>
      %195 = arith.divf %193, %194 : vector<8x1xf32>
      %196 = vector.broadcast %188 : vector<8x1xf32> to vector<8x768xf32>
      %197 = arith.subf %177, %196 : vector<8x768xf32>
      %cst_69 = arith.constant 9.99999974E-6 : f32
      %198 = vector.broadcast %cst_69 : f32 to vector<8x1xf32>
      %199 = arith.addf %195, %198 : vector<8x1xf32>
      %200 = math.rsqrt %199 : vector<8x1xf32>
      %201 = vector.broadcast %200 : vector<8x1xf32> to vector<8x768xf32>
      %202 = arith.mulf %197, %201 : vector<8x768xf32>
      %203 = vector.broadcast %183 : vector<1x768xf32> to vector<8x768xf32>
      %204 = arith.mulf %202, %203 : vector<8x768xf32>
      %205 = vector.broadcast %184 : vector<1x768xf32> to vector<8x768xf32>
      %206 = arith.addf %204, %205 : vector<8x768xf32>
      %cst_70 = arith.constant dense<0.000000e+00> : vector<768xf32>
      %207 = vector.multi_reduction <add>, %206, %cst_70 [0] : vector<8x768xf32> to vector<768xf32>
      %208 = vector.shape_cast %207 : vector<768xf32> to vector<1x768xf32>
      %cst_71 = arith.constant 8.000000e+00 : f32
      %209 = vector.broadcast %cst_71 : f32 to vector<1x768xf32>
      %210 = arith.divf %208, %209 : vector<1x768xf32>
      %c0_72 = arith.constant 0 : index
      %c0_73 = arith.constant 0 : index
      %211 = vector.load %arg8[%c0_72, %c0_73] : memref<768x128xf32, #tpu.memory_space<vmem>>, vector<768x128xf32>
      %c0_74 = arith.constant 0 : index
      %c0_75 = arith.constant 0 : index
      %212 = vector.load %arg9[%c0_74, %c0_75] : memref<1x128xf32, #tpu.memory_space<vmem>>, vector<1x128xf32>
      %cst_76 = arith.constant dense<0.000000e+00> : vector<1x128xf32>
      %213 = tpu.matmul %210, %211, %cst_76 {dimension_numbers = #tpu.dot_dimension_numbers<[1], [0], [0], [1], [0, 0, 1, 1], [], []>} : vector<1x768xf32>, vector<768x128xf32>, vector<1x128xf32> -> vector<1x128xf32>
      %214 = arith.addf %213, %212 : vector<1x128xf32>
      %c0_77 = arith.constant 0 : index
      %c0_78 = arith.constant 0 : index
      %215 = vector.load %arg10[%c0_77, %c0_78] : memref<1x768xf32, #tpu.memory_space<vmem>>, vector<1x768xf32>
      %cst_79 = arith.constant dense<0.000000e+00> : vector<1x128xf32>
      %216 = tpu.matmul %215, %211, %cst_79 {dimension_numbers = #tpu.dot_dimension_numbers<[1], [0], [0], [1], [0, 0, 1, 1], [], []>} : vector<1x768xf32>, vector<768x128xf32>, vector<1x128xf32> -> vector<1x128xf32>
      %217 = arith.addf %216, %212 : vector<1x128xf32>
      %cst_80 = arith.constant dense<0.000000e+00> : vector<1xf32>
      %218 = vector.multi_reduction <add>, %214, %cst_80 [1] : vector<1x128xf32> to vector<1xf32>
      %219 = vector.shape_cast %218 : vector<1xf32> to vector<1x1xf32>
      %cst_81 = arith.constant 1.280000e+02 : f32
      %220 = vector.broadcast %cst_81 : f32 to vector<1x1xf32>
      %221 = arith.divf %219, %220 : vector<1x1xf32>
      %cst_82 = arith.constant 0.000000e+00 : f32
      %222 = vector.broadcast %cst_82 : f32 to vector<1x1xf32>
      %223 = arith.maximumf %221, %222 : vector<1x1xf32>
      %c0_83 = arith.constant 0 : index
      %c0_84 = arith.constant 0 : index
      %224 = vector.load %arg11[%c0_83, %c0_84] : memref<2x1xf32, #tpu.memory_space<vmem>>, vector<1x1xf32>
      tpu.vector_store %arg11[%c0_83, %c0_84], %223 {strides = array<i32>} : memref<2x1xf32, #tpu.memory_space<vmem>>, vector<1x1xf32>,
      %cst_85 = arith.constant dense<0.000000e+00> : vector<1xf32>
      %225 = vector.multi_reduction <add>, %217, %cst_85 [1] : vector<1x128xf32> to vector<1xf32>
      %226 = vector.shape_cast %225 : vector<1xf32> to vector<1x1xf32>
      %cst_86 = arith.constant 1.280000e+02 : f32
      %227 = vector.broadcast %cst_86 : f32 to vector<1x1xf32>
      %228 = arith.divf %226, %227 : vector<1x1xf32>
      %cst_87 = arith.constant 0.000000e+00 : f32
      %229 = vector.broadcast %cst_87 : f32 to vector<1x1xf32>
      %230 = arith.maximumf %228, %229 : vector<1x1xf32>
      %c1 = arith.constant 1 : index
      %c0_88 = arith.constant 0 : index
      %231 = vector.load %arg11[%c1, %c0_88] : memref<2x1xf32, #tpu.memory_space<vmem>>, vector<1x1xf32>
      tpu.vector_store %arg11[%c1, %c0_88], %230 {strides = array<i32>} : memref<2x1xf32, #tpu.memory_space<vmem>>, vector<1x1xf32>,
    } else {
    }
    return
  }
  func.func @transform_0(%arg0: i32) -> (i32, i32) {
    %c0_i32 = arith.constant 0 : i32
    %c0_i32_0 = arith.constant 0 : i32
    %c0_i32_1 = arith.constant 0 : i32
    return %c0_i32, %c0_i32_0 : i32, i32
  }
  func.func @transform_1(%arg0: i32) -> (i32, i32, i32) {
    %c0_i32 = arith.constant 0 : i32
    %c0_i32_0 = arith.constant 0 : i32
    %c0_i32_1 = arith.constant 0 : i32
    return %arg0, %c0_i32, %c0_i32_0 : i32, i32, i32
  }
  func.func @transform_2(%arg0: i32) -> (i32, i32, i32) {
    %c0_i32 = arith.constant 0 : i32
    %c0_i32_0 = arith.constant 0 : i32
    %c0_i32_1 = arith.constant 0 : i32
    return %arg0, %c0_i32, %c0_i32_0 : i32, i32, i32
  }
  func.func @transform_3(%arg0: i32) -> (i32, i32, i32) {
    %c0_i32 = arith.constant 0 : i32
    %c0_i32_0 = arith.constant 0 : i32
    %c0_i32_1 = arith.constant 0 : i32
    return %arg0, %c0_i32, %c0_i32_0 : i32, i32, i32
  }
  func.func @transform_4(%arg0: i32) -> (i32, i32, i32) {
    %c0_i32 = arith.constant 0 : i32
    %c0_i32_0 = arith.constant 0 : i32
    %c0_i32_1 = arith.constant 0 : i32
    return %arg0, %c0_i32, %c0_i32_0 : i32, i32, i32
  }
  func.func @transform_5(%arg0: i32) -> (i32, i32, i32) {
    %c0_i32 = arith.constant 0 : i32
    %c0_i32_0 = arith.constant 0 : i32
    %c0_i32_1 = arith.constant 0 : i32
    return %arg0, %c0_i32, %c0_i32_0 : i32, i32, i32
  }
  func.func @transform_6(%arg0: i32) -> (i32, i32) {
    %c0_i32 = arith.constant 0 : i32
    %c0_i32_0 = arith.constant 0 : i32
    %c0_i32_1 = arith.constant 0 : i32
    return %c0_i32, %c0_i32_0 : i32, i32
  }
  func.func @transform_7(%arg0: i32) -> (i32, i32) {
    %c0_i32 = arith.constant 0 : i32
    %c0_i32_0 = arith.constant 0 : i32
    %c0_i32_1 = arith.constant 0 : i32
    return %c0_i32, %c0_i32_0 : i32, i32
  }
  func.func @transform_8(%arg0: i32) -> (i32, i32) {
    %c0_i32 = arith.constant 0 : i32
    %c0_i32_0 = arith.constant 0 : i32
    %c0_i32_1 = arith.constant 0 : i32
    return %c0_i32, %c0_i32_0 : i32, i32
  }
  func.func @transform_9(%arg0: i32) -> (i32, i32) {
    %c0_i32 = arith.constant 0 : i32
    %c0_i32_0 = arith.constant 0 : i32
    %c0_i32_1 = arith.constant 0 : i32
    return %c0_i32, %c0_i32_0 : i32, i32
  }
  func.func @transform_10(%arg0: i32) -> (i32, i32) {
    %c0_i32 = arith.constant 0 : i32
    %c0_i32_0 = arith.constant 0 : i32
    %c0_i32_1 = arith.constant 0 : i32
    return %c0_i32, %c0_i32_0 : i32, i32
  }
}

</mosaic_0001>

<bundles_post_ra>
// kernel: tpu_custom_call.1
= control target key start
LH: loop header
LB: loop body
LE: loop exit
PB: predicated region body
PF: predicated region fallthrough
CT: control target
= control target key end

     0   :  { %s25356_s0 = inlined_call_operand.hbm [shape: f32[8,768], index: 0, kind: input, shape index: {}]   ;;  %s25357_s1 = inlined_call_operand.hbm [shape: bf16[3,768,2304], index: 1, kind: input, shape index: {}]   ;;  %s25358_s2 = inlined_call_operand.hbm [shape: bf16[3,768,768], index: 2, kind: input, shape index: {}]   ;;  %s25359_s3 = inlined_call_operand.hbm [shape: bf16[3,768,1024], index: 3, kind: input, shape index: {}]   ;;  %s25360_s4 = inlined_call_operand.hbm [shape: bf16[3,1024,768], index: 4, kind: input, shape index: {}]   ;;  %s25361_s5 = inlined_call_operand.hbm [shape: f32[3,16,1024], index: 5, kind: input, shape index: {}]   ;;  %s25362_s6 = inlined_call_operand.hbm [shape: f32[2,768], index: 6, kind: input, shape index: {}]   ;;  %s25363_s7 = inlined_call_operand.hbm [shape: f32[768,128], index: 7, kind: input, shape index: {}]   ;;  %s25364_s8 = inlined_call_operand.hbm [shape: f32[1,128], index: 8, kind: input, shape index: {}]   ;;  %s25365_s9 = inlined_call_operand.hbm [shape: f32[1,768], index: 9, kind: input, shape index: {}]   ;;  %s25366_s10 = inlined_call_operand.vmem [shape: f32[2,1], index: 10, kind: output, shape index: {}]  }
   0x1   :  { %25398 = sst [smem:[#allocation42_spill]] %s25357_s1 }
   0x2   :  { %25399 = sst [smem:[#allocation43_spill]] %s25362_s6 }
   0x3   :  { %25400 = sst [smem:[#allocation44_spill]] %s25363_s7 }
   0x4   :  { %25401 = sst [smem:[#allocation45_spill]] %s25366_s10 }
   0x5   :  { %15 = vsyncpa [#allocation4], 0 }
   0x6   :  { %16 = vsyncpa [#allocation6], 0 }
   0x7   :  { %18 = vsyncpa [#allocation6 + $0x1], 0 }
   0x8   :  { %19 = vsyncpa [#allocation9], 0 }
   0x9   :  { %21 = vsyncpa [#allocation9 + $0x1], 0 }
   0xa   :  { %22 = vsyncpa [#allocation12], 0 }
   0xb   :  { %24 = vsyncpa [#allocation12 + $0x1], 0 }
   0xc   :  { %25 = vsyncpa [#allocation15], 0 }
   0xd   :  { %26 = vsyncpa [#allocation18], 0  ;;  %s22132_s13 = smov 0   ;;  %s22134_s14 = smov 0  }
   0xe   :  { %s22136_s15 = smov 0   ;;  %s22138_s16 = smov 0  }
   0xf LB: > { %25402 = sst [smem:[#allocation26_spill]] %s22049_s15  ;;  %s22151_s17 = sadd.s32 4294967295, %s22053_s16   ;;  %s22053_s16 = sphi %s22138_s16, %s25460_s16   ;;  %s22049_s15 = sphi %s22136_s15, %s25462_s15   ;;  %s22045_s14 = sphi %s22134_s14, %s25464_s14   ;;  %s22041_s13 = sphi %s22132_s13, %s25463_s13  }
  0x10   : > { %p73_p0 = scmp.ne.s32.totalorder %s22045_s14, %s22041_s13  ;;  %p25367_p1 = scmp.eq.s32.totalorder %s22151_s17, 0 }
  0x11   : > { %p16810_p2 = scmp.ge.s32.totalorder %s22053_s16, 1  ;;  %p293_p3 = scmp.lt.s32.totalorder %s22053_s16, 4 }
  0x12   : > { %p22160_p5 = por %p25367_p1, %p73_p0  ;;  %s22055_s20 = smov [#allocation13]  }
  0x13   : > { %p22164_p6 = pnand %p16810_p2, %p293_p3  ;;  %s317_s21 = sshll.u32 %s22055_s20, 4  ;;  %s318_s21 = int_to_ptr.vmem [resolvable:$true] %s317_s21 }
  0x14   : > { %s25403_s18 = scalar_select %p22160_p5, 1, 0 }
  0x15   : > { %s25405_s19 = scalar_select %p22164_p6, 1, 0 }
  0x16   : > { %25404 = sst [smem:[#allocation27_spill]] %s25403_s18  ;;  %p19263_p7 = pneg %p22164_p6 }
  0x17   : > { %s22056_s22 = smov [#allocation14]   ;;  %s25407_s6 = sld [smem:[#allocation43_spill]] }
  0x18   : > { %s327_s23 = sshll.u32 %s22056_s22, 4  ;;  %p22172_p8 = pnand %p19263_p7, %p25367_p1  ;;  %s22176_s23 = int_to_ptr.vmem [resolvable:$true] %s327_s23 }
  0x1a   : > { %s25406_s24 = scalar_select %p22172_p8, 1, 0 }
  0x1b   : > { %p22186_p10 = pneg %p22172_p8 }
  0x1d   : > { %s21705_s27 = scalar_lea.hbm %s25407_s6, 192 }
  0x1e   : > { %p21706_p9 = scmp.ne.s32.totalorder %s25407_s6, %s21705_s27  ;;  %p21712_p13 = scmp.lt.u32.totalorder %s21705_s27, %s25407_s6 }
  0x1f   : > { %s25408_s30 = scalar_select %p22186_p10, 1, 0 }
  0x20   : > { %p21708_p11 = pnand %p22186_p10, %p21706_p9 }
  0x22   : > { %p21709_p12 = pneg %p21708_p11 }
  0x24   : > { %p21714_p0 = pnand %p21712_p13, %p21709_p12 }
  0x26   : > { %21717 = shalt.err (!%p21714_p0)
}
  0x27   : > { %s21718_s13 = scalar_lea.vmem %s318_s21, 192  ;;  %p21726_p4 = scmp.lt.s32.totalorder %s318_s21, %s318_s21 }
  0x28   : > { %p21719_p2 = scmp.ne.s32.totalorder %s318_s21, %s21718_s13  ;;  %p21727_p1 = scmp.lt.s32.totalorder %s21718_s13, %s21718_s13 }
  0x2a   : > { %p21721_p3 = pnand %p21719_p2, %p22186_p10  ;;  %p21728_p5 = por %p21727_p1, %p21726_p4 }
  0x2c   : > { %p21722_p7 = pneg %p21721_p3 }
  0x2e   : > { %p21729_p6 = pnand %p21728_p5, %p21722_p7 }
  0x30   : > { %21732 = shalt.err (!%p21729_p6)
}
  0x31   : > { %19269 = dma.hbm_to_vmem [thread:$0]  (!%p22172_p8), %s25407_s6, 192, %s318_s21, [#allocation12]  }
  0x32   : > { %s25409_s7 = sld [smem:[#allocation44_spill]] }
  0x38   : > { %s21733_s27 = scalar_lea.hbm %s25409_s7, 12288 }
  0x39   : > { %p21734_p9 = scmp.ne.s32.totalorder %s25409_s7, %s21733_s27  ;;  %p21740_p4 = scmp.lt.u32.totalorder %s21733_s27, %s25409_s7 }
  0x3b   : > { %p21736_p11 = pnand %p21734_p9, %p22186_p10 }
  0x3d   : > { %p21737_p1 = pneg %p21736_p11 }
  0x3f   : > { %p21742_p5 = pnand %p21740_p4, %p21737_p1 }
  0x41   : > { %21745 = shalt.err (!%p21742_p5)
}
  0x42   : > { %s21746_s21 = scalar_lea.vmem %s22176_s23, 12288  ;;  %p21754_p0 = scmp.lt.s32.totalorder %s22176_s23, %s22176_s23 }
  0x43   : > { %p21747_p6 = scmp.ne.s32.totalorder %s22176_s23, %s21746_s21  ;;  %p21755_p2 = scmp.lt.s32.totalorder %s21746_s21, %s21746_s21 }
  0x45   : > { %p21749_p12 = pnand %p21747_p6, %p22186_p10  ;;  %p21756_p3 = por %p21755_p2, %p21754_p0 }
  0x47   : > { %p21750_p13 = pneg %p21749_p12 }
  0x49   : > { %p21757_p7 = pnand %p21756_p3, %p21750_p13 }
  0x4b   : > { %21760 = shalt.err (!%p21757_p7)
}
  0x4c   : > { %s22057_s13 = smov 128   ;;  %s22058_s20 = smov 8  }
  0x4d   : > { %19272 = dma.hbm_to_vmem [thread:$0]  (!%p22172_p8), %s25409_s7, 12288, %s22176_s23, [#allocation15], %s22057_s13, %s22057_s13, %s22058_s20  }
  0x4e   : > { %s22226_s26 = sadd.s32 1, %s22053_s16   ;;  %s60_s27 = sadd.s32 1, %s22049_s15 }
  0x4f   : > { %25410 = sst [smem:[#allocation28_spill]] %s22226_s26  ;;  %s57_s28 = ssub.s32 %s22053_s16, %s22226_s26 }
  0x50   : > { %p67_p9 = scmp.ne.s32.totalorder %s22049_s15, %s22045_s14  ;;  %p58_p11 = scmp.eq.s32.totalorder %s57_s28, 0 }
  0x51   : > { %p68_p1 = scmp.eq.s32.totalorder %s22053_s16, 0  ;;  %p19300_p4 = scmp.lt.s32.totalorder %s22053_s16, 3 }
  0x52   : > { %s22236_s29 = sand.u32 1, %s22053_s16   ;;  %s22242_s12 = sand.u32 1, %s22049_s15  }
  0x53   : > { %s22239_s11 = scalar_select %p58_p11, %s22049_s15, %s60_s27  }
  0x54   : > { %p69_p5 = por %p68_p1, %p67_p9  ;;  %s19223_s21 = smul.u32 110592, %s22053_s16 }
  0x55   : > { %25411 = sst [smem:[#allocation29_spill]] %s22239_s11  ;;  %s19222_s23 = smul.u32 6912, %s22242_s12 }
  0x56   : > { %p22246_p6 = pnand %p19300_p4, %p69_p5  ;;  %s25413_s1 = sld [smem:[#allocation42_spill]] }
  0x57   : > { %s367_s27 = scalar_lea.vmem [#allocation5], %s19222_s23 }
  0x58   : > { %s25412_s13 = scalar_select %p22246_p6, 1, 0 }
  0x59   : > { %s374_s28 = sshll.u32 %s367_s27, 4  ;;  %p22262_p13 = pneg %p22246_p6  ;;  %s22255_s28 = int_to_ptr.vmem [resolvable:$true] %s374_s28 }
  0x5b   : > { %s25414_s11 = scalar_select %p22262_p13, 1, 0 }
  0x5c   : > { %s22253_s25 = scalar_lea.hbm %s25413_s1, %s19223_s21  ;;  %s21766_s22 = scalar_lea.hbm %s25413_s1, 331776 }
  0x5d   : > { %s21761_s7 = scalar_lea.hbm %s22253_s25, 110592  ;;  %p21767_p3 = scmp.lt.u32.totalorder %s22253_s25, %s25413_s1 }
  0x5e   : > { %p21762_p12 = scmp.ne.s32.totalorder %s22253_s25, %s21761_s7  ;;  %p21768_p7 = scmp.lt.u32.totalorder %s21766_s22, %s21761_s7 }
  0x5f   : > { %p21770_p11 = scmp.lt.u32.totalorder %s21761_s7, %s22253_s25 }
  0x60   : > { %p21764_p0 = pnand %p22262_p13, %p21762_p12  ;;  %p21769_p9 = por %p21768_p7, %p21767_p3 }
  0x62   : > { %p21765_p2 = pneg %p21764_p0  ;;  %p21771_p1 = por %p21770_p11, %p21769_p9 }
  0x64   : > { %p21772_p4 = pnand %p21771_p1, %p21765_p2 }
  0x66   : > { %21775 = shalt.err (!%p21772_p4)
}
  0x67   : > { %s21776_s6 = scalar_lea.vmem %s22255_s28, 110592  ;;  %s22059_s21 = smov [#allocation5]  }
  0x68   : > { %p21777_p5 = scmp.ne.s32.totalorder %s22255_s28, %s21776_s6  ;;  %s21781_s20 = sshll.u32 %s22059_s21, 4  ;;  %s21782_s20 = int_to_ptr.vmem [resolvable:$false] %s21781_s20 }
  0x69   : > { %s21783_s23 = scalar_lea.vmem %s21782_s20, 221184  ;;  %p21784_p8 = scmp.lt.s32.totalorder %s22255_s28, %s21782_s20 }
  0x6a   : > { %p21779_p12 = pnand %p21777_p5, %p22262_p13  ;;  %p21785_p10 = scmp.lt.s32.totalorder %s21783_s23, %s21776_s6 }
  0x6c   : > { %p21780_p0 = pneg %p21779_p12  ;;  %p21786_p3 = por %p21785_p10, %p21784_p8 }
  0x6e   : > { %p21787_p7 = pnand %p21786_p3, %p21780_p0 }
  0x70   : > { %21790 = shalt.err (!%p21787_p7)
}
  0x71   : > { %s22060_s7 = smov 1152   ;;  %s22061_s22 = smov 72  }
  0x72   : > { %s25415_s27 = scalar_lea.sflag [#allocation6], %s22236_s29  ;;  %s25380_s21 = smul.u32 3072, %s22242_s12 }
  0x73   : > { %19282 = dma.hbm_to_vmem [thread:$0]  (!%p22246_p6), %s22253_s25, 110592, %s22255_s28, %s25415_s27, %s22060_s7, %s22060_s7, %s22061_s22  }
  0x74   : > { %s25381_s6 = smul.u32 49152, %s22053_s16  ;;  %s409_s15 = scalar_lea.vmem [#allocation8], %s25380_s21 }
  0x75   : > { %s416_s26 = sshll.u32 %s409_s15, 4  ;;  %s22062_s10 = smov [#allocation3]   ;;  %s22298_s26 = int_to_ptr.vmem [resolvable:$true] %s416_s26 }
  0x76   : > { %s22294_s1 = scalar_lea.hbm %s25359_s3, %s25381_s6  ;;  %s22300_s18 = sshll.u32 %s22062_s10, 4  ;;  %s307_s18 = int_to_ptr.vmem [resolvable:$true] %s22300_s18 }
  0x77   : > { %s406_s25 = scalar_lea.sflag [#allocation9], %s22236_s29  ;;  %s21791_s28 = scalar_lea.hbm %s22294_s1, 49152 }
  0x78   : > { %p21792_p8 = scmp.ne.s32.totalorder %s22294_s1, %s21791_s28  ;;  %s21796_s27 = scalar_lea.hbm %s25359_s3, 147456 }
  0x79   : > { %p21797_p9 = scmp.lt.u32.totalorder %s22294_s1, %s25359_s3  ;;  %p21798_p11 = scmp.lt.u32.totalorder %s21796_s27, %s21791_s28 }
  0x7a   : > { %p21794_p10 = pnand %p21792_p8, %p22262_p13  ;;  %p21800_p4 = scmp.lt.u32.totalorder %s21791_s28, %s22294_s1 }
  0x7b   : > { %p21799_p1 = por %p21798_p11, %p21797_p9 }
  0x7c   : > { %p21795_p2 = pneg %p21794_p10 }
  0x7d   : > { %p21801_p5 = por %p21800_p4, %p21799_p1 }
  0x7f   : > { %p21802_p12 = pnand %p21801_p5, %p21795_p2 }
  0x81   : > { %21805 = shalt.err (!%p21802_p12)
}
  0x82   : > { %s21806_s10 = scalar_lea.vmem %s22298_s26, 49152  ;;  %s22063_s15 = smov [#allocation8]  }
  0x83   : > { %p21807_p0 = scmp.ne.s32.totalorder %s22298_s26, %s21806_s10  ;;  %s21811_s7 = sshll.u32 %s22063_s15, 4  ;;  %s21812_s7 = int_to_ptr.vmem [resolvable:$false] %s21811_s7 }
  0x84   : > { %s21813_s22 = scalar_lea.vmem %s21812_s7, 98304  ;;  %p21814_p8 = scmp.lt.s32.totalorder %s22298_s26, %s21812_s7 }
  0x85   : > { %p21809_p3 = pnand %p21807_p0, %p22262_p13  ;;  %p21815_p10 = scmp.lt.s32.totalorder %s21813_s22, %s21806_s10 }
  0x87   : > { %p21810_p7 = pneg %p21809_p3  ;;  %p21816_p9 = por %p21815_p10, %p21814_p8 }
  0x89   : > { %p21817_p11 = pnand %p21816_p9, %p21810_p7 }
  0x8b   : > { %21820 = shalt.err (!%p21817_p11)
}
  0x8c   : > { %s22064_s28 = smov 512   ;;  %s22065_s27 = smov 32  }
  0x8d   : > { %19288 = dma.hbm_to_vmem [thread:$0]  (!%p22246_p6), %s22294_s1, 49152, %s22298_s26, %s406_s25, %s22064_s28, %s22064_s28, %s22065_s27  }
  0x8e   : > { %s21821_s15 = scalar_lea.hbm %s25356_s0, 768  ;;  %p25416_p1 = scmp.ne.s32.totalorder %s25408_s30, 0 }
  0x8f   : > { %p21822_p2 = scmp.ne.s32.totalorder %s25356_s0, %s21821_s15  ;;  %p21828_p12 = scmp.lt.u32.totalorder %s21821_s15, %s25356_s0 }
  0x91   : > { %p21824_p4 = pnand %p21822_p2, %p25416_p1 }
  0x93   : > { %p21825_p5 = pneg %p21824_p4 }
  0x95   : > { %p21830_p0 = pnand %p21828_p12, %p21825_p5 }
  0x97   : > { %21833 = shalt.err (!%p21830_p0)
}
  0x98   : > { %s21834_s6 = scalar_lea.vmem %s307_s18, 768  ;;  %p21842_p10 = scmp.lt.s32.totalorder %s307_s18, %s307_s18 }
  0x99   : > { %p21835_p3 = scmp.ne.s32.totalorder %s307_s18, %s21834_s6  ;;  %p21843_p9 = scmp.lt.s32.totalorder %s21834_s6, %s21834_s6 }
  0x9b   : > { %p21837_p7 = pnand %p21835_p3, %p25416_p1  ;;  %p21844_p11 = por %p21843_p9, %p21842_p10 }
  0x9d   : > { %p21838_p8 = pneg %p21837_p7 }
  0x9f   : > { %p21845_p6 = pnand %p21844_p11, %p21838_p8 }
  0xa1   : > { %21848 = shalt.err (!%p21845_p6)
}
  0xa2   : > { %p25417_p2 = scmp.ne.s32.totalorder %s25406_s24, 0  ;;  %s22066_s21 = smov [#allocation16]  }
  0xa3   : > { %s341_s28 = sshll.u32 %s22066_s21, 4  ;;  %s22067_s27 = smov [#allocation17]   ;;  %s342_s28 = int_to_ptr.vmem [resolvable:$true] %s341_s28 }
  0xa4   : > { %19266 = dma.hbm_to_vmem [thread:$0]  (!%p25417_p2), %s25356_s0, 768, %s307_s18, [#allocation4]  }
  0xa5   : > { %s352_s20 = sshll.u32 %s22067_s27, 4  ;;  %s21849_s10 = scalar_lea.hbm %s25364_s8, 16  ;;  %s353_s20 = int_to_ptr.vmem [resolvable:$true] %s352_s20 }
  0xa6   : > { %p21850_p6 = scmp.ne.s32.totalorder %s25364_s8, %s21849_s10  ;;  %p21856_p12 = scmp.lt.u32.totalorder %s21849_s10, %s25364_s8 }
  0xa8   : > { %p21852_p4 = pnand %p21850_p6, %p25416_p1 }
  0xaa   : > { %p21853_p5 = pneg %p21852_p4 }
  0xac   : > { %p21858_p0 = pnand %p21856_p12, %p21853_p5 }
  0xae   : > { %21861 = shalt.err (!%p21858_p0)
}
  0xaf   : > { %s21862_s18 = scalar_lea.vmem %s342_s28, 16  ;;  %s21869_s26 = scalar_lea.vmem %s342_s28, 32 }
  0xb0   : > { %p21863_p3 = scmp.ne.s32.totalorder %s342_s28, %s21862_s18  ;;  %p21870_p10 = scmp.lt.s32.totalorder %s342_s28, %s342_s28 }
  0xb1   : > { %p21871_p9 = scmp.lt.s32.totalorder %s21869_s26, %s21862_s18 }
  0xb2   : > { %p21865_p7 = pnand %p21863_p3, %p25416_p1 }
  0xb3   : > { %p21872_p11 = por %p21871_p9, %p21870_p10 }
  0xb4   : > { %p21866_p8 = pneg %p21865_p7 }
  0xb6   : > { %p21873_p13 = pnand %p21872_p11, %p21866_p8 }
  0xb8   : > { %21876 = shalt.err (!%p21873_p13)
}
  0xb9   : > { %19275 = dma.hbm_to_vmem [thread:$0]  (!%p25417_p2), %s25364_s8, 16, %s342_s28, [#allocation15]  }
  0xba   : > { %s19224_s23 = smul.u32 2304, %s22242_s12  ;;  %s21877_s6 = scalar_lea.hbm %s25365_s9, 96 }
  0xbb   : > { %p21878_p6 = scmp.ne.s32.totalorder %s25365_s9, %s21877_s6  ;;  %p21884_p5 = scmp.lt.u32.totalorder %s21877_s6, %s25365_s9 }
  0xbd   : > { %p21880_p13 = pnand %p21878_p6, %p25416_p1 }
  0xbf   : > { %p21881_p4 = pneg %p21880_p13 }
  0xc1   : > { %p21886_p12 = pnand %p21884_p5, %p21881_p4 }
  0xc3   : > { %21889 = shalt.err (!%p21886_p12)
}
  0xc4   : > { %s21890_s28 = scalar_lea.vmem %s353_s20, 96  ;;  %p21898_p8 = scmp.lt.s32.totalorder %s353_s20, %s353_s20 }
  0xc5   : > { %p21891_p0 = scmp.ne.s32.totalorder %s353_s20, %s21890_s28  ;;  %p21899_p10 = scmp.lt.s32.totalorder %s21890_s28, %s21890_s28 }
  0xc7   : > { %p21893_p3 = pnand %p21891_p0, %p25416_p1  ;;  %p21900_p9 = por %p21899_p10, %p21898_p8 }
  0xc9   : > { %p21894_p7 = pneg %p21893_p3 }
  0xcb   : > { %p21901_p11 = pnand %p21900_p9, %p21894_p7 }
  0xcd   : > { %21904 = shalt.err (!%p21901_p11)
}
  0xce   : > { %19278 = dma.hbm_to_vmem [thread:$0]  (!%p25417_p2), %s25365_s9, 96, %s353_s20, [#allocation18]  }
  0xcf   : > { %s19225_s27 = smul.u32 36864, %s22053_s16  ;;  %s388_s15 = scalar_lea.vmem [#allocation7], %s19224_s23 }
  0xd0   : > { %s395_s10 = sshll.u32 %s388_s15, 4  ;;  %p25418_p6 = scmp.ne.s32.totalorder %s25414_s11, 0  ;;  %s22388_s10 = int_to_ptr.vmem [resolvable:$true] %s395_s10 }
  0xd1   : > { %s22386_s7 = scalar_lea.hbm %s25358_s2, %s19225_s27  ;;  %s21910_s23 = scalar_lea.hbm %s25358_s2, 110592 }
  0xd2   : > { %s21905_s24 = scalar_lea.hbm %s22386_s7, 36864  ;;  %p21911_p2 = scmp.lt.u32.totalorder %s22386_s7, %s25358_s2 }
  0xd3   : > { %p21906_p1 = scmp.ne.s32.totalorder %s22386_s7, %s21905_s24  ;;  %p21912_p5 = scmp.lt.u32.totalorder %s21910_s23, %s21905_s24 }
  0xd4   : > { %p21914_p0 = scmp.lt.u32.totalorder %s21905_s24, %s22386_s7 }
  0xd5   : > { %p21908_p13 = pnand %p21906_p1, %p25418_p6  ;;  %p21913_p12 = por %p21912_p5, %p21911_p2 }
  0xd7   : > { %p21909_p4 = pneg %p21908_p13  ;;  %p21915_p3 = por %p21914_p0, %p21913_p12 }
  0xd9   : > { %p21916_p7 = pnand %p21915_p3, %p21909_p4 }
  0xdb   : > { %21919 = shalt.err (!%p21916_p7)
}
  0xdc   : > { %s21920_s28 = scalar_lea.vmem %s22388_s10, 36864  ;;  %s22068_s26 = smov [#allocation7]  }
  0xdd   : > { %p21921_p8 = scmp.ne.s32.totalorder %s22388_s10, %s21920_s28  ;;  %s21925_s21 = sshll.u32 %s22068_s26, 4  ;;  %s21926_s21 = int_to_ptr.vmem [resolvable:$false] %s21925_s21 }
  0xde   : > { %s21927_s27 = scalar_lea.vmem %s21926_s21, 73728  ;;  %p21928_p11 = scmp.lt.s32.totalorder %s22388_s10, %s21926_s21 }
  0xdf   : > { %p21923_p10 = pnand %p21921_p8, %p25418_p6  ;;  %p21929_p1 = scmp.lt.s32.totalorder %s21927_s27, %s21920_s28 }
  0xe1   : > { %p21924_p9 = pneg %p21923_p10  ;;  %p21930_p13 = por %p21929_p1, %p21928_p11 }
  0xe3   : > { %p21931_p2 = pnand %p21930_p13, %p21924_p9 }
  0xe5   : > { %21934 = shalt.err (!%p21931_p2)
}
  0xe6   : > { %s22069_s15 = smov 384   ;;  %s22070_s6 = smov 24  }
  0xe7   : > { %p25419_p4 = scmp.ne.s32.totalorder %s25412_s13, 0  ;;  %s25420_s30 = scalar_lea.sflag [#allocation6], %s22236_s29 }
  0xe8   : > { %s25421_s24 = smul.u32 49152, %s22053_s16  ;;  %s21940_s21 = scalar_lea.hbm %s25360_s4, 147456 }
  0xe9   : > { %19285 = dma.hbm_to_vmem [thread:$0]  (!%p25419_p4), %s22386_s7, 36864, %s22388_s10, %s25420_s30, %s22069_s15, %s22069_s15, %s22070_s6  }
  0xea   : > { %s22421_s23 = scalar_lea.hbm %s25360_s4, %s25421_s24  ;;  %s25422_s1 = smul.u32 3072, %s22242_s12 }
  0xeb   : > { %s21935_s26 = scalar_lea.hbm %s22421_s23, 49152  ;;  %p21941_p3 = scmp.lt.u32.totalorder %s22421_s23, %s25360_s4 }
  0xec   : > { %s430_s18 = scalar_lea.vmem [#allocation10], %s25422_s1  ;;  %p21936_p5 = scmp.ne.s32.totalorder %s22421_s23, %s21935_s26 }
  0xed   : > { %s437_s28 = sshll.u32 %s430_s18, 4  ;;  %p21942_p7 = scmp.lt.u32.totalorder %s21940_s21, %s21935_s26  ;;  %s22425_s28 = int_to_ptr.vmem [resolvable:$true] %s437_s28 }
  0xee   : > { %p21938_p12 = pnand %p21936_p5, %p25418_p6  ;;  %p21944_p10 = scmp.lt.u32.totalorder %s21935_s26, %s22421_s23 }
  0xef   : > { %p21943_p8 = por %p21942_p7, %p21941_p3 }
  0xf0   : > { %p21939_p0 = pneg %p21938_p12 }
  0xf1   : > { %p21945_p9 = por %p21944_p10, %p21943_p8 }
  0xf3   : > { %p21946_p11 = pnand %p21945_p9, %p21939_p0 }
  0xf5   : > { %21949 = shalt.err (!%p21946_p11)
}
  0xf6   : > { %s21950_s24 = scalar_lea.vmem %s22425_s28, 49152  ;;  %s22071_s20 = smov [#allocation10]  }
  0xf7   : > { %p21951_p1 = scmp.ne.s32.totalorder %s22425_s28, %s21950_s24  ;;  %s21955_s22 = sshll.u32 %s22071_s20, 4  ;;  %s21956_s22 = int_to_ptr.vmem [resolvable:$false] %s21955_s22 }
  0xf8   : > { %s21957_s1 = scalar_lea.vmem %s21956_s22, 98304  ;;  %p21958_p5 = scmp.lt.s32.totalorder %s22425_s28, %s21956_s22 }
  0xf9   : > { %p21953_p13 = pnand %p21951_p1, %p25418_p6  ;;  %p21959_p12 = scmp.lt.s32.totalorder %s21957_s1, %s21950_s24 }
  0xfb   : > { %p21954_p2 = pneg %p21953_p13  ;;  %p21960_p3 = por %p21959_p12, %p21958_p5 }
  0xfd   : > { %p21961_p7 = pnand %p21960_p3, %p21954_p2 }
  0xff   : > { %21964 = shalt.err (!%p21961_p7)
}
 0x100   : > { %19291 = dma.hbm_to_vmem [thread:$0]  (!%p25419_p4), %s22421_s23, 49152, %s22425_s28, %s406_s25, %s22069_s15, %s22069_s15, %s22070_s6  }
 0x101   : > { %s16821_s18 = sshll.u32 %s22242_s12, 7  ;;  %s18779_s26 = sshll.u32 %s22053_s16, 11 }
 0x102   : > { %s22458_s21 = scalar_lea.hbm %s25361_s5, %s18779_s26  ;;  %s451_s27 = scalar_lea.vmem [#allocation11], %s16821_s18 }
 0x103   : > { %s458_s30 = sshll.u32 %s451_s27, 4  ;;  %s448_s24 = scalar_lea.sflag [#allocation12], %s22236_s29  ;;  %s22460_s30 = int_to_ptr.vmem [resolvable:$true] %s458_s30 }
 0x104   : > { %s21965_s20 = scalar_lea.hbm %s22458_s21, 2048  ;;  %s21970_s25 = scalar_lea.hbm %s25361_s5, 6144 }
 0x105   : > { %p21966_p0 = scmp.ne.s32.totalorder %s22458_s21, %s21965_s20  ;;  %p21971_p9 = scmp.lt.u32.totalorder %s22458_s21, %s25361_s5 }
 0x106   : > { %p21972_p11 = scmp.lt.u32.totalorder %s21970_s25, %s21965_s20  ;;  %p21974_p13 = scmp.lt.u32.totalorder %s21965_s20, %s22458_s21 }
 0x107   : > { %p21968_p8 = pnand %p21966_p0, %p25418_p6 }
 0x108   : > { %p21973_p1 = por %p21972_p11, %p21971_p9 }
 0x109   : > { %p21969_p10 = pneg %p21968_p8 }
 0x10a   : > { %p21975_p2 = por %p21974_p13, %p21973_p1 }
 0x10c   : > { %p21976_p5 = pnand %p21975_p2, %p21969_p10 }
 0x10e   : > { %21979 = shalt.err (!%p21976_p5)
}
 0x10f   : > { %s21980_s23 = scalar_lea.vmem %s22460_s30, 2048  ;;  %s22072_s28 = smov [#allocation11]  }
 0x110   : > { %p21981_p12 = scmp.ne.s32.totalorder %s22460_s30, %s21980_s23  ;;  %s21985_s22 = sshll.u32 %s22072_s28, 4  ;;  %s21986_s22 = int_to_ptr.vmem [resolvable:$false] %s21985_s22 }
 0x111   : > { %s21987_s1 = scalar_lea.vmem %s21986_s22, 4096  ;;  %p21988_p0 = scmp.lt.s32.totalorder %s22460_s30, %s21986_s22 }
 0x112   : > { %p21983_p3 = pnand %p21981_p12, %p25418_p6  ;;  %p21989_p8 = scmp.lt.s32.totalorder %s21987_s1, %s21980_s23 }
 0x114   : > { %p21984_p7 = pneg %p21983_p3  ;;  %p21990_p9 = por %p21989_p8, %p21988_p0 }
 0x116   : > { %p21991_p11 = pnand %p21990_p9, %p21984_p7 }
 0x118   : > { %21994 = shalt.err (!%p21991_p11)
}
 0x119   : > { %s22073_s18 = smov 1024   ;;  %s22074_s26 = smov 64  }
 0x11a   : > { %19294 = dma.hbm_to_vmem [thread:$0]  (!%p25419_p4), %s22458_s21, 2048, %s22460_s30, %s448_s24, %s22073_s18, %s22073_s18, %s22074_s26  }
 0x11b   : > { %p25423_p6 = scmp.ne.s32.totalorder %s25405_s19, 0 }
 0x11d   : > { %470 = sbr.rel (%p25423_p6) target bundleno = 6812 (0x1a9c), region = 60 }
 0x124   : > { %p25424_p10 = scmp.eq.s32.totalorder %s22151_s17, 0 }
 0x126   : > { %22012 = dma.done.wait (%p25424_p10), [#allocation4], 768   ;;  %p25425_p1 = pmov %p25424_p10 }
 0x127   : > { %s25426_s11 = sld [smem:[#allocation27_spill]]  ;;  %s476_s10 = sand.u32 1, %s22151_s17  }
 0x128   : > { %22014 = vsyncadd (%p25425_p1), [#allocation4], 4294966528  ;;  %s478_s7 = sand.u32 1, %s22045_s14   ;;  %s477_s20 = scalar_lea.sflag [#allocation6], %s476_s10 }
 0x129   : > { %s19230_s27 = smul.u32 6912, %s478_s7 }
 0x12b   : > { %s22494_s16 = scalar_lea.vmem [#allocation5], %s19230_s27 }
 0x12d   : > { %p25427_p13 = scmp.ne.s32.totalorder %s25426_s11, 0 }
 0x12f   : > { %22016 = dma.done.wait (%p25427_p13), %s477_s20, 147456  }
 0x130   : > { %22018 = vsyncadd (%p25427_p13), %s477_s20, 4294819840  ;;  %s19231_s19 = smul.u32 2304, %s478_s7  ;;  %s495_s21 = scalar_lea.sflag [#allocation9], %s476_s10 }
 0x131   : > { %s19232_s29 = smul.u32 3072, %s478_s7 }
 0x132   : > { %s22500_s13 = scalar_lea.vmem [#allocation7], %s19231_s19 }
 0x133   : > { %s22502_s30 = scalar_lea.vmem [#allocation8], %s19232_s29 }
 0x134   : > { %22020 = dma.done.wait (%p25427_p13), %s495_s21, 98304  }
 0x135   : > { %22022 = vsyncadd (%p25427_p13), %s495_s21, 4294868992  ;;  %s16826_s24 = sshll.u32 %s478_s7, 7  ;;  %s22508_s12 = scalar_lea.vmem [#allocation10], %s19232_s29 }
 0x136   : > { %s513_s25 = scalar_lea.sflag [#allocation12], %s476_s10  ;;  %s22510_s15 = scalar_lea.vmem [#allocation11], %s16826_s24 }
 0x137   : > { %22024 = dma.done.wait (%p25427_p13), %s513_s25, 2048  }
 0x138   : > { %22026 = vsyncadd (%p25427_p13), %s513_s25, 4294965248  ;;  %p25428_p4 = pmov %p25425_p1 }
 0x139   : > { %p25429_p2 = pmov %p25425_p1 }
 0x13a   : > { %22028 = dma.done.wait (%p25428_p4), [#allocation12], 192  }
 0x13b   : > { %22030 = vsyncadd (%p25429_p2), [#allocation12], 4294967104  ;;  %p25430_p5 = pmov %p25425_p1 }
 0x13c   : > { %p25431_p12 = pmov %p25425_p1 }
 0x13d   : > { %22032 = dma.done.wait (%p25430_p5), [#allocation15], 12304  }
 0x13e   : > { %22034 = vsyncadd (%p25431_p12), [#allocation15], 4294954992  ;;  %p25432_p3 = pmov %p25425_p1 }
 0x13f   : > { %p25433_p7 = pmov %p25425_p1 }
 0x140   : > { %22036 = dma.done.wait (%p25432_p3), [#allocation18], 96  }
 0x141   : > { %22038 = vsyncadd (%p25433_p7), [#allocation18], 4294967200  ;;  %p25434_p0 = scmp.ne.s32.totalorder %s22151_s17, 0 }
 0x142   : > { %v589_v0 = vld [vmem:[#allocation3] sm:$0xff] (!%p25434_p0)  ;;  %v590_v1 = vld [vmem:[#allocation3 + $0x8] sm:$0xff] (!%p25434_p0)  ;;  %v591_v2 = vld [vmem:[#allocation3 + $0x10] sm:$0xff] (!%p25434_p0) }
 0x143   : > { %588 = sbr.rel (%p25434_p0) target bundleno = 330 (0x14a), region = 104  ;;  %595 = vst [vmem:[#allocation2] sm:$0xff] (!%p25434_p0), %v589_v0  ;;  %596 = vst [vmem:[#allocation2 + $0x8] sm:$0xff] (!%p25434_p0), %v590_v1  ;;  %v592_v3 = vld [vmem:[#allocation3 + $0x18] sm:$0xff] (!%p25434_p0)  ;;  %v593_v4 = vld [vmem:[#allocation3 + $0x20] sm:$0xff] (!%p25434_p0) }
 0x144   : > { %597 = vst [vmem:[#allocation2 + $0x10] sm:$0xff] (!%p25434_p0), %v591_v2  ;;  %v594_v5 = vld [vmem:[#allocation3 + $0x28] sm:$0xff] (!%p25434_p0)  ;;  %598 = vst [vmem:[#allocation2 + $0x18] sm:$0xff] (!%p25434_p0), %v592_v3 }
 0x145   : > { %599 = vst [vmem:[#allocation2 + $0x20] sm:$0xff] (!%p25434_p0), %v593_v4  ;;  %600 = vst [vmem:[#allocation2 + $0x28] sm:$0xff] (!%p25434_p0), %v594_v5 }
 0x14a PF: > { %v19355_v6 = vld [vmem:[%s22494_s16 + $0x4] ss:$72 sps:$4 sm:$0xff]   ;;  %v19359_v8 = vld [vmem:[%s22494_s16] ss:$72 sps:$4 sm:$0xff]   ;;  %v19361_v10 = vld [vmem:[%s22494_s16 + $0x94] ss:$72 sps:$4 sm:$0xff]  }
 0x14b   : > { %v19357_v7 = vld [vmem:[%s22494_s16 + $0x904] ss:$72 sps:$4 sm:$0xff]   ;;  %5811 = vmatprep.subr.bf16.mxu0 %v19355_v6  ;;  %v19360_v9 = vld [vmem:[%s22494_s16 + $0x900] ss:$72 sps:$4 sm:$0xff]   ;;  %v19363_v11 = vld [vmem:[%s22494_s16 + $0x994] ss:$72 sps:$4 sm:$0xff]  }
 0x14c   : > { %5852 = vmatprep.subr.bf16.mxu1 %v19357_v7  ;;  %5812 = vmatpush1.bf16.msra.mxu0 %v19359_v8  ;;  %v19365_v12 = vld [vmem:[%s22494_s16 + $0x90] ss:$72 sps:$4 sm:$0xff]   ;;  %v19367_v14 = vld [vmem:[%s22494_s16 + $0x124] ss:$72 sps:$4 sm:$0xff]   ;;  %v19371_v16 = vld [vmem:[%s22494_s16 + $0x120] ss:$72 sps:$4 sm:$0xff]  }
 0x14d   : > { %5853 = vmatpush1.bf16.msra.mxu1 %v19360_v9  ;;  %5813 = vmatprep.subr.bf16.mxu0 %v19361_v10  ;;  %v19366_v13 = vld [vmem:[%s22494_s16 + $0x990] ss:$72 sps:$4 sm:$0xff]   ;;  %v19369_v15 = vld [vmem:[%s22494_s16 + $0xa24] ss:$72 sps:$4 sm:$0xff]   ;;  %v19372_v17 = vld [vmem:[%s22494_s16 + $0xa20] ss:$72 sps:$4 sm:$0xff]  }
 0x14e   : > { %5854 = vmatprep.subr.bf16.mxu1 %v19363_v11  ;;  %v19373_v18 = vld [vmem:[%s22494_s16 + $0x1b4] ss:$72 sps:$4 sm:$0xff]   ;;  %v19377_v20 = vld [vmem:[%s22494_s16 + $0x1b0] ss:$72 sps:$4 sm:$0xff]   ;;  %v19379_v22 = vld [vmem:[%s22494_s16 + $0x244] ss:$72 sps:$4 sm:$0xff]  }
 0x14f   : > { %v19375_v19 = vld [vmem:[%s22494_s16 + $0xab4] ss:$72 sps:$4 sm:$0xff]   ;;  %v19378_v21 = vld [vmem:[%s22494_s16 + $0xab0] ss:$72 sps:$4 sm:$0xff]   ;;  %v19381_v23 = vld [vmem:[%s22494_s16 + $0xb44] ss:$72 sps:$4 sm:$0xff]  }
 0x150   : > { %5814 = vmatpush1.bf16.msra.mxu0 %v19365_v12  ;;  %v19383_v24 = vld [vmem:[%s22494_s16 + $0x240] ss:$72 sps:$4 sm:$0xff]   ;;  %v19385_v26 = vld [vmem:[%s22494_s16 + $0x2d4] ss:$72 sps:$4 sm:$0xff]   ;;  %v19389_v28 = vld [vmem:[%s22494_s16 + $0x2d0] ss:$72 sps:$4 sm:$0xff]  }
 0x151   : > { %5855 = vmatpush1.bf16.msra.mxu1 %v19366_v13  ;;  %5815 = vmatprep.subr.bf16.mxu0 %v19367_v14  ;;  %v19384_v25 = vld [vmem:[%s22494_s16 + $0xb40] ss:$72 sps:$4 sm:$0xff]   ;;  %v19387_v27 = vld [vmem:[%s22494_s16 + $0xbd4] ss:$72 sps:$4 sm:$0xff]   ;;  %v19390_v29 = vld [vmem:[%s22494_s16 + $0xbd0] ss:$72 sps:$4 sm:$0xff]  }
 0x152   : > { %5856 = vmatprep.subr.bf16.mxu1 %v19369_v15  ;;  %v19391_v30 = vld [vmem:[%s22494_s16 + $0x364] ss:$72 sps:$4 sm:$0xff]   ;;  %v19395_v32 = vld [vmem:[%s22494_s16 + $0x360] ss:$72 sps:$4 sm:$0xff]   ;;  %v19397_v34 = vld [vmem:[%s22494_s16 + $0x3f4] ss:$72 sps:$4 sm:$0xff]  }
 0x153   : > { %v19393_v31 = vld [vmem:[%s22494_s16 + $0xc64] ss:$72 sps:$4 sm:$0xff]   ;;  %v19396_v33 = vld [vmem:[%s22494_s16 + $0xc60] ss:$72 sps:$4 sm:$0xff]   ;;  %v19399_v35 = vld [vmem:[%s22494_s16 + $0xcf4] ss:$72 sps:$4 sm:$0xff]  }
 0x154   : > { %5816 = vmatpush1.bf16.msra.mxu0 %v19371_v16  ;;  %v19401_v36 = vld [vmem:[%s22494_s16 + $0x3f0] ss:$72 sps:$4 sm:$0xff]   ;;  %v19403_v38 = vld [vmem:[%s22494_s16 + $0x484] ss:$72 sps:$4 sm:$0xff]   ;;  %v19407_v40 = vld [vmem:[%s22494_s16 + $0x480] ss:$72 sps:$4 sm:$0xff]  }
 0x155   : > { %5857 = vmatpush1.bf16.msra.mxu1 %v19372_v17  ;;  %5817 = vmatprep.subr.bf16.mxu0 %v19373_v18  ;;  %v19402_v37 = vld [vmem:[%s22494_s16 + $0xcf0] ss:$72 sps:$4 sm:$0xff]   ;;  %v19405_v39 = vld [vmem:[%s22494_s16 + $0xd84] ss:$72 sps:$4 sm:$0xff]   ;;  %v19408_v41 = vld [vmem:[%s22494_s16 + $0xd80] ss:$72 sps:$4 sm:$0xff]  }
 0x156   : > { %5858 = vmatprep.subr.bf16.mxu1 %v19375_v19  ;;  %v19409_v42 = vld [vmem:[%s22494_s16 + $0x514] ss:$72 sps:$4 sm:$0xff]   ;;  %v19413_v44 = vld [vmem:[%s22494_s16 + $0x510] ss:$72 sps:$4 sm:$0xff]   ;;  %v19415_v46 = vld [vmem:[%s22494_s16 + $0x5a4] ss:$72 sps:$4 sm:$0xff]  }
 0x157   : > { %v19411_v43 = vld [vmem:[%s22494_s16 + $0xe14] ss:$72 sps:$4 sm:$0xff]   ;;  %v19414_v45 = vld [vmem:[%s22494_s16 + $0xe10] ss:$72 sps:$4 sm:$0xff]   ;;  %v19417_v47 = vld [vmem:[%s22494_s16 + $0xea4] ss:$72 sps:$4 sm:$0xff]  }
 0x158   : > { %5818 = vmatpush1.bf16.msra.mxu0 %v19377_v20  ;;  %v19419_v48 = vld [vmem:[%s22494_s16 + $0x5a0] ss:$72 sps:$4 sm:$0xff]   ;;  %v19421_v50 = vld [vmem:[%s22494_s16 + $0x634] ss:$72 sps:$4 sm:$0xff]   ;;  %v19425_v53 = vld [vmem:[%s22494_s16 + $0x630] ss:$72 sps:$4 sm:$0xff]  }
 0x159   : > { %5859 = vmatpush1.bf16.msra.mxu1 %v19378_v21  ;;  %5819 = vmatprep.subr.bf16.mxu0 %v19379_v22  ;;  %v19420_v49 = vld [vmem:[%s22494_s16 + $0xea0] ss:$72 sps:$4 sm:$0xff]   ;;  %v19423_v51 = vld [vmem:[%s22494_s16 + $0xf34] ss:$72 sps:$4 sm:$0xff]   ;;  %v19426_v54 = vld [vmem:[%s22494_s16 + $0xf30] ss:$72 sps:$4 sm:$0xff]  }
 0x15a   : > { %5860 = vmatprep.subr.bf16.mxu1 %v19381_v23  ;;  %v602_v52 = vld [vmem:[#allocation2 + $0x8] sm:$0xff]  ;;  %v604_v56 = vld [vmem:[#allocation2 + $0x18] sm:$0xff]  ;;  %v601_v10 = vld [vmem:[#allocation2] sm:$0xff]  ;;  %s22075_s6 = smov 64   ;;  %vm7008_vm0 = vcmask 523264   ;;  %vm7086_vm1 = vcmask 64512  }
 0x15b   : > { %v22578_v55 = vpack.c.bf16 %v602_v52, %v602_v52  ;;  %v19427_v57 = vld [vmem:[%s22494_s16 + $0x6c4] ss:$72 sps:$4 sm:$0xff]   ;;  %v22581_v58 = vpack.c.bf16 %v604_v56, %v604_v56  ;;  %v19431_v60 = vld [vmem:[%s22494_s16 + $0x6c0] ss:$72 sps:$4 sm:$0xff]   ;;  %v19433_v62 = vld [vmem:[%s22494_s16 + $0x754] ss:$72 sps:$4 sm:$0xff]   ;;  %v22602_v14 = vpack.c.bf16 %v601_v10, %v601_v10 }
 0x15c   : > { %5820 = vmatpush1.bf16.msra.mxu0 %v19383_v24  ;;  %v19429_v59 = vld [vmem:[%s22494_s16 + $0xfc4] ss:$72 sps:$4 sm:$0xff]   ;;  %v19432_v61 = vld [vmem:[%s22494_s16 + $0xfc0] ss:$72 sps:$4 sm:$0xff]   ;;  %v19435_v63 = vld [vmem:[%s22494_s16 + $0x1054] ss:$72 sps:$4 sm:$0xff]  }
 0x15d   : > { %5861 = vmatpush1.bf16.msra.mxu1 %v19384_v25  ;;  %5821 = vmatprep.subr.bf16.mxu0 %v19385_v26  ;;  %v19437_v0 = vld [vmem:[%s22494_s16 + $0x750] ss:$72 sps:$4 sm:$0xff]   ;;  %v19439_v2 = vld [vmem:[%s22494_s16 + $0x7e4] ss:$72 sps:$4 sm:$0xff]   ;;  %v19443_v4 = vld [vmem:[%s22494_s16 + $0x7e0] ss:$72 sps:$4 sm:$0xff]  }
 0x15e   : > { %5862 = vmatprep.subr.bf16.mxu1 %v19387_v27  ;;  %5843 = vmatprep.mubr.bf16.mxu0 %v22578_v55  ;;  %v19438_v1 = vld [vmem:[%s22494_s16 + $0x1050] ss:$72 sps:$4 sm:$0xff]   ;;  %v19441_v3 = vld [vmem:[%s22494_s16 + $0x10e4] ss:$72 sps:$4 sm:$0xff]   ;;  %v19444_v5 = vld [vmem:[%s22494_s16 + $0x10e0] ss:$72 sps:$4 sm:$0xff]  }
 0x15f   : > { %5884 = vmatprep.mubr.bf16.mxu1 %v22581_v58  ;;  %v19445_v6 = vld [vmem:[%s22494_s16 + $0x874] ss:$72 sps:$4 sm:$0xff]   ;;  %v19449_v8 = vld [vmem:[%s22494_s16 + $0x870] ss:$72 sps:$4 sm:$0xff]   ;;  %v19453_v12 = vld [vmem:[%s22494_s16 + $0x1204] ss:$72 sps:$4 sm:$0xff]  }
 0x160   : > { %5822 = vmatpush1.bf16.msra.mxu0 %v19389_v28  ;;  %v19447_v7 = vld [vmem:[%s22494_s16 + $0x1174] ss:$72 sps:$4 sm:$0xff]   ;;  %v19450_v9 = vld [vmem:[%s22494_s16 + $0x1170] ss:$72 sps:$4 sm:$0xff]   ;;  %v19451_v16 = vld [vmem:[%s22494_s16 + $0x1200] ss:$72 sps:$4 sm:$0xff]  }
 0x161   : > { %5863 = vmatpush1.bf16.msra.mxu1 %v19390_v29  ;;  %5823 = vmatprep.subr.bf16.mxu0 %v19391_v30  ;;  %v603_v11 = vld [vmem:[#allocation2 + $0x10] sm:$0xff]  ;;  %v19462_v19 = vld [vmem:[%s22494_s16 + $0x9c] ss:$72 sps:$4 sm:$0xff]   ;;  %v19460_v21 = vld [vmem:[%s22494_s16 + $0x98] ss:$72 sps:$4 sm:$0xff]   ;;  %p18776_p8 = scmp.ne.s32.totalorder %s22151_s17, 2 }
 0x162   : > { %5864 = vmatprep.subr.bf16.mxu1 %v19393_v31  ;;  %v19456_v13 = vld [vmem:[%s22494_s16 + $0xc] ss:$72 sps:$4 sm:$0xff]   ;;  %v22604_v15 = vpack.c.bf16 %v603_v11, %v603_v11  ;;  %v19454_v17 = vld [vmem:[%s22494_s16 + $0x8] ss:$72 sps:$4 sm:$0xff]   ;;  %v19474_v27 = vld [vmem:[%s22494_s16 + $0x1bc] ss:$72 sps:$4 sm:$0xff]  }
 0x163   : > { %v19459_v18 = vld [vmem:[%s22494_s16 + $0x1294] ss:$72 sps:$4 sm:$0xff]   ;;  %v19457_v20 = vld [vmem:[%s22494_s16 + $0x1290] ss:$72 sps:$4 sm:$0xff]   ;;  %v19465_v22 = vld [vmem:[%s22494_s16 + $0x1324] ss:$72 sps:$4 sm:$0xff]  }
 0x164   : > { %5824 = vmatpush1.bf16.msra.mxu0 %v19395_v32  ;;  %v19468_v23 = vld [vmem:[%s22494_s16 + $0x12c] ss:$72 sps:$4 sm:$0xff]   ;;  %v19463_v24 = vld [vmem:[%s22494_s16 + $0x1320] ss:$72 sps:$4 sm:$0xff]   ;;  %v19469_v28 = vld [vmem:[%s22494_s16 + $0x13b0] ss:$72 sps:$4 sm:$0xff]  }
 0x165   : > { %5865 = vmatpush1.bf16.msra.mxu1 %v19396_v33  ;;  %5825 = vmatprep.subr.bf16.mxu0 %v19397_v34  ;;  %v19466_v25 = vld [vmem:[%s22494_s16 + $0x128] ss:$72 sps:$4 sm:$0xff]   ;;  %v19471_v26 = vld [vmem:[%s22494_s16 + $0x13b4] ss:$72 sps:$4 sm:$0xff]   ;;  %v19472_v29 = vld [vmem:[%s22494_s16 + $0x1b8] ss:$72 sps:$4 sm:$0xff]  }
 0x166   : > { %5866 = vmatprep.subr.bf16.mxu1 %v19399_v35  ;;  %v19477_v30 = vld [vmem:[%s22494_s16 + $0x1444] ss:$72 sps:$4 sm:$0xff]   ;;  %v19475_v32 = vld [vmem:[%s22494_s16 + $0x1440] ss:$72 sps:$4 sm:$0xff]   ;;  %v19483_v34 = vld [vmem:[%s22494_s16 + $0x14d4] ss:$72 sps:$4 sm:$0xff]  }
 0x167   : > { %v19480_v31 = vld [vmem:[%s22494_s16 + $0x24c] ss:$72 sps:$4 sm:$0xff]   ;;  %v19478_v33 = vld [vmem:[%s22494_s16 + $0x248] ss:$72 sps:$4 sm:$0xff]   ;;  %v19486_v35 = vld [vmem:[%s22494_s16 + $0x2dc] ss:$72 sps:$4 sm:$0xff]  }
 0x168   : > { %5826 = vmatpush1.bf16.msra.mxu0 %v19401_v36  ;;  %v19481_v36 = vld [vmem:[%s22494_s16 + $0x14d0] ss:$72 sps:$4 sm:$0xff]   ;;  %v19507_v52 = vld [vmem:[%s22494_s16 + $0x1714] ss:$72 sps:$4 sm:$0xff]   ;;  %v19537_v10 = vld [vmem:[%s22494_s16 + $0x19e4] ss:$72 sps:$4 sm:$0xff]  }
 0x169   : > { %5867 = vmatpush1.bf16.msra.mxu1 %v19402_v37  ;;  %5827 = vmatprep.subr.bf16.mxu0 %v19403_v38  ;;  %v19484_v37 = vld [vmem:[%s22494_s16 + $0x2d8] ss:$72 sps:$4 sm:$0xff]   ;;  %v19489_v38 = vld [vmem:[%s22494_s16 + $0x1564] ss:$72 sps:$4 sm:$0xff]  }
 0x16a   : > { %5868 = vmatprep.subr.bf16.mxu1 %v19405_v39  ;;  %v19492_v39 = vld [vmem:[%s22494_s16 + $0x36c] ss:$72 sps:$4 sm:$0xff]   ;;  %v19508_v56 = vld [vmem:[%s22494_s16 + $0x518] ss:$72 sps:$4 sm:$0xff]  }
 0x16b   : > { %v19540_v11 = vld [vmem:[%s22494_s16 + $0x7ec] ss:$72 sps:$4 sm:$0xff]  }
 0x16c   : > { %5828 = vmatpush1.bf16.msra.mxu0 %v19407_v40  ;;  %v606_v40 = vld [vmem:[#allocation2 + $0x28] sm:$0xff] }
 0x16d   : > { %5869 = vmatpush1.bf16.msra.mxu1 %v19408_v41  ;;  %5829 = vmatprep.subr.bf16.mxu0 %v19409_v42  ;;  %v22633_v41 = vpack.c.bf16 %v606_v40, %v606_v40  ;;  %v19487_v42 = vld [vmem:[%s22494_s16 + $0x1560] ss:$72 sps:$4 sm:$0xff]  }
 0x16e   : > { %5870 = vmatprep.subr.bf16.mxu1 %v19411_v43  ;;  %v19490_v43 = vld [vmem:[%s22494_s16 + $0x368] ss:$72 sps:$4 sm:$0xff]  }
 0x16f   : > { %v19571_v40 = vld [vmem:[%s22494_s16 + $0xb48] ss:$72 sps:$4 sm:$0xff]  }
 0x170   : > { %5830 = vmatpush1.bf16.msra.mxu0 %v19413_v44  ;;  %v19495_v44 = vld [vmem:[%s22494_s16 + $0x15f4] ss:$72 sps:$4 sm:$0xff]  }
 0x171   : > { %5871 = vmatpush1.bf16.msra.mxu1 %v19414_v45  ;;  %5831 = vmatprep.subr.bf16.mxu0 %v19415_v46  ;;  %v19498_v45 = vld [vmem:[%s22494_s16 + $0x3fc] ss:$72 sps:$4 sm:$0xff]   ;;  %v19493_v46 = vld [vmem:[%s22494_s16 + $0x15f0] ss:$72 sps:$4 sm:$0xff]  }
 0x172   : > { %5872 = vmatprep.subr.bf16.mxu1 %v19417_v47  ;;  %v19496_v47 = vld [vmem:[%s22494_s16 + $0x3f8] ss:$72 sps:$4 sm:$0xff]  }
 0x174   : > { %5832 = vmatpush1.bf16.msra.mxu0 %v19419_v48  ;;  %v19501_v48 = vld [vmem:[%s22494_s16 + $0x1684] ss:$72 sps:$4 sm:$0xff]  }
 0x175   : > { %5873 = vmatpush1.bf16.msra.mxu1 %v19420_v49  ;;  %5833 = vmatprep.subr.bf16.mxu0 %v19421_v50  ;;  %v19504_v49 = vld [vmem:[%s22494_s16 + $0x48c] ss:$72 sps:$4 sm:$0xff]   ;;  %v19499_v50 = vld [vmem:[%s22494_s16 + $0x1680] ss:$72 sps:$4 sm:$0xff]  }
 0x176   : > { %5874 = vmatprep.subr.bf16.mxu1 %v19423_v51  ;;  %v19502_v51 = vld [vmem:[%s22494_s16 + $0x488] ss:$72 sps:$4 sm:$0xff]  }
 0x178   : > { %5834 = vmatpush1.bf16.msra.mxu0 %v19425_v53  ;;  %v19510_v53 = vld [vmem:[%s22494_s16 + $0x51c] ss:$72 sps:$4 sm:$0xff]  }
 0x179   : > { %5875 = vmatpush1.bf16.msra.mxu1 %v19426_v54  ;;  %5835 = vmatprep.subr.bf16.mxu0 %v19427_v57  ;;  %v19505_v54 = vld [vmem:[%s22494_s16 + $0x1710] ss:$72 sps:$4 sm:$0xff]   ;;  %v19513_v57 = vld [vmem:[%s22494_s16 + $0x17a4] ss:$72 sps:$4 sm:$0xff]  }
 0x17a   : > { %5876 = vmatprep.subr.bf16.mxu1 %v19429_v59  ;;  %v19516_v59 = vld [vmem:[%s22494_s16 + $0x5ac] ss:$72 sps:$4 sm:$0xff]  }
 0x17c   : > { %5836 = vmatpush1.bf16.msra.mxu0 %v19431_v60  ;;  %v19511_v60 = vld [vmem:[%s22494_s16 + $0x17a0] ss:$72 sps:$4 sm:$0xff]  }
 0x17d   : > { %5877 = vmatpush1.bf16.msra.mxu1 %v19432_v61  ;;  %5837 = vmatprep.subr.bf16.mxu0 %v19433_v62  ;;  %v19514_v61 = vld [vmem:[%s22494_s16 + $0x5a8] ss:$72 sps:$4 sm:$0xff]   ;;  %v19519_v62 = vld [vmem:[%s22494_s16 + $0x1834] ss:$72 sps:$4 sm:$0xff]  }
 0x17e   : > { %5878 = vmatprep.subr.bf16.mxu1 %v19435_v63  ;;  %v19522_v63 = vld [vmem:[%s22494_s16 + $0x63c] ss:$72 sps:$4 sm:$0xff]  }
 0x180   : > { %5838 = vmatpush1.bf16.msra.mxu0 %v19437_v0  ;;  %v19517_v0 = vld [vmem:[%s22494_s16 + $0x1830] ss:$72 sps:$4 sm:$0xff]  }
 0x181   : > { %5879 = vmatpush1.bf16.msra.mxu1 %v19438_v1  ;;  %5839 = vmatprep.subr.bf16.mxu0 %v19439_v2  ;;  %v19520_v1 = vld [vmem:[%s22494_s16 + $0x638] ss:$72 sps:$4 sm:$0xff]   ;;  %v19525_v2 = vld [vmem:[%s22494_s16 + $0x18c4] ss:$72 sps:$4 sm:$0xff]  }
 0x182   : > { %5880 = vmatprep.subr.bf16.mxu1 %v19441_v3  ;;  %v19528_v3 = vld [vmem:[%s22494_s16 + $0x6cc] ss:$72 sps:$4 sm:$0xff]  }
 0x184   : > { %5840 = vmatpush1.bf16.msra.mxu0 %v19443_v4  ;;  %v19523_v4 = vld [vmem:[%s22494_s16 + $0x18c0] ss:$72 sps:$4 sm:$0xff]  }
 0x185   : > { %5881 = vmatpush1.bf16.msra.mxu1 %v19444_v5  ;;  %5841 = vmatprep.subr.bf16.mxu0 %v19445_v6  ;;  %v19526_v5 = vld [vmem:[%s22494_s16 + $0x6c8] ss:$72 sps:$4 sm:$0xff]   ;;  %v19531_v6 = vld [vmem:[%s22494_s16 + $0x1954] ss:$72 sps:$4 sm:$0xff]  }
 0x186   : > { %5882 = vmatprep.subr.bf16.mxu1 %v19447_v7  ;;  %v19534_v7 = vld [vmem:[%s22494_s16 + $0x75c] ss:$72 sps:$4 sm:$0xff]  }
 0x188   : > { %5842 = vmatpush1.bf16.msra.mxu0 %v19449_v8  ;;  %v19529_v8 = vld [vmem:[%s22494_s16 + $0x1950] ss:$72 sps:$4 sm:$0xff]  }
 0x189   : > { %5883 = vmatpush1.bf16.msra.mxu1 %v19450_v9  ;;  %5893 = vmatprep.subr.bf16.mxu0 %v19453_v12  ;;  %v19532_v9 = vld [vmem:[%s22494_s16 + $0x758] ss:$72 sps:$4 sm:$0xff]  }
 0x18a   : > { %5934 = vmatprep.subr.bf16.mxu1 %v19456_v13  ;;  %v19535_v12 = vld [vmem:[%s22494_s16 + $0x19e0] ss:$72 sps:$4 sm:$0xff]  }
 0x18b   : > { %5844 = vmatmul.mubr.bf16.vlgmr.msra.gmra.mrb[0].mxu0 %v22602_v14  ;;  %v19538_v13 = vld [vmem:[%s22494_s16 + $0x7e8] ss:$72 sps:$4 sm:$0xff]  }
 0x18c   : > { %5885 = vmatmul.mubr.bf16.vlgmr.msra.gmra.mrb[0].mxu1 %v22604_v15  ;;  %5894 = vmatpush1.bf16.msra.mxu0 %v19451_v16  ;;  %v19543_v16 = vld [vmem:[%s22494_s16 + $0x1a74] ss:$72 sps:$4 sm:$0xff]  }
 0x18d   : > { %5935 = vmatpush1.bf16.msra.mxu1 %v19454_v17  ;;  %5895 = vmatprep.subr.bf16.mxu0 %v19459_v18  ;;  %v19546_v17 = vld [vmem:[%s22494_s16 + $0x87c] ss:$72 sps:$4 sm:$0xff]   ;;  %v19541_v18 = vld [vmem:[%s22494_s16 + $0x1a70] ss:$72 sps:$4 sm:$0xff]  }
 0x18e   : > { %5936 = vmatprep.subr.bf16.mxu1 %v19462_v19  ;;  %5966 = vmatprep.mubr.bf16.mxu1 %v22578_v55  ;;  %v19544_v19 = vld [vmem:[%s22494_s16 + $0x878] ss:$72 sps:$4 sm:$0xff]  }
 0x18f   : > { %5925 = vmatprep.mubr.bf16.mxu0 %v22633_v41 }
 0x190   : > { %5896 = vmatpush1.bf16.msra.mxu0 %v19457_v20  ;;  %v605_v20 = vld [vmem:[#allocation2 + $0x20] sm:$0xff] }
 0x191   : > { %5937 = vmatpush1.bf16.msra.mxu1 %v19460_v21  ;;  %5897 = vmatprep.subr.bf16.mxu0 %v19465_v22  ;;  %v19549_v21 = vld [vmem:[%s22494_s16 + $0x90c] ss:$72 sps:$4 sm:$0xff]  }
 0x192   : > { %5938 = vmatprep.subr.bf16.mxu1 %v19468_v23  ;;  %v19552_v22 = vld [vmem:[%s22494_s16 + $0x120c] ss:$72 sps:$4 sm:$0xff]   ;;  %v22676_v23 = vpack.c.bf16 %v605_v20, %v605_v20 }
 0x193   : > { %v19636_v20 = vld [vmem:[%s22494_s16 + $0x19ec] ss:$72 sps:$4 sm:$0xff]  }
 0x194   : > { %5898 = vmatpush1.bf16.msra.mxu0 %v19463_v24  ;;  %v19547_v24 = vld [vmem:[%s22494_s16 + $0x908] ss:$72 sps:$4 sm:$0xff]  }
 0x195   : > { %5939 = vmatpush1.bf16.msra.mxu1 %v19466_v25  ;;  %5899 = vmatprep.subr.bf16.mxu0 %v19471_v26  ;;  %v19550_v25 = vld [vmem:[%s22494_s16 + $0x1208] ss:$72 sps:$4 sm:$0xff]   ;;  %v19555_v26 = vld [vmem:[%s22494_s16 + $0x99c] ss:$72 sps:$4 sm:$0xff]  }
 0x196   : > { %5940 = vmatprep.subr.bf16.mxu1 %v19474_v27  ;;  %v19558_v27 = vld [vmem:[%s22494_s16 + $0x129c] ss:$72 sps:$4 sm:$0xff]  }
 0x198   : > { %5900 = vmatpush1.bf16.msra.mxu0 %v19469_v28  ;;  %v19553_v28 = vld [vmem:[%s22494_s16 + $0x998] ss:$72 sps:$4 sm:$0xff]  }
 0x199   : > { %5941 = vmatpush1.bf16.msra.mxu1 %v19472_v29  ;;  %5901 = vmatprep.subr.bf16.mxu0 %v19477_v30  ;;  %v19556_v29 = vld [vmem:[%s22494_s16 + $0x1298] ss:$72 sps:$4 sm:$0xff]   ;;  %v19561_v30 = vld [vmem:[%s22494_s16 + $0xa2c] ss:$72 sps:$4 sm:$0xff]  }
 0x19a   : > { %5942 = vmatprep.subr.bf16.mxu1 %v19480_v31  ;;  %v19564_v31 = vld [vmem:[%s22494_s16 + $0x132c] ss:$72 sps:$4 sm:$0xff]  }
 0x19c   : > { %5902 = vmatpush1.bf16.msra.mxu0 %v19475_v32  ;;  %v19559_v32 = vld [vmem:[%s22494_s16 + $0xa28] ss:$72 sps:$4 sm:$0xff]  }
 0x19d   : > { %5943 = vmatpush1.bf16.msra.mxu1 %v19478_v33  ;;  %5903 = vmatprep.subr.bf16.mxu0 %v19483_v34  ;;  %v19562_v33 = vld [vmem:[%s22494_s16 + $0x1328] ss:$72 sps:$4 sm:$0xff]   ;;  %v19567_v34 = vld [vmem:[%s22494_s16 + $0xabc] ss:$72 sps:$4 sm:$0xff]  }
 0x19e   : > { %5944 = vmatprep.subr.bf16.mxu1 %v19486_v35  ;;  %v19570_v35 = vld [vmem:[%s22494_s16 + $0x13bc] ss:$72 sps:$4 sm:$0xff]  }
 0x1a0   : > { %5904 = vmatpush1.bf16.msra.mxu0 %v19481_v36  ;;  %v19565_v36 = vld [vmem:[%s22494_s16 + $0xab8] ss:$72 sps:$4 sm:$0xff]  }
 0x1a1   : > { %5945 = vmatpush1.bf16.msra.mxu1 %v19484_v37  ;;  %5905 = vmatprep.subr.bf16.mxu0 %v19489_v38  ;;  %v19568_v37 = vld [vmem:[%s22494_s16 + $0x13b8] ss:$72 sps:$4 sm:$0xff]   ;;  %v19573_v38 = vld [vmem:[%s22494_s16 + $0xb4c] ss:$72 sps:$4 sm:$0xff]  }
 0x1a2   : > { %5946 = vmatprep.subr.bf16.mxu1 %v19492_v39  ;;  %v19576_v39 = vld [vmem:[%s22494_s16 + $0x144c] ss:$72 sps:$4 sm:$0xff]  }
 0x1a4   : > { %5906 = vmatpush1.bf16.msra.mxu0 %v19487_v42  ;;  %v19574_v42 = vld [vmem:[%s22494_s16 + $0x1448] ss:$72 sps:$4 sm:$0xff]  }
 0x1a5   : > { %5947 = vmatpush1.bf16.msra.mxu1 %v19490_v43  ;;  %5907 = vmatprep.subr.bf16.mxu0 %v19495_v44  ;;  %v19579_v43 = vld [vmem:[%s22494_s16 + $0xbdc] ss:$72 sps:$4 sm:$0xff]  }
 0x1a6   : > { %5948 = vmatprep.subr.bf16.mxu1 %v19498_v45  ;;  %v19582_v44 = vld [vmem:[%s22494_s16 + $0x14dc] ss:$72 sps:$4 sm:$0xff]   ;;  %v19577_v45 = vld [vmem:[%s22494_s16 + $0xbd8] ss:$72 sps:$4 sm:$0xff]  }
 0x1a8   : > { %5908 = vmatpush1.bf16.msra.mxu0 %v19493_v46  ;;  %v19580_v46 = vld [vmem:[%s22494_s16 + $0x14d8] ss:$72 sps:$4 sm:$0xff]  }
 0x1a9   : > { %5949 = vmatpush1.bf16.msra.mxu1 %v19496_v47  ;;  %5909 = vmatprep.subr.bf16.mxu0 %v19501_v48  ;;  %v19585_v47 = vld [vmem:[%s22494_s16 + $0xc6c] ss:$72 sps:$4 sm:$0xff]  }
 0x1aa   : > { %5950 = vmatprep.subr.bf16.mxu1 %v19504_v49  ;;  %v19588_v48 = vld [vmem:[%s22494_s16 + $0x156c] ss:$72 sps:$4 sm:$0xff]   ;;  %v19583_v49 = vld [vmem:[%s22494_s16 + $0xc68] ss:$72 sps:$4 sm:$0xff]  }
 0x1ac   : > { %5910 = vmatpush1.bf16.msra.mxu0 %v19499_v50  ;;  %v19586_v50 = vld [vmem:[%s22494_s16 + $0x1568] ss:$72 sps:$4 sm:$0xff]  }
 0x1ad   : > { %5951 = vmatpush1.bf16.msra.mxu1 %v19502_v51  ;;  %5911 = vmatprep.subr.bf16.mxu0 %v19507_v52  ;;  %v19591_v51 = vld [vmem:[%s22494_s16 + $0xcfc] ss:$72 sps:$4 sm:$0xff]  }
 0x1ae   : > { %5952 = vmatprep.subr.bf16.mxu1 %v19510_v53  ;;  %v19594_v52 = vld [vmem:[%s22494_s16 + $0x15fc] ss:$72 sps:$4 sm:$0xff]   ;;  %v19589_v53 = vld [vmem:[%s22494_s16 + $0xcf8] ss:$72 sps:$4 sm:$0xff]  }
 0x1b0   : > { %5912 = vmatpush1.bf16.msra.mxu0 %v19505_v54  ;;  %v19592_v54 = vld [vmem:[%s22494_s16 + $0x15f8] ss:$72 sps:$4 sm:$0xff]  }
 0x1b1   : > { %5953 = vmatpush1.bf16.msra.mxu1 %v19508_v56  ;;  %5913 = vmatprep.subr.bf16.mxu0 %v19513_v57  ;;  %v19597_v56 = vld [vmem:[%s22494_s16 + $0xd8c] ss:$72 sps:$4 sm:$0xff]  }
 0x1b2   : > { %5954 = vmatprep.subr.bf16.mxu1 %v19516_v59  ;;  %v19600_v57 = vld [vmem:[%s22494_s16 + $0x168c] ss:$72 sps:$4 sm:$0xff]   ;;  %v19595_v59 = vld [vmem:[%s22494_s16 + $0xd88] ss:$72 sps:$4 sm:$0xff]  }
 0x1b4   : > { %5914 = vmatpush1.bf16.msra.mxu0 %v19511_v60  ;;  %v19598_v60 = vld [vmem:[%s22494_s16 + $0x1688] ss:$72 sps:$4 sm:$0xff]  }
 0x1b5   : > { %5955 = vmatpush1.bf16.msra.mxu1 %v19514_v61  ;;  %5915 = vmatprep.subr.bf16.mxu0 %v19519_v62  ;;  %v19603_v61 = vld [vmem:[%s22494_s16 + $0xe1c] ss:$72 sps:$4 sm:$0xff]  }
 0x1b6   : > { %5956 = vmatprep.subr.bf16.mxu1 %v19522_v63  ;;  %v19606_v62 = vld [vmem:[%s22494_s16 + $0x171c] ss:$72 sps:$4 sm:$0xff]   ;;  %v19601_v63 = vld [vmem:[%s22494_s16 + $0xe18] ss:$72 sps:$4 sm:$0xff]  }
 0x1b8   : > { %5916 = vmatpush1.bf16.msra.mxu0 %v19517_v0  ;;  %v19604_v0 = vld [vmem:[%s22494_s16 + $0x1718] ss:$72 sps:$4 sm:$0xff]  }
 0x1b9   : > { %5957 = vmatpush1.bf16.msra.mxu1 %v19520_v1  ;;  %5917 = vmatprep.subr.bf16.mxu0 %v19525_v2  ;;  %v19609_v1 = vld [vmem:[%s22494_s16 + $0xeac] ss:$72 sps:$4 sm:$0xff]  }
 0x1ba   : > { %5958 = vmatprep.subr.bf16.mxu1 %v19528_v3  ;;  %v19612_v2 = vld [vmem:[%s22494_s16 + $0x17ac] ss:$72 sps:$4 sm:$0xff]   ;;  %v19607_v3 = vld [vmem:[%s22494_s16 + $0xea8] ss:$72 sps:$4 sm:$0xff]  }
 0x1bc   : > { %5918 = vmatpush1.bf16.msra.mxu0 %v19523_v4  ;;  %v19610_v4 = vld [vmem:[%s22494_s16 + $0x17a8] ss:$72 sps:$4 sm:$0xff]  }
 0x1bd   : > { %5959 = vmatpush1.bf16.msra.mxu1 %v19526_v5  ;;  %5919 = vmatprep.subr.bf16.mxu0 %v19531_v6  ;;  %v19615_v5 = vld [vmem:[%s22494_s16 + $0xf3c] ss:$72 sps:$4 sm:$0xff]  }
 0x1be   : > { %5960 = vmatprep.subr.bf16.mxu1 %v19534_v7  ;;  %v19618_v6 = vld [vmem:[%s22494_s16 + $0x183c] ss:$72 sps:$4 sm:$0xff]   ;;  %v19613_v7 = vld [vmem:[%s22494_s16 + $0xf38] ss:$72 sps:$4 sm:$0xff]  }
 0x1c0   : > { %5920 = vmatpush1.bf16.msra.mxu0 %v19529_v8  ;;  %v19616_v8 = vld [vmem:[%s22494_s16 + $0x1838] ss:$72 sps:$4 sm:$0xff]  }
 0x1c1   : > { %5961 = vmatpush1.bf16.msra.mxu1 %v19532_v9  ;;  %5921 = vmatprep.subr.bf16.mxu0 %v19537_v10  ;;  %v19621_v9 = vld [vmem:[%s22494_s16 + $0xfcc] ss:$72 sps:$4 sm:$0xff]  }
 0x1c2   : > { %5962 = vmatprep.subr.bf16.mxu1 %v19540_v11  ;;  %v19624_v10 = vld [vmem:[%s22494_s16 + $0x18cc] ss:$72 sps:$4 sm:$0xff]   ;;  %v19619_v11 = vld [vmem:[%s22494_s16 + $0xfc8] ss:$72 sps:$4 sm:$0xff]  }
 0x1c4   : > { %5922 = vmatpush1.bf16.msra.mxu0 %v19535_v12  ;;  %v19622_v12 = vld [vmem:[%s22494_s16 + $0x18c8] ss:$72 sps:$4 sm:$0xff]  }
 0x1c5   : > { %5963 = vmatpush1.bf16.msra.mxu1 %v19538_v13  ;;  %5923 = vmatprep.subr.bf16.mxu0 %v19543_v16  ;;  %v19627_v13 = vld [vmem:[%s22494_s16 + $0x105c] ss:$72 sps:$4 sm:$0xff]  }
 0x1c6   : > { %5964 = vmatprep.subr.bf16.mxu1 %v19546_v17  ;;  %v19630_v16 = vld [vmem:[%s22494_s16 + $0x195c] ss:$72 sps:$4 sm:$0xff]   ;;  %v19625_v17 = vld [vmem:[%s22494_s16 + $0x1058] ss:$72 sps:$4 sm:$0xff]  }
 0x1c8   : > { %5924 = vmatpush1.bf16.msra.mxu0 %v19541_v18  ;;  %v19628_v18 = vld [vmem:[%s22494_s16 + $0x1958] ss:$72 sps:$4 sm:$0xff]  }
 0x1c9   : > { %5965 = vmatpush1.bf16.msra.mxu1 %v19544_v19  ;;  %5975 = vmatprep.subr.bf16.mxu0 %v19549_v21  ;;  %v19633_v19 = vld [vmem:[%s22494_s16 + $0x10ec] ss:$72 sps:$4 sm:$0xff]   ;;  %v19631_v21 = vld [vmem:[%s22494_s16 + $0x10e8] ss:$72 sps:$4 sm:$0xff]  }
 0x1ca   : > { %6016 = vmatprep.subr.bf16.mxu1 %v19552_v22  ;;  %v19634_v22 = vld [vmem:[%s22494_s16 + $0x19e8] ss:$72 sps:$4 sm:$0xff]  }
 0x1cb   : > { %5926 = vmatmul.mubr.bf16.vlgmr.msra.gmra.mrb[4].mxu0 %v22676_v23 }
 0x1cc   : > { %5967 = vmatmul.mubr.bf16.vlgmr.msra.gmra.mrb[4].mxu1 %v22602_v14  ;;  %5976 = vmatpush1.bf16.msra.mxu0 %v19547_v24  ;;  %v19639_v24 = vld [vmem:[%s22494_s16 + $0x117c] ss:$72 sps:$4 sm:$0xff]  }
 0x1cd   : > { %6017 = vmatpush1.bf16.msra.mxu1 %v19550_v25  ;;  %5977 = vmatprep.subr.bf16.mxu0 %v19555_v26  ;;  %v19642_v25 = vld [vmem:[%s22494_s16 + $0x1a7c] ss:$72 sps:$4 sm:$0xff]   ;;  %v19637_v26 = vld [vmem:[%s22494_s16 + $0x1178] ss:$72 sps:$4 sm:$0xff]  }
 0x1ce   : > { %6018 = vmatprep.subr.bf16.mxu1 %v19558_v27  ;;  %6007 = vmatprep.mubr.bf16.mxu0 %v22581_v58  ;;  %v19640_v27 = vld [vmem:[%s22494_s16 + $0x1a78] ss:$72 sps:$4 sm:$0xff]  }
 0x1cf   : > { %6048 = vmatprep.mubr.bf16.mxu1 %v22633_v41 }
 0x1d0   : > { %5978 = vmatpush1.bf16.msra.mxu0 %v19553_v28  ;;  %v19645_v28 = vld [vmem:[%s22494_s16 + $0x14] ss:$72 sps:$4 sm:$0xff]  }
 0x1d1   : > { %6019 = vmatpush1.bf16.msra.mxu1 %v19556_v29  ;;  %5979 = vmatprep.subr.bf16.mxu0 %v19561_v30  ;;  %v19648_v29 = vld [vmem:[%s22494_s16 + $0x914] ss:$72 sps:$4 sm:$0xff]   ;;  %v19643_v30 = vld [vmem:[%s22494_s16 + $0x10] ss:$72 sps:$4 sm:$0xff]  }
 0x1d2   : > { %6020 = vmatprep.subr.bf16.mxu1 %v19564_v31  ;;  %v19646_v31 = vld [vmem:[%s22494_s16 + $0x910] ss:$72 sps:$4 sm:$0xff]  }
 0x1d4   : > { %5980 = vmatpush1.bf16.msra.mxu0 %v19559_v32  ;;  %v19651_v32 = vld [vmem:[%s22494_s16 + $0xa4] ss:$72 sps:$4 sm:$0xff]  }
 0x1d5   : > { %6021 = vmatpush1.bf16.msra.mxu1 %v19562_v33  ;;  %5981 = vmatprep.subr.bf16.mxu0 %v19567_v34  ;;  %v19654_v33 = vld [vmem:[%s22494_s16 + $0x9a4] ss:$72 sps:$4 sm:$0xff]   ;;  %v19649_v34 = vld [vmem:[%s22494_s16 + $0xa0] ss:$72 sps:$4 sm:$0xff]  }
 0x1d6   : > { %6022 = vmatprep.subr.bf16.mxu1 %v19570_v35  ;;  %v19652_v35 = vld [vmem:[%s22494_s16 + $0x9a0] ss:$72 sps:$4 sm:$0xff]  }
 0x1d8   : > { %5982 = vmatpush1.bf16.msra.mxu0 %v19565_v36  ;;  %v19657_v36 = vld [vmem:[%s22494_s16 + $0x134] ss:$72 sps:$4 sm:$0xff]  }
 0x1d9   : > { %6023 = vmatpush1.bf16.msra.mxu1 %v19568_v37  ;;  %5983 = vmatprep.subr.bf16.mxu0 %v19573_v38  ;;  %v19660_v37 = vld [vmem:[%s22494_s16 + $0xa34] ss:$72 sps:$4 sm:$0xff]   ;;  %v19655_v38 = vld [vmem:[%s22494_s16 + $0x130] ss:$72 sps:$4 sm:$0xff]  }
 0x1da   : > { %6024 = vmatprep.subr.bf16.mxu1 %v19576_v39  ;;  %v19658_v39 = vld [vmem:[%s22494_s16 + $0xa30] ss:$72 sps:$4 sm:$0xff]  }
 0x1dc   : > { %5984 = vmatpush1.bf16.msra.mxu0 %v19571_v40  ;;  %v19663_v40 = vld [vmem:[%s22494_s16 + $0x1c4] ss:$72 sps:$4 sm:$0xff]  }
 0x1dd   : > { %6025 = vmatpush1.bf16.msra.mxu1 %v19574_v42  ;;  %5985 = vmatprep.subr.bf16.mxu0 %v19579_v43  ;;  %v19666_v42 = vld [vmem:[%s22494_s16 + $0xac4] ss:$72 sps:$4 sm:$0xff]   ;;  %v19661_v43 = vld [vmem:[%s22494_s16 + $0x1c0] ss:$72 sps:$4 sm:$0xff]  }
 0x1de   : > { %6026 = vmatprep.subr.bf16.mxu1 %v19582_v44  ;;  %v19664_v44 = vld [vmem:[%s22494_s16 + $0xac0] ss:$72 sps:$4 sm:$0xff]  }
 0x1e0   : > { %5986 = vmatpush1.bf16.msra.mxu0 %v19577_v45  ;;  %v19669_v45 = vld [vmem:[%s22494_s16 + $0x254] ss:$72 sps:$4 sm:$0xff]  }
 0x1e1   : > { %6027 = vmatpush1.bf16.msra.mxu1 %v19580_v46  ;;  %5987 = vmatprep.subr.bf16.mxu0 %v19585_v47  ;;  %v19672_v46 = vld [vmem:[%s22494_s16 + $0xb54] ss:$72 sps:$4 sm:$0xff]   ;;  %v19667_v47 = vld [vmem:[%s22494_s16 + $0x250] ss:$72 sps:$4 sm:$0xff]  }
 0x1e2   : > { %6028 = vmatprep.subr.bf16.mxu1 %v19588_v48  ;;  %v19670_v48 = vld [vmem:[%s22494_s16 + $0xb50] ss:$72 sps:$4 sm:$0xff]  }
 0x1e4   : > { %5988 = vmatpush1.bf16.msra.mxu0 %v19583_v49  ;;  %v19675_v49 = vld [vmem:[%s22494_s16 + $0x2e4] ss:$72 sps:$4 sm:$0xff]  }
 0x1e5   : > { %6029 = vmatpush1.bf16.msra.mxu1 %v19586_v50  ;;  %5989 = vmatprep.subr.bf16.mxu0 %v19591_v51  ;;  %v19678_v50 = vld [vmem:[%s22494_s16 + $0xbe4] ss:$72 sps:$4 sm:$0xff]   ;;  %v19673_v51 = vld [vmem:[%s22494_s16 + $0x2e0] ss:$72 sps:$4 sm:$0xff]  }
 0x1e6   : > { %6030 = vmatprep.subr.bf16.mxu1 %v19594_v52  ;;  %v19676_v52 = vld [vmem:[%s22494_s16 + $0xbe0] ss:$72 sps:$4 sm:$0xff]  }
 0x1e8   : > { %5990 = vmatpush1.bf16.msra.mxu0 %v19589_v53  ;;  %v19681_v53 = vld [vmem:[%s22494_s16 + $0x374] ss:$72 sps:$4 sm:$0xff]  }
 0x1e9   : > { %6031 = vmatpush1.bf16.msra.mxu1 %v19592_v54  ;;  %5991 = vmatprep.subr.bf16.mxu0 %v19597_v56  ;;  %v19684_v54 = vld [vmem:[%s22494_s16 + $0xc74] ss:$72 sps:$4 sm:$0xff]   ;;  %v19679_v56 = vld [vmem:[%s22494_s16 + $0x370] ss:$72 sps:$4 sm:$0xff]  }
 0x1ea   : > { %6032 = vmatprep.subr.bf16.mxu1 %v19600_v57  ;;  %v19682_v57 = vld [vmem:[%s22494_s16 + $0xc70] ss:$72 sps:$4 sm:$0xff]  }
 0x1ec   : > { %5992 = vmatpush1.bf16.msra.mxu0 %v19595_v59  ;;  %v19687_v59 = vld [vmem:[%s22494_s16 + $0x404] ss:$72 sps:$4 sm:$0xff]  }
 0x1ed   : > { %6033 = vmatpush1.bf16.msra.mxu1 %v19598_v60  ;;  %5993 = vmatprep.subr.bf16.mxu0 %v19603_v61  ;;  %v19690_v60 = vld [vmem:[%s22494_s16 + $0xd04] ss:$72 sps:$4 sm:$0xff]   ;;  %v19685_v61 = vld [vmem:[%s22494_s16 + $0x400] ss:$72 sps:$4 sm:$0xff]  }
 0x1ee   : > { %6034 = vmatprep.subr.bf16.mxu1 %v19606_v62  ;;  %v19688_v62 = vld [vmem:[%s22494_s16 + $0xd00] ss:$72 sps:$4 sm:$0xff]  }
 0x1f0   : > { %5994 = vmatpush1.bf16.msra.mxu0 %v19601_v63  ;;  %v19693_v63 = vld [vmem:[%s22494_s16 + $0x494] ss:$72 sps:$4 sm:$0xff]  }
 0x1f1   : > { %6035 = vmatpush1.bf16.msra.mxu1 %v19604_v0  ;;  %5995 = vmatprep.subr.bf16.mxu0 %v19609_v1  ;;  %v19696_v0 = vld [vmem:[%s22494_s16 + $0xd94] ss:$72 sps:$4 sm:$0xff]   ;;  %v19691_v1 = vld [vmem:[%s22494_s16 + $0x490] ss:$72 sps:$4 sm:$0xff]  }
 0x1f2   : > { %6036 = vmatprep.subr.bf16.mxu1 %v19612_v2  ;;  %v19694_v2 = vld [vmem:[%s22494_s16 + $0xd90] ss:$72 sps:$4 sm:$0xff]  }
 0x1f4   : > { %5996 = vmatpush1.bf16.msra.mxu0 %v19607_v3  ;;  %v19699_v3 = vld [vmem:[%s22494_s16 + $0x524] ss:$72 sps:$4 sm:$0xff]  }
 0x1f5   : > { %6037 = vmatpush1.bf16.msra.mxu1 %v19610_v4  ;;  %5997 = vmatprep.subr.bf16.mxu0 %v19615_v5  ;;  %v19702_v4 = vld [vmem:[%s22494_s16 + $0xe24] ss:$72 sps:$4 sm:$0xff]   ;;  %v19697_v5 = vld [vmem:[%s22494_s16 + $0x520] ss:$72 sps:$4 sm:$0xff]  }
 0x1f6   : > { %6038 = vmatprep.subr.bf16.mxu1 %v19618_v6  ;;  %v19700_v6 = vld [vmem:[%s22494_s16 + $0xe20] ss:$72 sps:$4 sm:$0xff]  }
 0x1f8   : > { %5998 = vmatpush1.bf16.msra.mxu0 %v19613_v7  ;;  %v19705_v7 = vld [vmem:[%s22494_s16 + $0x5b4] ss:$72 sps:$4 sm:$0xff]  }
 0x1f9   : > { %6039 = vmatpush1.bf16.msra.mxu1 %v19616_v8  ;;  %5999 = vmatprep.subr.bf16.mxu0 %v19621_v9  ;;  %v19708_v8 = vld [vmem:[%s22494_s16 + $0xeb4] ss:$72 sps:$4 sm:$0xff]   ;;  %v19703_v9 = vld [vmem:[%s22494_s16 + $0x5b0] ss:$72 sps:$4 sm:$0xff]  }
 0x1fa   : > { %6040 = vmatprep.subr.bf16.mxu1 %v19624_v10  ;;  %v19706_v10 = vld [vmem:[%s22494_s16 + $0xeb0] ss:$72 sps:$4 sm:$0xff]  }
 0x1fc   : > { %6000 = vmatpush1.bf16.msra.mxu0 %v19619_v11  ;;  %v19711_v11 = vld [vmem:[%s22494_s16 + $0x644] ss:$72 sps:$4 sm:$0xff]  }
 0x1fd   : > { %6041 = vmatpush1.bf16.msra.mxu1 %v19622_v12  ;;  %6001 = vmatprep.subr.bf16.mxu0 %v19627_v13  ;;  %v19714_v12 = vld [vmem:[%s22494_s16 + $0xf44] ss:$72 sps:$4 sm:$0xff]   ;;  %v19709_v13 = vld [vmem:[%s22494_s16 + $0x640] ss:$72 sps:$4 sm:$0xff]  }
 0x1fe   : > { %6042 = vmatprep.subr.bf16.mxu1 %v19630_v16  ;;  %v19712_v16 = vld [vmem:[%s22494_s16 + $0xf40] ss:$72 sps:$4 sm:$0xff]  }
 0x200   : > { %6002 = vmatpush1.bf16.msra.mxu0 %v19625_v17  ;;  %v19717_v17 = vld [vmem:[%s22494_s16 + $0x6d4] ss:$72 sps:$4 sm:$0xff]  }
 0x201   : > { %6043 = vmatpush1.bf16.msra.mxu1 %v19628_v18  ;;  %6003 = vmatprep.subr.bf16.mxu0 %v19633_v19  ;;  %v19720_v18 = vld [vmem:[%s22494_s16 + $0xfd4] ss:$72 sps:$4 sm:$0xff]   ;;  %v19715_v19 = vld [vmem:[%s22494_s16 + $0x6d0] ss:$72 sps:$4 sm:$0xff]  }
 0x202   : > { %6044 = vmatprep.subr.bf16.mxu1 %v19636_v20  ;;  %v19718_v20 = vld [vmem:[%s22494_s16 + $0xfd0] ss:$72 sps:$4 sm:$0xff]  }
 0x204   : > { %6004 = vmatpush1.bf16.msra.mxu0 %v19631_v21  ;;  %v19723_v21 = vld [vmem:[%s22494_s16 + $0x764] ss:$72 sps:$4 sm:$0xff]  }
 0x205   : > { %6045 = vmatpush1.bf16.msra.mxu1 %v19634_v22  ;;  %6005 = vmatprep.subr.bf16.mxu0 %v19639_v24  ;;  %v19726_v22 = vld [vmem:[%s22494_s16 + $0x1064] ss:$72 sps:$4 sm:$0xff]   ;;  %v19721_v24 = vld [vmem:[%s22494_s16 + $0x760] ss:$72 sps:$4 sm:$0xff]  }
 0x206   : > { %6046 = vmatprep.subr.bf16.mxu1 %v19642_v25  ;;  %v19724_v25 = vld [vmem:[%s22494_s16 + $0x1060] ss:$72 sps:$4 sm:$0xff]  }
 0x208   : > { %6006 = vmatpush1.bf16.msra.mxu0 %v19637_v26  ;;  %v19729_v26 = vld [vmem:[%s22494_s16 + $0x7f4] ss:$72 sps:$4 sm:$0xff]  }
 0x209   : > { %6047 = vmatpush1.bf16.msra.mxu1 %v19640_v27  ;;  %6057 = vmatprep.subr.bf16.mxu0 %v19645_v28  ;;  %v19732_v27 = vld [vmem:[%s22494_s16 + $0x10f4] ss:$72 sps:$4 sm:$0xff]   ;;  %v19727_v28 = vld [vmem:[%s22494_s16 + $0x7f0] ss:$72 sps:$4 sm:$0xff]  }
 0x20a   : > { %6098 = vmatprep.subr.bf16.mxu1 %v19648_v29  ;;  %v19730_v29 = vld [vmem:[%s22494_s16 + $0x10f0] ss:$72 sps:$4 sm:$0xff]  }
 0x20b   : > { %6008 = vmatmul.mubr.bf16.vlgmr.msra.gmra.mrb[8].mxu0 %v22604_v15 }
 0x20c   : > { %6049 = vmatmul.mubr.bf16.vlgmr.msra.gmra.mrb[8].mxu1 %v22676_v23  ;;  %6058 = vmatpush1.bf16.msra.mxu0 %v19643_v30  ;;  %v19735_v30 = vld [vmem:[%s22494_s16 + $0x884] ss:$72 sps:$4 sm:$0xff]  }
 0x20d   : > { %6099 = vmatpush1.bf16.msra.mxu1 %v19646_v31  ;;  %6059 = vmatprep.subr.bf16.mxu0 %v19651_v32  ;;  %v19738_v31 = vld [vmem:[%s22494_s16 + $0x1184] ss:$72 sps:$4 sm:$0xff]   ;;  %v19733_v32 = vld [vmem:[%s22494_s16 + $0x880] ss:$72 sps:$4 sm:$0xff]  }
 0x20e   : > { %6100 = vmatprep.subr.bf16.mxu1 %v19654_v33  ;;  %6089 = vmatprep.mubr.bf16.mxu0 %v22578_v55  ;;  %v19736_v33 = vld [vmem:[%s22494_s16 + $0x1180] ss:$72 sps:$4 sm:$0xff]  }
 0x20f   : > { %6130 = vmatprep.mubr.bf16.mxu1 %v22581_v58 }
 0x210   : > { %6060 = vmatpush1.bf16.msra.mxu0 %v19649_v34  ;;  %v19741_v34 = vld [vmem:[%s22494_s16 + $0x1214] ss:$72 sps:$4 sm:$0xff]  }
 0x211   : > { %6101 = vmatpush1.bf16.msra.mxu1 %v19652_v35  ;;  %6061 = vmatprep.subr.bf16.mxu0 %v19657_v36  ;;  %v19744_v35 = vld [vmem:[%s22494_s16 + $0x1c] ss:$72 sps:$4 sm:$0xff]   ;;  %v19739_v36 = vld [vmem:[%s22494_s16 + $0x1210] ss:$72 sps:$4 sm:$0xff]  }
 0x212   : > { %6102 = vmatprep.subr.bf16.mxu1 %v19660_v37  ;;  %v19742_v37 = vld [vmem:[%s22494_s16 + $0x18] ss:$72 sps:$4 sm:$0xff]  }
 0x214   : > { %6062 = vmatpush1.bf16.msra.mxu0 %v19655_v38  ;;  %v19747_v38 = vld [vmem:[%s22494_s16 + $0x12a4] ss:$72 sps:$4 sm:$0xff]  }
 0x215   : > { %6103 = vmatpush1.bf16.msra.mxu1 %v19658_v39  ;;  %6063 = vmatprep.subr.bf16.mxu0 %v19663_v40  ;;  %v19750_v39 = vld [vmem:[%s22494_s16 + $0xac] ss:$72 sps:$4 sm:$0xff]   ;;  %v19745_v40 = vld [vmem:[%s22494_s16 + $0x12a0] ss:$72 sps:$4 sm:$0xff]  }
 0x216   : > { %6104 = vmatprep.subr.bf16.mxu1 %v19666_v42  ;;  %v19748_v42 = vld [vmem:[%s22494_s16 + $0xa8] ss:$72 sps:$4 sm:$0xff]  }
 0x218   : > { %6064 = vmatpush1.bf16.msra.mxu0 %v19661_v43  ;;  %v19753_v43 = vld [vmem:[%s22494_s16 + $0x1334] ss:$72 sps:$4 sm:$0xff]  }
 0x219   : > { %6105 = vmatpush1.bf16.msra.mxu1 %v19664_v44  ;;  %6065 = vmatprep.subr.bf16.mxu0 %v19669_v45  ;;  %v19756_v44 = vld [vmem:[%s22494_s16 + $0x13c] ss:$72 sps:$4 sm:$0xff]   ;;  %v19751_v45 = vld [vmem:[%s22494_s16 + $0x1330] ss:$72 sps:$4 sm:$0xff]  }
 0x21a   : > { %6106 = vmatprep.subr.bf16.mxu1 %v19672_v46  ;;  %v19754_v46 = vld [vmem:[%s22494_s16 + $0x138] ss:$72 sps:$4 sm:$0xff]  }
 0x21c   : > { %6066 = vmatpush1.bf16.msra.mxu0 %v19667_v47  ;;  %v19759_v47 = vld [vmem:[%s22494_s16 + $0x13c4] ss:$72 sps:$4 sm:$0xff]  }
 0x21d   : > { %6107 = vmatpush1.bf16.msra.mxu1 %v19670_v48  ;;  %6067 = vmatprep.subr.bf16.mxu0 %v19675_v49  ;;  %v19762_v48 = vld [vmem:[%s22494_s16 + $0x1cc] ss:$72 sps:$4 sm:$0xff]   ;;  %v19757_v49 = vld [vmem:[%s22494_s16 + $0x13c0] ss:$72 sps:$4 sm:$0xff]  }
 0x21e   : > { %6108 = vmatprep.subr.bf16.mxu1 %v19678_v50  ;;  %v19760_v50 = vld [vmem:[%s22494_s16 + $0x1c8] ss:$72 sps:$4 sm:$0xff]  }
 0x220   : > { %6068 = vmatpush1.bf16.msra.mxu0 %v19673_v51  ;;  %v19765_v51 = vld [vmem:[%s22494_s16 + $0x1454] ss:$72 sps:$4 sm:$0xff]  }
 0x221   : > { %6109 = vmatpush1.bf16.msra.mxu1 %v19676_v52  ;;  %6069 = vmatprep.subr.bf16.mxu0 %v19681_v53  ;;  %v19768_v52 = vld [vmem:[%s22494_s16 + $0x25c] ss:$72 sps:$4 sm:$0xff]   ;;  %v19763_v53 = vld [vmem:[%s22494_s16 + $0x1450] ss:$72 sps:$4 sm:$0xff]  }
 0x222   : > { %6110 = vmatprep.subr.bf16.mxu1 %v19684_v54  ;;  %v19766_v54 = vld [vmem:[%s22494_s16 + $0x258] ss:$72 sps:$4 sm:$0xff]  }
 0x224   : > { %6070 = vmatpush1.bf16.msra.mxu0 %v19679_v56  ;;  %v19771_v56 = vld [vmem:[%s22494_s16 + $0x14e4] ss:$72 sps:$4 sm:$0xff]  }
 0x225   : > { %6111 = vmatpush1.bf16.msra.mxu1 %v19682_v57  ;;  %6071 = vmatprep.subr.bf16.mxu0 %v19687_v59  ;;  %v19774_v57 = vld [vmem:[%s22494_s16 + $0x2ec] ss:$72 sps:$4 sm:$0xff]   ;;  %v19769_v59 = vld [vmem:[%s22494_s16 + $0x14e0] ss:$72 sps:$4 sm:$0xff]  }
 0x226   : > { %6112 = vmatprep.subr.bf16.mxu1 %v19690_v60  ;;  %v19772_v60 = vld [vmem:[%s22494_s16 + $0x2e8] ss:$72 sps:$4 sm:$0xff]  }
 0x228   : > { %6072 = vmatpush1.bf16.msra.mxu0 %v19685_v61  ;;  %v19777_v61 = vld [vmem:[%s22494_s16 + $0x1574] ss:$72 sps:$4 sm:$0xff]  }
 0x229   : > { %6113 = vmatpush1.bf16.msra.mxu1 %v19688_v62  ;;  %6073 = vmatprep.subr.bf16.mxu0 %v19693_v63  ;;  %v19780_v62 = vld [vmem:[%s22494_s16 + $0x37c] ss:$72 sps:$4 sm:$0xff]  }
 0x22a   : > { %6114 = vmatprep.subr.bf16.mxu1 %v19696_v0 }
 0x22c   : > { %6074 = vmatpush1.bf16.msra.mxu0 %v19691_v1  ;;  %v19775_v1 = vld [vmem:[%s22494_s16 + $0x1570] ss:$72 sps:$4 sm:$0xff]  }
 0x22d   : > { %6115 = vmatpush1.bf16.msra.mxu1 %v19694_v2  ;;  %6075 = vmatprep.subr.bf16.mxu0 %v19699_v3  ;;  %v19778_v2 = vld [vmem:[%s22494_s16 + $0x378] ss:$72 sps:$4 sm:$0xff]  }
 0x22e   : > { %6116 = vmatprep.subr.bf16.mxu1 %v19702_v4 }
 0x230   : > { %6076 = vmatpush1.bf16.msra.mxu0 %v19697_v5 }
 0x231   : > { %6117 = vmatpush1.bf16.msra.mxu1 %v19700_v6  ;;  %6077 = vmatprep.subr.bf16.mxu0 %v19705_v7  ;;  %v19783_v6 = vld [vmem:[%s22494_s16 + $0x1604] ss:$72 sps:$4 sm:$0xff]  }
 0x232   : > { %6118 = vmatprep.subr.bf16.mxu1 %v19708_v8 }
 0x234   : > { %6078 = vmatpush1.bf16.msra.mxu0 %v19703_v9 }
 0x235   : > { %6119 = vmatpush1.bf16.msra.mxu1 %v19706_v10  ;;  %6079 = vmatprep.subr.bf16.mxu0 %v19711_v11  ;;  %v19786_v11 = vld [vmem:[%s22494_s16 + $0x40c] ss:$72 sps:$4 sm:$0xff]  }
 0x236   : > { %6120 = vmatprep.subr.bf16.mxu1 %v19714_v12 }
 0x238   : > { %6080 = vmatpush1.bf16.msra.mxu0 %v19709_v13  ;;  %v19781_v13 = vld [vmem:[%s22494_s16 + $0x1600] ss:$72 sps:$4 sm:$0xff]  }
 0x239   : > { %6121 = vmatpush1.bf16.msra.mxu1 %v19712_v16  ;;  %6081 = vmatprep.subr.bf16.mxu0 %v19717_v17  ;;  %v19784_v16 = vld [vmem:[%s22494_s16 + $0x408] ss:$72 sps:$4 sm:$0xff]   ;;  %v19789_v17 = vld [vmem:[%s22494_s16 + $0x1694] ss:$72 sps:$4 sm:$0xff]  }
 0x23a   : > { %6122 = vmatprep.subr.bf16.mxu1 %v19720_v18  ;;  %v19792_v18 = vld [vmem:[%s22494_s16 + $0x49c] ss:$72 sps:$4 sm:$0xff]  }
 0x23c   : > { %6082 = vmatpush1.bf16.msra.mxu0 %v19715_v19  ;;  %v19787_v19 = vld [vmem:[%s22494_s16 + $0x1690] ss:$72 sps:$4 sm:$0xff]  }
 0x23d   : > { %6123 = vmatpush1.bf16.msra.mxu1 %v19718_v20  ;;  %6083 = vmatprep.subr.bf16.mxu0 %v19723_v21  ;;  %v19790_v20 = vld [vmem:[%s22494_s16 + $0x498] ss:$72 sps:$4 sm:$0xff]   ;;  %v19795_v21 = vld [vmem:[%s22494_s16 + $0x1724] ss:$72 sps:$4 sm:$0xff]  }
 0x23e   : > { %6124 = vmatprep.subr.bf16.mxu1 %v19726_v22  ;;  %v19798_v22 = vld [vmem:[%s22494_s16 + $0x52c] ss:$72 sps:$4 sm:$0xff]  }
 0x240   : > { %6084 = vmatpush1.bf16.msra.mxu0 %v19721_v24  ;;  %v19793_v24 = vld [vmem:[%s22494_s16 + $0x1720] ss:$72 sps:$4 sm:$0xff]  }
 0x241   : > { %6125 = vmatpush1.bf16.msra.mxu1 %v19724_v25  ;;  %6085 = vmatprep.subr.bf16.mxu0 %v19729_v26  ;;  %v19796_v25 = vld [vmem:[%s22494_s16 + $0x528] ss:$72 sps:$4 sm:$0xff]   ;;  %v19801_v26 = vld [vmem:[%s22494_s16 + $0x17b4] ss:$72 sps:$4 sm:$0xff]  }
 0x242   : > { %6126 = vmatprep.subr.bf16.mxu1 %v19732_v27  ;;  %v19804_v27 = vld [vmem:[%s22494_s16 + $0x5bc] ss:$72 sps:$4 sm:$0xff]  }
 0x244   : > { %6086 = vmatpush1.bf16.msra.mxu0 %v19727_v28  ;;  %v19799_v28 = vld [vmem:[%s22494_s16 + $0x17b0] ss:$72 sps:$4 sm:$0xff]  }
 0x245   : > { %6127 = vmatpush1.bf16.msra.mxu1 %v19730_v29  ;;  %6087 = vmatprep.subr.bf16.mxu0 %v19735_v30  ;;  %v19802_v29 = vld [vmem:[%s22494_s16 + $0x5b8] ss:$72 sps:$4 sm:$0xff]   ;;  %v19807_v30 = vld [vmem:[%s22494_s16 + $0x1844] ss:$72 sps:$4 sm:$0xff]  }
 0x246   : > { %6128 = vmatprep.subr.bf16.mxu1 %v19738_v31  ;;  %v19810_v31 = vld [vmem:[%s22494_s16 + $0x64c] ss:$72 sps:$4 sm:$0xff]  }
 0x248   : > { %6088 = vmatpush1.bf16.msra.mxu0 %v19733_v32  ;;  %v19805_v32 = vld [vmem:[%s22494_s16 + $0x1840] ss:$72 sps:$4 sm:$0xff]  }
 0x249   : > { %6129 = vmatpush1.bf16.msra.mxu1 %v19736_v33  ;;  %6139 = vmatprep.subr.bf16.mxu0 %v19741_v34  ;;  %v19808_v33 = vld [vmem:[%s22494_s16 + $0x648] ss:$72 sps:$4 sm:$0xff]   ;;  %v19813_v34 = vld [vmem:[%s22494_s16 + $0x18d4] ss:$72 sps:$4 sm:$0xff]  }
 0x24a   : > { %6180 = vmatprep.subr.bf16.mxu1 %v19744_v35  ;;  %v19816_v35 = vld [vmem:[%s22494_s16 + $0x6dc] ss:$72 sps:$4 sm:$0xff]  }
 0x24b   : > { %6090 = vmatmul.mubr.bf16.vlgmr.msra.gmra.mrb[12].mxu0 %v22602_v14 }
 0x24c   : > { %6131 = vmatmul.mubr.bf16.vlgmr.msra.gmra.mrb[12].mxu1 %v22604_v15  ;;  %6140 = vmatpush1.bf16.msra.mxu0 %v19739_v36  ;;  %v19811_v36 = vld [vmem:[%s22494_s16 + $0x18d0] ss:$72 sps:$4 sm:$0xff]  }
 0x24d   : > { %6181 = vmatpush1.bf16.msra.mxu1 %v19742_v37  ;;  %6141 = vmatprep.subr.bf16.mxu0 %v19747_v38  ;;  %v19814_v37 = vld [vmem:[%s22494_s16 + $0x6d8] ss:$72 sps:$4 sm:$0xff]   ;;  %v19819_v38 = vld [vmem:[%s22494_s16 + $0x1964] ss:$72 sps:$4 sm:$0xff]  }
 0x24e   : > { %6182 = vmatprep.subr.bf16.mxu1 %v19750_v39  ;;  %6171 = vmatprep.mubr.bf16.mxu0 %v22633_v41  ;;  %v19822_v39 = vld [vmem:[%s22494_s16 + $0x76c] ss:$72 sps:$4 sm:$0xff]  }
 0x24f   : > { %6212 = vmatprep.mubr.bf16.mxu1 %v22578_v55 }
 0x250   : > { %6142 = vmatpush1.bf16.msra.mxu0 %v19745_v40  ;;  %v19817_v40 = vld [vmem:[%s22494_s16 + $0x1960] ss:$72 sps:$4 sm:$0xff]  }
 0x251   : > { %6183 = vmatpush1.bf16.msra.mxu1 %v19748_v42  ;;  %6143 = vmatprep.subr.bf16.mxu0 %v19753_v43  ;;  %v19820_v42 = vld [vmem:[%s22494_s16 + $0x768] ss:$72 sps:$4 sm:$0xff]   ;;  %v19825_v43 = vld [vmem:[%s22494_s16 + $0x19f4] ss:$72 sps:$4 sm:$0xff]  }
 0x252   : > { %6184 = vmatprep.subr.bf16.mxu1 %v19756_v44  ;;  %v19828_v44 = vld [vmem:[%s22494_s16 + $0x7fc] ss:$72 sps:$4 sm:$0xff]  }
 0x254   : > { %6144 = vmatpush1.bf16.msra.mxu0 %v19751_v45  ;;  %v19823_v45 = vld [vmem:[%s22494_s16 + $0x19f0] ss:$72 sps:$4 sm:$0xff]  }
 0x255   : > { %6185 = vmatpush1.bf16.msra.mxu1 %v19754_v46  ;;  %6145 = vmatprep.subr.bf16.mxu0 %v19759_v47  ;;  %v19826_v46 = vld [vmem:[%s22494_s16 + $0x7f8] ss:$72 sps:$4 sm:$0xff]   ;;  %v19831_v47 = vld [vmem:[%s22494_s16 + $0x1a84] ss:$72 sps:$4 sm:$0xff]  }
 0x256   : > { %6186 = vmatprep.subr.bf16.mxu1 %v19762_v48  ;;  %v19834_v48 = vld [vmem:[%s22494_s16 + $0x88c] ss:$72 sps:$4 sm:$0xff]  }
 0x258   : > { %6146 = vmatpush1.bf16.msra.mxu0 %v19757_v49  ;;  %v19829_v49 = vld [vmem:[%s22494_s16 + $0x1a80] ss:$72 sps:$4 sm:$0xff]  }
 0x259   : > { %6187 = vmatpush1.bf16.msra.mxu1 %v19760_v50  ;;  %6147 = vmatprep.subr.bf16.mxu0 %v19765_v51  ;;  %v19832_v50 = vld [vmem:[%s22494_s16 + $0x888] ss:$72 sps:$4 sm:$0xff]   ;;  %v19837_v51 = vld [vmem:[%s22494_s16 + $0x91c] ss:$72 sps:$4 sm:$0xff]  }
 0x25a   : > { %6188 = vmatprep.subr.bf16.mxu1 %v19768_v52  ;;  %v19840_v52 = vld [vmem:[%s22494_s16 + $0x121c] ss:$72 sps:$4 sm:$0xff]  }
 0x25c   : > { %6148 = vmatpush1.bf16.msra.mxu0 %v19763_v53  ;;  %v19835_v53 = vld [vmem:[%s22494_s16 + $0x918] ss:$72 sps:$4 sm:$0xff]  }
 0x25d   : > { %6189 = vmatpush1.bf16.msra.mxu1 %v19766_v54  ;;  %6149 = vmatprep.subr.bf16.mxu0 %v19771_v56  ;;  %v19838_v54 = vld [vmem:[%s22494_s16 + $0x1218] ss:$72 sps:$4 sm:$0xff]   ;;  %v19843_v56 = vld [vmem:[%s22494_s16 + $0x9ac] ss:$72 sps:$4 sm:$0xff]  }
 0x25e   : > { %6190 = vmatprep.subr.bf16.mxu1 %v19774_v57  ;;  %v5845_v63 = vpop.f32.mrb[0].mxu0  ;;  %v19846_v57 = vld [vmem:[%s22494_s16 + $0x12ac] ss:$72 sps:$4 sm:$0xff]  }
 0x25f   : > { %v5886_v0 = vpop.f32.mrb[0].mxu1  ;;  %v5847_v4 = vpop.f32.mrb[1].mxu0 }
 0x260   : > { %v22844_v3 = vadd.f32 %v5886_v0, %v5845_v63  ;;  %v5888_v5 = vpop.f32.mrb[1].mxu1  ;;  %6150 = vmatpush1.bf16.msra.mxu0 %v19769_v59  ;;  %v5849_v9 = vpop.f32.mrb[2].mxu0  ;;  %v19841_v59 = vld [vmem:[%s22494_s16 + $0x9a8] ss:$72 sps:$4 sm:$0xff]   ;;  %v19847_v63 = vld [vmem:[%s22494_s16 + $0xa38] ss:$72 sps:$4 sm:$0xff]  }
 0x261   : > { %v22847_v7 = vadd.f32 %v5888_v5, %v5847_v4  ;;  %v5890_v8 = vpop.f32.mrb[2].mxu1  ;;  %6191 = vmatpush1.bf16.msra.mxu1 %v19772_v60  ;;  %6151 = vmatprep.subr.bf16.mxu0 %v19777_v61  ;;  %v5850_v12 = vpop.f32.mrb[3].mxu0  ;;  %v19844_v60 = vld [vmem:[%s22494_s16 + $0x12a8] ss:$72 sps:$4 sm:$0xff]   ;;  %v19849_v61 = vld [vmem:[%s22494_s16 + $0xa3c] ss:$72 sps:$4 sm:$0xff]  }
 0x262   : > { %v5891_v10 = vpop.f32.mrb[3].mxu1  ;;  %6192 = vmatprep.subr.bf16.mxu1 %v19780_v62  ;;  %v19852_v62 = vld [vmem:[%s22494_s16 + $0x133c] ss:$72 sps:$4 sm:$0xff]   ;;  %v19850_v0 = vld [vmem:[%s22494_s16 + $0x1338] ss:$72 sps:$4 sm:$0xff]  }
 0x263   : > { %v19853_v4 = vld [vmem:[%s22494_s16 + $0xac8] ss:$72 sps:$4 sm:$0xff]   ;;  %v19864_v8 = vld [vmem:[%s22494_s16 + $0x145c] ss:$72 sps:$4 sm:$0xff]   ;;  %v19859_v9 = vld [vmem:[%s22494_s16 + $0xb58] ss:$72 sps:$4 sm:$0xff]  }
 0x264   : > { %6152 = vmatpush1.bf16.msra.mxu0 %v19775_v1  ;;  %v19855_v1 = vld [vmem:[%s22494_s16 + $0xacc] ss:$72 sps:$4 sm:$0xff]   ;;  %v19856_v5 = vld [vmem:[%s22494_s16 + $0x13c8] ss:$72 sps:$4 sm:$0xff]   ;;  %v19862_v10 = vld [vmem:[%s22494_s16 + $0x1458] ss:$72 sps:$4 sm:$0xff]  }
 0x265   : > { %6193 = vmatpush1.bf16.msra.mxu1 %v19778_v2  ;;  %6153 = vmatprep.subr.bf16.mxu0 %v19783_v6  ;;  %v19858_v2 = vld [vmem:[%s22494_s16 + $0x13cc] ss:$72 sps:$4 sm:$0xff]   ;;  %v19861_v6 = vld [vmem:[%s22494_s16 + $0xb5c] ss:$72 sps:$4 sm:$0xff]  }
 0x266   : > { %6194 = vmatprep.subr.bf16.mxu1 %v19786_v11  ;;  %v19867_v11 = vld [vmem:[%s22494_s16 + $0xbec] ss:$72 sps:$4 sm:$0xff]  }
 0x267   : > { %v19870_v12 = vld [vmem:[%s22494_s16 + $0x14ec] ss:$72 sps:$4 sm:$0xff]  }
 0x268   : > { %6154 = vmatpush1.bf16.msra.mxu0 %v19781_v13  ;;  %v19865_v13 = vld [vmem:[%s22494_s16 + $0xbe8] ss:$72 sps:$4 sm:$0xff]  }
 0x269   : > { %6195 = vmatpush1.bf16.msra.mxu1 %v19784_v16  ;;  %6155 = vmatprep.subr.bf16.mxu0 %v19789_v17  ;;  %v19868_v16 = vld [vmem:[%s22494_s16 + $0x14e8] ss:$72 sps:$4 sm:$0xff]   ;;  %v19873_v17 = vld [vmem:[%s22494_s16 + $0xc7c] ss:$72 sps:$4 sm:$0xff]  }
 0x26a   : > { %6196 = vmatprep.subr.bf16.mxu1 %v19792_v18  ;;  %v19876_v18 = vld [vmem:[%s22494_s16 + $0x157c] ss:$72 sps:$4 sm:$0xff]  }
 0x26c   : > { %6156 = vmatpush1.bf16.msra.mxu0 %v19787_v19 }
 0x26d   : > { %6197 = vmatpush1.bf16.msra.mxu1 %v19790_v20  ;;  %6157 = vmatprep.subr.bf16.mxu0 %v19795_v21  ;;  %v19871_v21 = vld [vmem:[%s22494_s16 + $0xc78] ss:$72 sps:$4 sm:$0xff]  }
 0x26e   : > { %6198 = vmatprep.subr.bf16.mxu1 %v19798_v22  ;;  %v19874_v22 = vld [vmem:[%s22494_s16 + $0x1578] ss:$72 sps:$4 sm:$0xff]  }
 0x270   : > { %6158 = vmatpush1.bf16.msra.mxu0 %v19793_v24 }
 0x271   : > { %6199 = vmatpush1.bf16.msra.mxu1 %v19796_v25  ;;  %6159 = vmatprep.subr.bf16.mxu0 %v19801_v26 }
 0x272   : > { %6200 = vmatprep.subr.bf16.mxu1 %v19804_v27 }
 0x274   : > { %6160 = vmatpush1.bf16.msra.mxu0 %v19799_v28 }
 0x275   : > { %6201 = vmatpush1.bf16.msra.mxu1 %v19802_v29  ;;  %6161 = vmatprep.subr.bf16.mxu0 %v19807_v30 }
 0x276   : > { %6202 = vmatprep.subr.bf16.mxu1 %v19810_v31  ;;  %v19882_v31 = vld [vmem:[%s22494_s16 + $0x160c] ss:$72 sps:$4 sm:$0xff]  }
 0x278   : > { %6162 = vmatpush1.bf16.msra.mxu0 %v19805_v32 }
 0x279   : > { %6203 = vmatpush1.bf16.msra.mxu1 %v19808_v33  ;;  %6163 = vmatprep.subr.bf16.mxu0 %v19813_v34  ;;  %v19880_v33 = vld [vmem:[%s22494_s16 + $0x1608] ss:$72 sps:$4 sm:$0xff]   ;;  %v19885_v34 = vld [vmem:[%s22494_s16 + $0xd9c] ss:$72 sps:$4 sm:$0xff]  }
 0x27a   : > { %6204 = vmatprep.subr.bf16.mxu1 %v19816_v35  ;;  %v19888_v35 = vld [vmem:[%s22494_s16 + $0x169c] ss:$72 sps:$4 sm:$0xff]  }
 0x27c   : > { %6164 = vmatpush1.bf16.msra.mxu0 %v19811_v36  ;;  %v19883_v36 = vld [vmem:[%s22494_s16 + $0xd98] ss:$72 sps:$4 sm:$0xff]  }
 0x27d   : > { %6205 = vmatpush1.bf16.msra.mxu1 %v19814_v37  ;;  %6165 = vmatprep.subr.bf16.mxu0 %v19819_v38  ;;  %v19886_v37 = vld [vmem:[%s22494_s16 + $0x1698] ss:$72 sps:$4 sm:$0xff]   ;;  %v19891_v38 = vld [vmem:[%s22494_s16 + $0xe2c] ss:$72 sps:$4 sm:$0xff]  }
 0x27e   : > { %6206 = vmatprep.subr.bf16.mxu1 %v19822_v39  ;;  %v19894_v39 = vld [vmem:[%s22494_s16 + $0x172c] ss:$72 sps:$4 sm:$0xff]  }
 0x280   : > { %6166 = vmatpush1.bf16.msra.mxu0 %v19817_v40  ;;  %v19889_v40 = vld [vmem:[%s22494_s16 + $0xe28] ss:$72 sps:$4 sm:$0xff]  }
 0x281   : > { %6207 = vmatpush1.bf16.msra.mxu1 %v19820_v42  ;;  %6167 = vmatprep.subr.bf16.mxu0 %v19825_v43  ;;  %v19892_v42 = vld [vmem:[%s22494_s16 + $0x1728] ss:$72 sps:$4 sm:$0xff]   ;;  %v19897_v43 = vld [vmem:[%s22494_s16 + $0xebc] ss:$72 sps:$4 sm:$0xff]  }
 0x282   : > { %6208 = vmatprep.subr.bf16.mxu1 %v19828_v44  ;;  %v19900_v44 = vld [vmem:[%s22494_s16 + $0x17bc] ss:$72 sps:$4 sm:$0xff]  }
 0x284   : > { %6168 = vmatpush1.bf16.msra.mxu0 %v19823_v45  ;;  %v19895_v45 = vld [vmem:[%s22494_s16 + $0xeb8] ss:$72 sps:$4 sm:$0xff]  }
 0x285   : > { %6209 = vmatpush1.bf16.msra.mxu1 %v19826_v46  ;;  %6169 = vmatprep.subr.bf16.mxu0 %v19831_v47  ;;  %v19898_v46 = vld [vmem:[%s22494_s16 + $0x17b8] ss:$72 sps:$4 sm:$0xff]   ;;  %v19903_v47 = vld [vmem:[%s22494_s16 + $0xf4c] ss:$72 sps:$4 sm:$0xff]  }
 0x286   : > { %6210 = vmatprep.subr.bf16.mxu1 %v19834_v48  ;;  %v19906_v48 = vld [vmem:[%s22494_s16 + $0x184c] ss:$72 sps:$4 sm:$0xff]  }
 0x288   : > { %6170 = vmatpush1.bf16.msra.mxu0 %v19829_v49  ;;  %v19901_v49 = vld [vmem:[%s22494_s16 + $0xf48] ss:$72 sps:$4 sm:$0xff]  }
 0x289   : > { %6211 = vmatpush1.bf16.msra.mxu1 %v19832_v50  ;;  %6221 = vmatprep.subr.bf16.mxu0 %v19837_v51  ;;  %v19904_v50 = vld [vmem:[%s22494_s16 + $0x1848] ss:$72 sps:$4 sm:$0xff]   ;;  %v19909_v51 = vld [vmem:[%s22494_s16 + $0xfdc] ss:$72 sps:$4 sm:$0xff]  }
 0x28a   : > { %6262 = vmatprep.subr.bf16.mxu1 %v19840_v52  ;;  %v19912_v52 = vld [vmem:[%s22494_s16 + $0x18dc] ss:$72 sps:$4 sm:$0xff]  }
 0x28b   : > { %6172 = vmatmul.mubr.bf16.vlgmr.msra.gmra.mrb[16].mxu0 %v22676_v23 }
 0x28c   : > { %6213 = vmatmul.mubr.bf16.vlgmr.msra.gmra.mrb[16].mxu1 %v22602_v14  ;;  %6222 = vmatpush1.bf16.msra.mxu0 %v19835_v53  ;;  %v19907_v53 = vld [vmem:[%s22494_s16 + $0xfd8] ss:$72 sps:$4 sm:$0xff]  }
 0x28d   : > { %6263 = vmatpush1.bf16.msra.mxu1 %v19838_v54  ;;  %6223 = vmatprep.subr.bf16.mxu0 %v19843_v56  ;;  %v19910_v54 = vld [vmem:[%s22494_s16 + $0x18d8] ss:$72 sps:$4 sm:$0xff]   ;;  %v19915_v56 = vld [vmem:[%s22494_s16 + $0x106c] ss:$72 sps:$4 sm:$0xff]  }
 0x28e   : > { %6264 = vmatprep.subr.bf16.mxu1 %v19846_v57  ;;  %6253 = vmatprep.mubr.bf16.mxu0 %v22581_v58  ;;  %v19918_v57 = vld [vmem:[%s22494_s16 + $0x196c] ss:$72 sps:$4 sm:$0xff]  }
 0x28f   : > { %6294 = vmatprep.mubr.bf16.mxu1 %v22633_v41 }
 0x290   : > { %6224 = vmatpush1.bf16.msra.mxu0 %v19841_v59  ;;  %v19913_v59 = vld [vmem:[%s22494_s16 + $0x1068] ss:$72 sps:$4 sm:$0xff]  }
 0x291   : > { %6265 = vmatpush1.bf16.msra.mxu1 %v19844_v60  ;;  %6225 = vmatprep.subr.bf16.mxu0 %v19849_v61  ;;  %v19916_v60 = vld [vmem:[%s22494_s16 + $0x1968] ss:$72 sps:$4 sm:$0xff]   ;;  %v19921_v61 = vld [vmem:[%s22494_s16 + $0x10fc] ss:$72 sps:$4 sm:$0xff]  }
 0x292   : > { %6266 = vmatprep.subr.bf16.mxu1 %v19852_v62  ;;  %v19924_v62 = vld [vmem:[%s22494_s16 + $0x19fc] ss:$72 sps:$4 sm:$0xff]  }
 0x294   : > { %6226 = vmatpush1.bf16.msra.mxu0 %v19847_v63  ;;  %v19919_v63 = vld [vmem:[%s22494_s16 + $0x10f8] ss:$72 sps:$4 sm:$0xff]  }
 0x295   : > { %6267 = vmatpush1.bf16.msra.mxu1 %v19850_v0  ;;  %6227 = vmatprep.subr.bf16.mxu0 %v19855_v1  ;;  %v19922_v0 = vld [vmem:[%s22494_s16 + $0x19f8] ss:$72 sps:$4 sm:$0xff]   ;;  %v19927_v1 = vld [vmem:[%s22494_s16 + $0x118c] ss:$72 sps:$4 sm:$0xff]  }
 0x296   : > { %6268 = vmatprep.subr.bf16.mxu1 %v19858_v2  ;;  %v19930_v2 = vld [vmem:[%s22494_s16 + $0x1a8c] ss:$72 sps:$4 sm:$0xff]  }
 0x298   : > { %6228 = vmatpush1.bf16.msra.mxu0 %v19853_v4  ;;  %v19925_v4 = vld [vmem:[%s22494_s16 + $0x1188] ss:$72 sps:$4 sm:$0xff]  }
 0x299   : > { %6269 = vmatpush1.bf16.msra.mxu1 %v19856_v5  ;;  %6229 = vmatprep.subr.bf16.mxu0 %v19861_v6  ;;  %v19928_v5 = vld [vmem:[%s22494_s16 + $0x1a88] ss:$72 sps:$4 sm:$0xff]   ;;  %v19933_v6 = vld [vmem:[%s22494_s16 + $0x24] ss:$72 sps:$4 sm:$0xff]  }
 0x29a   : > { %6270 = vmatprep.subr.bf16.mxu1 %v19864_v8  ;;  %v19936_v8 = vld [vmem:[%s22494_s16 + $0x924] ss:$72 sps:$4 sm:$0xff]  }
 0x29c   : > { %6230 = vmatpush1.bf16.msra.mxu0 %v19859_v9  ;;  %v19931_v9 = vld [vmem:[%s22494_s16 + $0x20] ss:$72 sps:$4 sm:$0xff]  }
 0x29d   : > { %6271 = vmatpush1.bf16.msra.mxu1 %v19862_v10  ;;  %6231 = vmatprep.subr.bf16.mxu0 %v19867_v11  ;;  %v19934_v10 = vld [vmem:[%s22494_s16 + $0x920] ss:$72 sps:$4 sm:$0xff]   ;;  %v19939_v11 = vld [vmem:[%s22494_s16 + $0xb4] ss:$72 sps:$4 sm:$0xff]  }
 0x29e   : > { %6272 = vmatprep.subr.bf16.mxu1 %v19870_v12  ;;  %v5927_v19 = vpop.f32.mrb[4].mxu0  ;;  %v19942_v12 = vld [vmem:[%s22494_s16 + $0x9b4] ss:$72 sps:$4 sm:$0xff]  }
 0x29f   : > { %v22914_v20 = vpop.f32.mrb[4].mxu1  ;;  %v22919_v24 = vadd.f32 %v5927_v19, %v22844_v3  ;;  %v5929_v25 = vpop.f32.mrb[5].mxu0  ;;  %v19879_v3 = vld [vmem:[%s22494_s16 + $0xd0c] ss:$72 sps:$4 sm:$0xff]   ;;  %v19943_v19 = vld [vmem:[%s22494_s16 + $0x140] ss:$72 sps:$4 sm:$0xff]  }
 0x2a0   : > { %v22921_v26 = vpop.f32.mrb[5].mxu1  ;;  %v22924_v27 = vadd.f32 %v5929_v25, %v22847_v7  ;;  %6232 = vmatpush1.bf16.msra.mxu0 %v19865_v13  ;;  %v5931_v29 = vpop.f32.mrb[6].mxu0  ;;  %v19877_v7 = vld [vmem:[%s22494_s16 + $0xd08] ss:$72 sps:$4 sm:$0xff]   ;;  %v19954_v25 = vld [vmem:[%s22494_s16 + $0xad4] ss:$72 sps:$4 sm:$0xff]  }
 0x2a1   : > { %v5972_v28 = vpop.f32.mrb[6].mxu1  ;;  %6273 = vmatpush1.bf16.msra.mxu1 %v19868_v16  ;;  %6233 = vmatprep.subr.bf16.mxu0 %v19873_v17  ;;  %v5932_v32 = vpop.f32.mrb[7].mxu0  ;;  %v19937_v13 = vld [vmem:[%s22494_s16 + $0xb0] ss:$72 sps:$4 sm:$0xff]   ;;  %v19945_v17 = vld [vmem:[%s22494_s16 + $0x144] ss:$72 sps:$4 sm:$0xff]  }
 0x2a2   : > { %v5973_v30 = vpop.f32.mrb[7].mxu1  ;;  %6274 = vmatprep.subr.bf16.mxu1 %v19876_v18  ;;  %v19940_v16 = vld [vmem:[%s22494_s16 + $0x9b0] ss:$72 sps:$4 sm:$0xff]   ;;  %v19948_v18 = vld [vmem:[%s22494_s16 + $0xa44] ss:$72 sps:$4 sm:$0xff]  }
 0x2a3   : > { %v19949_v28 = vld [vmem:[%s22494_s16 + $0x1d0] ss:$72 sps:$4 sm:$0xff]   ;;  %v19957_v30 = vld [vmem:[%s22494_s16 + $0x264] ss:$72 sps:$4 sm:$0xff]   ;;  %v19958_v32 = vld [vmem:[%s22494_s16 + $0xb60] ss:$72 sps:$4 sm:$0xff]  }
 0x2a4   : > { %6234 = vmatpush1.bf16.msra.mxu0 %v19871_v21  ;;  %v19946_v21 = vld [vmem:[%s22494_s16 + $0xa40] ss:$72 sps:$4 sm:$0xff]   ;;  %v19952_v29 = vld [vmem:[%s22494_s16 + $0xad0] ss:$72 sps:$4 sm:$0xff]  }
 0x2a5   : > { %6275 = vmatpush1.bf16.msra.mxu1 %v19874_v22  ;;  %6235 = vmatprep.subr.bf16.mxu0 %v19879_v3  ;;  %v19951_v22 = vld [vmem:[%s22494_s16 + $0x1d4] ss:$72 sps:$4 sm:$0xff]   ;;  %v19960_v3 = vld [vmem:[%s22494_s16 + $0xb64] ss:$72 sps:$4 sm:$0xff]  }
 0x2a6   : > { %6276 = vmatprep.subr.bf16.mxu1 %v19882_v31  ;;  %v19955_v31 = vld [vmem:[%s22494_s16 + $0x260] ss:$72 sps:$4 sm:$0xff]  }
 0x2a8   : > { %6236 = vmatpush1.bf16.msra.mxu0 %v19877_v7  ;;  %v19963_v7 = vld [vmem:[%s22494_s16 + $0x2f4] ss:$72 sps:$4 sm:$0xff]  }
 0x2a9   : > { %6277 = vmatpush1.bf16.msra.mxu1 %v19880_v33  ;;  %6237 = vmatprep.subr.bf16.mxu0 %v19885_v34  ;;  %v19966_v33 = vld [vmem:[%s22494_s16 + $0xbf4] ss:$72 sps:$4 sm:$0xff]   ;;  %v19961_v34 = vld [vmem:[%s22494_s16 + $0x2f0] ss:$72 sps:$4 sm:$0xff]  }
 0x2aa   : > { %6278 = vmatprep.subr.bf16.mxu1 %v19888_v35  ;;  %v19964_v35 = vld [vmem:[%s22494_s16 + $0xbf0] ss:$72 sps:$4 sm:$0xff]  }
 0x2ac   : > { %6238 = vmatpush1.bf16.msra.mxu0 %v19883_v36  ;;  %v19969_v36 = vld [vmem:[%s22494_s16 + $0x384] ss:$72 sps:$4 sm:$0xff]  }
 0x2ad   : > { %6279 = vmatpush1.bf16.msra.mxu1 %v19886_v37  ;;  %6239 = vmatprep.subr.bf16.mxu0 %v19891_v38  ;;  %v19972_v37 = vld [vmem:[%s22494_s16 + $0xc84] ss:$72 sps:$4 sm:$0xff]  }
 0x2ae   : > { %6280 = vmatprep.subr.bf16.mxu1 %v19894_v39 }
 0x2b0   : > { %6240 = vmatpush1.bf16.msra.mxu0 %v19889_v40  ;;  %v19967_v40 = vld [vmem:[%s22494_s16 + $0x380] ss:$72 sps:$4 sm:$0xff]  }
 0x2b1   : > { %6281 = vmatpush1.bf16.msra.mxu1 %v19892_v42  ;;  %6241 = vmatprep.subr.bf16.mxu0 %v19897_v43 }
 0x2b2   : > { %6282 = vmatprep.subr.bf16.mxu1 %v19900_v44 }
 0x2b4   : > { %6242 = vmatpush1.bf16.msra.mxu0 %v19895_v45  ;;  %v19970_v45 = vld [vmem:[%s22494_s16 + $0xc80] ss:$72 sps:$4 sm:$0xff]  }
 0x2b5   : > { %6283 = vmatpush1.bf16.msra.mxu1 %v19898_v46  ;;  %6243 = vmatprep.subr.bf16.mxu0 %v19903_v47 }
 0x2b6   : > { %6284 = vmatprep.subr.bf16.mxu1 %v19906_v48 }
 0x2b8   : > { %6244 = vmatpush1.bf16.msra.mxu0 %v19901_v49 }
 0x2b9   : > { %6285 = vmatpush1.bf16.msra.mxu1 %v19904_v50  ;;  %6245 = vmatprep.subr.bf16.mxu0 %v19909_v51  ;;  %v19978_v51 = vld [vmem:[%s22494_s16 + $0xd14] ss:$72 sps:$4 sm:$0xff]  }
 0x2ba   : > { %6286 = vmatprep.subr.bf16.mxu1 %v19912_v52 }
 0x2bc   : > { %6246 = vmatpush1.bf16.msra.mxu0 %v19907_v53 }
 0x2bd   : > { %6287 = vmatpush1.bf16.msra.mxu1 %v19910_v54  ;;  %6247 = vmatprep.subr.bf16.mxu0 %v19915_v56  ;;  %v19976_v54 = vld [vmem:[%s22494_s16 + $0xd10] ss:$72 sps:$4 sm:$0xff]   ;;  %v19981_v56 = vld [vmem:[%s22494_s16 + $0x4a4] ss:$72 sps:$4 sm:$0xff]  }
 0x2be   : > { %6288 = vmatprep.subr.bf16.mxu1 %v19918_v57  ;;  %v19984_v57 = vld [vmem:[%s22494_s16 + $0xda4] ss:$72 sps:$4 sm:$0xff]  }
 0x2c0   : > { %6248 = vmatpush1.bf16.msra.mxu0 %v19913_v59  ;;  %v19979_v59 = vld [vmem:[%s22494_s16 + $0x4a0] ss:$72 sps:$4 sm:$0xff]  }
 0x2c1   : > { %6289 = vmatpush1.bf16.msra.mxu1 %v19916_v60  ;;  %6249 = vmatprep.subr.bf16.mxu0 %v19921_v61  ;;  %v19982_v60 = vld [vmem:[%s22494_s16 + $0xda0] ss:$72 sps:$4 sm:$0xff]   ;;  %v19987_v61 = vld [vmem:[%s22494_s16 + $0x534] ss:$72 sps:$4 sm:$0xff]  }
 0x2c2   : > { %6290 = vmatprep.subr.bf16.mxu1 %v19924_v62  ;;  %v19990_v62 = vld [vmem:[%s22494_s16 + $0xe34] ss:$72 sps:$4 sm:$0xff]  }
 0x2c4   : > { %6250 = vmatpush1.bf16.msra.mxu0 %v19919_v63  ;;  %v19985_v63 = vld [vmem:[%s22494_s16 + $0x530] ss:$72 sps:$4 sm:$0xff]  }
 0x2c5   : > { %6291 = vmatpush1.bf16.msra.mxu1 %v19922_v0  ;;  %6251 = vmatprep.subr.bf16.mxu0 %v19927_v1  ;;  %v19988_v0 = vld [vmem:[%s22494_s16 + $0xe30] ss:$72 sps:$4 sm:$0xff]   ;;  %v19993_v1 = vld [vmem:[%s22494_s16 + $0x5c4] ss:$72 sps:$4 sm:$0xff]  }
 0x2c6   : > { %6292 = vmatprep.subr.bf16.mxu1 %v19930_v2  ;;  %v19996_v2 = vld [vmem:[%s22494_s16 + $0xec4] ss:$72 sps:$4 sm:$0xff]  }
 0x2c8   : > { %6252 = vmatpush1.bf16.msra.mxu0 %v19925_v4  ;;  %v19991_v4 = vld [vmem:[%s22494_s16 + $0x5c0] ss:$72 sps:$4 sm:$0xff]  }
 0x2c9   : > { %6293 = vmatpush1.bf16.msra.mxu1 %v19928_v5  ;;  %6303 = vmatprep.subr.bf16.mxu0 %v19933_v6  ;;  %v19994_v5 = vld [vmem:[%s22494_s16 + $0xec0] ss:$72 sps:$4 sm:$0xff]   ;;  %v19999_v6 = vld [vmem:[%s22494_s16 + $0x654] ss:$72 sps:$4 sm:$0xff]  }
 0x2ca   : > { %6344 = vmatprep.subr.bf16.mxu1 %v19936_v8  ;;  %v20002_v8 = vld [vmem:[%s22494_s16 + $0xf54] ss:$72 sps:$4 sm:$0xff]  }
 0x2cb   : > { %6254 = vmatmul.mubr.bf16.vlgmr.msra.gmra.mrb[20].mxu0 %v22604_v15 }
 0x2cc   : > { %6295 = vmatmul.mubr.bf16.vlgmr.msra.gmra.mrb[20].mxu1 %v22676_v23  ;;  %6304 = vmatpush1.bf16.msra.mxu0 %v19931_v9  ;;  %v19997_v9 = vld [vmem:[%s22494_s16 + $0x650] ss:$72 sps:$4 sm:$0xff]  }
 0x2cd   : > { %6345 = vmatpush1.bf16.msra.mxu1 %v19934_v10  ;;  %6305 = vmatprep.subr.bf16.mxu0 %v19939_v11  ;;  %v20000_v10 = vld [vmem:[%s22494_s16 + $0xf50] ss:$72 sps:$4 sm:$0xff]   ;;  %v20005_v11 = vld [vmem:[%s22494_s16 + $0x6e4] ss:$72 sps:$4 sm:$0xff]  }
 0x2ce   : > { %6346 = vmatprep.subr.bf16.mxu1 %v19942_v12  ;;  %6335 = vmatprep.mubr.bf16.mxu0 %v22578_v55  ;;  %v20008_v12 = vld [vmem:[%s22494_s16 + $0xfe4] ss:$72 sps:$4 sm:$0xff]  }
 0x2cf   : > { %6376 = vmatprep.mubr.bf16.mxu1 %v22581_v58 }
 0x2d0   : > { %6306 = vmatpush1.bf16.msra.mxu0 %v19937_v13  ;;  %v20003_v13 = vld [vmem:[%s22494_s16 + $0x6e0] ss:$72 sps:$4 sm:$0xff]  }
 0x2d1   : > { %6347 = vmatpush1.bf16.msra.mxu1 %v19940_v16  ;;  %6307 = vmatprep.subr.bf16.mxu0 %v19945_v17  ;;  %v20006_v16 = vld [vmem:[%s22494_s16 + $0xfe0] ss:$72 sps:$4 sm:$0xff]   ;;  %v20011_v17 = vld [vmem:[%s22494_s16 + $0x774] ss:$72 sps:$4 sm:$0xff]  }
 0x2d2   : > { %6348 = vmatprep.subr.bf16.mxu1 %v19948_v18  ;;  %v20014_v18 = vld [vmem:[%s22494_s16 + $0x1074] ss:$72 sps:$4 sm:$0xff]  }
 0x2d4   : > { %6308 = vmatpush1.bf16.msra.mxu0 %v19943_v19  ;;  %v20009_v19 = vld [vmem:[%s22494_s16 + $0x770] ss:$72 sps:$4 sm:$0xff]  }
 0x2d5   : > { %6349 = vmatpush1.bf16.msra.mxu1 %v19946_v21  ;;  %6309 = vmatprep.subr.bf16.mxu0 %v19951_v22  ;;  %v20012_v21 = vld [vmem:[%s22494_s16 + $0x1070] ss:$72 sps:$4 sm:$0xff]   ;;  %v20017_v22 = vld [vmem:[%s22494_s16 + $0x804] ss:$72 sps:$4 sm:$0xff]  }
 0x2d6   : > { %6350 = vmatprep.subr.bf16.mxu1 %v19954_v25  ;;  %v20020_v25 = vld [vmem:[%s22494_s16 + $0x1104] ss:$72 sps:$4 sm:$0xff]  }
 0x2d8   : > { %6310 = vmatpush1.bf16.msra.mxu0 %v19949_v28  ;;  %v20015_v28 = vld [vmem:[%s22494_s16 + $0x800] ss:$72 sps:$4 sm:$0xff]  }
 0x2d9   : > { %6351 = vmatpush1.bf16.msra.mxu1 %v19952_v29  ;;  %6311 = vmatprep.subr.bf16.mxu0 %v19957_v30  ;;  %v20018_v29 = vld [vmem:[%s22494_s16 + $0x1100] ss:$72 sps:$4 sm:$0xff]   ;;  %v20023_v30 = vld [vmem:[%s22494_s16 + $0x894] ss:$72 sps:$4 sm:$0xff]  }
 0x2da   : > { %6352 = vmatprep.subr.bf16.mxu1 %v19960_v3  ;;  %v20026_v3 = vld [vmem:[%s22494_s16 + $0x1194] ss:$72 sps:$4 sm:$0xff]  }
 0x2dc   : > { %6312 = vmatpush1.bf16.msra.mxu0 %v19955_v31  ;;  %v20021_v31 = vld [vmem:[%s22494_s16 + $0x890] ss:$72 sps:$4 sm:$0xff]  }
 0x2dd   : > { %6353 = vmatpush1.bf16.msra.mxu1 %v19958_v32  ;;  %6313 = vmatprep.subr.bf16.mxu0 %v19963_v7  ;;  %v20024_v32 = vld [vmem:[%s22494_s16 + $0x1190] ss:$72 sps:$4 sm:$0xff]   ;;  %v20029_v7 = vld [vmem:[%s22494_s16 + $0x1224] ss:$72 sps:$4 sm:$0xff]  }
 0x2de   : > { %6354 = vmatprep.subr.bf16.mxu1 %v19966_v33  ;;  %v6009_v38 = vpop.f32.mrb[8].mxu0  ;;  %v20032_v33 = vld [vmem:[%s22494_s16 + $0x2c] ss:$72 sps:$4 sm:$0xff]  }
 0x2df   : > { %v6050_v39 = vpop.f32.mrb[8].mxu1  ;;  %v6010_v42 = vadd.f32 %v6009_v38, %v22914_v20  ;;  %v6011_v43 = vpop.f32.mrb[9].mxu0  ;;  %v19975_v20 = vld [vmem:[%s22494_s16 + $0x414] ss:$72 sps:$4 sm:$0xff]   ;;  %v20033_v38 = vld [vmem:[%s22494_s16 + $0x12b0] ss:$72 sps:$4 sm:$0xff]  }
 0x2e0   : > { %v6052_v44 = vpop.f32.mrb[9].mxu1  ;;  %v6012_v46 = vadd.f32 %v6011_v43, %v22921_v26  ;;  %6314 = vmatpush1.bf16.msra.mxu0 %v19961_v34  ;;  %v6013_v48 = vpop.f32.mrb[10].mxu0  ;;  %v19973_v26 = vld [vmem:[%s22494_s16 + $0x410] ss:$72 sps:$4 sm:$0xff]   ;;  %v20027_v34 = vld [vmem:[%s22494_s16 + $0x1220] ss:$72 sps:$4 sm:$0xff]  }
 0x2e1   : > { %v6054_v47 = vpop.f32.mrb[10].mxu1  ;;  %6355 = vmatpush1.bf16.msra.mxu1 %v19964_v35  ;;  %v22996_v49 = vadd.f32 %v6050_v39, %v6010_v42  ;;  %6315 = vmatprep.subr.bf16.mxu0 %v19969_v36  ;;  %v6014_v52 = vpop.f32.mrb[11].mxu0  ;;  %v20030_v35 = vld [vmem:[%s22494_s16 + $0x28] ss:$72 sps:$4 sm:$0xff]   ;;  %v20035_v36 = vld [vmem:[%s22494_s16 + $0x12b4] ss:$72 sps:$4 sm:$0xff]  }
 0x2e2   : > { %v6055_v50 = vpop.f32.mrb[11].mxu1  ;;  %6356 = vmatprep.subr.bf16.mxu1 %v19972_v37  ;;  %v23000_v53 = vadd.f32 %v6052_v44, %v6012_v46  ;;  %v20038_v37 = vld [vmem:[%s22494_s16 + $0xbc] ss:$72 sps:$4 sm:$0xff]   ;;  %v20036_v39 = vld [vmem:[%s22494_s16 + $0xb8] ss:$72 sps:$4 sm:$0xff]  }
 0x2e3   : > { %v20044_v42 = vld [vmem:[%s22494_s16 + $0x14c] ss:$72 sps:$4 sm:$0xff]   ;;  %v20039_v43 = vld [vmem:[%s22494_s16 + $0x1340] ss:$72 sps:$4 sm:$0xff]   ;;  %v20050_v46 = vld [vmem:[%s22494_s16 + $0x1dc] ss:$72 sps:$4 sm:$0xff]  }
 0x2e4   : > { %6316 = vmatpush1.bf16.msra.mxu0 %v19967_v40  ;;  %v20041_v40 = vld [vmem:[%s22494_s16 + $0x1344] ss:$72 sps:$4 sm:$0xff]   ;;  %v20042_v44 = vld [vmem:[%s22494_s16 + $0x148] ss:$72 sps:$4 sm:$0xff]   ;;  %v20048_v48 = vld [vmem:[%s22494_s16 + $0x1d8] ss:$72 sps:$4 sm:$0xff]  }
 0x2e5   : > { %6357 = vmatpush1.bf16.msra.mxu1 %v19970_v45  ;;  %6317 = vmatprep.subr.bf16.mxu0 %v19975_v20  ;;  %v20047_v45 = vld [vmem:[%s22494_s16 + $0x13d4] ss:$72 sps:$4 sm:$0xff]   ;;  %v20045_v47 = vld [vmem:[%s22494_s16 + $0x13d0] ss:$72 sps:$4 sm:$0xff]   ;;  %v20053_v50 = vld [vmem:[%s22494_s16 + $0x1464] ss:$72 sps:$4 sm:$0xff]  }
 0x2e6   : > { %6358 = vmatprep.subr.bf16.mxu1 %v19978_v51  ;;  %v20056_v20 = vld [vmem:[%s22494_s16 + $0x26c] ss:$72 sps:$4 sm:$0xff]   ;;  %v20051_v51 = vld [vmem:[%s22494_s16 + $0x1460] ss:$72 sps:$4 sm:$0xff]  }
 0x2e7   : > { %v20054_v52 = vld [vmem:[%s22494_s16 + $0x268] ss:$72 sps:$4 sm:$0xff]  }
 0x2e8   : > { %6318 = vmatpush1.bf16.msra.mxu0 %v19973_v26  ;;  %v20059_v26 = vld [vmem:[%s22494_s16 + $0x14f4] ss:$72 sps:$4 sm:$0xff]  }
 0x2e9   : > { %6359 = vmatpush1.bf16.msra.mxu1 %v19976_v54  ;;  %6319 = vmatprep.subr.bf16.mxu0 %v19981_v56  ;;  %v20062_v54 = vld [vmem:[%s22494_s16 + $0x2fc] ss:$72 sps:$4 sm:$0xff]   ;;  %v20057_v56 = vld [vmem:[%s22494_s16 + $0x14f0] ss:$72 sps:$4 sm:$0xff]  }
 0x2ea   : > { %6360 = vmatprep.subr.bf16.mxu1 %v19984_v57  ;;  %v20060_v57 = vld [vmem:[%s22494_s16 + $0x2f8] ss:$72 sps:$4 sm:$0xff]  }
 0x2ec   : > { %6320 = vmatpush1.bf16.msra.mxu0 %v19979_v59  ;;  %v20065_v59 = vld [vmem:[%s22494_s16 + $0x1584] ss:$72 sps:$4 sm:$0xff]  }
 0x2ed   : > { %6361 = vmatpush1.bf16.msra.mxu1 %v19982_v60  ;;  %6321 = vmatprep.subr.bf16.mxu0 %v19987_v61  ;;  %v20068_v60 = vld [vmem:[%s22494_s16 + $0x38c] ss:$72 sps:$4 sm:$0xff]  }
 0x2ee   : > { %6362 = vmatprep.subr.bf16.mxu1 %v19990_v62 }
 0x2f0   : > { %6322 = vmatpush1.bf16.msra.mxu0 %v19985_v63  ;;  %v20063_v63 = vld [vmem:[%s22494_s16 + $0x1580] ss:$72 sps:$4 sm:$0xff]  }
 0x2f1   : > { %6363 = vmatpush1.bf16.msra.mxu1 %v19988_v0  ;;  %6323 = vmatprep.subr.bf16.mxu0 %v19993_v1  ;;  %v20066_v0 = vld [vmem:[%s22494_s16 + $0x388] ss:$72 sps:$4 sm:$0xff]  }
 0x2f2   : > { %6364 = vmatprep.subr.bf16.mxu1 %v19996_v2 }
 0x2f4   : > { %6324 = vmatpush1.bf16.msra.mxu0 %v19991_v4 }
 0x2f5   : > { %6365 = vmatpush1.bf16.msra.mxu1 %v19994_v5  ;;  %6325 = vmatprep.subr.bf16.mxu0 %v19999_v6 }
 0x2f6   : > { %6366 = vmatprep.subr.bf16.mxu1 %v20002_v8 }
 0x2f8   : > { %6326 = vmatpush1.bf16.msra.mxu0 %v19997_v9 }
 0x2f9   : > { %6367 = vmatpush1.bf16.msra.mxu1 %v20000_v10  ;;  %6327 = vmatprep.subr.bf16.mxu0 %v20005_v11  ;;  %v20071_v10 = vld [vmem:[%s22494_s16 + $0x1614] ss:$72 sps:$4 sm:$0xff]  }
 0x2fa   : > { %6368 = vmatprep.subr.bf16.mxu1 %v20008_v12  ;;  %v20074_v11 = vld [vmem:[%s22494_s16 + $0x41c] ss:$72 sps:$4 sm:$0xff]  }
 0x2fc   : > { %6328 = vmatpush1.bf16.msra.mxu0 %v20003_v13  ;;  %v20069_v13 = vld [vmem:[%s22494_s16 + $0x1610] ss:$72 sps:$4 sm:$0xff]  }
 0x2fd   : > { %6369 = vmatpush1.bf16.msra.mxu1 %v20006_v16  ;;  %6329 = vmatprep.subr.bf16.mxu0 %v20011_v17  ;;  %v20072_v16 = vld [vmem:[%s22494_s16 + $0x418] ss:$72 sps:$4 sm:$0xff]   ;;  %v20077_v17 = vld [vmem:[%s22494_s16 + $0x16a4] ss:$72 sps:$4 sm:$0xff]  }
 0x2fe   : > { %6370 = vmatprep.subr.bf16.mxu1 %v20014_v18  ;;  %v20080_v18 = vld [vmem:[%s22494_s16 + $0x4ac] ss:$72 sps:$4 sm:$0xff]  }
 0x300   : > { %6330 = vmatpush1.bf16.msra.mxu0 %v20009_v19  ;;  %v20075_v19 = vld [vmem:[%s22494_s16 + $0x16a0] ss:$72 sps:$4 sm:$0xff]  }
 0x301   : > { %6371 = vmatpush1.bf16.msra.mxu1 %v20012_v21  ;;  %6331 = vmatprep.subr.bf16.mxu0 %v20017_v22  ;;  %v20078_v21 = vld [vmem:[%s22494_s16 + $0x4a8] ss:$72 sps:$4 sm:$0xff]   ;;  %v20083_v22 = vld [vmem:[%s22494_s16 + $0x1734] ss:$72 sps:$4 sm:$0xff]  }
 0x302   : > { %6372 = vmatprep.subr.bf16.mxu1 %v20020_v25  ;;  %v20086_v25 = vld [vmem:[%s22494_s16 + $0x53c] ss:$72 sps:$4 sm:$0xff]  }
 0x304   : > { %6332 = vmatpush1.bf16.msra.mxu0 %v20015_v28  ;;  %v20081_v28 = vld [vmem:[%s22494_s16 + $0x1730] ss:$72 sps:$4 sm:$0xff]  }
 0x305   : > { %6373 = vmatpush1.bf16.msra.mxu1 %v20018_v29  ;;  %6333 = vmatprep.subr.bf16.mxu0 %v20023_v30  ;;  %v20084_v29 = vld [vmem:[%s22494_s16 + $0x538] ss:$72 sps:$4 sm:$0xff]   ;;  %v20089_v30 = vld [vmem:[%s22494_s16 + $0x17c4] ss:$72 sps:$4 sm:$0xff]  }
 0x306   : > { %6374 = vmatprep.subr.bf16.mxu1 %v20026_v3  ;;  %v20092_v3 = vld [vmem:[%s22494_s16 + $0x5cc] ss:$72 sps:$4 sm:$0xff]  }
 0x308   : > { %6334 = vmatpush1.bf16.msra.mxu0 %v20021_v31  ;;  %v20087_v31 = vld [vmem:[%s22494_s16 + $0x17c0] ss:$72 sps:$4 sm:$0xff]  }
 0x309   : > { %6375 = vmatpush1.bf16.msra.mxu1 %v20024_v32  ;;  %6385 = vmatprep.subr.bf16.mxu0 %v20029_v7  ;;  %v20090_v32 = vld [vmem:[%s22494_s16 + $0x5c8] ss:$72 sps:$4 sm:$0xff]   ;;  %v20095_v7 = vld [vmem:[%s22494_s16 + $0x1854] ss:$72 sps:$4 sm:$0xff]  }
 0x30a   : > { %6426 = vmatprep.subr.bf16.mxu1 %v20032_v33  ;;  %v20098_v33 = vld [vmem:[%s22494_s16 + $0x65c] ss:$72 sps:$4 sm:$0xff]  }
 0x30b   : > { %6336 = vmatmul.mubr.bf16.vlgmr.msra.gmra.mrb[24].mxu0 %v22602_v14 }
 0x30c   : > { %6377 = vmatmul.mubr.bf16.vlgmr.msra.gmra.mrb[24].mxu1 %v22604_v15  ;;  %6386 = vmatpush1.bf16.msra.mxu0 %v20027_v34  ;;  %v20093_v34 = vld [vmem:[%s22494_s16 + $0x1850] ss:$72 sps:$4 sm:$0xff]  }
 0x30d   : > { %6427 = vmatpush1.bf16.msra.mxu1 %v20030_v35  ;;  %6387 = vmatprep.subr.bf16.mxu0 %v20035_v36  ;;  %v20096_v35 = vld [vmem:[%s22494_s16 + $0x658] ss:$72 sps:$4 sm:$0xff]   ;;  %v20101_v36 = vld [vmem:[%s22494_s16 + $0x18e4] ss:$72 sps:$4 sm:$0xff]  }
 0x30e   : > { %6428 = vmatprep.subr.bf16.mxu1 %v20038_v37  ;;  %6417 = vmatprep.mubr.bf16.mxu0 %v22633_v41  ;;  %v20104_v37 = vld [vmem:[%s22494_s16 + $0x6ec] ss:$72 sps:$4 sm:$0xff]  }
 0x30f   : > { %6458 = vmatprep.mubr.bf16.mxu1 %v22578_v55 }
 0x310   : > { %6388 = vmatpush1.bf16.msra.mxu0 %v20033_v38  ;;  %v20099_v38 = vld [vmem:[%s22494_s16 + $0x18e0] ss:$72 sps:$4 sm:$0xff]  }
 0x311   : > { %6429 = vmatpush1.bf16.msra.mxu1 %v20036_v39  ;;  %6389 = vmatprep.subr.bf16.mxu0 %v20041_v40  ;;  %v20102_v39 = vld [vmem:[%s22494_s16 + $0x6e8] ss:$72 sps:$4 sm:$0xff]   ;;  %v20107_v40 = vld [vmem:[%s22494_s16 + $0x1974] ss:$72 sps:$4 sm:$0xff]  }
 0x312   : > { %6430 = vmatprep.subr.bf16.mxu1 %v20044_v42  ;;  %v20110_v42 = vld [vmem:[%s22494_s16 + $0x77c] ss:$72 sps:$4 sm:$0xff]  }
 0x314   : > { %6390 = vmatpush1.bf16.msra.mxu0 %v20039_v43  ;;  %v20105_v43 = vld [vmem:[%s22494_s16 + $0x1970] ss:$72 sps:$4 sm:$0xff]  }
 0x315   : > { %6431 = vmatpush1.bf16.msra.mxu1 %v20042_v44  ;;  %6391 = vmatprep.subr.bf16.mxu0 %v20047_v45  ;;  %v20108_v44 = vld [vmem:[%s22494_s16 + $0x778] ss:$72 sps:$4 sm:$0xff]   ;;  %v20113_v45 = vld [vmem:[%s22494_s16 + $0x1a04] ss:$72 sps:$4 sm:$0xff]  }
 0x316   : > { %6432 = vmatprep.subr.bf16.mxu1 %v20050_v46  ;;  %v20116_v46 = vld [vmem:[%s22494_s16 + $0x80c] ss:$72 sps:$4 sm:$0xff]  }
 0x318   : > { %6392 = vmatpush1.bf16.msra.mxu0 %v20045_v47  ;;  %v20111_v47 = vld [vmem:[%s22494_s16 + $0x1a00] ss:$72 sps:$4 sm:$0xff]  }
 0x319   : > { %6433 = vmatpush1.bf16.msra.mxu1 %v20048_v48  ;;  %6393 = vmatprep.subr.bf16.mxu0 %v20053_v50  ;;  %v20114_v48 = vld [vmem:[%s22494_s16 + $0x808] ss:$72 sps:$4 sm:$0xff]   ;;  %v20119_v50 = vld [vmem:[%s22494_s16 + $0x1a94] ss:$72 sps:$4 sm:$0xff]  }
 0x31a   : > { %6434 = vmatprep.subr.bf16.mxu1 %v20056_v20  ;;  %v20122_v20 = vld [vmem:[%s22494_s16 + $0x89c] ss:$72 sps:$4 sm:$0xff]  }
 0x31c   : > { %6394 = vmatpush1.bf16.msra.mxu0 %v20051_v51  ;;  %v20117_v51 = vld [vmem:[%s22494_s16 + $0x1a90] ss:$72 sps:$4 sm:$0xff]  }
 0x31d   : > { %6435 = vmatpush1.bf16.msra.mxu1 %v20054_v52  ;;  %6395 = vmatprep.subr.bf16.mxu0 %v20059_v26  ;;  %v20120_v52 = vld [vmem:[%s22494_s16 + $0x898] ss:$72 sps:$4 sm:$0xff]   ;;  %v20125_v26 = vld [vmem:[%s22494_s16 + $0x92c] ss:$72 sps:$4 sm:$0xff]  }
 0x31e   : > { %6436 = vmatprep.subr.bf16.mxu1 %v20062_v54  ;;  %v6091_v61 = vpop.f32.mrb[12].mxu0  ;;  %v20128_v54 = vld [vmem:[%s22494_s16 + $0x122c] ss:$72 sps:$4 sm:$0xff]  }
 0x31f   : > { %v6132_v62 = vpop.f32.mrb[12].mxu1  ;;  %v6093_v2 = vpop.f32.mrb[13].mxu0 }
 0x320   : > { %v23068_v1 = vadd.f32 %v6132_v62, %v6091_v61  ;;  %v6134_v4 = vpop.f32.mrb[13].mxu1  ;;  %6396 = vmatpush1.bf16.msra.mxu0 %v20057_v56  ;;  %v6095_v8 = vpop.f32.mrb[14].mxu0  ;;  %v20123_v56 = vld [vmem:[%s22494_s16 + $0x928] ss:$72 sps:$4 sm:$0xff]   ;;  %v20129_v61 = vld [vmem:[%s22494_s16 + $0x9b8] ss:$72 sps:$4 sm:$0xff]  }
 0x321   : > { %v23070_v5 = vadd.f32 %v6134_v4, %v6093_v2  ;;  %v6136_v6 = vpop.f32.mrb[14].mxu1  ;;  %6437 = vmatpush1.bf16.msra.mxu1 %v20060_v57  ;;  %6397 = vmatprep.subr.bf16.mxu0 %v20065_v59  ;;  %v6096_v12 = vpop.f32.mrb[15].mxu0  ;;  %v20126_v57 = vld [vmem:[%s22494_s16 + $0x1228] ss:$72 sps:$4 sm:$0xff]   ;;  %v20131_v59 = vld [vmem:[%s22494_s16 + $0x9bc] ss:$72 sps:$4 sm:$0xff]  }
 0x322   : > { %v6137_v9 = vpop.f32.mrb[15].mxu1  ;;  %6438 = vmatprep.subr.bf16.mxu1 %v20068_v60  ;;  %v20134_v60 = vld [vmem:[%s22494_s16 + $0x12bc] ss:$72 sps:$4 sm:$0xff]   ;;  %v20132_v62 = vld [vmem:[%s22494_s16 + $0x12b8] ss:$72 sps:$4 sm:$0xff]  }
 0x323   : > { %v20135_v2 = vld [vmem:[%s22494_s16 + $0xa48] ss:$72 sps:$4 sm:$0xff]   ;;  %v20143_v6 = vld [vmem:[%s22494_s16 + $0xadc] ss:$72 sps:$4 sm:$0xff]   ;;  %v20141_v9 = vld [vmem:[%s22494_s16 + $0xad8] ss:$72 sps:$4 sm:$0xff]  }
 0x324   : > { %6398 = vmatpush1.bf16.msra.mxu0 %v20063_v63  ;;  %v20137_v63 = vld [vmem:[%s22494_s16 + $0xa4c] ss:$72 sps:$4 sm:$0xff]   ;;  %v20138_v4 = vld [vmem:[%s22494_s16 + $0x1348] ss:$72 sps:$4 sm:$0xff]   ;;  %v20146_v8 = vld [vmem:[%s22494_s16 + $0x13dc] ss:$72 sps:$4 sm:$0xff]  }
 0x325   : > { %6439 = vmatpush1.bf16.msra.mxu1 %v20066_v0  ;;  %6399 = vmatprep.subr.bf16.mxu0 %v20071_v10  ;;  %v20140_v0 = vld [vmem:[%s22494_s16 + $0x134c] ss:$72 sps:$4 sm:$0xff]   ;;  %v20144_v10 = vld [vmem:[%s22494_s16 + $0x13d8] ss:$72 sps:$4 sm:$0xff]  }
 0x326   : > { %6440 = vmatprep.subr.bf16.mxu1 %v20074_v11  ;;  %v20149_v11 = vld [vmem:[%s22494_s16 + $0xb6c] ss:$72 sps:$4 sm:$0xff]  }
 0x327   : > { %v20152_v12 = vld [vmem:[%s22494_s16 + $0x146c] ss:$72 sps:$4 sm:$0xff]  }
 0x328   : > { %6400 = vmatpush1.bf16.msra.mxu0 %v20069_v13  ;;  %v20147_v13 = vld [vmem:[%s22494_s16 + $0xb68] ss:$72 sps:$4 sm:$0xff]  }
 0x329   : > { %6441 = vmatpush1.bf16.msra.mxu1 %v20072_v16  ;;  %6401 = vmatprep.subr.bf16.mxu0 %v20077_v17  ;;  %v20150_v16 = vld [vmem:[%s22494_s16 + $0x1468] ss:$72 sps:$4 sm:$0xff]   ;;  %v20155_v17 = vld [vmem:[%s22494_s16 + $0xbfc] ss:$72 sps:$4 sm:$0xff]  }
 0x32a   : > { %6442 = vmatprep.subr.bf16.mxu1 %v20080_v18  ;;  %v20158_v18 = vld [vmem:[%s22494_s16 + $0x14fc] ss:$72 sps:$4 sm:$0xff]  }
 0x32c   : > { %6402 = vmatpush1.bf16.msra.mxu0 %v20075_v19  ;;  %v20153_v19 = vld [vmem:[%s22494_s16 + $0xbf8] ss:$72 sps:$4 sm:$0xff]  }
 0x32d   : > { %6443 = vmatpush1.bf16.msra.mxu1 %v20078_v21  ;;  %6403 = vmatprep.subr.bf16.mxu0 %v20083_v22  ;;  %v20156_v21 = vld [vmem:[%s22494_s16 + $0x14f8] ss:$72 sps:$4 sm:$0xff]   ;;  %v20161_v22 = vld [vmem:[%s22494_s16 + $0xc8c] ss:$72 sps:$4 sm:$0xff]  }
 0x32e   : > { %6444 = vmatprep.subr.bf16.mxu1 %v20086_v25  ;;  %v20164_v25 = vld [vmem:[%s22494_s16 + $0x158c] ss:$72 sps:$4 sm:$0xff]  }
 0x330   : > { %6404 = vmatpush1.bf16.msra.mxu0 %v20081_v28 }
 0x331   : > { %6445 = vmatpush1.bf16.msra.mxu1 %v20084_v29  ;;  %6405 = vmatprep.subr.bf16.mxu0 %v20089_v30  ;;  %v20159_v30 = vld [vmem:[%s22494_s16 + $0xc88] ss:$72 sps:$4 sm:$0xff]  }
 0x332   : > { %6446 = vmatprep.subr.bf16.mxu1 %v20092_v3  ;;  %v20162_v3 = vld [vmem:[%s22494_s16 + $0x1588] ss:$72 sps:$4 sm:$0xff]  }
 0x334   : > { %6406 = vmatpush1.bf16.msra.mxu0 %v20087_v31 }
 0x335   : > { %6447 = vmatpush1.bf16.msra.mxu1 %v20090_v32  ;;  %6407 = vmatprep.subr.bf16.mxu0 %v20095_v7 }
 0x336   : > { %6448 = vmatprep.subr.bf16.mxu1 %v20098_v33 }
 0x338   : > { %6408 = vmatpush1.bf16.msra.mxu0 %v20093_v34 }
 0x339   : > { %6449 = vmatpush1.bf16.msra.mxu1 %v20096_v35  ;;  %6409 = vmatprep.subr.bf16.mxu0 %v20101_v36 }
 0x33a   : > { %6450 = vmatprep.subr.bf16.mxu1 %v20104_v37  ;;  %v20170_v37 = vld [vmem:[%s22494_s16 + $0x161c] ss:$72 sps:$4 sm:$0xff]  }
 0x33c   : > { %6410 = vmatpush1.bf16.msra.mxu0 %v20099_v38 }
 0x33d   : > { %6451 = vmatpush1.bf16.msra.mxu1 %v20102_v39  ;;  %6411 = vmatprep.subr.bf16.mxu0 %v20107_v40  ;;  %v20168_v39 = vld [vmem:[%s22494_s16 + $0x1618] ss:$72 sps:$4 sm:$0xff]   ;;  %v20173_v40 = vld [vmem:[%s22494_s16 + $0xdac] ss:$72 sps:$4 sm:$0xff]  }
 0x33e   : > { %6452 = vmatprep.subr.bf16.mxu1 %v20110_v42  ;;  %v20176_v42 = vld [vmem:[%s22494_s16 + $0x16ac] ss:$72 sps:$4 sm:$0xff]  }
 0x340   : > { %6412 = vmatpush1.bf16.msra.mxu0 %v20105_v43  ;;  %v20171_v43 = vld [vmem:[%s22494_s16 + $0xda8] ss:$72 sps:$4 sm:$0xff]  }
 0x341   : > { %6453 = vmatpush1.bf16.msra.mxu1 %v20108_v44  ;;  %6413 = vmatprep.subr.bf16.mxu0 %v20113_v45  ;;  %v20174_v44 = vld [vmem:[%s22494_s16 + $0x16a8] ss:$72 sps:$4 sm:$0xff]   ;;  %v20179_v45 = vld [vmem:[%s22494_s16 + $0xe3c] ss:$72 sps:$4 sm:$0xff]  }
 0x342   : > { %6454 = vmatprep.subr.bf16.mxu1 %v20116_v46  ;;  %v20182_v46 = vld [vmem:[%s22494_s16 + $0x173c] ss:$72 sps:$4 sm:$0xff]  }
 0x344   : > { %6414 = vmatpush1.bf16.msra.mxu0 %v20111_v47  ;;  %v20177_v47 = vld [vmem:[%s22494_s16 + $0xe38] ss:$72 sps:$4 sm:$0xff]  }
 0x345   : > { %6455 = vmatpush1.bf16.msra.mxu1 %v20114_v48  ;;  %6415 = vmatprep.subr.bf16.mxu0 %v20119_v50  ;;  %v20180_v48 = vld [vmem:[%s22494_s16 + $0x1738] ss:$72 sps:$4 sm:$0xff]   ;;  %v20185_v50 = vld [vmem:[%s22494_s16 + $0xecc] ss:$72 sps:$4 sm:$0xff]  }
 0x346   : > { %6456 = vmatprep.subr.bf16.mxu1 %v20122_v20  ;;  %v20188_v20 = vld [vmem:[%s22494_s16 + $0x17cc] ss:$72 sps:$4 sm:$0xff]  }
 0x348   : > { %6416 = vmatpush1.bf16.msra.mxu0 %v20117_v51  ;;  %v20183_v51 = vld [vmem:[%s22494_s16 + $0xec8] ss:$72 sps:$4 sm:$0xff]  }
 0x349   : > { %6457 = vmatpush1.bf16.msra.mxu1 %v20120_v52  ;;  %6467 = vmatprep.subr.bf16.mxu0 %v20125_v26  ;;  %v20186_v52 = vld [vmem:[%s22494_s16 + $0x17c8] ss:$72 sps:$4 sm:$0xff]   ;;  %v20191_v26 = vld [vmem:[%s22494_s16 + $0xf5c] ss:$72 sps:$4 sm:$0xff]  }
 0x34a   : > { %6508 = vmatprep.subr.bf16.mxu1 %v20128_v54  ;;  %v20194_v54 = vld [vmem:[%s22494_s16 + $0x185c] ss:$72 sps:$4 sm:$0xff]  }
 0x34b   : > { %6418 = vmatmul.mubr.bf16.vlgmr.msra.gmra.mrb[28].mxu0 %v22676_v23 }
 0x34c   : > { %6459 = vmatmul.mubr.bf16.vlgmr.msra.gmra.mrb[28].mxu1 %v22602_v14  ;;  %6468 = vmatpush1.bf16.msra.mxu0 %v20123_v56  ;;  %v20189_v56 = vld [vmem:[%s22494_s16 + $0xf58] ss:$72 sps:$4 sm:$0xff]  }
 0x34d   : > { %6509 = vmatpush1.bf16.msra.mxu1 %v20126_v57  ;;  %6469 = vmatprep.subr.bf16.mxu0 %v20131_v59  ;;  %v20192_v57 = vld [vmem:[%s22494_s16 + $0x1858] ss:$72 sps:$4 sm:$0xff]   ;;  %v20197_v59 = vld [vmem:[%s22494_s16 + $0xfec] ss:$72 sps:$4 sm:$0xff]  }
 0x34e   : > { %6510 = vmatprep.subr.bf16.mxu1 %v20134_v60  ;;  %6499 = vmatprep.mubr.bf16.mxu0 %v22581_v58  ;;  %v20200_v60 = vld [vmem:[%s22494_s16 + $0x18ec] ss:$72 sps:$4 sm:$0xff]  }
 0x34f   : > { %6540 = vmatprep.mubr.bf16.mxu1 %v22633_v41 }
 0x350   : > { %6470 = vmatpush1.bf16.msra.mxu0 %v20129_v61  ;;  %v20195_v61 = vld [vmem:[%s22494_s16 + $0xfe8] ss:$72 sps:$4 sm:$0xff]  }
 0x351   : > { %6511 = vmatpush1.bf16.msra.mxu1 %v20132_v62  ;;  %6471 = vmatprep.subr.bf16.mxu0 %v20137_v63  ;;  %v20198_v62 = vld [vmem:[%s22494_s16 + $0x18e8] ss:$72 sps:$4 sm:$0xff]   ;;  %v20203_v63 = vld [vmem:[%s22494_s16 + $0x107c] ss:$72 sps:$4 sm:$0xff]  }
 0x352   : > { %6512 = vmatprep.subr.bf16.mxu1 %v20140_v0  ;;  %v20206_v0 = vld [vmem:[%s22494_s16 + $0x197c] ss:$72 sps:$4 sm:$0xff]  }
 0x354   : > { %6472 = vmatpush1.bf16.msra.mxu0 %v20135_v2  ;;  %v20201_v2 = vld [vmem:[%s22494_s16 + $0x1078] ss:$72 sps:$4 sm:$0xff]  }
 0x355   : > { %6513 = vmatpush1.bf16.msra.mxu1 %v20138_v4  ;;  %6473 = vmatprep.subr.bf16.mxu0 %v20143_v6  ;;  %v20204_v4 = vld [vmem:[%s22494_s16 + $0x1978] ss:$72 sps:$4 sm:$0xff]   ;;  %v20209_v6 = vld [vmem:[%s22494_s16 + $0x110c] ss:$72 sps:$4 sm:$0xff]  }
 0x356   : > { %6514 = vmatprep.subr.bf16.mxu1 %v20146_v8  ;;  %v20212_v8 = vld [vmem:[%s22494_s16 + $0x1a0c] ss:$72 sps:$4 sm:$0xff]  }
 0x358   : > { %6474 = vmatpush1.bf16.msra.mxu0 %v20141_v9  ;;  %v20207_v9 = vld [vmem:[%s22494_s16 + $0x1108] ss:$72 sps:$4 sm:$0xff]  }
 0x359   : > { %6515 = vmatpush1.bf16.msra.mxu1 %v20144_v10  ;;  %6475 = vmatprep.subr.bf16.mxu0 %v20149_v11  ;;  %v20210_v10 = vld [vmem:[%s22494_s16 + $0x1a08] ss:$72 sps:$4 sm:$0xff]   ;;  %v20215_v11 = vld [vmem:[%s22494_s16 + $0x119c] ss:$72 sps:$4 sm:$0xff]  }
 0x35a   : > { %6516 = vmatprep.subr.bf16.mxu1 %v20152_v12  ;;  %v20218_v12 = vld [vmem:[%s22494_s16 + $0x1a9c] ss:$72 sps:$4 sm:$0xff]  }
 0x35c   : > { %6476 = vmatpush1.bf16.msra.mxu0 %v20147_v13  ;;  %v20213_v13 = vld [vmem:[%s22494_s16 + $0x1198] ss:$72 sps:$4 sm:$0xff]  }
 0x35d   : > { %6517 = vmatpush1.bf16.msra.mxu1 %v20150_v16  ;;  %6477 = vmatprep.subr.bf16.mxu0 %v20155_v17  ;;  %v20216_v16 = vld [vmem:[%s22494_s16 + $0x1a98] ss:$72 sps:$4 sm:$0xff]   ;;  %v20221_v17 = vld [vmem:[%s22494_s16 + $0x34] ss:$72 sps:$4 sm:$0xff]  }
 0x35e   : > { %6518 = vmatprep.subr.bf16.mxu1 %v20158_v18  ;;  %v6173_v28 = vpop.f32.mrb[16].mxu0  ;;  %v20224_v18 = vld [vmem:[%s22494_s16 + $0x934] ss:$72 sps:$4 sm:$0xff]  }
 0x35f   : > { %v23138_v29 = vpop.f32.mrb[16].mxu1  ;;  %v23143_v31 = vadd.f32 %v6173_v28, %v23068_v1  ;;  %v6175_v32 = vpop.f32.mrb[17].mxu0  ;;  %v20167_v1 = vld [vmem:[%s22494_s16 + $0xd1c] ss:$72 sps:$4 sm:$0xff]   ;;  %v20225_v28 = vld [vmem:[%s22494_s16 + $0xc0] ss:$72 sps:$4 sm:$0xff]  }
 0x360   : > { %v23145_v7 = vpop.f32.mrb[17].mxu1  ;;  %v23148_v33 = vadd.f32 %v6175_v32, %v23070_v5  ;;  %6478 = vmatpush1.bf16.msra.mxu0 %v20153_v19  ;;  %v6177_v35 = vpop.f32.mrb[18].mxu0  ;;  %v20165_v5 = vld [vmem:[%s22494_s16 + $0xd18] ss:$72 sps:$4 sm:$0xff]   ;;  %v20236_v32 = vld [vmem:[%s22494_s16 + $0xa54] ss:$72 sps:$4 sm:$0xff]  }
 0x361   : > { %v6218_v34 = vpop.f32.mrb[18].mxu1  ;;  %6519 = vmatpush1.bf16.msra.mxu1 %v20156_v21  ;;  %6479 = vmatprep.subr.bf16.mxu0 %v20161_v22  ;;  %v6178_v38 = vpop.f32.mrb[19].mxu0  ;;  %v20219_v19 = vld [vmem:[%s22494_s16 + $0x30] ss:$72 sps:$4 sm:$0xff]   ;;  %v20227_v22 = vld [vmem:[%s22494_s16 + $0xc4] ss:$72 sps:$4 sm:$0xff]  }
 0x362   : > { %v6219_v36 = vpop.f32.mrb[19].mxu1  ;;  %6520 = vmatprep.subr.bf16.mxu1 %v20164_v25  ;;  %v20222_v21 = vld [vmem:[%s22494_s16 + $0x930] ss:$72 sps:$4 sm:$0xff]   ;;  %v20230_v25 = vld [vmem:[%s22494_s16 + $0x9c4] ss:$72 sps:$4 sm:$0xff]  }
 0x363   : > { %v20231_v34 = vld [vmem:[%s22494_s16 + $0x150] ss:$72 sps:$4 sm:$0xff]   ;;  %v20239_v36 = vld [vmem:[%s22494_s16 + $0x1e4] ss:$72 sps:$4 sm:$0xff]   ;;  %v20240_v38 = vld [vmem:[%s22494_s16 + $0xae0] ss:$72 sps:$4 sm:$0xff]  }
 0x364   : > { %6480 = vmatpush1.bf16.msra.mxu0 %v20159_v30  ;;  %v20228_v30 = vld [vmem:[%s22494_s16 + $0x9c0] ss:$72 sps:$4 sm:$0xff]   ;;  %v20234_v35 = vld [vmem:[%s22494_s16 + $0xa50] ss:$72 sps:$4 sm:$0xff]  }
 0x365   : > { %6521 = vmatpush1.bf16.msra.mxu1 %v20162_v3  ;;  %6481 = vmatprep.subr.bf16.mxu0 %v20167_v1  ;;  %v20233_v3 = vld [vmem:[%s22494_s16 + $0x154] ss:$72 sps:$4 sm:$0xff]   ;;  %v20242_v1 = vld [vmem:[%s22494_s16 + $0xae4] ss:$72 sps:$4 sm:$0xff]  }
 0x366   : > { %6522 = vmatprep.subr.bf16.mxu1 %v20170_v37  ;;  %v20237_v37 = vld [vmem:[%s22494_s16 + $0x1e0] ss:$72 sps:$4 sm:$0xff]  }
 0x368   : > { %6482 = vmatpush1.bf16.msra.mxu0 %v20165_v5  ;;  %v20245_v5 = vld [vmem:[%s22494_s16 + $0x274] ss:$72 sps:$4 sm:$0xff]  }
 0x369   : > { %6523 = vmatpush1.bf16.msra.mxu1 %v20168_v39  ;;  %6483 = vmatprep.subr.bf16.mxu0 %v20173_v40  ;;  %v20248_v39 = vld [vmem:[%s22494_s16 + $0xb74] ss:$72 sps:$4 sm:$0xff]   ;;  %v6918_v40 = vlaneseq }
 0x36a   : > { %6524 = vmatprep.subr.bf16.mxu1 %v20176_v42  ;;  %v20243_v42 = vld [vmem:[%s22494_s16 + $0x270] ss:$72 sps:$4 sm:$0xff]  }
 0x36c   : > { %6484 = vmatpush1.bf16.msra.mxu0 %v20171_v43  ;;  %v20246_v43 = vld [vmem:[%s22494_s16 + $0xb70] ss:$72 sps:$4 sm:$0xff]  }
 0x36d   : > { %6525 = vmatpush1.bf16.msra.mxu1 %v20174_v44  ;;  %6485 = vmatprep.subr.bf16.mxu0 %v20179_v45  ;;  %v20251_v44 = vld [vmem:[%s22494_s16 + $0x304] ss:$72 sps:$4 sm:$0xff]  }
 0x36e   : > { %6526 = vmatprep.subr.bf16.mxu1 %v20182_v46  ;;  %v20254_v45 = vld [vmem:[%s22494_s16 + $0xc04] ss:$72 sps:$4 sm:$0xff]   ;;  %v23212_v46 = vshrl.u32 %v6918_v40, 7 }
 0x36f   : > { %v20299_v40 = vld [vmem:[%s22494_s16 + $0x784] ss:$72 sps:$4 sm:$0xff]  }
 0x370   : > { %6486 = vmatpush1.bf16.msra.mxu0 %v20177_v47  ;;  %v20249_v47 = vld [vmem:[%s22494_s16 + $0x300] ss:$72 sps:$4 sm:$0xff]  }
 0x371   : > { %6527 = vmatpush1.bf16.msra.mxu1 %v20180_v48  ;;  %6487 = vmatprep.subr.bf16.mxu0 %v20185_v50  ;;  %v20252_v48 = vld [vmem:[%s22494_s16 + $0xc00] ss:$72 sps:$4 sm:$0xff]   ;;  %v23217_v50 = vsub.s32 1, %v23212_v46 }
 0x372   : > { %6528 = vmatprep.subr.bf16.mxu1 %v20188_v20  ;;  %v608_v20 = vld [vmem:[%s22510_s15 + $0x8] sm:$0xff] }
 0x374   : > { %6488 = vmatpush1.bf16.msra.mxu0 %v20183_v51  ;;  %v20257_v51 = vld [vmem:[%s22494_s16 + $0x394] ss:$72 sps:$4 sm:$0xff]  }
 0x375   : > { %6529 = vmatpush1.bf16.msra.mxu1 %v20186_v52  ;;  %6489 = vmatprep.subr.bf16.mxu0 %v20191_v26  ;;  %v20260_v52 = vld [vmem:[%s22494_s16 + $0xc94] ss:$72 sps:$4 sm:$0xff]  }
 0x376   : > { %6530 = vmatprep.subr.bf16.mxu1 %v20194_v54 }
 0x378   : > { %6490 = vmatpush1.bf16.msra.mxu0 %v20189_v56  ;;  %v20255_v56 = vld [vmem:[%s22494_s16 + $0x390] ss:$72 sps:$4 sm:$0xff]  }
 0x379   : > { %6531 = vmatpush1.bf16.msra.mxu1 %v20192_v57  ;;  %6491 = vmatprep.subr.bf16.mxu0 %v20197_v59  ;;  %v20258_v57 = vld [vmem:[%s22494_s16 + $0xc90] ss:$72 sps:$4 sm:$0xff]  }
 0x37a   : > { %6532 = vmatprep.subr.bf16.mxu1 %v20200_v60 }
 0x37c   : > { %6492 = vmatpush1.bf16.msra.mxu0 %v20195_v61 }
 0x37d   : > { %6533 = vmatpush1.bf16.msra.mxu1 %v20198_v62  ;;  %6493 = vmatprep.subr.bf16.mxu0 %v20203_v63 }
 0x37e   : > { %6534 = vmatprep.subr.bf16.mxu1 %v20206_v0  ;;  %v6955_v0 = vrot.slane %v608_v20, %v23217_v50  ;;  %v20306_v20 = vld [vmem:[%s22494_s16 + $0x1110] ss:$72 sps:$4 sm:$0xff]  }
 0x380   : > { %6494 = vmatpush1.bf16.msra.mxu0 %v20201_v2 }
 0x381   : > { %6535 = vmatpush1.bf16.msra.mxu1 %v20204_v4  ;;  %6495 = vmatprep.subr.bf16.mxu0 %v20209_v6 }
 0x382   : > { %6536 = vmatprep.subr.bf16.mxu1 %v20212_v8  ;;  %v20266_v8 = vld [vmem:[%s22494_s16 + $0xd24] ss:$72 sps:$4 sm:$0xff]  }
 0x384   : > { %6496 = vmatpush1.bf16.msra.mxu0 %v20207_v9 }
 0x385   : > { %6537 = vmatpush1.bf16.msra.mxu1 %v20210_v10  ;;  %6497 = vmatprep.subr.bf16.mxu0 %v20215_v11  ;;  %v20261_v11 = vld [vmem:[%s22494_s16 + $0x420] ss:$72 sps:$4 sm:$0xff]  }
 0x386   : > { %6538 = vmatprep.subr.bf16.mxu1 %v20218_v12  ;;  %v20264_v12 = vld [vmem:[%s22494_s16 + $0xd20] ss:$72 sps:$4 sm:$0xff]  }
 0x388   : > { %6498 = vmatpush1.bf16.msra.mxu0 %v20213_v13  ;;  %v20269_v13 = vld [vmem:[%s22494_s16 + $0x4b4] ss:$72 sps:$4 sm:$0xff]  }
 0x389   : > { %6539 = vmatpush1.bf16.msra.mxu1 %v20216_v16  ;;  %6549 = vmatprep.subr.bf16.mxu0 %v20221_v17  ;;  %v20272_v16 = vld [vmem:[%s22494_s16 + $0xdb4] ss:$72 sps:$4 sm:$0xff]   ;;  %v20267_v17 = vld [vmem:[%s22494_s16 + $0x4b0] ss:$72 sps:$4 sm:$0xff]  }
 0x38a   : > { %6590 = vmatprep.subr.bf16.mxu1 %v20224_v18  ;;  %v20270_v18 = vld [vmem:[%s22494_s16 + $0xdb0] ss:$72 sps:$4 sm:$0xff]  }
 0x38b   : > { %6500 = vmatmul.mubr.bf16.vlgmr.msra.gmra.mrb[32].mxu0 %v22604_v15 }
 0x38c   : > { %6541 = vmatmul.mubr.bf16.vlgmr.msra.gmra.mrb[32].mxu1 %v22676_v23  ;;  %6550 = vmatpush1.bf16.msra.mxu0 %v20219_v19  ;;  %v20275_v19 = vld [vmem:[%s22494_s16 + $0x544] ss:$72 sps:$4 sm:$0xff]  }
 0x38d   : > { %6591 = vmatpush1.bf16.msra.mxu1 %v20222_v21  ;;  %6551 = vmatprep.subr.bf16.mxu0 %v20227_v22  ;;  %v20278_v21 = vld [vmem:[%s22494_s16 + $0xe44] ss:$72 sps:$4 sm:$0xff]   ;;  %v20273_v22 = vld [vmem:[%s22494_s16 + $0x540] ss:$72 sps:$4 sm:$0xff]  }
 0x38e   : > { %6592 = vmatprep.subr.bf16.mxu1 %v20230_v25  ;;  %6581 = vmatprep.mubr.bf16.mxu0 %v22578_v55  ;;  %v20276_v25 = vld [vmem:[%s22494_s16 + $0xe40] ss:$72 sps:$4 sm:$0xff]  }
 0x38f   : > { %6622 = vmatprep.mubr.bf16.mxu1 %v22581_v58 }
 0x390   : > { %6552 = vmatpush1.bf16.msra.mxu0 %v20225_v28  ;;  %v20281_v28 = vld [vmem:[%s22494_s16 + $0x5d4] ss:$72 sps:$4 sm:$0xff]  }
 0x391   : > { %6593 = vmatpush1.bf16.msra.mxu1 %v20228_v30  ;;  %6553 = vmatprep.subr.bf16.mxu0 %v20233_v3  ;;  %v20284_v30 = vld [vmem:[%s22494_s16 + $0xed4] ss:$72 sps:$4 sm:$0xff]   ;;  %v20279_v3 = vld [vmem:[%s22494_s16 + $0x5d0] ss:$72 sps:$4 sm:$0xff]  }
 0x392   : > { %6594 = vmatprep.subr.bf16.mxu1 %v20236_v32  ;;  %v20282_v32 = vld [vmem:[%s22494_s16 + $0xed0] ss:$72 sps:$4 sm:$0xff]  }
 0x394   : > { %6554 = vmatpush1.bf16.msra.mxu0 %v20231_v34  ;;  %v20287_v34 = vld [vmem:[%s22494_s16 + $0x664] ss:$72 sps:$4 sm:$0xff]  }
 0x395   : > { %6595 = vmatpush1.bf16.msra.mxu1 %v20234_v35  ;;  %6555 = vmatprep.subr.bf16.mxu0 %v20239_v36  ;;  %v20290_v35 = vld [vmem:[%s22494_s16 + $0xf64] ss:$72 sps:$4 sm:$0xff]   ;;  %v20285_v36 = vld [vmem:[%s22494_s16 + $0x660] ss:$72 sps:$4 sm:$0xff]  }
 0x396   : > { %6596 = vmatprep.subr.bf16.mxu1 %v20242_v1  ;;  %v20288_v1 = vld [vmem:[%s22494_s16 + $0xf60] ss:$72 sps:$4 sm:$0xff]  }
 0x398   : > { %6556 = vmatpush1.bf16.msra.mxu0 %v20237_v37  ;;  %v20293_v37 = vld [vmem:[%s22494_s16 + $0x6f4] ss:$72 sps:$4 sm:$0xff]  }
 0x399   : > { %6597 = vmatpush1.bf16.msra.mxu1 %v20240_v38  ;;  %6557 = vmatprep.subr.bf16.mxu0 %v20245_v5  ;;  %v20296_v38 = vld [vmem:[%s22494_s16 + $0xff4] ss:$72 sps:$4 sm:$0xff]   ;;  %v20291_v5 = vld [vmem:[%s22494_s16 + $0x6f0] ss:$72 sps:$4 sm:$0xff]  }
 0x39a   : > { %6598 = vmatprep.subr.bf16.mxu1 %v20248_v39  ;;  %v20294_v39 = vld [vmem:[%s22494_s16 + $0xff0] ss:$72 sps:$4 sm:$0xff]  }
 0x39c   : > { %6558 = vmatpush1.bf16.msra.mxu0 %v20243_v42  ;;  %v20302_v42 = vld [vmem:[%s22494_s16 + $0x1084] ss:$72 sps:$4 sm:$0xff]  }
 0x39d   : > { %6599 = vmatpush1.bf16.msra.mxu1 %v20246_v43  ;;  %6559 = vmatprep.subr.bf16.mxu0 %v20251_v44  ;;  %v20297_v43 = vld [vmem:[%s22494_s16 + $0x780] ss:$72 sps:$4 sm:$0xff]  }
 0x39e   : > { %6600 = vmatprep.subr.bf16.mxu1 %v20254_v45  ;;  %v6255_v26 = vpop.f32.mrb[20].mxu0  ;;  %v20300_v44 = vld [vmem:[%s22494_s16 + $0x1080] ss:$72 sps:$4 sm:$0xff]   ;;  %v20305_v45 = vld [vmem:[%s22494_s16 + $0x814] ss:$72 sps:$4 sm:$0xff]  }
 0x39f   : > { %v6296_v54 = vpop.f32.mrb[20].mxu1  ;;  %v6256_v59 = vadd.f32 %v6255_v26, %v23138_v29  ;;  %v6257_v60 = vpop.f32.mrb[21].mxu0  ;;  %v20263_v29 = vld [vmem:[%s22494_s16 + $0x424] ss:$72 sps:$4 sm:$0xff]   ;;  %v20309_v26 = vld [vmem:[%s22494_s16 + $0x8a0] ss:$72 sps:$4 sm:$0xff]  }
 0x3a0   : > { %v6298_v61 = vpop.f32.mrb[21].mxu1  ;;  %v6258_v62 = vadd.f32 %v6257_v60, %v23145_v7  ;;  %6560 = vmatpush1.bf16.msra.mxu0 %v20249_v47  ;;  %v6259_v2 = vpop.f32.mrb[22].mxu0  ;;  %v20308_v47 = vld [vmem:[%s22494_s16 + $0x1114] ss:$72 sps:$4 sm:$0xff]   ;;  %v20318_v60 = vld [vmem:[%s22494_s16 + $0x38] ss:$72 sps:$4 sm:$0xff]  }
 0x3a1   : > { %v6300_v63 = vpop.f32.mrb[22].mxu1  ;;  %6601 = vmatpush1.bf16.msra.mxu1 %v20252_v48  ;;  %v23227_v4 = vadd.f32 %v6296_v54, %v6256_v59  ;;  %6561 = vmatprep.subr.bf16.mxu0 %v20257_v51  ;;  %v6260_v9 = vpop.f32.mrb[23].mxu0  ;;  %v20303_v48 = vld [vmem:[%s22494_s16 + $0x810] ss:$72 sps:$4 sm:$0xff]   ;;  %v20311_v51 = vld [vmem:[%s22494_s16 + $0x8a4] ss:$72 sps:$4 sm:$0xff]  }
 0x3a2   : > { %v6301_v6 = vpop.f32.mrb[23].mxu1  ;;  %6602 = vmatprep.subr.bf16.mxu1 %v20260_v52  ;;  %v6299_v7 = vadd.f32 %v6298_v61, %v6258_v62  ;;  %v20314_v52 = vld [vmem:[%s22494_s16 + $0x11a4] ss:$72 sps:$4 sm:$0xff]   ;;  %v20312_v54 = vld [vmem:[%s22494_s16 + $0x11a0] ss:$72 sps:$4 sm:$0xff]  }
 0x3a3   : > { %v20315_v59 = vld [vmem:[%s22494_s16 + $0x1230] ss:$72 sps:$4 sm:$0xff]   ;;  %v20323_v61 = vld [vmem:[%s22494_s16 + $0x12c4] ss:$72 sps:$4 sm:$0xff]   ;;  %v20321_v63 = vld [vmem:[%s22494_s16 + $0x12c0] ss:$72 sps:$4 sm:$0xff]  }
 0x3a4   : > { %6562 = vmatpush1.bf16.msra.mxu0 %v20255_v56  ;;  %v23231_v10 = vadd.f32 %v6955_v0, %v6299_v7  ;;  %v20317_v56 = vld [vmem:[%s22494_s16 + $0x1234] ss:$72 sps:$4 sm:$0xff]   ;;  %v20324_v0 = vld [vmem:[%s22494_s16 + $0xc8] ss:$72 sps:$4 sm:$0xff]   ;;  %v20335_v9 = vld [vmem:[%s22494_s16 + $0x13e4] ss:$72 sps:$4 sm:$0xff]  }
 0x3a5   : > { %6603 = vmatpush1.bf16.msra.mxu1 %v20258_v57  ;;  %6563 = vmatprep.subr.bf16.mxu0 %v20263_v29  ;;  %v20320_v57 = vld [vmem:[%s22494_s16 + $0x3c] ss:$72 sps:$4 sm:$0xff]   ;;  %v20326_v62 = vld [vmem:[%s22494_s16 + $0xcc] ss:$72 sps:$4 sm:$0xff]   ;;  %v20327_v29 = vld [vmem:[%s22494_s16 + $0x1350] ss:$72 sps:$4 sm:$0xff]  }
 0x3a6   : > { %6604 = vmatprep.subr.bf16.mxu1 %v20266_v8  ;;  %7254 = vrot.lane.b32.xlu1 %v23231_v10, %s22075_s6  ;;  %v20329_v2 = vld [vmem:[%s22494_s16 + $0x1354] ss:$72 sps:$4 sm:$0xff]   ;;  %v20330_v8 = vld [vmem:[%s22494_s16 + $0x158] ss:$72 sps:$4 sm:$0xff]  }
 0x3a7   : > { %v20332_v6 = vld [vmem:[%s22494_s16 + $0x15c] ss:$72 sps:$4 sm:$0xff]   ;;  %v20338_v7 = vld [vmem:[%s22494_s16 + $0x1ec] ss:$72 sps:$4 sm:$0xff]  }
 0x3a8   : > { %6564 = vmatpush1.bf16.msra.mxu0 %v20261_v11  ;;  %v20333_v11 = vld [vmem:[%s22494_s16 + $0x13e0] ss:$72 sps:$4 sm:$0xff]  }
 0x3a9   : > { %6605 = vmatpush1.bf16.msra.mxu1 %v20264_v12  ;;  %6565 = vmatprep.subr.bf16.mxu0 %v20269_v13  ;;  %v20336_v12 = vld [vmem:[%s22494_s16 + $0x1e8] ss:$72 sps:$4 sm:$0xff]   ;;  %v20341_v13 = vld [vmem:[%s22494_s16 + $0x1474] ss:$72 sps:$4 sm:$0xff]  }
 0x3aa   : > { %6606 = vmatprep.subr.bf16.mxu1 %v20272_v16  ;;  %v20344_v16 = vld [vmem:[%s22494_s16 + $0x27c] ss:$72 sps:$4 sm:$0xff]  }
 0x3ac   : > { %6566 = vmatpush1.bf16.msra.mxu0 %v20267_v17  ;;  %v20339_v17 = vld [vmem:[%s22494_s16 + $0x1470] ss:$72 sps:$4 sm:$0xff]  }
 0x3ad   : > { %6607 = vmatpush1.bf16.msra.mxu1 %v20270_v18  ;;  %6567 = vmatprep.subr.bf16.mxu0 %v20275_v19  ;;  %v20342_v18 = vld [vmem:[%s22494_s16 + $0x278] ss:$72 sps:$4 sm:$0xff]   ;;  %v20347_v19 = vld [vmem:[%s22494_s16 + $0x1504] ss:$72 sps:$4 sm:$0xff]  }
 0x3ae   : > { %6608 = vmatprep.subr.bf16.mxu1 %v20278_v21  ;;  %v20350_v21 = vld [vmem:[%s22494_s16 + $0x30c] ss:$72 sps:$4 sm:$0xff]  }
 0x3b0   : > { %6568 = vmatpush1.bf16.msra.mxu0 %v20273_v22  ;;  %v20345_v22 = vld [vmem:[%s22494_s16 + $0x1500] ss:$72 sps:$4 sm:$0xff]  }
 0x3b1   : > { %6609 = vmatpush1.bf16.msra.mxu1 %v20276_v25  ;;  %6569 = vmatprep.subr.bf16.mxu0 %v20281_v28  ;;  %v20348_v25 = vld [vmem:[%s22494_s16 + $0x308] ss:$72 sps:$4 sm:$0xff]   ;;  %v20353_v28 = vld [vmem:[%s22494_s16 + $0x1594] ss:$72 sps:$4 sm:$0xff]  }
 0x3b2   : > { %6610 = vmatprep.subr.bf16.mxu1 %v20284_v30  ;;  %v20356_v30 = vld [vmem:[%s22494_s16 + $0x39c] ss:$72 sps:$4 sm:$0xff]  }
 0x3b4   : > { %6570 = vmatpush1.bf16.msra.mxu0 %v20279_v3 }
 0x3b5   : > { %6611 = vmatpush1.bf16.msra.mxu1 %v20282_v32  ;;  %6571 = vmatprep.subr.bf16.mxu0 %v20287_v34  ;;  %v20351_v34 = vld [vmem:[%s22494_s16 + $0x1590] ss:$72 sps:$4 sm:$0xff]  }
 0x3b6   : > { %6612 = vmatprep.subr.bf16.mxu1 %v20290_v35  ;;  %v20354_v35 = vld [vmem:[%s22494_s16 + $0x398] ss:$72 sps:$4 sm:$0xff]  }
 0x3b8   : > { %6572 = vmatpush1.bf16.msra.mxu0 %v20285_v36 }
 0x3b9   : > { %6613 = vmatpush1.bf16.msra.mxu1 %v20288_v1  ;;  %6573 = vmatprep.subr.bf16.mxu0 %v20293_v37 }
 0x3ba   : > { %6614 = vmatprep.subr.bf16.mxu1 %v20296_v38 }
 0x3bc   : > { %6574 = vmatpush1.bf16.msra.mxu0 %v20291_v5 }
 0x3bd   : > { %6615 = vmatpush1.bf16.msra.mxu1 %v20294_v39  ;;  %6575 = vmatprep.subr.bf16.mxu0 %v20299_v40 }
 0x3be   : > { %6616 = vmatprep.subr.bf16.mxu1 %v20302_v42  ;;  %v20359_v42 = vld [vmem:[%s22494_s16 + $0x1624] ss:$72 sps:$4 sm:$0xff]  }
 0x3c0   : > { %6576 = vmatpush1.bf16.msra.mxu0 %v20297_v43  ;;  %v20362_v43 = vld [vmem:[%s22494_s16 + $0x42c] ss:$72 sps:$4 sm:$0xff]  }
 0x3c1   : > { %6617 = vmatpush1.bf16.msra.mxu1 %v20300_v44  ;;  %6577 = vmatprep.subr.bf16.mxu0 %v20305_v45  ;;  %v20357_v45 = vld [vmem:[%s22494_s16 + $0x1620] ss:$72 sps:$4 sm:$0xff]  }
 0x3c2   : > { %6618 = vmatprep.subr.bf16.mxu1 %v20308_v47  ;;  %v20360_v47 = vld [vmem:[%s22494_s16 + $0x428] ss:$72 sps:$4 sm:$0xff]  }
 0x3c4   : > { %6578 = vmatpush1.bf16.msra.mxu0 %v20303_v48  ;;  %v20365_v48 = vld [vmem:[%s22494_s16 + $0x16b4] ss:$72 sps:$4 sm:$0xff]  }
 0x3c5   : > { %6619 = vmatpush1.bf16.msra.mxu1 %v20306_v20  ;;  %6579 = vmatprep.subr.bf16.mxu0 %v20311_v51  ;;  %v20368_v20 = vld [vmem:[%s22494_s16 + $0x4bc] ss:$72 sps:$4 sm:$0xff]   ;;  %v20363_v51 = vld [vmem:[%s22494_s16 + $0x16b0] ss:$72 sps:$4 sm:$0xff]  }
 0x3c6   : > { %6620 = vmatprep.subr.bf16.mxu1 %v20314_v52  ;;  %v20366_v52 = vld [vmem:[%s22494_s16 + $0x4b8] ss:$72 sps:$4 sm:$0xff]  }
 0x3c8   : > { %6580 = vmatpush1.bf16.msra.mxu0 %v20309_v26  ;;  %v20371_v26 = vld [vmem:[%s22494_s16 + $0x1744] ss:$72 sps:$4 sm:$0xff]  }
 0x3c9   : > { %6621 = vmatpush1.bf16.msra.mxu1 %v20312_v54  ;;  %6631 = vmatprep.subr.bf16.mxu0 %v20317_v56  ;;  %v20374_v54 = vld [vmem:[%s22494_s16 + $0x54c] ss:$72 sps:$4 sm:$0xff]   ;;  %v20369_v56 = vld [vmem:[%s22494_s16 + $0x1740] ss:$72 sps:$4 sm:$0xff]  }
 0x3ca   : > { %6672 = vmatprep.subr.bf16.mxu1 %v20320_v57  ;;  %v20372_v57 = vld [vmem:[%s22494_s16 + $0x548] ss:$72 sps:$4 sm:$0xff]  }
 0x3cb   : > { %6582 = vmatmul.mubr.bf16.vlgmr.msra.gmra.mrb[36].mxu0 %v22602_v14 }
 0x3cc   : > { %6623 = vmatmul.mubr.bf16.vlgmr.msra.gmra.mrb[36].mxu1 %v22604_v15  ;;  %6632 = vmatpush1.bf16.msra.mxu0 %v20315_v59  ;;  %v20377_v59 = vld [vmem:[%s22494_s16 + $0x17d4] ss:$72 sps:$4 sm:$0xff]  }
 0x3cd   : > { %6673 = vmatpush1.bf16.msra.mxu1 %v20318_v60  ;;  %6633 = vmatprep.subr.bf16.mxu0 %v20323_v61  ;;  %v20380_v60 = vld [vmem:[%s22494_s16 + $0x5dc] ss:$72 sps:$4 sm:$0xff]   ;;  %v20375_v61 = vld [vmem:[%s22494_s16 + $0x17d0] ss:$72 sps:$4 sm:$0xff]  }
 0x3ce   : > { %6674 = vmatprep.subr.bf16.mxu1 %v20326_v62  ;;  %6663 = vmatprep.mubr.bf16.mxu0 %v22633_v41  ;;  %v20378_v62 = vld [vmem:[%s22494_s16 + $0x5d8] ss:$72 sps:$4 sm:$0xff]  }
 0x3cf   : > { %6704 = vmatprep.mubr.bf16.mxu1 %v22578_v55 }
 0x3d0   : > { %6634 = vmatpush1.bf16.msra.mxu0 %v20321_v63  ;;  %v20383_v63 = vld [vmem:[%s22494_s16 + $0x1864] ss:$72 sps:$4 sm:$0xff]  }
 0x3d1   : > { %6675 = vmatpush1.bf16.msra.mxu1 %v20324_v0  ;;  %6635 = vmatprep.subr.bf16.mxu0 %v20329_v2  ;;  %v20386_v0 = vld [vmem:[%s22494_s16 + $0x66c] ss:$72 sps:$4 sm:$0xff]   ;;  %v20381_v2 = vld [vmem:[%s22494_s16 + $0x1860] ss:$72 sps:$4 sm:$0xff]  }
 0x3d2   : > { %6676 = vmatprep.subr.bf16.mxu1 %v20332_v6  ;;  %v20384_v6 = vld [vmem:[%s22494_s16 + $0x668] ss:$72 sps:$4 sm:$0xff]  }
 0x3d4   : > { %6636 = vmatpush1.bf16.msra.mxu0 %v20327_v29  ;;  %v20389_v29 = vld [vmem:[%s22494_s16 + $0x18f4] ss:$72 sps:$4 sm:$0xff]  }
 0x3d5   : > { %6677 = vmatpush1.bf16.msra.mxu1 %v20330_v8  ;;  %6637 = vmatprep.subr.bf16.mxu0 %v20335_v9  ;;  %v20392_v8 = vld [vmem:[%s22494_s16 + $0x6fc] ss:$72 sps:$4 sm:$0xff]   ;;  %v20387_v9 = vld [vmem:[%s22494_s16 + $0x18f0] ss:$72 sps:$4 sm:$0xff]  }
 0x3d6   : > { %6678 = vmatprep.subr.bf16.mxu1 %v20338_v7  ;;  %v20390_v7 = vld [vmem:[%s22494_s16 + $0x6f8] ss:$72 sps:$4 sm:$0xff]  }
 0x3d8   : > { %6638 = vmatpush1.bf16.msra.mxu0 %v20333_v11  ;;  %v20395_v11 = vld [vmem:[%s22494_s16 + $0x1984] ss:$72 sps:$4 sm:$0xff]  }
 0x3d9   : > { %6679 = vmatpush1.bf16.msra.mxu1 %v20336_v12  ;;  %6639 = vmatprep.subr.bf16.mxu0 %v20341_v13  ;;  %v20398_v12 = vld [vmem:[%s22494_s16 + $0x78c] ss:$72 sps:$4 sm:$0xff]   ;;  %v20393_v13 = vld [vmem:[%s22494_s16 + $0x1980] ss:$72 sps:$4 sm:$0xff]  }
 0x3da   : > { %6680 = vmatprep.subr.bf16.mxu1 %v20344_v16  ;;  %v20396_v16 = vld [vmem:[%s22494_s16 + $0x788] ss:$72 sps:$4 sm:$0xff]  }
 0x3dc   : > { %6640 = vmatpush1.bf16.msra.mxu0 %v20339_v17  ;;  %v20401_v17 = vld [vmem:[%s22494_s16 + $0x1a14] ss:$72 sps:$4 sm:$0xff]  }
 0x3dd   : > { %6681 = vmatpush1.bf16.msra.mxu1 %v20342_v18  ;;  %6641 = vmatprep.subr.bf16.mxu0 %v20347_v19  ;;  %v20404_v18 = vld [vmem:[%s22494_s16 + $0x81c] ss:$72 sps:$4 sm:$0xff]   ;;  %v20399_v19 = vld [vmem:[%s22494_s16 + $0x1a10] ss:$72 sps:$4 sm:$0xff]  }
 0x3de   : > { %6682 = vmatprep.subr.bf16.mxu1 %v20350_v21  ;;  %v6337_v3 = vpop.f32.mrb[24].mxu0  ;;  %v20402_v21 = vld [vmem:[%s22494_s16 + $0x818] ss:$72 sps:$4 sm:$0xff]  }
 0x3df   : > { %v6378_v32 = vpop.f32.mrb[24].mxu1  ;;  %v6339_v1 = vpop.f32.mrb[25].mxu0 }
 0x3e0   : > { %v23301_v36 = vadd.f32 %v6378_v32, %v6337_v3  ;;  %v6380_v37 = vpop.f32.mrb[25].mxu1  ;;  %6642 = vmatpush1.bf16.msra.mxu0 %v20345_v22  ;;  %v6341_v39 = vpop.f32.mrb[26].mxu0  ;;  %v20407_v22 = vld [vmem:[%s22494_s16 + $0x1aa4] ss:$72 sps:$4 sm:$0xff]  }
 0x3e1   : > { %v23303_v38 = vadd.f32 %v6380_v37, %v6339_v1  ;;  %v6382_v5 = vpop.f32.mrb[26].mxu1  ;;  %6683 = vmatpush1.bf16.msra.mxu1 %v20348_v25  ;;  %6643 = vmatprep.subr.bf16.mxu0 %v20353_v28  ;;  %v6342_v44 = vpop.f32.mrb[27].mxu0  ;;  %v20410_v25 = vld [vmem:[%s22494_s16 + $0x8ac] ss:$72 sps:$4 sm:$0xff]   ;;  %v20405_v28 = vld [vmem:[%s22494_s16 + $0x1aa0] ss:$72 sps:$4 sm:$0xff]  }
 0x3e2   : > { %v6383_v40 = vpop.f32.mrb[27].mxu1  ;;  %6684 = vmatprep.subr.bf16.mxu1 %v20356_v30  ;;  %v20408_v30 = vld [vmem:[%s22494_s16 + $0x8a8] ss:$72 sps:$4 sm:$0xff]   ;;  %v20413_v3 = vld [vmem:[%s22494_s16 + $0x93c] ss:$72 sps:$4 sm:$0xff]  }
 0x3e3   : > { %v20416_v32 = vld [vmem:[%s22494_s16 + $0x123c] ss:$72 sps:$4 sm:$0xff]   ;;  %v20419_v1 = vld [vmem:[%s22494_s16 + $0x9cc] ss:$72 sps:$4 sm:$0xff]   ;;  %v20417_v5 = vld [vmem:[%s22494_s16 + $0x9c8] ss:$72 sps:$4 sm:$0xff]  }
 0x3e4   : > { %6644 = vmatpush1.bf16.msra.mxu0 %v20351_v34  ;;  %v20411_v34 = vld [vmem:[%s22494_s16 + $0x938] ss:$72 sps:$4 sm:$0xff]   ;;  %v20422_v37 = vld [vmem:[%s22494_s16 + $0x12cc] ss:$72 sps:$4 sm:$0xff]   ;;  %v20420_v39 = vld [vmem:[%s22494_s16 + $0x12c8] ss:$72 sps:$4 sm:$0xff]  }
 0x3e5   : > { %6685 = vmatpush1.bf16.msra.mxu1 %v20354_v35  ;;  %6645 = vmatprep.subr.bf16.mxu0 %v20359_v42  ;;  %v20414_v35 = vld [vmem:[%s22494_s16 + $0x1238] ss:$72 sps:$4 sm:$0xff]   ;;  %v20425_v40 = vld [vmem:[%s22494_s16 + $0xa5c] ss:$72 sps:$4 sm:$0xff]  }
 0x3e6   : > { %6686 = vmatprep.subr.bf16.mxu1 %v20362_v43  ;;  %v20428_v42 = vld [vmem:[%s22494_s16 + $0x135c] ss:$72 sps:$4 sm:$0xff]   ;;  %v20423_v43 = vld [vmem:[%s22494_s16 + $0xa58] ss:$72 sps:$4 sm:$0xff]  }
 0x3e7   : > { %v20426_v44 = vld [vmem:[%s22494_s16 + $0x1358] ss:$72 sps:$4 sm:$0xff]  }
 0x3e8   : > { %6646 = vmatpush1.bf16.msra.mxu0 %v20357_v45  ;;  %v20431_v45 = vld [vmem:[%s22494_s16 + $0xaec] ss:$72 sps:$4 sm:$0xff]  }
 0x3e9   : > { %6687 = vmatpush1.bf16.msra.mxu1 %v20360_v47  ;;  %6647 = vmatprep.subr.bf16.mxu0 %v20365_v48  ;;  %v20434_v47 = vld [vmem:[%s22494_s16 + $0x13ec] ss:$72 sps:$4 sm:$0xff]   ;;  %v20429_v48 = vld [vmem:[%s22494_s16 + $0xae8] ss:$72 sps:$4 sm:$0xff]  }
 0x3ea   : > { %6688 = vmatprep.subr.bf16.mxu1 %v20368_v20  ;;  %v20432_v20 = vld [vmem:[%s22494_s16 + $0x13e8] ss:$72 sps:$4 sm:$0xff]  }
 0x3ec   : > { %6648 = vmatpush1.bf16.msra.mxu0 %v20363_v51  ;;  %v20437_v51 = vld [vmem:[%s22494_s16 + $0xb7c] ss:$72 sps:$4 sm:$0xff]  }
 0x3ed   : > { %6689 = vmatpush1.bf16.msra.mxu1 %v20366_v52  ;;  %6649 = vmatprep.subr.bf16.mxu0 %v20371_v26  ;;  %v20440_v52 = vld [vmem:[%s22494_s16 + $0x147c] ss:$72 sps:$4 sm:$0xff]   ;;  %v20435_v26 = vld [vmem:[%s22494_s16 + $0xb78] ss:$72 sps:$4 sm:$0xff]  }
 0x3ee   : > { %6690 = vmatprep.subr.bf16.mxu1 %v20374_v54  ;;  %v20438_v54 = vld [vmem:[%s22494_s16 + $0x1478] ss:$72 sps:$4 sm:$0xff]  }
 0x3f0   : > { %6650 = vmatpush1.bf16.msra.mxu0 %v20369_v56  ;;  %v20443_v56 = vld [vmem:[%s22494_s16 + $0xc0c] ss:$72 sps:$4 sm:$0xff]  }
 0x3f1   : > { %6691 = vmatpush1.bf16.msra.mxu1 %v20372_v57  ;;  %6651 = vmatprep.subr.bf16.mxu0 %v20377_v59  ;;  %v20446_v57 = vld [vmem:[%s22494_s16 + $0x150c] ss:$72 sps:$4 sm:$0xff]  }
 0x3f2   : > { %6692 = vmatprep.subr.bf16.mxu1 %v20380_v60  ;;  %v609_v59 = vld [vmem:[%s22510_s15 + $0x10] sm:$0xff] }
 0x3f3   : > { %v20441_v60 = vld [vmem:[%s22494_s16 + $0xc08] ss:$72 sps:$4 sm:$0xff]  }
 0x3f4   : > { %6652 = vmatpush1.bf16.msra.mxu0 %v20375_v61  ;;  %v20444_v61 = vld [vmem:[%s22494_s16 + $0x1508] ss:$72 sps:$4 sm:$0xff]  }
 0x3f5   : > { %6693 = vmatpush1.bf16.msra.mxu1 %v20378_v62  ;;  %6653 = vmatprep.subr.bf16.mxu0 %v20383_v63  ;;  %v20449_v62 = vld [vmem:[%s22494_s16 + $0xc9c] ss:$72 sps:$4 sm:$0xff]   ;;  %v6959_v63 = vrot.slane %v609_v59, %v23217_v50 }
 0x3f6   : > { %6694 = vmatprep.subr.bf16.mxu1 %v20386_v0  ;;  %v20452_v0 = vld [vmem:[%s22494_s16 + $0x159c] ss:$72 sps:$4 sm:$0xff]  }
 0x3f8   : > { %6654 = vmatpush1.bf16.msra.mxu0 %v20381_v2 }
 0x3f9   : > { %6695 = vmatpush1.bf16.msra.mxu1 %v20384_v6  ;;  %6655 = vmatprep.subr.bf16.mxu0 %v20389_v29  ;;  %v20447_v29 = vld [vmem:[%s22494_s16 + $0xc98] ss:$72 sps:$4 sm:$0xff]  }
 0x3fa   : > { %6696 = vmatprep.subr.bf16.mxu1 %v20392_v8  ;;  %v20450_v8 = vld [vmem:[%s22494_s16 + $0x1598] ss:$72 sps:$4 sm:$0xff]  }
 0x3fc   : > { %6656 = vmatpush1.bf16.msra.mxu0 %v20387_v9  ;;  %v23378_v9 = vsub.s32 0, %v23212_v46 }
 0x3fd   : > { %6697 = vmatpush1.bf16.msra.mxu1 %v20390_v7  ;;  %6657 = vmatprep.subr.bf16.mxu0 %v20395_v11 }
 0x3fe   : > { %6698 = vmatprep.subr.bf16.mxu1 %v20398_v12 }
 0x400   : > { %6658 = vmatpush1.bf16.msra.mxu0 %v20393_v13 }
 0x401   : > { %6699 = vmatpush1.bf16.msra.mxu1 %v20396_v16  ;;  %6659 = vmatprep.subr.bf16.mxu0 %v20401_v17 }
 0x402   : > { %6700 = vmatprep.subr.bf16.mxu1 %v20404_v18  ;;  %v6929_v18 = vrot.slane %v609_v59, %v23378_v9  ;;  %v20492_v59 = vld [vmem:[%s22494_s16 + $0x1988] ss:$72 sps:$4 sm:$0xff]  }
 0x404   : > { %6660 = vmatpush1.bf16.msra.mxu0 %v20399_v19 }
 0x405   : > { %6701 = vmatpush1.bf16.msra.mxu1 %v20402_v21  ;;  %6661 = vmatprep.subr.bf16.mxu0 %v20407_v22  ;;  %v20458_v22 = vld [vmem:[%s22494_s16 + $0x162c] ss:$72 sps:$4 sm:$0xff]  }
 0x406   : > { %6702 = vmatprep.subr.bf16.mxu1 %v20410_v25 }
 0x408   : > { %6662 = vmatpush1.bf16.msra.mxu0 %v20405_v28  ;;  %v20456_v28 = vld [vmem:[%s22494_s16 + $0x1628] ss:$72 sps:$4 sm:$0xff]  }
 0x409   : > { %6703 = vmatpush1.bf16.msra.mxu1 %v20408_v30  ;;  %6713 = vmatprep.subr.bf16.mxu0 %v20413_v3  ;;  %v20461_v30 = vld [vmem:[%s22494_s16 + $0xdbc] ss:$72 sps:$4 sm:$0xff]  }
 0x40a   : > { %6754 = vmatprep.subr.bf16.mxu1 %v20416_v32  ;;  %v20464_v3 = vld [vmem:[%s22494_s16 + $0x16bc] ss:$72 sps:$4 sm:$0xff]   ;;  %v6944_v32 = vadd.f32 %v6929_v18, %v22996_v49  ;;  %v20468_v49 = vld [vmem:[%s22494_s16 + $0x1748] ss:$72 sps:$4 sm:$0xff]  }
 0x40b   : > { %6664 = vmatmul.mubr.bf16.vlgmr.msra.gmra.mrb[40].mxu0 %v22676_v23  ;;  %v20515_v18 = vld [vmem:[%s22494_s16 + $0xd4] ss:$72 sps:$4 sm:$0xff]  }
 0x40c   : > { %6705 = vmatmul.mubr.bf16.vlgmr.msra.gmra.mrb[40].mxu1 %v22602_v14  ;;  %6714 = vmatpush1.bf16.msra.mxu0 %v20411_v34  ;;  %v20459_v34 = vld [vmem:[%s22494_s16 + $0xdb8] ss:$72 sps:$4 sm:$0xff]  }
 0x40d   : > { %6755 = vmatpush1.bf16.msra.mxu1 %v20414_v35  ;;  %6715 = vmatprep.subr.bf16.mxu0 %v20419_v1  ;;  %v20462_v35 = vld [vmem:[%s22494_s16 + $0x16b8] ss:$72 sps:$4 sm:$0xff]   ;;  %v20467_v1 = vld [vmem:[%s22494_s16 + $0xe4c] ss:$72 sps:$4 sm:$0xff]  }
 0x40e   : > { %6756 = vmatprep.subr.bf16.mxu1 %v20422_v37  ;;  %6745 = vmatprep.mubr.bf16.mxu0 %v22581_v58  ;;  %v20470_v37 = vld [vmem:[%s22494_s16 + $0x174c] ss:$72 sps:$4 sm:$0xff]  }
 0x40f   : > { %6786 = vmatprep.mubr.bf16.mxu1 %v22633_v41 }
 0x410   : > { %6716 = vmatpush1.bf16.msra.mxu0 %v20417_v5  ;;  %v20465_v5 = vld [vmem:[%s22494_s16 + $0xe48] ss:$72 sps:$4 sm:$0xff]  }
 0x411   : > { %6757 = vmatpush1.bf16.msra.mxu1 %v20420_v39  ;;  %6717 = vmatprep.subr.bf16.mxu0 %v20425_v40  ;;  %v20473_v39 = vld [vmem:[%s22494_s16 + $0xedc] ss:$72 sps:$4 sm:$0xff]  }
 0x412   : > { %6758 = vmatprep.subr.bf16.mxu1 %v20428_v42  ;;  %v20476_v40 = vld [vmem:[%s22494_s16 + $0x17dc] ss:$72 sps:$4 sm:$0xff]   ;;  %v20471_v42 = vld [vmem:[%s22494_s16 + $0xed8] ss:$72 sps:$4 sm:$0xff]  }
 0x414   : > { %6718 = vmatpush1.bf16.msra.mxu0 %v20423_v43  ;;  %v20474_v43 = vld [vmem:[%s22494_s16 + $0x17d8] ss:$72 sps:$4 sm:$0xff]  }
 0x415   : > { %6759 = vmatpush1.bf16.msra.mxu1 %v20426_v44  ;;  %6719 = vmatprep.subr.bf16.mxu0 %v20431_v45  ;;  %v20479_v44 = vld [vmem:[%s22494_s16 + $0xf6c] ss:$72 sps:$4 sm:$0xff]  }
 0x416   : > { %6760 = vmatprep.subr.bf16.mxu1 %v20434_v47  ;;  %v20482_v45 = vld [vmem:[%s22494_s16 + $0x186c] ss:$72 sps:$4 sm:$0xff]   ;;  %v20477_v47 = vld [vmem:[%s22494_s16 + $0xf68] ss:$72 sps:$4 sm:$0xff]  }
 0x418   : > { %6720 = vmatpush1.bf16.msra.mxu0 %v20429_v48  ;;  %v20480_v48 = vld [vmem:[%s22494_s16 + $0x1868] ss:$72 sps:$4 sm:$0xff]  }
 0x419   : > { %6761 = vmatpush1.bf16.msra.mxu1 %v20432_v20  ;;  %6721 = vmatprep.subr.bf16.mxu0 %v20437_v51  ;;  %v20485_v20 = vld [vmem:[%s22494_s16 + $0xffc] ss:$72 sps:$4 sm:$0xff]  }
 0x41a   : > { %6762 = vmatprep.subr.bf16.mxu1 %v20440_v52  ;;  %v20488_v51 = vld [vmem:[%s22494_s16 + $0x18fc] ss:$72 sps:$4 sm:$0xff]   ;;  %v20483_v52 = vld [vmem:[%s22494_s16 + $0xff8] ss:$72 sps:$4 sm:$0xff]  }
 0x41c   : > { %6722 = vmatpush1.bf16.msra.mxu0 %v20435_v26  ;;  %v20486_v26 = vld [vmem:[%s22494_s16 + $0x18f8] ss:$72 sps:$4 sm:$0xff]  }
 0x41d   : > { %6763 = vmatpush1.bf16.msra.mxu1 %v20438_v54  ;;  %6723 = vmatprep.subr.bf16.mxu0 %v20443_v56  ;;  %v20491_v54 = vld [vmem:[%s22494_s16 + $0x108c] ss:$72 sps:$4 sm:$0xff]  }
 0x41e   : > { %6764 = vmatprep.subr.bf16.mxu1 %v20446_v57  ;;  %v6419_v2 = vpop.f32.mrb[28].mxu0  ;;  %v20494_v56 = vld [vmem:[%s22494_s16 + $0x198c] ss:$72 sps:$4 sm:$0xff]   ;;  %v20489_v57 = vld [vmem:[%s22494_s16 + $0x1088] ss:$72 sps:$4 sm:$0xff]  }
 0x41f   : > { %v23373_v6 = vpop.f32.mrb[28].mxu1  ;;  %v6420_v7 = vadd.f32 %v6419_v2, %v23301_v36  ;;  %v6421_v11 = vpop.f32.mrb[29].mxu0  ;;  %v20455_v36 = vld [vmem:[%s22494_s16 + $0xd2c] ss:$72 sps:$4 sm:$0xff]  }
 0x420   : > { %v23381_v12 = vpop.f32.mrb[29].mxu1  ;;  %v23384_v13 = vadd.f32 %v6421_v11, %v23303_v38  ;;  %6724 = vmatpush1.bf16.msra.mxu0 %v20441_v60  ;;  %v6423_v17 = vpop.f32.mrb[30].mxu0  ;;  %v20453_v38 = vld [vmem:[%s22494_s16 + $0xd28] ss:$72 sps:$4 sm:$0xff]   ;;  %v20497_v60 = vld [vmem:[%s22494_s16 + $0x111c] ss:$72 sps:$4 sm:$0xff]  }
 0x421   : > { %v6464_v16 = vpop.f32.mrb[30].mxu1  ;;  %6765 = vmatpush1.bf16.msra.mxu1 %v20444_v61  ;;  %v6974_v19 = vadd.f32 %v6959_v63, %v6420_v7  ;;  %6725 = vmatprep.subr.bf16.mxu0 %v20449_v62  ;;  %v6424_v25 = vpop.f32.mrb[31].mxu0  ;;  %v20500_v61 = vld [vmem:[%s22494_s16 + $0x1a1c] ss:$72 sps:$4 sm:$0xff]   ;;  %v20495_v62 = vld [vmem:[%s22494_s16 + $0x1118] ss:$72 sps:$4 sm:$0xff]  }
 0x422   : > { %v6465_v21 = vpop.f32.mrb[31].mxu1  ;;  %6766 = vmatprep.subr.bf16.mxu1 %v20452_v0  ;;  %v20498_v63 = vld [vmem:[%s22494_s16 + $0x1a18] ss:$72 sps:$4 sm:$0xff]   ;;  %v20503_v0 = vld [vmem:[%s22494_s16 + $0x11ac] ss:$72 sps:$4 sm:$0xff]  }
 0x423   : > { %7256 = vrot.lane.b32.xlu1 %v6974_v19, %s22075_s6  ;;  %v20506_v2 = vld [vmem:[%s22494_s16 + $0x1aac] ss:$72 sps:$4 sm:$0xff]   ;;  %v20507_v16 = vld [vmem:[%s22494_s16 + $0x40] ss:$72 sps:$4 sm:$0xff]   ;;  %v20513_v21 = vld [vmem:[%s22494_s16 + $0xd0] ss:$72 sps:$4 sm:$0xff]  }
 0x424   : > { %6726 = vmatpush1.bf16.msra.mxu0 %v20447_v29  ;;  %v20501_v29 = vld [vmem:[%s22494_s16 + $0x11a8] ss:$72 sps:$4 sm:$0xff]   ;;  %v20509_v7 = vld [vmem:[%s22494_s16 + $0x44] ss:$72 sps:$4 sm:$0xff]   ;;  %v20518_v19 = vld [vmem:[%s22494_s16 + $0x9d4] ss:$72 sps:$4 sm:$0xff]  }
 0x425   : > { %6767 = vmatpush1.bf16.msra.mxu1 %v20450_v8  ;;  %6727 = vmatprep.subr.bf16.mxu0 %v20455_v36  ;;  %v20504_v8 = vld [vmem:[%s22494_s16 + $0x1aa8] ss:$72 sps:$4 sm:$0xff]   ;;  %v20512_v11 = vld [vmem:[%s22494_s16 + $0x944] ss:$72 sps:$4 sm:$0xff]  }
 0x426   : > { %6768 = vmatprep.subr.bf16.mxu1 %v20458_v22  ;;  %v20510_v17 = vld [vmem:[%s22494_s16 + $0x940] ss:$72 sps:$4 sm:$0xff]   ;;  %v20516_v36 = vld [vmem:[%s22494_s16 + $0x9d0] ss:$72 sps:$4 sm:$0xff]   ;;  %v20521_v22 = vld [vmem:[%s22494_s16 + $0x164] ss:$72 sps:$4 sm:$0xff]  }
 0x427   : > { %7249 = vrot.lane.b32.xlu1 %v6944_v32, %s22075_s6  ;;  %v20524_v25 = vld [vmem:[%s22494_s16 + $0xa64] ss:$72 sps:$4 sm:$0xff]   ;;  %v20525_v32 = vld [vmem:[%s22494_s16 + $0x1f0] ss:$72 sps:$4 sm:$0xff]  }
 0x428   : > { %6728 = vmatpush1.bf16.msra.mxu0 %v20453_v38  ;;  %v20519_v38 = vld [vmem:[%s22494_s16 + $0x160] ss:$72 sps:$4 sm:$0xff]  }
 0x429   : > { %6769 = vmatpush1.bf16.msra.mxu1 %v20456_v28  ;;  %6729 = vmatprep.subr.bf16.mxu0 %v20461_v30  ;;  %v20522_v28 = vld [vmem:[%s22494_s16 + $0xa60] ss:$72 sps:$4 sm:$0xff]   ;;  %v20527_v30 = vld [vmem:[%s22494_s16 + $0x1f4] ss:$72 sps:$4 sm:$0xff]  }
 0x42a   : > { %6770 = vmatprep.subr.bf16.mxu1 %v20464_v3  ;;  %v20530_v3 = vld [vmem:[%s22494_s16 + $0xaf4] ss:$72 sps:$4 sm:$0xff]  }
 0x42c   : > { %6730 = vmatpush1.bf16.msra.mxu0 %v20459_v34  ;;  %v20528_v34 = vld [vmem:[%s22494_s16 + $0xaf0] ss:$72 sps:$4 sm:$0xff]  }
 0x42d   : > { %6771 = vmatpush1.bf16.msra.mxu1 %v20462_v35  ;;  %6731 = vmatprep.subr.bf16.mxu0 %v20467_v1  ;;  %v20533_v35 = vld [vmem:[%s22494_s16 + $0x284] ss:$72 sps:$4 sm:$0xff]  }
 0x42e   : > { %6772 = vmatprep.subr.bf16.mxu1 %v20470_v37  ;;  %v20536_v1 = vld [vmem:[%s22494_s16 + $0xb84] ss:$72 sps:$4 sm:$0xff]   ;;  %v20539_v37 = vld [vmem:[%s22494_s16 + $0x314] ss:$72 sps:$4 sm:$0xff]  }
 0x430   : > { %6732 = vmatpush1.bf16.msra.mxu0 %v20465_v5  ;;  %v20542_v5 = vld [vmem:[%s22494_s16 + $0xc14] ss:$72 sps:$4 sm:$0xff]  }
 0x431   : > { %6773 = vmatpush1.bf16.msra.mxu1 %v20468_v49  ;;  %6733 = vmatprep.subr.bf16.mxu0 %v20473_v39  ;;  %v20537_v49 = vld [vmem:[%s22494_s16 + $0x310] ss:$72 sps:$4 sm:$0xff]  }
 0x432   : > { %6774 = vmatprep.subr.bf16.mxu1 %v20476_v40  ;;  %v20540_v39 = vld [vmem:[%s22494_s16 + $0xc10] ss:$72 sps:$4 sm:$0xff]   ;;  %v20545_v40 = vld [vmem:[%s22494_s16 + $0x3a4] ss:$72 sps:$4 sm:$0xff]  }
 0x434   : > { %6734 = vmatpush1.bf16.msra.mxu0 %v20471_v42  ;;  %v20548_v42 = vld [vmem:[%s22494_s16 + $0xca4] ss:$72 sps:$4 sm:$0xff]  }
 0x435   : > { %6775 = vmatpush1.bf16.msra.mxu1 %v20474_v43  ;;  %6735 = vmatprep.subr.bf16.mxu0 %v20479_v44 }
 0x436   : > { %6776 = vmatprep.subr.bf16.mxu1 %v20482_v45  ;;  %v20543_v45 = vld [vmem:[%s22494_s16 + $0x3a0] ss:$72 sps:$4 sm:$0xff]  }
 0x438   : > { %6736 = vmatpush1.bf16.msra.mxu0 %v20477_v47  ;;  %v20546_v47 = vld [vmem:[%s22494_s16 + $0xca0] ss:$72 sps:$4 sm:$0xff]  }
 0x439   : > { %6777 = vmatpush1.bf16.msra.mxu1 %v20480_v48  ;;  %6737 = vmatprep.subr.bf16.mxu0 %v20485_v20 }
 0x43a   : > { %6778 = vmatprep.subr.bf16.mxu1 %v20488_v51 }
 0x43c   : > { %6738 = vmatpush1.bf16.msra.mxu0 %v20483_v52  ;;  %v20551_v52 = vld [vmem:[%s22494_s16 + $0x434] ss:$72 sps:$4 sm:$0xff]  }
 0x43d   : > { %6779 = vmatpush1.bf16.msra.mxu1 %v20486_v26  ;;  %6739 = vmatprep.subr.bf16.mxu0 %v20491_v54  ;;  %v20554_v26 = vld [vmem:[%s22494_s16 + $0xd34] ss:$72 sps:$4 sm:$0xff]  }
 0x43e   : > { %6780 = vmatprep.subr.bf16.mxu1 %v20494_v56 }
 0x440   : > { %6740 = vmatpush1.bf16.msra.mxu0 %v20489_v57 }
 0x441   : > { %6781 = vmatpush1.bf16.msra.mxu1 %v20492_v59  ;;  %6741 = vmatprep.subr.bf16.mxu0 %v20497_v60 }
 0x442   : > { %6782 = vmatprep.subr.bf16.mxu1 %v20500_v61 }
 0x444   : > { %6742 = vmatpush1.bf16.msra.mxu0 %v20495_v62  ;;  %v20549_v62 = vld [vmem:[%s22494_s16 + $0x430] ss:$72 sps:$4 sm:$0xff]  }
 0x445   : > { %6783 = vmatpush1.bf16.msra.mxu1 %v20498_v63  ;;  %6743 = vmatprep.subr.bf16.mxu0 %v20503_v0  ;;  %v20552_v63 = vld [vmem:[%s22494_s16 + $0xd30] ss:$72 sps:$4 sm:$0xff]   ;;  %v20560_v0 = vld [vmem:[%s22494_s16 + $0xdc4] ss:$72 sps:$4 sm:$0xff]  }
 0x446   : > { %6784 = vmatprep.subr.bf16.mxu1 %v20506_v2  ;;  %v20555_v2 = vld [vmem:[%s22494_s16 + $0x4c0] ss:$72 sps:$4 sm:$0xff]  }
 0x448   : > { %6744 = vmatpush1.bf16.msra.mxu0 %v20501_v29  ;;  %v20558_v29 = vld [vmem:[%s22494_s16 + $0xdc0] ss:$72 sps:$4 sm:$0xff]  }
 0x449   : > { %6785 = vmatpush1.bf16.msra.mxu1 %v20504_v8  ;;  %6795 = vmatprep.subr.bf16.mxu0 %v20509_v7  ;;  %v20563_v8 = vld [vmem:[%s22494_s16 + $0x554] ss:$72 sps:$4 sm:$0xff]  }
 0x44a   : > { %6836 = vmatprep.subr.bf16.mxu1 %v20512_v11  ;;  %v20566_v7 = vld [vmem:[%s22494_s16 + $0xe54] ss:$72 sps:$4 sm:$0xff]   ;;  %v20561_v11 = vld [vmem:[%s22494_s16 + $0x550] ss:$72 sps:$4 sm:$0xff]  }
 0x44b   : > { %6746 = vmatmul.mubr.bf16.vlgmr.msra.gmra.mrb[44].mxu0 %v22604_v15 }
 0x44c   : > { %6787 = vmatmul.mubr.bf16.vlgmr.msra.gmra.mrb[44].mxu1 %v22676_v23  ;;  %6796 = vmatpush1.bf16.msra.mxu0 %v20507_v16  ;;  %v20564_v16 = vld [vmem:[%s22494_s16 + $0xe50] ss:$72 sps:$4 sm:$0xff]  }
 0x44d   : > { %6837 = vmatpush1.bf16.msra.mxu1 %v20510_v17  ;;  %6797 = vmatprep.subr.bf16.mxu0 %v20515_v18  ;;  %v20569_v17 = vld [vmem:[%s22494_s16 + $0x5e4] ss:$72 sps:$4 sm:$0xff]  }
 0x44e   : > { %6838 = vmatprep.subr.bf16.mxu1 %v20518_v19  ;;  %6827 = vmatprep.mubr.bf16.mxu0 %v22578_v55  ;;  %v20531_v55 = vld [vmem:[%s22494_s16 + $0x280] ss:$72 sps:$4 sm:$0xff]   ;;  %v20572_v18 = vld [vmem:[%s22494_s16 + $0xee4] ss:$72 sps:$4 sm:$0xff]  }
 0x44f   : > { %6868 = vmatprep.mubr.bf16.mxu1 %v22581_v58  ;;  %v20534_v58 = vld [vmem:[%s22494_s16 + $0xb80] ss:$72 sps:$4 sm:$0xff]  }
 0x450   : > { %6798 = vmatpush1.bf16.msra.mxu0 %v20513_v21  ;;  %v20567_v19 = vld [vmem:[%s22494_s16 + $0x5e0] ss:$72 sps:$4 sm:$0xff]  }
 0x451   : > { %6839 = vmatpush1.bf16.msra.mxu1 %v20516_v36  ;;  %6799 = vmatprep.subr.bf16.mxu0 %v20521_v22  ;;  %v20570_v21 = vld [vmem:[%s22494_s16 + $0xee0] ss:$72 sps:$4 sm:$0xff]   ;;  %v20575_v36 = vld [vmem:[%s22494_s16 + $0x674] ss:$72 sps:$4 sm:$0xff]  }
 0x452   : > { %6840 = vmatprep.subr.bf16.mxu1 %v20524_v25  ;;  %v20578_v22 = vld [vmem:[%s22494_s16 + $0xf74] ss:$72 sps:$4 sm:$0xff]   ;;  %v20573_v25 = vld [vmem:[%s22494_s16 + $0x670] ss:$72 sps:$4 sm:$0xff]  }
 0x454   : > { %6800 = vmatpush1.bf16.msra.mxu0 %v20519_v38  ;;  %v20576_v38 = vld [vmem:[%s22494_s16 + $0xf70] ss:$72 sps:$4 sm:$0xff]  }
 0x455   : > { %6841 = vmatpush1.bf16.msra.mxu1 %v20522_v28  ;;  %6801 = vmatprep.subr.bf16.mxu0 %v20527_v30  ;;  %v20581_v28 = vld [vmem:[%s22494_s16 + $0x704] ss:$72 sps:$4 sm:$0xff]  }
 0x456   : > { %6842 = vmatprep.subr.bf16.mxu1 %v20530_v3  ;;  %v20584_v30 = vld [vmem:[%s22494_s16 + $0x1004] ss:$72 sps:$4 sm:$0xff]   ;;  %v20579_v3 = vld [vmem:[%s22494_s16 + $0x700] ss:$72 sps:$4 sm:$0xff]  }
 0x458   : > { %6802 = vmatpush1.bf16.msra.mxu0 %v20525_v32  ;;  %v20582_v32 = vld [vmem:[%s22494_s16 + $0x1000] ss:$72 sps:$4 sm:$0xff]  }
 0x459   : > { %6843 = vmatpush1.bf16.msra.mxu1 %v20528_v34  ;;  %6803 = vmatprep.subr.bf16.mxu0 %v20533_v35  ;;  %v20587_v34 = vld [vmem:[%s22494_s16 + $0x794] ss:$72 sps:$4 sm:$0xff]  }
 0x45a   : > { %6844 = vmatprep.subr.bf16.mxu1 %v20536_v1  ;;  %v20590_v35 = vld [vmem:[%s22494_s16 + $0x1094] ss:$72 sps:$4 sm:$0xff]   ;;  %v20585_v1 = vld [vmem:[%s22494_s16 + $0x790] ss:$72 sps:$4 sm:$0xff]  }
 0x45c   : > { %6804 = vmatpush1.bf16.msra.mxu0 %v20531_v55  ;;  %v20588_v55 = vld [vmem:[%s22494_s16 + $0x1090] ss:$72 sps:$4 sm:$0xff]  }
 0x45d   : > { %6845 = vmatpush1.bf16.msra.mxu1 %v20534_v58  ;;  %6805 = vmatprep.subr.bf16.mxu0 %v20539_v37  ;;  %v20593_v58 = vld [vmem:[%s22494_s16 + $0x824] ss:$72 sps:$4 sm:$0xff]  }
 0x45e   : > { %6846 = vmatprep.subr.bf16.mxu1 %v20542_v5  ;;  %v6501_v43 = vpop.f32.mrb[32].mxu0  ;;  %v20596_v37 = vld [vmem:[%s22494_s16 + $0x1124] ss:$72 sps:$4 sm:$0xff]   ;;  %v20591_v5 = vld [vmem:[%s22494_s16 + $0x820] ss:$72 sps:$4 sm:$0xff]  }
 0x45f   : > { %v6542_v44 = vpop.f32.mrb[32].mxu1  ;;  %v6502_v48 = vadd.f32 %v6501_v43, %v23373_v6  ;;  %v6503_v20 = vpop.f32.mrb[33].mxu0  ;;  %v20600_v43 = vld [vmem:[%s22494_s16 + $0x11b0] ss:$72 sps:$4 sm:$0xff]  }
 0x460   : > { %v6544_v51 = vpop.f32.mrb[33].mxu1  ;;  %v6504_v54 = vadd.f32 %v6503_v20, %v23381_v12  ;;  %6806 = vmatpush1.bf16.msra.mxu0 %v20537_v49  ;;  %v6505_v57 = vpop.f32.mrb[34].mxu0  ;;  %v20557_v12 = vld [vmem:[%s22494_s16 + $0x4c4] ss:$72 sps:$4 sm:$0xff]   ;;  %v20594_v49 = vld [vmem:[%s22494_s16 + $0x1120] ss:$72 sps:$4 sm:$0xff]  }
 0x461   : > { %v6546_v56 = vpop.f32.mrb[34].mxu1  ;;  %6847 = vmatpush1.bf16.msra.mxu1 %v20540_v39  ;;  %v23462_v59 = vadd.f32 %v6542_v44, %v6502_v48  ;;  %6807 = vmatprep.subr.bf16.mxu0 %v20545_v40  ;;  %v6506_v60 = vpop.f32.mrb[35].mxu0  ;;  %v20599_v39 = vld [vmem:[%s22494_s16 + $0x8b4] ss:$72 sps:$4 sm:$0xff]   ;;  %v20605_v44 = vld [vmem:[%s22494_s16 + $0x1244] ss:$72 sps:$4 sm:$0xff]  }
 0x462   : > { %v6547_v6 = vpop.f32.mrb[35].mxu1  ;;  %6848 = vmatprep.subr.bf16.mxu1 %v20548_v42  ;;  %v23464_v61 = vadd.f32 %v6544_v51, %v6504_v54  ;;  %v20602_v40 = vld [vmem:[%s22494_s16 + $0x11b4] ss:$72 sps:$4 sm:$0xff]   ;;  %v20597_v42 = vld [vmem:[%s22494_s16 + $0x8b0] ss:$72 sps:$4 sm:$0xff]   ;;  %v23511_v51 = vld [vmem:[%s22510_s15] sm:$0xff] }
 0x463   : > { %v20603_v48 = vld [vmem:[%s22494_s16 + $0x1240] ss:$72 sps:$4 sm:$0xff]   ;;  %v20608_v20 = vld [vmem:[%s22494_s16 + $0x12d4] ss:$72 sps:$4 sm:$0xff]   ;;  %v20611_v54 = vld [vmem:[%s22494_s16 + $0x1364] ss:$72 sps:$4 sm:$0xff]  }
 0x464   : > { %6808 = vmatpush1.bf16.msra.mxu0 %v20543_v45  ;;  %v23502_v45 = vld [vmem:[%s22510_s15 + $0x8] sm:$0xff]  ;;  %v20614_v56 = vld [vmem:[%s22494_s16 + $0x13f4] ss:$72 sps:$4 sm:$0xff]   ;;  %v20612_v6 = vld [vmem:[%s22494_s16 + $0x13f0] ss:$72 sps:$4 sm:$0xff]  }
 0x465   : > { %6849 = vmatpush1.bf16.msra.mxu1 %v20546_v47  ;;  %6809 = vmatprep.subr.bf16.mxu0 %v20551_v52  ;;  %v6925_v47 = vrot.slane %v23502_v45, %v23378_v9  ;;  %v20615_v60 = vld [vmem:[%s22494_s16 + $0x1480] ss:$72 sps:$4 sm:$0xff]  }
 0x466   : > { %6850 = vmatprep.subr.bf16.mxu1 %v20554_v26  ;;  %v6951_v26 = vrot.slane %v23511_v51, %v23217_v50 }
 0x467   : > { %v23514_v52 = vadd.f32 %v6925_v47, %v22924_v27  ;;  %v6921_v27 = vrot.slane %v23511_v51, %v23378_v9 }
 0x468   : > { %6810 = vmatpush1.bf16.msra.mxu0 %v20549_v62  ;;  %v20620_v62 = vld [vmem:[%s22494_s16 + $0x1514] ss:$72 sps:$4 sm:$0xff]  }
 0x469   : > { %6851 = vmatpush1.bf16.msra.mxu1 %v20552_v63  ;;  %6811 = vmatprep.subr.bf16.mxu0 %v20557_v12  ;;  %v6942_v57 = vadd.f32 %v6921_v27, %v22919_v24  ;;  %v20623_v63 = vld [vmem:[%s22494_s16 + $0x15a4] ss:$72 sps:$4 sm:$0xff]  }
 0x46a   : > { %6852 = vmatprep.subr.bf16.mxu1 %v20560_v0 }
 0x46c   : > { %6812 = vmatpush1.bf16.msra.mxu0 %v20555_v2 }
 0x46d   : > { %6853 = vmatpush1.bf16.msra.mxu1 %v20558_v29  ;;  %6813 = vmatprep.subr.bf16.mxu0 %v20563_v8 }
 0x46e   : > { %6854 = vmatprep.subr.bf16.mxu1 %v20566_v7 }
 0x470   : > { %6814 = vmatpush1.bf16.msra.mxu0 %v20561_v11  ;;  %v20621_v11 = vld [vmem:[%s22494_s16 + $0x15a0] ss:$72 sps:$4 sm:$0xff]  }
 0x471   : > { %6855 = vmatpush1.bf16.msra.mxu1 %v20564_v16  ;;  %6815 = vmatprep.subr.bf16.mxu0 %v20569_v17 }
 0x472   : > { %6856 = vmatprep.subr.bf16.mxu1 %v20572_v18  ;;  %v20626_v18 = vld [vmem:[%s22494_s16 + $0x1634] ss:$72 sps:$4 sm:$0xff]  }
 0x474   : > { %6816 = vmatpush1.bf16.msra.mxu0 %v20567_v19 }
 0x475   : > { %6857 = vmatpush1.bf16.msra.mxu1 %v20570_v21  ;;  %6817 = vmatprep.subr.bf16.mxu0 %v20575_v36  ;;  %v20624_v21 = vld [vmem:[%s22494_s16 + $0x1630] ss:$72 sps:$4 sm:$0xff]   ;;  %v20629_v36 = vld [vmem:[%s22494_s16 + $0x16c4] ss:$72 sps:$4 sm:$0xff]  }
 0x476   : > { %6858 = vmatprep.subr.bf16.mxu1 %v20578_v22  ;;  %v20627_v22 = vld [vmem:[%s22494_s16 + $0x16c0] ss:$72 sps:$4 sm:$0xff]  }
 0x478   : > { %6818 = vmatpush1.bf16.msra.mxu0 %v20573_v25  ;;  %v20632_v25 = vld [vmem:[%s22494_s16 + $0x1754] ss:$72 sps:$4 sm:$0xff]  }
 0x479   : > { %6859 = vmatpush1.bf16.msra.mxu1 %v20576_v38  ;;  %6819 = vmatprep.subr.bf16.mxu0 %v20581_v28  ;;  %v20630_v38 = vld [vmem:[%s22494_s16 + $0x1750] ss:$72 sps:$4 sm:$0xff]   ;;  %v20635_v28 = vld [vmem:[%s22494_s16 + $0x17e4] ss:$72 sps:$4 sm:$0xff]  }
 0x47a   : > { %6860 = vmatprep.subr.bf16.mxu1 %v20584_v30  ;;  %v20633_v30 = vld [vmem:[%s22494_s16 + $0x17e0] ss:$72 sps:$4 sm:$0xff]  }
 0x47c   : > { %6820 = vmatpush1.bf16.msra.mxu0 %v20579_v3  ;;  %v20638_v3 = vld [vmem:[%s22494_s16 + $0x1874] ss:$72 sps:$4 sm:$0xff]  }
 0x47d   : > { %6861 = vmatpush1.bf16.msra.mxu1 %v20582_v32  ;;  %6821 = vmatprep.subr.bf16.mxu0 %v20587_v34  ;;  %v20636_v32 = vld [vmem:[%s22494_s16 + $0x1870] ss:$72 sps:$4 sm:$0xff]   ;;  %v20641_v34 = vld [vmem:[%s22494_s16 + $0x1904] ss:$72 sps:$4 sm:$0xff]  }
 0x47e   : > { %6862 = vmatprep.subr.bf16.mxu1 %v20590_v35  ;;  %v20639_v35 = vld [vmem:[%s22494_s16 + $0x1900] ss:$72 sps:$4 sm:$0xff]  }
 0x480   : > { %6822 = vmatpush1.bf16.msra.mxu0 %v20585_v1  ;;  %v20644_v1 = vld [vmem:[%s22494_s16 + $0x1994] ss:$72 sps:$4 sm:$0xff]  }
 0x481   : > { %6863 = vmatpush1.bf16.msra.mxu1 %v20588_v55  ;;  %6823 = vmatprep.subr.bf16.mxu0 %v20593_v58  ;;  %v20642_v55 = vld [vmem:[%s22494_s16 + $0x1990] ss:$72 sps:$4 sm:$0xff]   ;;  %v20647_v58 = vld [vmem:[%s22494_s16 + $0x1a24] ss:$72 sps:$4 sm:$0xff]  }
 0x482   : > { %6864 = vmatprep.subr.bf16.mxu1 %v20596_v37  ;;  %v20645_v37 = vld [vmem:[%s22494_s16 + $0x1a20] ss:$72 sps:$4 sm:$0xff]  }
 0x484   : > { %6824 = vmatpush1.bf16.msra.mxu0 %v20591_v5  ;;  %v20650_v5 = vld [vmem:[%s22494_s16 + $0x1ab4] ss:$72 sps:$4 sm:$0xff]  }
 0x485   : > { %6865 = vmatpush1.bf16.msra.mxu1 %v20594_v49  ;;  %6825 = vmatprep.subr.bf16.mxu0 %v20599_v39  ;;  %v20648_v49 = vld [vmem:[%s22494_s16 + $0x1ab0] ss:$72 sps:$4 sm:$0xff]   ;;  %v23558_v39 = vsub.s32 2, %v23212_v46 }
 0x486   : > { %6866 = vmatprep.subr.bf16.mxu1 %v20602_v40  ;;  %v23560_v40 = vpop.permute.xlu1 %7254 }
 0x487   : > { %25435 = vst [vmem:[#allocation30_spill] sm:$0xff] %v23558_v39 }
 0x488   : > { %6826 = vmatpush1.bf16.msra.mxu0 %v20597_v42 }
 0x489   : > { %6867 = vmatpush1.bf16.msra.mxu1 %v20600_v43  ;;  %6877 = vmatprep.subr.bf16.mxu0 %v20605_v44  ;;  %v6985_v44 = vrot.slane %v23502_v45, %v23558_v39 }
 0x48a   : > { %17696 = vmatprep.subr.msk.mxu1 %vm7008_vm0, %v23231_v10  ;;  %v20606_v10 = vld [vmem:[%s22494_s16 + $0x12d0] ss:$72 sps:$4 sm:$0xff]  }
 0x48b   : > { %6828 = vmatmul.mubr.bf16.vlgmr.msra.gmra.mrb[48].mxu0 %v22602_v14  ;;  %v6972_v14 = vadd.f32 %v6951_v26, %v23227_v4  ;;  %v20618_v4 = vld [vmem:[%s22494_s16 + $0x1510] ss:$72 sps:$4 sm:$0xff]  }
 0x48c   : > { %6869 = vmatmul.mubr.bf16.vlgmr.msra.gmra.mrb[48].mxu1 %v22604_v15  ;;  %6878 = vmatpush1.bf16.msra.mxu0 %v20603_v48  ;;  %v20609_v15 = vld [vmem:[%s22494_s16 + $0x1360] ss:$72 sps:$4 sm:$0xff]   ;;  %v6981_v48 = vrot.slane %v23511_v51, %v23558_v39 }
 0x48d   : > { %17697 = vmatprep.mubr.msk.f32.mxu1 %vm7008_vm0, %v23514_v52  ;;  %6879 = vmatprep.subr.bf16.mxu0 %v20608_v20 }
 0x48e   : > { %6909 = vmatprep.mubr.bf16.mxu0 %v22633_v41  ;;  %v20617_v41 = vld [vmem:[%s22494_s16 + $0x1484] ss:$72 sps:$4 sm:$0xff]  }
 0x490   : > { %6880 = vmatpush1.bf16.msra.mxu0 %v20606_v10 }
 0x491   : > { %6881 = vmatprep.subr.bf16.mxu0 %v20611_v54 }
 0x492   : > { %7016 = vmatpush1.xpose.msra.mxu1 %v6972_v14 }
 0x494   : > { %6882 = vmatpush1.bf16.msra.mxu0 %v20609_v15 }
 0x495   : > { %7080 = vmatmul.mubr.f32.vlgmr.msra.gmra.mrb[52].mxu1 %v6942_v57  ;;  %6883 = vmatprep.subr.bf16.mxu0 %v20614_v56  ;;  %v7257_v57 = vpop.permute.xlu1 %7256 }
 0x498   : > { %6884 = vmatpush1.bf16.msra.mxu0 %v20612_v6 }
 0x499   : > { %6885 = vmatprep.subr.bf16.mxu0 %v20617_v41 }
 0x49c   : > { %6886 = vmatpush1.bf16.msra.mxu0 %v20615_v60 }
 0x49d   : > { %6887 = vmatprep.subr.bf16.mxu0 %v20620_v62 }
 0x49e   : > { %v6583_v12 = vpop.f32.mrb[36].mxu0 }
 0x49f   : > { %v6624_v0 = vpop.f32.mrb[36].mxu1  ;;  %v6585_v2 = vpop.f32.mrb[37].mxu0 }
 0x4a0   : > { %v6625_v24 = vadd.f32 %v6624_v0, %v6583_v12  ;;  %v6626_v29 = vpop.f32.mrb[37].mxu1  ;;  %6888 = vmatpush1.bf16.msra.mxu0 %v20618_v4  ;;  %v6587_v16 = vpop.f32.mrb[38].mxu0 }
 0x4a1   : > { %v6627_v8 = vadd.f32 %v6626_v29, %v6585_v2  ;;  %v6628_v7 = vpop.f32.mrb[38].mxu1  ;;  %6889 = vmatprep.subr.bf16.mxu0 %v20623_v63  ;;  %v6588_v19 = vpop.f32.mrb[39].mxu0 }
 0x4a2   : > { %v6629_v17 = vpop.f32.mrb[39].mxu1 }
 0x4a4   : > { %6890 = vmatpush1.bf16.msra.mxu0 %v20621_v11 }
 0x4a5   : > { %6891 = vmatprep.subr.bf16.mxu0 %v20626_v18 }
 0x4a8   : > { %6892 = vmatpush1.bf16.msra.mxu0 %v20624_v21 }
 0x4a9   : > { %6893 = vmatprep.subr.bf16.mxu0 %v20629_v36 }
 0x4ac   : > { %6894 = vmatpush1.bf16.msra.mxu0 %v20627_v22 }
 0x4ad   : > { %6895 = vmatprep.subr.bf16.mxu0 %v20632_v25 }
 0x4b0   : > { %6896 = vmatpush1.bf16.msra.mxu0 %v20630_v38 }
 0x4b1   : > { %6897 = vmatprep.subr.bf16.mxu0 %v20635_v28 }
 0x4b4   : > { %6898 = vmatpush1.bf16.msra.mxu0 %v20633_v30 }
 0x4b5   : > { %6899 = vmatprep.subr.bf16.mxu0 %v20638_v3 }
 0x4b8   : > { %6900 = vmatpush1.bf16.msra.mxu0 %v20636_v32 }
 0x4b9   : > { %6901 = vmatprep.subr.bf16.mxu0 %v20641_v34 }
 0x4bc   : > { %6902 = vmatpush1.bf16.msra.mxu0 %v20639_v35 }
 0x4bd   : > { %6903 = vmatprep.subr.bf16.mxu0 %v20644_v1 }
 0x4c0   : > { %6904 = vmatpush1.bf16.msra.mxu0 %v20642_v55 }
 0x4c1   : > { %6905 = vmatprep.subr.bf16.mxu0 %v20647_v58 }
 0x4c4   : > { %6906 = vmatpush1.bf16.msra.mxu0 %v20645_v37 }
 0x4c5   : > { %6907 = vmatprep.subr.bf16.mxu0 %v20650_v5 }
 0x4c8   : > { %6908 = vmatpush1.bf16.msra.mxu0 %v20648_v49 }
 0x4cb   : > { %6910 = vmatmul.mubr.bf16.vlgmr.msra.gmra.mrb[52].mxu0 %v22676_v23 }
 0x4de   : > { %v6665_v42 = vpop.f32.mrb[40].mxu0 }
 0x4df   : > { %v6706_v43 = vpop.f32.mrb[40].mxu1  ;;  %v6666_v47 = vadd.f32 %v6665_v42, %v6625_v24  ;;  %v6667_v20 = vpop.f32.mrb[41].mxu0  ;;  %v22076_v42 = vmov 0.0  }
 0x4e0   : > { %v6708_v26 = vpop.f32.mrb[41].mxu1  ;;  %v6668_v10 = vadd.f32 %v6667_v20, %v6627_v8  ;;  %v6669_v27 = vpop.f32.mrb[42].mxu0  ;;  %7165 = vmatprep.mubr.f32.mxu1 %v22076_v42 }
 0x4e1   : > { %v6710_v54 = vpop.f32.mrb[42].mxu1  ;;  %v6670_v14 = vpop.f32.mrb[43].mxu0  ;;  %v7002_v56 = vadd.f32 %v6981_v48, %v6666_v47  ;;  %v7258_v48 = vsel %vm7008_vm0, %v23560_v40, %v7257_v57 }
 0x4e2   : > { %v6711_v23 = vpop.f32.mrb[43].mxu1  ;;  %v23566_v15 = vadd.f32 %v6985_v44, %v6668_v10  ;;  %v7250_v20 = vpop.permute.xlu1 %7249 }
 0x4e4   : > { %7101 = vmatprep.subr.mxu1 %v23566_v15 }
 0x4e5   : > { %7102 = vmatpush1.msra.mxu1 %v7002_v56 }
 0x4e6   : > { %17699 = vmatprep.subr.msk.mxu1 %vm7008_vm0, %v7257_v57 }
 0x51e   : > { %v6747_v45 = vpop.f32.mrb[44].mxu0 }
 0x51f   : > { %v6788_v6 = vpop.f32.mrb[44].mxu1  ;;  %v6748_v41 = vadd.f32 %v6747_v45, %v6706_v43  ;;  %v6749_v51 = vpop.f32.mrb[45].mxu0 }
 0x520   : > { %v6790_v60 = vpop.f32.mrb[45].mxu1  ;;  %v6750_v62 = vadd.f32 %v6749_v51, %v6708_v26  ;;  %v6751_v63 = vpop.f32.mrb[46].mxu0  ;;  %v21680_v51 = vld [vmem:[%s22510_s15 + $0x10] sm:$0xff] }
 0x521   : > { %v6792_v4 = vpop.f32.mrb[46].mxu1  ;;  %v23570_v12 = vadd.f32 %v6788_v6, %v6748_v41  ;;  %v6752_v24 = vpop.f32.mrb[47].mxu0  ;;  %v20662_v63 = vld [vmem:[%s22500_s13 + $0x27c] ss:$24 sps:$4 sm:$0xff]  }
 0x522   : > { %v6793_v0 = vpop.f32.mrb[47].mxu1  ;;  %v23572_v2 = vadd.f32 %v6790_v60, %v6750_v62  ;;  %v6989_v60 = vrot.slane %v21680_v51, %v23558_v39  ;;  %v20656_v4 = vld [vmem:[%s22500_s13 + $0x24c] ss:$24 sps:$4 sm:$0xff]   ;;  %v20699_v51 = vld [vmem:[%s22500_s13 + $0x3c0] ss:$24 sps:$4 sm:$0xff]  }
 0x523   : > { %7907 = vmatprep.subr.bf16.mxu0 %v20656_v4  ;;  %v20660_v0 = vld [vmem:[%s22500_s13 + $0x278] ss:$24 sps:$4 sm:$0xff]   ;;  %v20668_v24 = vld [vmem:[%s22500_s13 + $0x2ac] ss:$24 sps:$4 sm:$0xff]  }
 0x524   : > { %v7004_v62 = vadd.f32 %v6989_v60, %v23570_v12  ;;  %v20674_v12 = vld [vmem:[%s22500_s13 + $0x2dc] ss:$24 sps:$4 sm:$0xff]   ;;  %v20711_v4 = vld [vmem:[%s22500_s13 + $0x420] ss:$24 sps:$4 sm:$0xff]  }
 0x525   : > { %v20707_v60 = vld [vmem:[%s22500_s13 + $0x3f4] ss:$24 sps:$4 sm:$0xff]  }
 0x55e   : > { %v6829_v29 = vpop.f32.mrb[48].mxu0 }
 0x55f   : > { %v6870_v8 = vpop.f32.mrb[48].mxu1  ;;  %v6831_v11 = vpop.f32.mrb[49].mxu0 }
 0x560   : > { %v6871_v7 = vadd.f32 %v6870_v8, %v6829_v29  ;;  %v6872_v16 = vpop.f32.mrb[49].mxu1  ;;  %v6833_v19 = vpop.f32.mrb[50].mxu0  ;;  %v20666_v29 = vld [vmem:[%s22500_s13 + $0x2a8] ss:$24 sps:$4 sm:$0xff]   ;;  %v20672_v8 = vld [vmem:[%s22500_s13 + $0x2d8] ss:$24 sps:$4 sm:$0xff]  }
 0x561   : > { %v6873_v17 = vadd.f32 %v6872_v16, %v6831_v11  ;;  %v6874_v18 = vpop.f32.mrb[50].mxu1  ;;  %v6834_v36 = vpop.f32.mrb[51].mxu0  ;;  %v20678_v11 = vld [vmem:[%s22500_s13 + $0x308] ss:$24 sps:$4 sm:$0xff]   ;;  %v20686_v16 = vld [vmem:[%s22500_s13 + $0x33c] ss:$24 sps:$4 sm:$0xff]  }
 0x562   : > { %v6875_v21 = vpop.f32.mrb[51].mxu1  ;;  %v20692_v18 = vld [vmem:[%s22500_s13 + $0x36c] ss:$24 sps:$4 sm:$0xff]   ;;  %v20690_v19 = vld [vmem:[%s22500_s13 + $0x368] ss:$24 sps:$4 sm:$0xff]  }
 0x563   : > { %v20698_v21 = vld [vmem:[%s22500_s13 + $0x39c] ss:$24 sps:$4 sm:$0xff]   ;;  %v20696_v36 = vld [vmem:[%s22500_s13 + $0x398] ss:$24 sps:$4 sm:$0xff]  }
 0x568   : > { %v7081_v22 = vpop.f32.mrb[52].mxu1 }
 0x569   : > { %v7085_v25 = vmul.f32 0.07216878, %v7081_v22  ;;  %v7083_v38 = vpop.f32.mrb[53].mxu1  ;;  %v20704_v22 = vld [vmem:[%s22500_s13 + $0x3cc] ss:$24 sps:$4 sm:$0xff]  }
 0x56a   : > { %v20710_v38 = vld [vmem:[%s22500_s13 + $0x3fc] ss:$24 sps:$4 sm:$0xff]  }
 0x56b   : > { %v7087_v28 = vsel %vm7086_vm1, %v7085_v25, -inf }
 0x56c   : > { %7088 = vmax.xlane.f32.xlu0 %v7087_v28  ;;  %v20708_v28 = vld [vmem:[%s22500_s13 + $0x3f8] ss:$24 sps:$4 sm:$0xff]  }
 0x59e   : > { %v6911_v30 = vpop.f32.mrb[52].mxu0 }
 0x59f   : > { %v23575_v3 = vadd.f32 %v6911_v30, %v6871_v7  ;;  %v6913_v32 = vpop.f32.mrb[53].mxu0  ;;  %v20680_v7 = vld [vmem:[%s22500_s13 + $0x30c] ss:$24 sps:$4 sm:$0xff]  }
 0x5a0   : > { %v23577_v34 = vadd.f32 %v6913_v32, %v6873_v17  ;;  %v6915_v35 = vpop.f32.mrb[54].mxu0  ;;  %v20684_v17 = vld [vmem:[%s22500_s13 + $0x338] ss:$24 sps:$4 sm:$0xff]   ;;  %v20716_v30 = vld [vmem:[%s22500_s13 + $0x42c] ss:$24 sps:$4 sm:$0xff]  }
 0x5a1   : > { %v6916_v1 = vpop.f32.mrb[55].mxu0  ;;  %v20714_v32 = vld [vmem:[%s22500_s13 + $0x428] ss:$24 sps:$4 sm:$0xff]  }
 0x5a2   : > { %v20653_v1 = vld [vmem:[%s22500_s13 + $0x244] ss:$24 sps:$4 sm:$0xff]  }
 0x5f9   : > { %v7089_v55 = vpop.xlane.xlu0 %7088 }
 0x5fa   : > { %v7090_v58 = vsub.f32 %v7085_v25, %v7089_v55  ;;  %v20702_v25 = vld [vmem:[%s22500_s13 + $0x3c8] ss:$24 sps:$4 sm:$0xff]  }
 0x5fc   : > { %v7091_v37 = vmul.f32 1.442695, %v7090_v58 }
 0x5fe   : > { %21659 = vpow2.f32 %v7091_v37 }
 0x608   : > { %v21660_v5 = vpop.eup %21659 }
 0x609   : > { %v7093_v49 = vsel %vm7086_vm1, %v21660_v5, 0.0 }
 0x60a   : > { %7094 = vadd.xlane.f32.xlu0 %v7093_v49  ;;  %v20651_v49 = vld [vmem:[%s22500_s13 + $0x240] ss:$24 sps:$4 sm:$0xff]  }
 0x620   : > { %7247 = vrot.lane.b32.xlu0 %v23514_v52, %s22075_s6 }
 0x697   : > { %v7095_v43 = vpop.xlane.xlu0 %7094 }
 0x698   : > { %21661 = vrcp.f32 %v7095_v43 }
 0x69b   : > { %v7248_v26 = vpop.permute.xlu0 %7247 }
 0x69c   : > { %v7251_v10 = vsel %vm7008_vm0, %v7248_v26, %v7250_v20  ;;  %v20671_v26 = vld [vmem:[%s22500_s13 + $0x2d4] ss:$24 sps:$4 sm:$0xff]  }
 0x6a2   : > { %v21662_v44 = vpop.eup %21661 }
 0x6a3   : > { %v7097_v47 = vmul.f32 %v21662_v44, %v21660_v5  ;;  %v20659_v44 = vld [vmem:[%s22500_s13 + $0x274] ss:$24 sps:$4 sm:$0xff]  }
 0x6a5   : > { %17698 = vmatmul.mubr.msk.f32.vlgmr.msra.gmra.mrb[54].mxu1 %vm7086_vm1, %v7097_v47  ;;  %v20657_v47 = vld [vmem:[%s22500_s13 + $0x270] ss:$24 sps:$4 sm:$0xff]  }
 0x6a6   : > { %7265 = vmatpush1.xpose.msra.mxu1 %v7258_v48  ;;  %17700 = vmatprep.mubr.msk.f32.mxu1 %vm7008_vm0, %v7250_v20  ;;  %v20665_v48 = vld [vmem:[%s22500_s13 + $0x2a4] ss:$24 sps:$4 sm:$0xff]   ;;  %v20663_v20 = vld [vmem:[%s22500_s13 + $0x2a0] ss:$24 sps:$4 sm:$0xff]  }
 0x6a9   : > { %7329 = vmatmul.mubr.f32.vlgmr.msra.gmra.mrb[56].mxu1 %v7251_v10  ;;  %v20669_v10 = vld [vmem:[%s22500_s13 + $0x2d0] ss:$24 sps:$4 sm:$0xff]  }
 0x6aa   : > { %7422 = vmatprep.mubr.f32.mxu1 %v22076_v42 }
 0x778   : > { %v23589_v52 = vpop.f32.mrb[54].mxu1 }
 0x779   : > { %v23591_v54 = vpop.f32.mrb[55].mxu1 }
 0x77c   : > { %v7330_v27 = vpop.f32.mrb[56].mxu1 }
 0x77d   : > { %v7334_v23 = vmul.f32 0.07216878, %v7330_v27  ;;  %v7332_v40 = vpop.f32.mrb[57].mxu1  ;;  %v20677_v27 = vld [vmem:[%s22500_s13 + $0x304] ss:$24 sps:$4 sm:$0xff]  }
 0x77e   : > { %v20683_v40 = vld [vmem:[%s22500_s13 + $0x334] ss:$24 sps:$4 sm:$0xff]  }
 0x77f   : > { %v7335_v14 = vsel %vm7086_vm1, %v7334_v23, -inf }
 0x780   : > { %7336 = vmax.xlane.f32.xlu1 %v7335_v14  ;;  %v20681_v14 = vld [vmem:[%s22500_s13 + $0x330] ss:$24 sps:$4 sm:$0xff]  }
 0x791   : > { %7348 = vrot.lane.b32.xlu1 %v23566_v15, %s22075_s6  ;;  %v20654_v15 = vld [vmem:[%s22500_s13 + $0x248] ss:$24 sps:$4 sm:$0xff]  }
 0x792   : > { %7908 = vmatpush1.bf16.msra.mxu0 %v20654_v15  ;;  %v20713_v15 = vld [vmem:[%s22500_s13 + $0x424] ss:$24 sps:$4 sm:$0xff]  }
 0x793   : > { %7909 = vmatprep.subr.bf16.mxu0 %v20662_v63  ;;  %v20719_v63 = vld [vmem:[%s22500_s13 + $0x454] ss:$24 sps:$4 sm:$0xff]  }
 0x796   : > { %7910 = vmatpush1.bf16.msra.mxu0 %v20660_v0  ;;  %v20722_v0 = vld [vmem:[%s22500_s13 + $0x45c] ss:$24 sps:$4 sm:$0xff]  }
 0x797   : > { %7911 = vmatprep.subr.bf16.mxu0 %v20668_v24  ;;  %v20717_v24 = vld [vmem:[%s22500_s13 + $0x450] ss:$24 sps:$4 sm:$0xff]  }
 0x79a   : > { %7912 = vmatpush1.bf16.msra.mxu0 %v20666_v29  ;;  %v20720_v29 = vld [vmem:[%s22500_s13 + $0x458] ss:$24 sps:$4 sm:$0xff]  }
 0x79b   : > { %7913 = vmatprep.subr.bf16.mxu0 %v20674_v12  ;;  %v20725_v12 = vld [vmem:[%s22500_s13 + $0x254] ss:$24 sps:$4 sm:$0xff]  }
 0x79e   : > { %7914 = vmatpush1.bf16.msra.mxu0 %v20672_v8  ;;  %v20728_v8 = vld [vmem:[%s22500_s13 + $0x4] ss:$24 sps:$4 sm:$0xff]  }
 0x79f   : > { %7915 = vmatprep.subr.bf16.mxu0 %v20680_v7 }
 0x7a2   : > { %7916 = vmatpush1.bf16.msra.mxu0 %v20678_v11 }
 0x7a3   : > { %7917 = vmatprep.subr.bf16.mxu0 %v20686_v16 }
 0x7a6   : > { %7918 = vmatpush1.bf16.msra.mxu0 %v20684_v17  ;;  %v20723_v17 = vld [vmem:[%s22500_s13 + $0x250] ss:$24 sps:$4 sm:$0xff]  }
 0x7a7   : > { %7919 = vmatprep.subr.bf16.mxu0 %v20692_v18  ;;  %v20726_v18 = vld [vmem:[%s22500_s13] ss:$24 sps:$4 sm:$0xff]  }
 0x7aa   : > { %7920 = vmatpush1.bf16.msra.mxu0 %v20690_v19 }
 0x7ab   : > { %7921 = vmatprep.subr.bf16.mxu0 %v20698_v21  ;;  %v20731_v21 = vld [vmem:[%s22500_s13 + $0x284] ss:$24 sps:$4 sm:$0xff]  }
 0x7ae   : > { %7922 = vmatpush1.bf16.msra.mxu0 %v20696_v36  ;;  %v20734_v36 = vld [vmem:[%s22500_s13 + $0x34] ss:$24 sps:$4 sm:$0xff]  }
 0x7af   : > { %7923 = vmatprep.subr.bf16.mxu0 %v20704_v22  ;;  %v23663_v22 = vpack.c.bf16 %v23591_v54, %v23591_v54  ;;  %v20737_v54 = vld [vmem:[%s22500_s13 + $0x2b4] ss:$24 sps:$4 sm:$0xff]  }
 0x7b2   : > { %7924 = vmatpush1.bf16.msra.mxu0 %v20702_v25  ;;  %v20729_v25 = vld [vmem:[%s22500_s13 + $0x280] ss:$24 sps:$4 sm:$0xff]  }
 0x7b3   : > { %7925 = vmatprep.subr.bf16.mxu0 %v20710_v38  ;;  %v20732_v38 = vld [vmem:[%s22500_s13 + $0x30] ss:$24 sps:$4 sm:$0xff]  }
 0x7b6   : > { %7926 = vmatpush1.bf16.msra.mxu0 %v20708_v28  ;;  %v20740_v28 = vld [vmem:[%s22500_s13 + $0x64] ss:$24 sps:$4 sm:$0xff]  }
 0x7b7   : > { %7927 = vmatprep.subr.bf16.mxu0 %v20716_v30  ;;  %v20735_v30 = vld [vmem:[%s22500_s13 + $0x2b0] ss:$24 sps:$4 sm:$0xff]  }
 0x7ba   : > { %7928 = vmatpush1.bf16.msra.mxu0 %v20714_v32  ;;  %v20738_v32 = vld [vmem:[%s22500_s13 + $0x60] ss:$24 sps:$4 sm:$0xff]  }
 0x7bb   : > { %7929 = vmatprep.subr.bf16.mxu0 %v20722_v0  ;;  %v20788_v0 = vld [vmem:[%s22500_s13 + $0x1e4] ss:$24 sps:$4 sm:$0xff]  }
 0x7be   : > { %7930 = vmatpush1.bf16.msra.mxu0 %v20720_v29  ;;  %v20786_v29 = vld [vmem:[%s22500_s13 + $0x1e0] ss:$24 sps:$4 sm:$0xff]  }
 0x7bf   : > { %8352 = vmatprep.subr.bf16.mxu0 %v20728_v8  ;;  %v20794_v8 = vld [vmem:[%s22500_s13 + $0x214] ss:$24 sps:$4 sm:$0xff]  }
 0x80d   : > { %v7337_v56 = vpop.xlane.xlu1 %7336 }
 0x80e   : > { %v7338_v57 = vsub.f32 %v7334_v23, %v7337_v56  ;;  %v20675_v23 = vld [vmem:[%s22500_s13 + $0x300] ss:$24 sps:$4 sm:$0xff]   ;;  %v20689_v56 = vld [vmem:[%s22500_s13 + $0x364] ss:$24 sps:$4 sm:$0xff]  }
 0x810   : > { %v7339_v45 = vmul.f32 1.442695, %v7338_v57  ;;  %v20687_v57 = vld [vmem:[%s22500_s13 + $0x360] ss:$24 sps:$4 sm:$0xff]  }
 0x811   : > { %v7349_v55 = vpop.permute.xlu1 %7348 }
 0x812   : > { %21663 = vpow2.f32 %v7339_v45  ;;  %v20695_v45 = vld [vmem:[%s22500_s13 + $0x394] ss:$24 sps:$4 sm:$0xff]  }
 0x81c   : > { %v21664_v6 = vpop.eup %21663 }
 0x81d   : > { %v7341_v41 = vsel %vm7086_vm1, %v21664_v6, 0.0 }
 0x81e   : > { %7342 = vadd.xlane.f32.xlu0 %v7341_v41  ;;  %v20701_v41 = vld [vmem:[%s22500_s13 + $0x3c4] ss:$24 sps:$4 sm:$0xff]  }
 0x834   : > { %7350 = vrot.lane.b32.xlu0 %v7004_v62, %s22075_s6  ;;  %v20705_v62 = vld [vmem:[%s22500_s13 + $0x3f0] ss:$24 sps:$4 sm:$0xff]  }
 0x8ab   : > { %v7343_v35 = vpop.xlane.xlu0 %7342 }
 0x8ac   : > { %21665 = vrcp.f32 %v7343_v35  ;;  %v20743_v35 = vld [vmem:[%s22500_s13 + $0x2e4] ss:$24 sps:$4 sm:$0xff]  }
 0x8af   : > { %v7351_v58 = vpop.permute.xlu0 %7350 }
 0x8b0   : > { %v7352_v37 = vsel %vm7008_vm0, %v7349_v55, %v7351_v58  ;;  %7358 = vmatprep.subr.mxu1 %v7351_v58  ;;  %v20741_v55 = vld [vmem:[%s22500_s13 + $0x2e0] ss:$24 sps:$4 sm:$0xff]   ;;  %v20744_v58 = vld [vmem:[%s22500_s13 + $0x90] ss:$24 sps:$4 sm:$0xff]  }
 0x8b1   : > { %7359 = vmatpush1.msra.mxu1 %v7352_v37  ;;  %v20749_v37 = vld [vmem:[%s22500_s13 + $0x314] ss:$24 sps:$4 sm:$0xff]  }
 0x8b2   : > { %7866 = vmatprep.subr.bf16.mxu1 %v20653_v1  ;;  %v20746_v1 = vld [vmem:[%s22500_s13 + $0x94] ss:$24 sps:$4 sm:$0xff]  }
 0x8b6   : > { %v21666_v5 = vpop.eup %21665 }
 0x8b7   : > { %v7345_v43 = vmul.f32 %v21666_v5, %v21664_v6  ;;  %v20693_v6 = vld [vmem:[%s22500_s13 + $0x390] ss:$24 sps:$4 sm:$0xff]   ;;  %v20752_v5 = vld [vmem:[%s22500_s13 + $0xc4] ss:$24 sps:$4 sm:$0xff]  }
 0x8b9   : > { %17701 = vmatmul.mubr.msk.f32.vlgmr.msra.gmra.mrb[58].mxu1 %vm7086_vm1, %v7345_v43  ;;  %v20750_v43 = vld [vmem:[%s22500_s13 + $0xc0] ss:$24 sps:$4 sm:$0xff]  }
 0x8ba   : > { %7867 = vmatpush1.bf16.msra.mxu1 %v20651_v49  ;;  %v20747_v49 = vld [vmem:[%s22500_s13 + $0x310] ss:$24 sps:$4 sm:$0xff]  }
 0x8bb   : > { %7868 = vmatprep.subr.bf16.mxu1 %v20659_v44  ;;  %v20755_v44 = vld [vmem:[%s22500_s13 + $0x344] ss:$24 sps:$4 sm:$0xff]  }
 0x8be   : > { %7869 = vmatpush1.bf16.msra.mxu1 %v20657_v47  ;;  %v20758_v47 = vld [vmem:[%s22500_s13 + $0xf4] ss:$24 sps:$4 sm:$0xff]  }
 0x8bf   : > { %7870 = vmatprep.subr.bf16.mxu1 %v20665_v48  ;;  %v20753_v48 = vld [vmem:[%s22500_s13 + $0x340] ss:$24 sps:$4 sm:$0xff]  }
 0x8c2   : > { %7871 = vmatpush1.bf16.msra.mxu1 %v20663_v20  ;;  %v20756_v20 = vld [vmem:[%s22500_s13 + $0xf0] ss:$24 sps:$4 sm:$0xff]  }
 0x8c3   : > { %7872 = vmatprep.subr.bf16.mxu1 %v20671_v26  ;;  %v20761_v26 = vld [vmem:[%s22500_s13 + $0x374] ss:$24 sps:$4 sm:$0xff]  }
 0x8c6   : > { %7873 = vmatpush1.bf16.msra.mxu1 %v20669_v10  ;;  %v20764_v10 = vld [vmem:[%s22500_s13 + $0x124] ss:$24 sps:$4 sm:$0xff]  }
 0x8c7   : > { %7874 = vmatprep.subr.bf16.mxu1 %v20677_v27  ;;  %v20759_v27 = vld [vmem:[%s22500_s13 + $0x370] ss:$24 sps:$4 sm:$0xff]  }
 0x8ca   : > { %7875 = vmatpush1.bf16.msra.mxu1 %v20675_v23  ;;  %v20762_v23 = vld [vmem:[%s22500_s13 + $0x120] ss:$24 sps:$4 sm:$0xff]  }
 0x8cb   : > { %7876 = vmatprep.subr.bf16.mxu1 %v20683_v40  ;;  %v20767_v40 = vld [vmem:[%s22500_s13 + $0x3a4] ss:$24 sps:$4 sm:$0xff]  }
 0x8ce   : > { %7877 = vmatpush1.bf16.msra.mxu1 %v20681_v14  ;;  %v20770_v14 = vld [vmem:[%s22500_s13 + $0x154] ss:$24 sps:$4 sm:$0xff]  }
 0x8cf   : > { %7878 = vmatprep.subr.bf16.mxu1 %v20689_v56  ;;  %v20765_v56 = vld [vmem:[%s22500_s13 + $0x3a0] ss:$24 sps:$4 sm:$0xff]  }
 0x8d2   : > { %7879 = vmatpush1.bf16.msra.mxu1 %v20687_v57  ;;  %v20768_v57 = vld [vmem:[%s22500_s13 + $0x150] ss:$24 sps:$4 sm:$0xff]  }
 0x8d3   : > { %7880 = vmatprep.subr.bf16.mxu1 %v20695_v45  ;;  %v20773_v45 = vld [vmem:[%s22500_s13 + $0x3d4] ss:$24 sps:$4 sm:$0xff]  }
 0x8d6   : > { %7881 = vmatpush1.bf16.msra.mxu1 %v20693_v6  ;;  %v20776_v6 = vld [vmem:[%s22500_s13 + $0x184] ss:$24 sps:$4 sm:$0xff]  }
 0x8d7   : > { %7882 = vmatprep.subr.bf16.mxu1 %v20701_v41  ;;  %v20771_v41 = vld [vmem:[%s22500_s13 + $0x3d0] ss:$24 sps:$4 sm:$0xff]  }
 0x8da   : > { %7883 = vmatpush1.bf16.msra.mxu1 %v20699_v51  ;;  %v20774_v51 = vld [vmem:[%s22500_s13 + $0x180] ss:$24 sps:$4 sm:$0xff]  }
 0x8db   : > { %7884 = vmatprep.subr.bf16.mxu1 %v20707_v60  ;;  %v20779_v60 = vld [vmem:[%s22500_s13 + $0x404] ss:$24 sps:$4 sm:$0xff]  }
 0x8de   : > { %7885 = vmatpush1.bf16.msra.mxu1 %v20705_v62  ;;  %v20782_v62 = vld [vmem:[%s22500_s13 + $0x1b4] ss:$24 sps:$4 sm:$0xff]  }
 0x8df   : > { %7886 = vmatprep.subr.bf16.mxu1 %v20713_v15  ;;  %v20777_v15 = vld [vmem:[%s22500_s13 + $0x400] ss:$24 sps:$4 sm:$0xff]  }
 0x8e2   : > { %7887 = vmatpush1.bf16.msra.mxu1 %v20711_v4  ;;  %v20780_v4 = vld [vmem:[%s22500_s13 + $0x1b0] ss:$24 sps:$4 sm:$0xff]  }
 0x8e3   : > { %7888 = vmatprep.subr.bf16.mxu1 %v20719_v63  ;;  %v20785_v63 = vld [vmem:[%s22500_s13 + $0x434] ss:$24 sps:$4 sm:$0xff]  }
 0x8e6   : > { %7889 = vmatpush1.bf16.msra.mxu1 %v20717_v24  ;;  %v20783_v24 = vld [vmem:[%s22500_s13 + $0x430] ss:$24 sps:$4 sm:$0xff]  }
 0x8e7   : > { %7948 = vmatprep.subr.bf16.mxu1 %v20725_v12  ;;  %v20791_v12 = vld [vmem:[%s22500_s13 + $0x464] ss:$24 sps:$4 sm:$0xff]  }
 0x98c   : > { %v7424_v7 = vpop.f32.mrb[58].mxu1 }
 0x98d   : > { %v7426_v11 = vpop.f32.mrb[59].mxu1  ;;  %v23655_v19 = vpack.c.bf16 %v7424_v7, %v7424_v7  ;;  %v20789_v7 = vld [vmem:[%s22500_s13 + $0x460] ss:$24 sps:$4 sm:$0xff]  }
 0x98e   : > { %v7430_v16 = vpack.c.bf16 %v7426_v11, %v7426_v11  ;;  %v20792_v11 = vld [vmem:[%s22500_s13 + $0x210] ss:$24 sps:$4 sm:$0xff]  }
 0x990   : > { %17774 = vmatprep.mubr.msk.bf16.mxu1 %vm7008_vm0, %v7430_v16  ;;  %17775 = vmatprep.mubr.msk.bf16.mxu0 %vm7008_vm0, %v7430_v16 }
 0x991   : > { %7899 = vmatmul.mubr.bf16.vlgmr.msra.gmra.mrb[60].mxu1 %v23655_v19  ;;  %7940 = vmatmul.mubr.bf16.vlgmr.msra.gmra.mrb[56].mxu0 %v23655_v19 }
 0x992   : > { %7949 = vmatpush1.bf16.msra.mxu1 %v20723_v17  ;;  %8353 = vmatpush1.bf16.msra.mxu0 %v20726_v18  ;;  %v20800_v17 = vld [vmem:[%s22500_s13 + $0x14] ss:$24 sps:$4 sm:$0xff]   ;;  %v20795_v18 = vld [vmem:[%s22500_s13 + $0x8] ss:$24 sps:$4 sm:$0xff]  }
 0x993   : > { %17776 = vmatprep.mubr.msk.bf16.mxu1 %vm7008_vm0, %v7430_v16  ;;  %17849 = vmatprep.mubr.msk.bf16.mxu0 %vm7008_vm0, %v23663_v22  ;;  %v20797_v16 = vld [vmem:[%s22500_s13 + $0xc] ss:$24 sps:$4 sm:$0xff]  }
 0x994   : > { %7950 = vmatprep.subr.bf16.mxu1 %v20731_v21  ;;  %8354 = vmatprep.subr.bf16.mxu0 %v20734_v36  ;;  %v23717_v21 = vpack.c.bf16 %v23589_v52, %v23589_v52  ;;  %v20798_v36 = vld [vmem:[%s22500_s13 + $0x10] ss:$24 sps:$4 sm:$0xff]  }
 0x995   : > { %v20801_v52 = vld [vmem:[%s22500_s13 + $0x38] ss:$24 sps:$4 sm:$0xff]  }
 0x996   : > { %7951 = vmatpush1.bf16.msra.mxu1 %v20729_v25  ;;  %8355 = vmatpush1.bf16.msra.mxu0 %v20732_v38  ;;  %v20803_v25 = vld [vmem:[%s22500_s13 + $0x3c] ss:$24 sps:$4 sm:$0xff]  }
 0x997   : > { %7952 = vmatprep.subr.bf16.mxu1 %v20737_v54  ;;  %8356 = vmatprep.subr.bf16.mxu0 %v20740_v28  ;;  %v20806_v38 = vld [vmem:[%s22500_s13 + $0x44] ss:$24 sps:$4 sm:$0xff]   ;;  %v20804_v54 = vld [vmem:[%s22500_s13 + $0x40] ss:$24 sps:$4 sm:$0xff]  }
 0x998   : > { %v20809_v28 = vld [vmem:[%s22500_s13 + $0x6c] ss:$24 sps:$4 sm:$0xff]  }
 0x99a   : > { %7953 = vmatpush1.bf16.msra.mxu1 %v20735_v30  ;;  %8357 = vmatpush1.bf16.msra.mxu0 %v20738_v32  ;;  %v20807_v30 = vld [vmem:[%s22500_s13 + $0x68] ss:$24 sps:$4 sm:$0xff]  }
 0x99b   : > { %7954 = vmatprep.subr.bf16.mxu1 %v20743_v35  ;;  %8358 = vmatprep.subr.bf16.mxu0 %v20746_v1  ;;  %v20810_v32 = vld [vmem:[%s22500_s13 + $0x70] ss:$24 sps:$4 sm:$0xff]   ;;  %v20815_v35 = vld [vmem:[%s22500_s13 + $0x9c] ss:$24 sps:$4 sm:$0xff]  }
 0x99c   : > { %v20818_v1 = vld [vmem:[%s22500_s13 + $0xa4] ss:$24 sps:$4 sm:$0xff]  }
 0x99e   : > { %7955 = vmatpush1.bf16.msra.mxu1 %v20741_v55  ;;  %8359 = vmatpush1.bf16.msra.mxu0 %v20744_v58  ;;  %v20816_v55 = vld [vmem:[%s22500_s13 + $0xa0] ss:$24 sps:$4 sm:$0xff]   ;;  %v20821_v58 = vld [vmem:[%s22500_s13 + $0xcc] ss:$24 sps:$4 sm:$0xff]  }
 0x99f   : > { %7956 = vmatprep.subr.bf16.mxu1 %v20749_v37  ;;  %8360 = vmatprep.subr.bf16.mxu0 %v20752_v5  ;;  %v20824_v37 = vld [vmem:[%s22500_s13 + $0xd4] ss:$24 sps:$4 sm:$0xff]   ;;  %v20819_v5 = vld [vmem:[%s22500_s13 + $0xc8] ss:$24 sps:$4 sm:$0xff]  }
 0x9a2   : > { %7957 = vmatpush1.bf16.msra.mxu1 %v20747_v49  ;;  %8361 = vmatpush1.bf16.msra.mxu0 %v20750_v43  ;;  %v20822_v49 = vld [vmem:[%s22500_s13 + $0xd0] ss:$24 sps:$4 sm:$0xff]   ;;  %v20827_v43 = vld [vmem:[%s22500_s13 + $0xfc] ss:$24 sps:$4 sm:$0xff]  }
 0x9a3   : > { %7958 = vmatprep.subr.bf16.mxu1 %v20755_v44  ;;  %8362 = vmatprep.subr.bf16.mxu0 %v20758_v47  ;;  %v20830_v44 = vld [vmem:[%s22500_s13 + $0x104] ss:$24 sps:$4 sm:$0xff]   ;;  %v20825_v47 = vld [vmem:[%s22500_s13 + $0xf8] ss:$24 sps:$4 sm:$0xff]  }
 0x9a6   : > { %7959 = vmatpush1.bf16.msra.mxu1 %v20753_v48  ;;  %8363 = vmatpush1.bf16.msra.mxu0 %v20756_v20  ;;  %v20828_v48 = vld [vmem:[%s22500_s13 + $0x100] ss:$24 sps:$4 sm:$0xff]   ;;  %v20833_v20 = vld [vmem:[%s22500_s13 + $0x12c] ss:$24 sps:$4 sm:$0xff]  }
 0x9a7   : > { %7960 = vmatprep.subr.bf16.mxu1 %v20761_v26  ;;  %8364 = vmatprep.subr.bf16.mxu0 %v20764_v10  ;;  %v20836_v26 = vld [vmem:[%s22500_s13 + $0x134] ss:$24 sps:$4 sm:$0xff]   ;;  %v20831_v10 = vld [vmem:[%s22500_s13 + $0x128] ss:$24 sps:$4 sm:$0xff]  }
 0x9aa   : > { %7961 = vmatpush1.bf16.msra.mxu1 %v20759_v27  ;;  %8365 = vmatpush1.bf16.msra.mxu0 %v20762_v23  ;;  %v20834_v27 = vld [vmem:[%s22500_s13 + $0x130] ss:$24 sps:$4 sm:$0xff]   ;;  %v20839_v23 = vld [vmem:[%s22500_s13 + $0x15c] ss:$24 sps:$4 sm:$0xff]  }
 0x9ab   : > { %7962 = vmatprep.subr.bf16.mxu1 %v20767_v40  ;;  %8366 = vmatprep.subr.bf16.mxu0 %v20770_v14  ;;  %v20842_v40 = vld [vmem:[%s22500_s13 + $0x164] ss:$24 sps:$4 sm:$0xff]   ;;  %v20837_v14 = vld [vmem:[%s22500_s13 + $0x158] ss:$24 sps:$4 sm:$0xff]  }
 0x9ae   : > { %7963 = vmatpush1.bf16.msra.mxu1 %v20765_v56  ;;  %8367 = vmatpush1.bf16.msra.mxu0 %v20768_v57  ;;  %v20840_v56 = vld [vmem:[%s22500_s13 + $0x160] ss:$24 sps:$4 sm:$0xff]   ;;  %v20845_v57 = vld [vmem:[%s22500_s13 + $0x18c] ss:$24 sps:$4 sm:$0xff]  }
 0x9af   : > { %7964 = vmatprep.subr.bf16.mxu1 %v20773_v45  ;;  %8368 = vmatprep.subr.bf16.mxu0 %v20776_v6  ;;  %v20848_v45 = vld [vmem:[%s22500_s13 + $0x194] ss:$24 sps:$4 sm:$0xff]   ;;  %v20843_v6 = vld [vmem:[%s22500_s13 + $0x188] ss:$24 sps:$4 sm:$0xff]  }
 0x9b2   : > { %7965 = vmatpush1.bf16.msra.mxu1 %v20771_v41  ;;  %8369 = vmatpush1.bf16.msra.mxu0 %v20774_v51  ;;  %v20846_v41 = vld [vmem:[%s22500_s13 + $0x190] ss:$24 sps:$4 sm:$0xff]   ;;  %v20851_v51 = vld [vmem:[%s22500_s13 + $0x1bc] ss:$24 sps:$4 sm:$0xff]  }
 0x9b3   : > { %7966 = vmatprep.subr.bf16.mxu1 %v20779_v60  ;;  %8370 = vmatprep.subr.bf16.mxu0 %v20782_v62  ;;  %v20854_v60 = vld [vmem:[%s22500_s13 + $0x1c4] ss:$24 sps:$4 sm:$0xff]   ;;  %v20849_v62 = vld [vmem:[%s22500_s13 + $0x1b8] ss:$24 sps:$4 sm:$0xff]  }
 0x9b6   : > { %7967 = vmatpush1.bf16.msra.mxu1 %v20777_v15  ;;  %8371 = vmatpush1.bf16.msra.mxu0 %v20780_v4  ;;  %v20852_v15 = vld [vmem:[%s22500_s13 + $0x1c0] ss:$24 sps:$4 sm:$0xff]   ;;  %v20857_v4 = vld [vmem:[%s22500_s13 + $0x1ec] ss:$24 sps:$4 sm:$0xff]  }
 0x9b7   : > { %7968 = vmatprep.subr.bf16.mxu1 %v20785_v63  ;;  %8372 = vmatprep.subr.bf16.mxu0 %v20788_v0  ;;  %v20860_v63 = vld [vmem:[%s22500_s13 + $0x1f4] ss:$24 sps:$4 sm:$0xff]   ;;  %v20855_v0 = vld [vmem:[%s22500_s13 + $0x1e8] ss:$24 sps:$4 sm:$0xff]  }
 0x9ba   : > { %7969 = vmatpush1.bf16.msra.mxu1 %v20783_v24  ;;  %8373 = vmatpush1.bf16.msra.mxu0 %v20786_v29  ;;  %v20858_v24 = vld [vmem:[%s22500_s13 + $0x1f0] ss:$24 sps:$4 sm:$0xff]   ;;  %v20863_v29 = vld [vmem:[%s22500_s13 + $0x21c] ss:$24 sps:$4 sm:$0xff]  }
 0x9bb   : > { %7970 = vmatprep.subr.bf16.mxu1 %v20791_v12  ;;  %8374 = vmatprep.subr.bf16.mxu0 %v20794_v8  ;;  %v23768_v12 = vld [vmem:[%s22510_s15 + $0x20] sm:$0xff] }
 0x9bc   : > { %v20866_v8 = vld [vmem:[%s22500_s13 + $0x224] ss:$24 sps:$4 sm:$0xff]  }
 0x9be   : > { %7971 = vmatpush1.bf16.msra.mxu1 %v20789_v7  ;;  %8375 = vmatpush1.bf16.msra.mxu0 %v20792_v11  ;;  %v6967_v7 = vrot.slane %v23768_v12, %v23217_v50  ;;  %v20861_v11 = vld [vmem:[%s22500_s13 + $0x218] ss:$24 sps:$4 sm:$0xff]  }
 0x9bf   : > { %8393 = vmatprep.subr.bf16.mxu1 %v20797_v16  ;;  %8434 = vmatprep.subr.bf16.mxu0 %v20800_v17  ;;  %v20864_v16 = vld [vmem:[%s22500_s13 + $0x220] ss:$24 sps:$4 sm:$0xff]   ;;  %v6937_v17 = vrot.slane %v23768_v12, %v23378_v9 }
 0x9c1   : > { %7981 = vmatmul.mubr.bf16.vlgmr.msra.gmra.mrb[64].mxu1 %v23655_v19  ;;  %8385 = vmatmul.mubr.bf16.vlgmr.msra.gmra.mrb[60].mxu0 %v23717_v21  ;;  %v20812_v19 = vld [vmem:[%s22500_s13 + $0x74] ss:$24 sps:$4 sm:$0xff]  }
 0x9c2   : > { %8394 = vmatpush1.bf16.msra.mxu1 %v20795_v18  ;;  %17850 = vmatprep.mubr.msk.bf16.mxu1 %vm7008_vm0, %v23663_v22  ;;  %v6976_v18 = vadd.f32 %v6967_v7, %v23462_v59 }
 0x9c3   : > { %8435 = vmatpush1.bf16.msra.mxu0 %v20798_v36  ;;  %17851 = vmatprep.mubr.msk.bf16.mxu0 %vm7008_vm0, %v23663_v22  ;;  %v20813_v22 = vld [vmem:[%s22500_s13 + $0x98] ss:$24 sps:$4 sm:$0xff]  }
 0x9c4   : > { %8395 = vmatprep.subr.bf16.mxu1 %v20803_v25  ;;  %8436 = vmatprep.subr.bf16.mxu0 %v20806_v38  ;;  %v23780_v36 = vld [vmem:[%s22510_s15 + $0x18] sm:$0xff]  ;;  %v6946_v25 = vadd.f32 %v6937_v17, %v23143_v31 }
 0x9c5   : > { %v6963_v38 = vrot.slane %v23780_v36, %v23217_v50  ;;  %v6933_v59 = vrot.slane %v23780_v36, %v23378_v9  ;;  %v6993_v31 = vrot.slane %v23780_v36, %v23558_v39 }
 0x9c6   : > { %8396 = vmatpush1.bf16.msra.mxu1 %v20801_v52  ;;  %v6997_v52 = vrot.slane %v23768_v12, %v23558_v39 }
 0x9c7   : > { %8437 = vmatpush1.bf16.msra.mxu0 %v20804_v54  ;;  %8397 = vmatprep.subr.bf16.mxu1 %v20809_v28  ;;  %v6975_v54 = vadd.f32 %v6963_v38, %v23384_v13  ;;  %v20876_v38 = vld [vmem:[%s22500_s13 + $0x4b8] ss:$24 sps:$4 sm:$0xff]  }
 0x9c8   : > { %8438 = vmatprep.subr.bf16.mxu0 %v20812_v19  ;;  %v23796_v28 = vadd.f32 %v6997_v52, %v23575_v3  ;;  %v6945_v19 = vadd.f32 %v6933_v59, %v23000_v53  ;;  %v20878_v52 = vld [vmem:[%s22500_s13 + $0x4bc] ss:$24 sps:$4 sm:$0xff]   ;;  %v20882_v59 = vld [vmem:[%s22500_s13 + $0x4e8] ss:$24 sps:$4 sm:$0xff]  }
 0x9ca   : > { %8398 = vmatpush1.bf16.msra.mxu1 %v20807_v30 }
 0x9cb   : > { %8439 = vmatpush1.bf16.msra.mxu0 %v20810_v32  ;;  %8399 = vmatprep.subr.bf16.mxu1 %v20815_v35 }
 0x9cc   : > { %8440 = vmatprep.subr.bf16.mxu0 %v20818_v1 }
 0x9ce   : > { %8400 = vmatpush1.bf16.msra.mxu1 %v20813_v22 }
 0x9cf   : > { %8441 = vmatpush1.bf16.msra.mxu0 %v20816_v55  ;;  %8401 = vmatprep.subr.bf16.mxu1 %v20821_v58 }
 0x9d0   : > { %8442 = vmatprep.subr.bf16.mxu0 %v20824_v37 }
 0x9d2   : > { %8402 = vmatpush1.bf16.msra.mxu1 %v20819_v5 }
 0x9d3   : > { %8443 = vmatpush1.bf16.msra.mxu0 %v20822_v49  ;;  %8403 = vmatprep.subr.bf16.mxu1 %v20827_v43 }
 0x9d4   : > { %8444 = vmatprep.subr.bf16.mxu0 %v20830_v44 }
 0x9d6   : > { %8404 = vmatpush1.bf16.msra.mxu1 %v20825_v47 }
 0x9d7   : > { %8445 = vmatpush1.bf16.msra.mxu0 %v20828_v48  ;;  %8405 = vmatprep.subr.bf16.mxu1 %v20833_v20 }
 0x9d8   : > { %8446 = vmatprep.subr.bf16.mxu0 %v20836_v26 }
 0x9da   : > { %8406 = vmatpush1.bf16.msra.mxu1 %v20831_v10 }
 0x9db   : > { %8447 = vmatpush1.bf16.msra.mxu0 %v20834_v27  ;;  %8407 = vmatprep.subr.bf16.mxu1 %v20839_v23 }
 0x9dc   : > { %8448 = vmatprep.subr.bf16.mxu0 %v20842_v40 }
 0x9de   : > { %8408 = vmatpush1.bf16.msra.mxu1 %v20837_v14 }
 0x9df   : > { %8449 = vmatpush1.bf16.msra.mxu0 %v20840_v56  ;;  %8409 = vmatprep.subr.bf16.mxu1 %v20845_v57 }
 0x9e0   : > { %8450 = vmatprep.subr.bf16.mxu0 %v20848_v45 }
 0x9e2   : > { %8410 = vmatpush1.bf16.msra.mxu1 %v20843_v6 }
 0x9e3   : > { %8451 = vmatpush1.bf16.msra.mxu0 %v20846_v41  ;;  %8411 = vmatprep.subr.bf16.mxu1 %v20851_v51 }
 0x9e4   : > { %8452 = vmatprep.subr.bf16.mxu0 %v20854_v60 }
 0x9e6   : > { %8412 = vmatpush1.bf16.msra.mxu1 %v20849_v62 }
 0x9e7   : > { %8453 = vmatpush1.bf16.msra.mxu0 %v20852_v15  ;;  %8413 = vmatprep.subr.bf16.mxu1 %v20857_v4  ;;  %v23816_v4 = vld [vmem:[%s22510_s15 + $0x28] sm:$0xff] }
 0x9e8   : > { %8454 = vmatprep.subr.bf16.mxu0 %v20860_v63  ;;  %v6941_v63 = vrot.slane %v23816_v4, %v23378_v9 }
 0x9ea   : > { %8414 = vmatpush1.bf16.msra.mxu1 %v20855_v0  ;;  %v6947_v0 = vadd.f32 %v6941_v63, %v23148_v33  ;;  %v20869_v33 = vld [vmem:[%s22500_s13 + $0x484] ss:$24 sps:$4 sm:$0xff]   ;;  %v20911_v63 = vld [vmem:[%s22500_s13 + $0x5d4] ss:$24 sps:$4 sm:$0xff]  }
 0x9eb   : > { %8455 = vmatpush1.bf16.msra.mxu0 %v20858_v24  ;;  %8415 = vmatprep.subr.bf16.mxu1 %v20863_v29 }
 0x9ec   : > { %8456 = vmatprep.subr.bf16.mxu0 %v20866_v8 }
 0x9ee   : > { %8416 = vmatpush1.bf16.msra.mxu1 %v20861_v11 }
 0x9ef   : > { %8457 = vmatpush1.bf16.msra.mxu0 %v20864_v16  ;;  %17852 = vmatprep.subr.msk.mxu1 %vm7008_vm0, %v6976_v18  ;;  %v6971_v16 = vrot.slane %v23816_v4, %v23217_v50 }
 0x9f1   : > { %8426 = vmatmul.mubr.bf16.vlgmr.msra.gmra.mrb[68].mxu1 %v23717_v21  ;;  %v6977_v17 = vadd.f32 %v6971_v16, %v23464_v61  ;;  %v20884_v61 = vld [vmem:[%s22500_s13 + $0x4ec] ss:$24 sps:$4 sm:$0xff]   ;;  %v20927_v16 = vld [vmem:[%s22500_s13 + $0x660] ss:$24 sps:$4 sm:$0xff]  }
 0x9f2   : > { %8467 = vmatmul.mubr.bf16.vlgmr.msra.gmra.mrb[64].mxu0 %v23717_v21  ;;  %17853 = vmatprep.mubr.msk.f32.mxu1 %vm7008_vm0, %v6946_v25  ;;  %v7005_v21 = vadd.f32 %v6993_v31, %v23572_v2  ;;  %v20890_v31 = vld [vmem:[%s22500_s13 + $0x51c] ss:$24 sps:$4 sm:$0xff]  }
 0x9f7   : > { %8482 = vmatpush1.xpose.msra.mxu1 %v6975_v54  ;;  %v20888_v54 = vld [vmem:[%s22500_s13 + $0x518] ss:$24 sps:$4 sm:$0xff]  }
 0x9f8   : > { %8566 = vmatprep.subr.mxu1 %v23796_v28 }
 0x9fa   : > { %8546 = vmatmul.mubr.f32.vlgmr.msra.gmra.mrb[72].mxu1 %v6945_v19  ;;  %v20894_v19 = vld [vmem:[%s22500_s13 + $0x548] ss:$24 sps:$4 sm:$0xff]  }
 0x9fb   : > { %8567 = vmatpush1.msra.mxu1 %v7005_v21  ;;  %8630 = vmatprep.mubr.f32.mxu1 %v22076_v42  ;;  %v20896_v21 = vld [vmem:[%s22500_s13 + $0x54c] ss:$24 sps:$4 sm:$0xff]  }
 0x9fc   : > { %9074 = vmatprep.subr.bf16.mxu1 %v20869_v33  ;;  %v20933_v33 = vld [vmem:[%s22500_s13 + $0x690] ss:$24 sps:$4 sm:$0xff]  }
 0xa64   : > { %v7900_v30 = vpop.f32.mrb[60].mxu1  ;;  %v7941_v32 = vpop.f32.mrb[56].mxu0 }
 0xa65   : > { %v7902_v13 = vpop.f32.mrb[61].mxu1  ;;  %v7943_v35 = vpop.f32.mrb[57].mxu0 }
 0xa66   : > { %v7904_v1 = vpop.f32.mrb[62].mxu1  ;;  %v7945_v22 = vpop.f32.mrb[58].mxu0 }
 0xa67   : > { %v7905_v55 = vpop.f32.mrb[63].mxu1  ;;  %v7946_v3 = vpop.f32.mrb[59].mxu0  ;;  %v20912_v1 = vld [vmem:[%s22500_s13 + $0x5d8] ss:$24 sps:$4 sm:$0xff]   ;;  %v20914_v22 = vld [vmem:[%s22500_s13 + $0x5dc] ss:$24 sps:$4 sm:$0xff]  }
 0xa68   : > { %v20918_v55 = vld [vmem:[%s22500_s13 + $0x608] ss:$24 sps:$4 sm:$0xff]   ;;  %v20920_v3 = vld [vmem:[%s22500_s13 + $0x60c] ss:$24 sps:$4 sm:$0xff]  }
 0xa94   : > { %v7982_v58 = vpop.f32.mrb[64].mxu1  ;;  %v8386_v37 = vpop.f32.mrb[60].mxu0 }
 0xa95   : > { %v23802_v5 = vadd.f32 %v8386_v37, %v7900_v30  ;;  %v7984_v53 = vpop.f32.mrb[65].mxu1  ;;  %v8388_v49 = vpop.f32.mrb[61].mxu0  ;;  %v20900_v30 = vld [vmem:[%s22500_s13 + $0x578] ss:$24 sps:$4 sm:$0xff]   ;;  %v20926_v37 = vld [vmem:[%s22500_s13 + $0x63c] ss:$24 sps:$4 sm:$0xff]  }
 0xa96   : > { %v23804_v43 = vadd.f32 %v8388_v49, %v7902_v13  ;;  %v7986_v2 = vpop.f32.mrb[66].mxu1  ;;  %v8390_v44 = vpop.f32.mrb[62].mxu0  ;;  %v20906_v13 = vld [vmem:[%s22500_s13 + $0x5a8] ss:$24 sps:$4 sm:$0xff]   ;;  %v20932_v49 = vld [vmem:[%s22500_s13 + $0x66c] ss:$24 sps:$4 sm:$0xff]  }
 0xa97   : > { %v7987_v47 = vpop.f32.mrb[67].mxu1  ;;  %v8391_v48 = vpop.f32.mrb[63].mxu0 }
 0xa98   : > { %v20867_v47 = vld [vmem:[%s22500_s13 + $0x480] ss:$24 sps:$4 sm:$0xff]  }
 0xac4   : > { %v8427_v20 = vpop.f32.mrb[68].mxu1 }
 0xac5   : > { %v23806_v26 = vadd.f32 %v8427_v20, %v7941_v32  ;;  %v8468_v10 = vpop.f32.mrb[64].mxu0  ;;  %v8429_v27 = vpop.f32.mrb[69].mxu1  ;;  %v20902_v32 = vld [vmem:[%s22500_s13 + $0x57c] ss:$24 sps:$4 sm:$0xff]  }
 0xac6   : > { %v23808_v23 = vadd.f32 %v8468_v10, %v7982_v58  ;;  %v23810_v40 = vadd.f32 %v8429_v27, %v7943_v35  ;;  %v8470_v14 = vpop.f32.mrb[65].mxu0  ;;  %v8431_v56 = vpop.f32.mrb[70].mxu1  ;;  %v20908_v35 = vld [vmem:[%s22500_s13 + $0x5ac] ss:$24 sps:$4 sm:$0xff]   ;;  %v20924_v58 = vld [vmem:[%s22500_s13 + $0x638] ss:$24 sps:$4 sm:$0xff]  }
 0xac7   : > { %v23812_v57 = vadd.f32 %v8470_v14, %v7984_v53  ;;  %v8472_v45 = vpop.f32.mrb[66].mxu0  ;;  %v8432_v6 = vpop.f32.mrb[71].mxu1  ;;  %v20930_v53 = vld [vmem:[%s22500_s13 + $0x668] ss:$24 sps:$4 sm:$0xff]   ;;  %v20875_v20 = vld [vmem:[%s22500_s13 + $0x4b4] ss:$24 sps:$4 sm:$0xff]  }
 0xac8   : > { %v8473_v41 = vpop.f32.mrb[67].mxu0  ;;  %v20873_v10 = vld [vmem:[%s22500_s13 + $0x4b0] ss:$24 sps:$4 sm:$0xff]   ;;  %v20881_v27 = vld [vmem:[%s22500_s13 + $0x4e4] ss:$24 sps:$4 sm:$0xff]  }
 0xac9   : > { %v20879_v14 = vld [vmem:[%s22500_s13 + $0x4e0] ss:$24 sps:$4 sm:$0xff]   ;;  %v20887_v56 = vld [vmem:[%s22500_s13 + $0x514] ss:$24 sps:$4 sm:$0xff]   ;;  %v20885_v45 = vld [vmem:[%s22500_s13 + $0x510] ss:$24 sps:$4 sm:$0xff]  }
 0xaca   : > { %v20893_v6 = vld [vmem:[%s22500_s13 + $0x544] ss:$24 sps:$4 sm:$0xff]   ;;  %v20891_v41 = vld [vmem:[%s22500_s13 + $0x540] ss:$24 sps:$4 sm:$0xff]  }
 0xacd   : > { %v8547_v51 = vpop.f32.mrb[72].mxu1 }
 0xace   : > { %v8551_v60 = vmul.f32 0.07216878, %v8547_v51  ;;  %v8549_v62 = vpop.f32.mrb[73].mxu1  ;;  %v20899_v51 = vld [vmem:[%s22500_s13 + $0x574] ss:$24 sps:$4 sm:$0xff]  }
 0xacf   : > { %v20905_v62 = vld [vmem:[%s22500_s13 + $0x5a4] ss:$24 sps:$4 sm:$0xff]  }
 0xad0   : > { %v8552_v15 = vsel %vm7086_vm1, %v8551_v60, -inf }
 0xad1   : > { %8553 = vmax.xlane.f32.xlu1 %v8552_v15  ;;  %v20903_v15 = vld [vmem:[%s22500_s13 + $0x5a0] ss:$24 sps:$4 sm:$0xff]  }
 0xae2   : > { %9211 = vrot.lane.b32.xlu1 %v6976_v18, %s22075_s6  ;;  %v20870_v18 = vld [vmem:[%s22500_s13 + $0x488] ss:$24 sps:$4 sm:$0xff]  }
 0xae6   : > { %9204 = vrot.lane.b32.xlu1 %v6946_v25, %s22075_s6  ;;  %v20872_v25 = vld [vmem:[%s22500_s13 + $0x48c] ss:$24 sps:$4 sm:$0xff]  }
 0xae7   : > { %9115 = vmatprep.subr.bf16.mxu0 %v20872_v25  ;;  %v20936_v25 = vld [vmem:[%s22500_s13 + $0x698] ss:$24 sps:$4 sm:$0xff]  }
 0xae8   : > { %9116 = vmatpush1.bf16.msra.mxu0 %v20870_v18  ;;  %v20938_v18 = vld [vmem:[%s22500_s13 + $0x69c] ss:$24 sps:$4 sm:$0xff]  }
 0xae9   : > { %9117 = vmatprep.subr.bf16.mxu0 %v20878_v52 }
 0xaea   : > { %9206 = vrot.lane.b32.xlu1 %v6947_v0, %s22075_s6  ;;  %v20909_v0 = vld [vmem:[%s22500_s13 + $0x5d0] ss:$24 sps:$4 sm:$0xff]  }
 0xaec   : > { %9118 = vmatpush1.bf16.msra.mxu0 %v20876_v38  ;;  %v20941_v38 = vld [vmem:[%s22500_s13 + $0x494] ss:$24 sps:$4 sm:$0xff]  }
 0xaed   : > { %9119 = vmatprep.subr.bf16.mxu0 %v20884_v61 }
 0xaf0   : > { %9120 = vmatpush1.bf16.msra.mxu0 %v20882_v59 }
 0xaf1   : > { %9121 = vmatprep.subr.bf16.mxu0 %v20890_v31 }
 0xaf4   : > { %9122 = vmatpush1.bf16.msra.mxu0 %v20888_v54  ;;  %v20939_v54 = vld [vmem:[%s22500_s13 + $0x490] ss:$24 sps:$4 sm:$0xff]  }
 0xaf5   : > { %9123 = vmatprep.subr.bf16.mxu0 %v20896_v21  ;;  %v20942_v21 = vld [vmem:[%s22500_s13 + $0x4c0] ss:$24 sps:$4 sm:$0xff]  }
 0xaf8   : > { %9124 = vmatpush1.bf16.msra.mxu0 %v20894_v19  ;;  %v20944_v19 = vld [vmem:[%s22500_s13 + $0x4c4] ss:$24 sps:$4 sm:$0xff]  }
 0xaf9   : > { %9125 = vmatprep.subr.bf16.mxu0 %v20902_v32  ;;  %v20945_v32 = vld [vmem:[%s22500_s13 + $0x4f0] ss:$24 sps:$4 sm:$0xff]  }
 0xafc   : > { %9126 = vmatpush1.bf16.msra.mxu0 %v20900_v30  ;;  %v20947_v30 = vld [vmem:[%s22500_s13 + $0x4f4] ss:$24 sps:$4 sm:$0xff]  }
 0xafd   : > { %9127 = vmatprep.subr.bf16.mxu0 %v20908_v35  ;;  %v20948_v35 = vld [vmem:[%s22500_s13 + $0x520] ss:$24 sps:$4 sm:$0xff]  }
 0xb00   : > { %9128 = vmatpush1.bf16.msra.mxu0 %v20906_v13  ;;  %v20950_v13 = vld [vmem:[%s22500_s13 + $0x524] ss:$24 sps:$4 sm:$0xff]  }
 0xb01   : > { %9129 = vmatprep.subr.bf16.mxu0 %v20914_v22  ;;  %v20951_v22 = vld [vmem:[%s22500_s13 + $0x550] ss:$24 sps:$4 sm:$0xff]  }
 0xb04   : > { %9130 = vmatpush1.bf16.msra.mxu0 %v20912_v1  ;;  %v20953_v1 = vld [vmem:[%s22500_s13 + $0x554] ss:$24 sps:$4 sm:$0xff]  }
 0xb05   : > { %9131 = vmatprep.subr.bf16.mxu0 %v20920_v3  ;;  %v20954_v3 = vld [vmem:[%s22500_s13 + $0x580] ss:$24 sps:$4 sm:$0xff]  }
 0xb08   : > { %9132 = vmatpush1.bf16.msra.mxu0 %v20918_v55  ;;  %v20956_v55 = vld [vmem:[%s22500_s13 + $0x584] ss:$24 sps:$4 sm:$0xff]  }
 0xb09   : > { %9133 = vmatprep.subr.bf16.mxu0 %v20926_v37  ;;  %v20957_v37 = vld [vmem:[%s22500_s13 + $0x5b0] ss:$24 sps:$4 sm:$0xff]  }
 0xb0c   : > { %9134 = vmatpush1.bf16.msra.mxu0 %v20924_v58  ;;  %v20959_v58 = vld [vmem:[%s22500_s13 + $0x5b4] ss:$24 sps:$4 sm:$0xff]  }
 0xb0d   : > { %9135 = vmatprep.subr.bf16.mxu0 %v20932_v49  ;;  %v20960_v49 = vld [vmem:[%s22500_s13 + $0x5e0] ss:$24 sps:$4 sm:$0xff]  }
 0xb10   : > { %9136 = vmatpush1.bf16.msra.mxu0 %v20930_v53  ;;  %v20962_v53 = vld [vmem:[%s22500_s13 + $0x5e4] ss:$24 sps:$4 sm:$0xff]  }
 0xb11   : > { %9137 = vmatprep.subr.bf16.mxu0 %v20938_v18 }
 0xb14   : > { %9138 = vmatpush1.bf16.msra.mxu0 %v20936_v25 }
 0xb5e   : > { %v8554_v24 = vpop.xlane.xlu1 %8553 }
 0xb5f   : > { %v8555_v29 = vsub.f32 %v8551_v60, %v8554_v24  ;;  %v20897_v60 = vld [vmem:[%s22500_s13 + $0x570] ss:$24 sps:$4 sm:$0xff]   ;;  %v20917_v24 = vld [vmem:[%s22500_s13 + $0x604] ss:$24 sps:$4 sm:$0xff]  }
 0xb61   : > { %v8556_v8 = vmul.f32 1.442695, %v8555_v29  ;;  %v20915_v29 = vld [vmem:[%s22500_s13 + $0x600] ss:$24 sps:$4 sm:$0xff]  }
 0xb63   : > { %21667 = vpow2.f32 %v8556_v8  ;;  %v20923_v8 = vld [vmem:[%s22500_s13 + $0x634] ss:$24 sps:$4 sm:$0xff]  }
 0xb6d   : > { %v21668_v7 = vpop.eup %21667 }
 0xb6e   : > { %v8558_v11 = vsel %vm7086_vm1, %v21668_v7, 0.0 }
 0xb6f   : > { %8559 = vadd.xlane.f32.xlu0 %v8558_v11  ;;  %v20929_v11 = vld [vmem:[%s22500_s13 + $0x664] ss:$24 sps:$4 sm:$0xff]  }
 0xb85   : > { %9213 = vrot.lane.b32.xlu0 %v6977_v17, %s22075_s6  ;;  %v20935_v17 = vld [vmem:[%s22500_s13 + $0x694] ss:$24 sps:$4 sm:$0xff]  }
 0xbfc   : > { %v8560_v2 = vpop.xlane.xlu0 %8559 }
 0xbfd   : > { %21669 = vrcp.f32 %v8560_v2  ;;  %v20965_v2 = vld [vmem:[%s22500_s13 + $0x614] ss:$24 sps:$4 sm:$0xff]  }
 0xc07   : > { %v21670_v44 = vpop.eup %21669 }
 0xc08   : > { %v8562_v48 = vmul.f32 %v21670_v44, %v21668_v7  ;;  %v20921_v7 = vld [vmem:[%s22500_s13 + $0x630] ss:$24 sps:$4 sm:$0xff]  }
 0xc09   : > { %v20963_v44 = vld [vmem:[%s22500_s13 + $0x610] ss:$24 sps:$4 sm:$0xff]  }
 0xc0a   : > { %17854 = vmatmul.mubr.msk.f32.vlgmr.msra.gmra.mrb[74].mxu1 %vm7086_vm1, %v8562_v48  ;;  %v20966_v48 = vld [vmem:[%s22500_s13 + $0x640] ss:$24 sps:$4 sm:$0xff]  }
 0xc0b   : > { %9075 = vmatpush1.bf16.msra.mxu1 %v20867_v47  ;;  %v20968_v47 = vld [vmem:[%s22500_s13 + $0x644] ss:$24 sps:$4 sm:$0xff]  }
 0xc0c   : > { %9076 = vmatprep.subr.bf16.mxu1 %v20875_v20  ;;  %v20971_v20 = vld [vmem:[%s22500_s13 + $0x674] ss:$24 sps:$4 sm:$0xff]  }
 0xc0f   : > { %9077 = vmatpush1.bf16.msra.mxu1 %v20873_v10  ;;  %v9212_v10 = vpop.permute.xlu1 %9211 }
 0xc10   : > { %9078 = vmatprep.subr.bf16.mxu1 %v20881_v27  ;;  %v20969_v27 = vld [vmem:[%s22500_s13 + $0x670] ss:$24 sps:$4 sm:$0xff]  }
 0xc13   : > { %9079 = vmatpush1.bf16.msra.mxu1 %v20879_v14  ;;  %v20974_v14 = vld [vmem:[%s22500_s13 + $0x6a4] ss:$24 sps:$4 sm:$0xff]  }
 0xc14   : > { %9080 = vmatprep.subr.bf16.mxu1 %v20887_v56  ;;  %v20972_v56 = vld [vmem:[%s22500_s13 + $0x6a0] ss:$24 sps:$4 sm:$0xff]  }
 0xc17   : > { %9081 = vmatpush1.bf16.msra.mxu1 %v20885_v45  ;;  %v9205_v45 = vpop.permute.xlu1 %9204 }
 0xc18   : > { %9082 = vmatprep.subr.bf16.mxu1 %v20893_v6  ;;  %v9214_v6 = vpop.permute.xlu0 %9213 }
 0xc1b   : > { %9083 = vmatpush1.bf16.msra.mxu1 %v20891_v41  ;;  %v9207_v41 = vpop.permute.xlu1 %9206 }
 0xc1c   : > { %9084 = vmatprep.subr.bf16.mxu1 %v20899_v51  ;;  %v9215_v51 = vsel %vm7008_vm0, %v9212_v10, %v9214_v6  ;;  %v21029_v10 = vld [vmem:[%s22500_s13 + $0x870] ss:$24 sps:$4 sm:$0xff]  }
 0xc1f   : > { %9085 = vmatpush1.bf16.msra.mxu1 %v20897_v60  ;;  %v9208_v60 = vsel %vm7008_vm0, %v9205_v45, %v9207_v41  ;;  %v20980_v45 = vld [vmem:[%s22500_s13 + $0x6cc] ss:$24 sps:$4 sm:$0xff]  }
 0xc20   : > { %9086 = vmatprep.subr.bf16.mxu1 %v20905_v62 }
 0xc23   : > { %9087 = vmatpush1.bf16.msra.mxu1 %v20903_v15 }
 0xc24   : > { %9088 = vmatprep.subr.bf16.mxu1 %v20911_v63 }
 0xc27   : > { %9089 = vmatpush1.bf16.msra.mxu1 %v20909_v0 }
 0xc28   : > { %9090 = vmatprep.subr.bf16.mxu1 %v20917_v24 }
 0xc2b   : > { %9091 = vmatpush1.bf16.msra.mxu1 %v20915_v29 }
 0xc2c   : > { %9092 = vmatprep.subr.bf16.mxu1 %v20923_v8 }
 0xc2f   : > { %9093 = vmatpush1.bf16.msra.mxu1 %v20921_v7 }
 0xc30   : > { %9094 = vmatprep.subr.bf16.mxu1 %v20929_v11 }
 0xc33   : > { %9095 = vmatpush1.bf16.msra.mxu1 %v20927_v16 }
 0xc34   : > { %9096 = vmatprep.subr.bf16.mxu1 %v20935_v17 }
 0xc37   : > { %9097 = vmatpush1.bf16.msra.mxu1 %v20933_v33 }
 0xc38   : > { %9156 = vmatprep.subr.bf16.mxu1 %v20941_v38 }
 0xcdd   : > { %v8632_v52 = vpop.f32.mrb[74].mxu1 }
 0xcde   : > { %v8634_v59 = vpop.f32.mrb[75].mxu1  ;;  %v8637_v31 = vpack.c.bf16 %v8632_v52, %v8632_v52 }
 0xcdf   : > { %v8638_v61 = vpack.c.bf16 %v8634_v59, %v8634_v59 }
 0xce1   : > { %17927 = vmatprep.mubr.msk.bf16.mxu1 %vm7008_vm0, %v8638_v61  ;;  %17928 = vmatprep.mubr.msk.bf16.mxu0 %vm7008_vm0, %v8638_v61 }
 0xce2   : > { %9107 = vmatmul.mubr.bf16.vlgmr.msra.gmra.mrb[76].mxu1 %v8637_v31  ;;  %9148 = vmatmul.mubr.bf16.vlgmr.msra.gmra.mrb[68].mxu0 %v8637_v31 }
 0xce3   : > { %9157 = vmatpush1.bf16.msra.mxu1 %v20939_v54  ;;  %17929 = vmatprep.mubr.msk.bf16.mxu1 %vm7008_vm0, %v8638_v61 }
 0xce4   : > { %9158 = vmatprep.subr.bf16.mxu1 %v20944_v19  ;;  %v7001_v19 = vrot.slane %v23816_v4, %v23558_v39 }
 0xce7   : > { %9159 = vmatpush1.bf16.msra.mxu1 %v20942_v21  ;;  %v7007_v21 = vadd.f32 %v7001_v19, %v23577_v34  ;;  %v20995_v34 = vld [vmem:[%s22500_s13 + $0x754] ss:$24 sps:$4 sm:$0xff]   ;;  %v21038_v19 = vld [vmem:[%s22500_s13 + $0x8a8] ss:$24 sps:$4 sm:$0xff]  }
 0xce8   : > { %9160 = vmatprep.subr.bf16.mxu1 %v20947_v30  ;;  %v20977_v30 = vld [vmem:[%s22500_s13 + $0x6c4] ss:$24 sps:$4 sm:$0xff]  }
 0xce9   : > { %9823 = vmatprep.subr.bf16.mxu0 %v20977_v30  ;;  %v21046_v30 = vld [vmem:[%s22500_s13 + $0x8dc] ss:$24 sps:$4 sm:$0xff]  }
 0xceb   : > { %9161 = vmatpush1.bf16.msra.mxu1 %v20945_v32  ;;  %v20983_v32 = vld [vmem:[%s22500_s13 + $0x6f4] ss:$24 sps:$4 sm:$0xff]  }
 0xcec   : > { %9162 = vmatprep.subr.bf16.mxu1 %v20950_v13  ;;  %v20981_v13 = vld [vmem:[%s22500_s13 + $0x6f0] ss:$24 sps:$4 sm:$0xff]  }
 0xcef   : > { %9163 = vmatpush1.bf16.msra.mxu1 %v20948_v35  ;;  %v20989_v35 = vld [vmem:[%s22500_s13 + $0x724] ss:$24 sps:$4 sm:$0xff]  }
 0xcf0   : > { %9164 = vmatprep.subr.bf16.mxu1 %v20953_v1  ;;  %v20987_v1 = vld [vmem:[%s22500_s13 + $0x720] ss:$24 sps:$4 sm:$0xff]  }
 0xcf3   : > { %9165 = vmatpush1.bf16.msra.mxu1 %v20951_v22  ;;  %v20993_v22 = vld [vmem:[%s22500_s13 + $0x750] ss:$24 sps:$4 sm:$0xff]  }
 0xcf4   : > { %9166 = vmatprep.subr.bf16.mxu1 %v20956_v55  ;;  %v21001_v55 = vld [vmem:[%s22500_s13 + $0x784] ss:$24 sps:$4 sm:$0xff]  }
 0xcf7   : > { %9167 = vmatpush1.bf16.msra.mxu1 %v20954_v3  ;;  %v20999_v3 = vld [vmem:[%s22500_s13 + $0x780] ss:$24 sps:$4 sm:$0xff]  }
 0xcf8   : > { %9168 = vmatprep.subr.bf16.mxu1 %v20959_v58  ;;  %v21007_v58 = vld [vmem:[%s22500_s13 + $0x7b4] ss:$24 sps:$4 sm:$0xff]  }
 0xcfb   : > { %9169 = vmatpush1.bf16.msra.mxu1 %v20957_v37  ;;  %v21005_v37 = vld [vmem:[%s22500_s13 + $0x7b0] ss:$24 sps:$4 sm:$0xff]  }
 0xcfc   : > { %9170 = vmatprep.subr.bf16.mxu1 %v20962_v53  ;;  %v21013_v53 = vld [vmem:[%s22500_s13 + $0x7e4] ss:$24 sps:$4 sm:$0xff]  }
 0xcff   : > { %9171 = vmatpush1.bf16.msra.mxu1 %v20960_v49  ;;  %v21011_v49 = vld [vmem:[%s22500_s13 + $0x7e0] ss:$24 sps:$4 sm:$0xff]  }
 0xd00   : > { %9172 = vmatprep.subr.bf16.mxu1 %v20965_v2  ;;  %v21019_v2 = vld [vmem:[%s22500_s13 + $0x814] ss:$24 sps:$4 sm:$0xff]  }
 0xd03   : > { %9173 = vmatpush1.bf16.msra.mxu1 %v20963_v44  ;;  %v21017_v44 = vld [vmem:[%s22500_s13 + $0x810] ss:$24 sps:$4 sm:$0xff]  }
 0xd04   : > { %9174 = vmatprep.subr.bf16.mxu1 %v20968_v47  ;;  %v21025_v47 = vld [vmem:[%s22500_s13 + $0x844] ss:$24 sps:$4 sm:$0xff]  }
 0xd07   : > { %9175 = vmatpush1.bf16.msra.mxu1 %v20966_v48  ;;  %v21023_v48 = vld [vmem:[%s22500_s13 + $0x840] ss:$24 sps:$4 sm:$0xff]  }
 0xd08   : > { %9176 = vmatprep.subr.bf16.mxu1 %v20971_v20  ;;  %v21031_v20 = vld [vmem:[%s22500_s13 + $0x874] ss:$24 sps:$4 sm:$0xff]  }
 0xd0b   : > { %9177 = vmatpush1.bf16.msra.mxu1 %v20969_v27  ;;  %v21037_v27 = vld [vmem:[%s22500_s13 + $0x8a4] ss:$24 sps:$4 sm:$0xff]  }
 0xd0c   : > { %9178 = vmatprep.subr.bf16.mxu1 %v20974_v14  ;;  %v21035_v14 = vld [vmem:[%s22500_s13 + $0x8a0] ss:$24 sps:$4 sm:$0xff]  }
 0xd0f   : > { %9179 = vmatpush1.bf16.msra.mxu1 %v20972_v56 }
 0xd10   : > { %17930 = vmatprep.subr.msk.mxu1 %vm7008_vm0, %v9214_v6 }
 0xd12   : > { %9189 = vmatmul.mubr.bf16.vlgmr.msra.gmra.mrb[80].mxu1 %v8637_v31 }
 0xd13   : > { %17931 = vmatprep.mubr.msk.f32.mxu1 %vm7008_vm0, %v9207_v41 }
 0xd18   : > { %9222 = vmatpush1.xpose.msra.mxu1 %v9215_v51 }
 0xd1b   : > { %9286 = vmatmul.mubr.f32.vlgmr.msra.gmra.mrb[84].mxu1 %v9208_v60 }
 0xd1c   : > { %9379 = vmatprep.mubr.f32.mxu1 %v22076_v42 }
 0xdb5   : > { %v9108_v62 = vpop.f32.mrb[76].mxu1  ;;  %v9149_v15 = vpop.f32.mrb[68].mxu0 }
 0xdb6   : > { %v23911_v63 = vadd.f32 %v9108_v62, %v23802_v5  ;;  %v23914_v0 = vadd.f32 %v9149_v15, %v23806_v26  ;;  %v9110_v24 = vpop.f32.mrb[77].mxu1  ;;  %v9151_v29 = vpop.f32.mrb[69].mxu0  ;;  %v20978_v62 = vld [vmem:[%s22500_s13 + $0x6c8] ss:$24 sps:$4 sm:$0xff]  }
 0xdb7   : > { %v23917_v8 = vadd.f32 %v9110_v24, %v23804_v43  ;;  %v23920_v7 = vadd.f32 %v9151_v29, %v23810_v40  ;;  %v9112_v11 = vpop.f32.mrb[78].mxu1  ;;  %v9153_v16 = vpop.f32.mrb[70].mxu0  ;;  %v20986_v24 = vld [vmem:[%s22500_s13 + $0x6fc] ss:$24 sps:$4 sm:$0xff]   ;;  %v20984_v29 = vld [vmem:[%s22500_s13 + $0x6f8] ss:$24 sps:$4 sm:$0xff]  }
 0xdb8   : > { %v9113_v17 = vpop.f32.mrb[79].mxu1  ;;  %v9154_v42 = vpop.f32.mrb[71].mxu0  ;;  %v20992_v11 = vld [vmem:[%s22500_s13 + $0x72c] ss:$24 sps:$4 sm:$0xff]   ;;  %v20990_v16 = vld [vmem:[%s22500_s13 + $0x728] ss:$24 sps:$4 sm:$0xff]  }
 0xdb9   : > { %v20998_v17 = vld [vmem:[%s22500_s13 + $0x75c] ss:$24 sps:$4 sm:$0xff]   ;;  %v20996_v42 = vld [vmem:[%s22500_s13 + $0x758] ss:$24 sps:$4 sm:$0xff]  }
 0xde5   : > { %v9190_v33 = vpop.f32.mrb[80].mxu1 }
 0xde6   : > { %v23923_v18 = vadd.f32 %v9190_v33, %v23808_v23  ;;  %v9192_v5 = vpop.f32.mrb[81].mxu1  ;;  %v21004_v33 = vld [vmem:[%s22500_s13 + $0x78c] ss:$24 sps:$4 sm:$0xff]  }
 0xde7   : > { %v23926_v26 = vadd.f32 %v9192_v5, %v23812_v57  ;;  %v9194_v25 = vpop.f32.mrb[82].mxu1  ;;  %v21002_v5 = vld [vmem:[%s22500_s13 + $0x788] ss:$24 sps:$4 sm:$0xff]  }
 0xde8   : > { %v9195_v38 = vpop.f32.mrb[83].mxu1  ;;  %v21010_v25 = vld [vmem:[%s22500_s13 + $0x7bc] ss:$24 sps:$4 sm:$0xff]  }
 0xde9   : > { %v21008_v38 = vld [vmem:[%s22500_s13 + $0x7b8] ss:$24 sps:$4 sm:$0xff]  }
 0xdee   : > { %v9287_v52 = vpop.f32.mrb[84].mxu1 }
 0xdef   : > { %v9291_v43 = vmul.f32 0.07216878, %v9287_v52  ;;  %v9289_v40 = vpop.f32.mrb[85].mxu1  ;;  %v21016_v52 = vld [vmem:[%s22500_s13 + $0x7ec] ss:$24 sps:$4 sm:$0xff]  }
 0xdf0   : > { %v21022_v40 = vld [vmem:[%s22500_s13 + $0x81c] ss:$24 sps:$4 sm:$0xff]  }
 0xdf1   : > { %v9292_v59 = vsel %vm7086_vm1, %v9291_v43, -inf }
 0xdf2   : > { %9293 = vmax.xlane.f32.xlu1 %v9292_v59  ;;  %v21020_v59 = vld [vmem:[%s22500_s13 + $0x818] ss:$24 sps:$4 sm:$0xff]  }
 0xe03   : > { %9305 = vrot.lane.b32.xlu1 %v23796_v28, %s22075_s6  ;;  %v20975_v28 = vld [vmem:[%s22500_s13 + $0x6c0] ss:$24 sps:$4 sm:$0xff]  }
 0xe04   : > { %9824 = vmatpush1.bf16.msra.mxu0 %v20975_v28  ;;  %v21041_v28 = vld [vmem:[%s22500_s13 + $0x8d0] ss:$24 sps:$4 sm:$0xff]  }
 0xe05   : > { %9825 = vmatprep.subr.bf16.mxu0 %v20983_v32  ;;  %v21044_v32 = vld [vmem:[%s22500_s13 + $0x8d8] ss:$24 sps:$4 sm:$0xff]  }
 0xe08   : > { %9826 = vmatpush1.bf16.msra.mxu0 %v20981_v13  ;;  %v21049_v13 = vld [vmem:[%s22500_s13 + $0x6d4] ss:$24 sps:$4 sm:$0xff]  }
 0xe09   : > { %9827 = vmatprep.subr.bf16.mxu0 %v20989_v35 }
 0xe0c   : > { %9828 = vmatpush1.bf16.msra.mxu0 %v20987_v1 }
 0xe0d   : > { %9829 = vmatprep.subr.bf16.mxu0 %v20995_v34 }
 0xe10   : > { %9830 = vmatpush1.bf16.msra.mxu0 %v20993_v22  ;;  %v21047_v22 = vld [vmem:[%s22500_s13 + $0x6d0] ss:$24 sps:$4 sm:$0xff]  }
 0xe11   : > { %9831 = vmatprep.subr.bf16.mxu0 %v21001_v55 }
 0xe14   : > { %9832 = vmatpush1.bf16.msra.mxu0 %v20999_v3  ;;  %v21052_v3 = vld [vmem:[%s22500_s13 + $0x704] ss:$24 sps:$4 sm:$0xff]  }
 0xe15   : > { %9833 = vmatprep.subr.bf16.mxu0 %v21007_v58  ;;  %v21050_v58 = vld [vmem:[%s22500_s13 + $0x700] ss:$24 sps:$4 sm:$0xff]  }
 0xe18   : > { %9834 = vmatpush1.bf16.msra.mxu0 %v21005_v37  ;;  %v21055_v37 = vld [vmem:[%s22500_s13 + $0x734] ss:$24 sps:$4 sm:$0xff]  }
 0xe19   : > { %9835 = vmatprep.subr.bf16.mxu0 %v21013_v53  ;;  %v21053_v53 = vld [vmem:[%s22500_s13 + $0x730] ss:$24 sps:$4 sm:$0xff]  }
 0xe1c   : > { %9836 = vmatpush1.bf16.msra.mxu0 %v21011_v49  ;;  %v21058_v49 = vld [vmem:[%s22500_s13 + $0x764] ss:$24 sps:$4 sm:$0xff]  }
 0xe1d   : > { %9837 = vmatprep.subr.bf16.mxu0 %v21019_v2  ;;  %v21056_v2 = vld [vmem:[%s22500_s13 + $0x760] ss:$24 sps:$4 sm:$0xff]  }
 0xe20   : > { %9838 = vmatpush1.bf16.msra.mxu0 %v21017_v44  ;;  %v21061_v44 = vld [vmem:[%s22500_s13 + $0x794] ss:$24 sps:$4 sm:$0xff]  }
 0xe21   : > { %9839 = vmatprep.subr.bf16.mxu0 %v21025_v47  ;;  %v21059_v47 = vld [vmem:[%s22500_s13 + $0x790] ss:$24 sps:$4 sm:$0xff]  }
 0xe24   : > { %9840 = vmatpush1.bf16.msra.mxu0 %v21023_v48  ;;  %v21064_v48 = vld [vmem:[%s22500_s13 + $0x7c4] ss:$24 sps:$4 sm:$0xff]  }
 0xe25   : > { %9841 = vmatprep.subr.bf16.mxu0 %v21031_v20  ;;  %v21062_v20 = vld [vmem:[%s22500_s13 + $0x7c0] ss:$24 sps:$4 sm:$0xff]  }
 0xe28   : > { %9842 = vmatpush1.bf16.msra.mxu0 %v21029_v10  ;;  %v21067_v10 = vld [vmem:[%s22500_s13 + $0x7f4] ss:$24 sps:$4 sm:$0xff]  }
 0xe29   : > { %9843 = vmatprep.subr.bf16.mxu0 %v21037_v27  ;;  %v21065_v27 = vld [vmem:[%s22500_s13 + $0x7f0] ss:$24 sps:$4 sm:$0xff]  }
 0xe2c   : > { %9844 = vmatpush1.bf16.msra.mxu0 %v21035_v14  ;;  %v21070_v14 = vld [vmem:[%s22500_s13 + $0x824] ss:$24 sps:$4 sm:$0xff]  }
 0xe7f   : > { %v9294_v23 = vpop.xlane.xlu1 %9293 }
 0xe80   : > { %v9295_v61 = vsub.f32 %v9291_v43, %v9294_v23  ;;  %v21014_v43 = vld [vmem:[%s22500_s13 + $0x7e8] ss:$24 sps:$4 sm:$0xff]   ;;  %v21028_v23 = vld [vmem:[%s22500_s13 + $0x84c] ss:$24 sps:$4 sm:$0xff]  }
 0xe82   : > { %v9296_v57 = vmul.f32 1.442695, %v9295_v61  ;;  %v21026_v61 = vld [vmem:[%s22500_s13 + $0x848] ss:$24 sps:$4 sm:$0xff]  }
 0xe83   : > { %v9306_v6 = vpop.permute.xlu1 %9305 }
 0xe84   : > { %21671 = vpow2.f32 %v9296_v57  ;;  %v21034_v57 = vld [vmem:[%s22500_s13 + $0x87c] ss:$24 sps:$4 sm:$0xff]  }
 0xe8e   : > { %v21672_v54 = vpop.eup %21671 }
 0xe8f   : > { %v9298_v31 = vsel %vm7086_vm1, %v21672_v54, 0.0 }
 0xe90   : > { %9299 = vadd.xlane.f32.xlu0 %v9298_v31  ;;  %v21040_v31 = vld [vmem:[%s22500_s13 + $0x8ac] ss:$24 sps:$4 sm:$0xff]  }
 0xea6   : > { %9307 = vrot.lane.b32.xlu0 %v7007_v21, %s22075_s6  ;;  %v21043_v21 = vld [vmem:[%s22500_s13 + $0x8d4] ss:$24 sps:$4 sm:$0xff]  }
 0xea7   : > { %9845 = vmatprep.subr.bf16.mxu0 %v21043_v21  ;;  %v21685_v21 = vld [vmem:[#allocation2 + $0x8] sm:$0xff] }
 0xea8   : > { %9846 = vmatpush1.bf16.msra.mxu0 %v21041_v28 }
 0xea9   : > { %9905 = vmatprep.subr.bf16.mxu0 %v21049_v13 }
 0xf1d   : > { %v9300_v56 = vpop.xlane.xlu0 %9299 }
 0xf1e   : > { %21673 = vrcp.f32 %v9300_v56  ;;  %v21068_v56 = vld [vmem:[%s22500_s13 + $0x820] ss:$24 sps:$4 sm:$0xff]  }
 0xf21   : > { %v9308_v41 = vpop.permute.xlu0 %9307 }
 0xf22   : > { %v9309_v51 = vsel %vm7008_vm0, %v9306_v6, %v9308_v41  ;;  %9315 = vmatprep.subr.mxu1 %v9308_v41  ;;  %v21071_v6 = vld [vmem:[%s22500_s13 + $0x850] ss:$24 sps:$4 sm:$0xff]   ;;  %v21076_v41 = vld [vmem:[%s22500_s13 + $0x884] ss:$24 sps:$4 sm:$0xff]  }
 0xf23   : > { %9316 = vmatpush1.msra.mxu1 %v9309_v51  ;;  %v21074_v51 = vld [vmem:[%s22500_s13 + $0x880] ss:$24 sps:$4 sm:$0xff]  }
 0xf24   : > { %9864 = vmatprep.subr.bf16.mxu1 %v20980_v45  ;;  %v21073_v45 = vld [vmem:[%s22500_s13 + $0x854] ss:$24 sps:$4 sm:$0xff]  }
 0xf28   : > { %v21674_v60 = vpop.eup %21673 }
 0xf29   : > { %v9302_v15 = vmul.f32 %v21674_v60, %v21672_v54  ;;  %v21032_v54 = vld [vmem:[%s22500_s13 + $0x878] ss:$24 sps:$4 sm:$0xff]   ;;  %v21079_v60 = vld [vmem:[%s22500_s13 + $0x8b4] ss:$24 sps:$4 sm:$0xff]  }
 0xf2b   : > { %17932 = vmatmul.mubr.msk.f32.vlgmr.msra.gmra.mrb[86].mxu1 %vm7086_vm1, %v9302_v15  ;;  %v21082_v15 = vld [vmem:[%s22500_s13 + $0x8e4] ss:$24 sps:$4 sm:$0xff]  }
 0xf2c   : > { %9865 = vmatpush1.bf16.msra.mxu1 %v20978_v62  ;;  %v21077_v62 = vld [vmem:[%s22500_s13 + $0x8b0] ss:$24 sps:$4 sm:$0xff]  }
 0xf2d   : > { %9866 = vmatprep.subr.bf16.mxu1 %v20986_v24  ;;  %v21080_v24 = vld [vmem:[%s22500_s13 + $0x8e0] ss:$24 sps:$4 sm:$0xff]  }
 0xf30   : > { %9867 = vmatpush1.bf16.msra.mxu1 %v20984_v29 }
 0xf31   : > { %9868 = vmatprep.subr.bf16.mxu1 %v20992_v11 }
 0xf34   : > { %9869 = vmatpush1.bf16.msra.mxu1 %v20990_v16 }
 0xf35   : > { %9870 = vmatprep.subr.bf16.mxu1 %v20998_v17 }
 0xf38   : > { %9871 = vmatpush1.bf16.msra.mxu1 %v20996_v42 }
 0xf39   : > { %9872 = vmatprep.subr.bf16.mxu1 %v21004_v33 }
 0xf3c   : > { %9873 = vmatpush1.bf16.msra.mxu1 %v21002_v5 }
 0xf3d   : > { %9874 = vmatprep.subr.bf16.mxu1 %v21010_v25 }
 0xf40   : > { %9875 = vmatpush1.bf16.msra.mxu1 %v21008_v38 }
 0xf41   : > { %9876 = vmatprep.subr.bf16.mxu1 %v21016_v52 }
 0xf44   : > { %9877 = vmatpush1.bf16.msra.mxu1 %v21014_v43 }
 0xf45   : > { %9878 = vmatprep.subr.bf16.mxu1 %v21022_v40 }
 0xf48   : > { %9879 = vmatpush1.bf16.msra.mxu1 %v21020_v59  ;;  %v24018_v59 = vsub.s32 3, %v23212_v46 }
 0xf49   : > { %9880 = vmatprep.subr.bf16.mxu1 %v21028_v23  ;;  %v24021_v23 = vld [vmem:[%s22510_s15] sm:$0xff] }
 0xf4c   : > { %9881 = vmatpush1.bf16.msra.mxu1 %v21026_v61 }
 0xf4d   : > { %9882 = vmatprep.subr.bf16.mxu1 %v21034_v57 }
 0xf50   : > { %9883 = vmatpush1.bf16.msra.mxu1 %v21032_v54 }
 0xf51   : > { %9884 = vmatprep.subr.bf16.mxu1 %v21040_v31  ;;  %v21684_v31 = vld [vmem:[#allocation2] sm:$0xff] }
 0xf54   : > { %9885 = vmatpush1.bf16.msra.mxu1 %v21038_v19 }
 0xf55   : > { %9886 = vmatprep.subr.bf16.mxu1 %v21046_v30 }
 0xf58   : > { %9887 = vmatpush1.bf16.msra.mxu1 %v21044_v32  ;;  %v9967_v32 = vrot.slane %v23780_v36, %v24018_v59 }
 0xffe   : > { %v9381_v35 = vpop.f32.mrb[86].mxu1 }
 0xfff   : > { %v9383_v1 = vpop.f32.mrb[87].mxu1  ;;  %v9386_v55 = vpack.c.bf16 %v9381_v35, %v9381_v35  ;;  %v21686_v35 = vld [vmem:[#allocation2 + $0x10] sm:$0xff] }
0x1000   : > { %v9387_v34 = vpack.c.bf16 %v9383_v1, %v9383_v1 }
0x1002   : > { %18005 = vmatprep.mubr.msk.bf16.mxu0 %vm7008_vm0, %v9387_v34  ;;  %18006 = vmatprep.mubr.msk.bf16.mxu1 %vm7008_vm0, %v9387_v34 }
0x1003   : > { %9856 = vmatmul.mubr.bf16.vlgmr.msra.gmra.mrb[72].mxu0 %v9386_v55  ;;  %9897 = vmatmul.mubr.bf16.vlgmr.msra.gmra.mrb[88].mxu1 %v9386_v55 }
0x1004   : > { %9906 = vmatpush1.bf16.msra.mxu0 %v21047_v22  ;;  %18007 = vmatprep.mubr.msk.bf16.mxu0 %vm7008_vm0, %v9387_v34  ;;  %v9971_v22 = vrot.slane %v23768_v12, %v24018_v59 }
0x1005   : > { %9907 = vmatprep.subr.bf16.mxu0 %v21052_v3  ;;  %v9975_v3 = vrot.slane %v23816_v4, %v24018_v59  ;;  %v21688_v4 = vld [vmem:[#allocation2 + $0x20] sm:$0xff] }
0x1008   : > { %9908 = vmatpush1.bf16.msra.mxu0 %v21050_v58 }
0x1009   : > { %9909 = vmatprep.subr.bf16.mxu0 %v21055_v37 }
0x100c   : > { %9910 = vmatpush1.bf16.msra.mxu0 %v21053_v53 }
0x100d   : > { %9911 = vmatprep.subr.bf16.mxu0 %v21058_v49 }
0x1010   : > { %9912 = vmatpush1.bf16.msra.mxu0 %v21056_v2  ;;  %v21687_v2 = vld [vmem:[#allocation2 + $0x18] sm:$0xff] }
0x1011   : > { %9913 = vmatprep.subr.bf16.mxu0 %v21061_v44 }
0x1014   : > { %9914 = vmatpush1.bf16.msra.mxu0 %v21059_v47 }
0x1015   : > { %9915 = vmatprep.subr.bf16.mxu0 %v21064_v48 }
0x1018   : > { %9916 = vmatpush1.bf16.msra.mxu0 %v21062_v20 }
0x1019   : > { %9917 = vmatprep.subr.bf16.mxu0 %v21067_v10  ;;  %v21689_v10 = vld [vmem:[#allocation2 + $0x28] sm:$0xff] }
0x101c   : > { %9918 = vmatpush1.bf16.msra.mxu0 %v21065_v27 }
0x101d   : > { %9919 = vmatprep.subr.bf16.mxu0 %v21070_v14 }
0x1020   : > { %9920 = vmatpush1.bf16.msra.mxu0 %v21068_v56  ;;  %v10091_v56 = vld [vmem:[%s22502_s30] sm:$0xff] }
0x1021   : > { %9921 = vmatprep.subr.bf16.mxu0 %v21073_v45  ;;  %v10095_v45 = vld [vmem:[%s22502_s30 + $0x20] sm:$0xff] }
0x1024   : > { %9922 = vmatpush1.bf16.msra.mxu0 %v21071_v6  ;;  %v10092_v6 = vld [vmem:[%s22502_s30 + $0x8] sm:$0xff] }
0x1025   : > { %9923 = vmatprep.subr.bf16.mxu0 %v21076_v41  ;;  %v18008_v41 = vcombine.low %v10091_v56, %v10095_v45 }
0x1028   : > { %9924 = vmatpush1.bf16.msra.mxu0 %v21074_v51  ;;  %v18009_v51 = vcombine.high %v10091_v56, %v10095_v45 }
0x1029   : > { %9925 = vmatprep.subr.bf16.mxu0 %v21079_v60  ;;  %v10096_v60 = vld [vmem:[%s22502_s30 + $0x28] sm:$0xff] }
0x102a   : > { %12427 = vmatprep.subr.bf16.mxu1 %v18009_v51  ;;  %v10147_v51 = vld [vmem:[%s22502_s30 + $0x1c0] sm:$0xff] }
0x102b   : > { %12428 = vmatpush1.bf16.msra.mxu1 %v18008_v41 }
0x102c   : > { %9926 = vmatpush1.bf16.msra.mxu0 %v21077_v62  ;;  %v10099_v62 = vld [vmem:[%s22502_s30 + $0x40] sm:$0xff] }
0x102d   : > { %9927 = vmatprep.subr.bf16.mxu0 %v21082_v15  ;;  %v10103_v15 = vld [vmem:[%s22502_s30 + $0x60] sm:$0xff] }
0x1030   : > { %9928 = vmatpush1.bf16.msra.mxu0 %v21080_v24  ;;  %v18010_v24 = vcombine.low %v10092_v6, %v10096_v60 }
0x1033   : > { %9938 = vmatmul.mubr.bf16.vlgmr.msra.gmra.mrb[76].mxu0 %v9386_v55 }
0x10d6   : > { %v9857_v29 = vpop.f32.mrb[72].mxu0  ;;  %v9898_v11 = vpop.f32.mrb[88].mxu1 }
0x10d7   : > { %v9946_v16 = vadd.f32 %v9857_v29, %v23911_v63  ;;  %v9948_v17 = vadd.f32 %v9898_v11, %v23914_v0  ;;  %v9859_v42 = vpop.f32.mrb[73].mxu0  ;;  %v9900_v33 = vpop.f32.mrb[89].mxu1  ;;  %v9955_v63 = vrot.slane %v24021_v23, %v24018_v59  ;;  %v24026_v0 = vld [vmem:[%s22510_s15 + $0x8] sm:$0xff]  ;;  %v18011_v29 = vcombine.high %v10092_v6, %v10096_v60  ;;  %v10151_v60 = vld [vmem:[%s22502_s30 + $0x1e0] sm:$0xff] }
0x10d8   : > { %v9947_v5 = vadd.f32 %v9859_v42, %v23917_v8  ;;  %v9949_v25 = vadd.f32 %v9900_v33, %v23920_v7  ;;  %v9861_v38 = vpop.f32.mrb[74].mxu0  ;;  %v9902_v52 = vpop.f32.mrb[90].mxu1  ;;  %v9959_v61 = vrot.slane %v24026_v0, %v24018_v59  ;;  %v24031_v7 = vld [vmem:[%s22510_s15 + $0x10] sm:$0xff]  ;;  %v18017_v11 = vcombine.high %v10099_v62, %v10103_v15  ;;  %v10107_v42 = vld [vmem:[%s22502_s30 + $0x80] sm:$0xff] }
0x10d9   : > { %v9862_v43 = vpop.f32.mrb[75].mxu0  ;;  %v9903_v40 = vpop.f32.mrb[91].mxu1  ;;  %v9976_v8 = vadd.f32 %v9955_v63, %v9946_v16  ;;  %v9963_v54 = vrot.slane %v24031_v7, %v24018_v59  ;;  %v10100_v16 = vld [vmem:[%s22502_s30 + $0x48] sm:$0xff]  ;;  %12550 = vmatprep.subr.bf16.mxu0 %v18011_v29  ;;  %v18016_v52 = vcombine.low %v10099_v62, %v10103_v15 }
0x10da   : > { %v9977_v57 = vadd.f32 %v9959_v61, %v9947_v5  ;;  %v9979_v34 = vadd.f32 %v9967_v32, %v9949_v25  ;;  %v10111_v5 = vld [vmem:[%s22502_s30 + $0xa0] sm:$0xff]  ;;  %v10108_v25 = vld [vmem:[%s22502_s30 + $0x88] sm:$0xff]  ;;  %12551 = vmatpush1.bf16.msra.mxu0 %v18010_v24  ;;  %12429 = vmatprep.subr.bf16.mxu1 %v18017_v11  ;;  %v18065_v11 = vcombine.high %v10147_v51, %v10151_v60 }
0x10db   : > { %v24035_v19 = vadd.f32 %v21684_v31, %v9976_v8  ;;  %v9978_v30 = vadd.f32 %v9963_v54, %v9948_v17  ;;  %v10104_v17 = vld [vmem:[%s22502_s30 + $0x68] sm:$0xff]  ;;  %v18025_v40 = vcombine.high %v10107_v42, %v10111_v5  ;;  %v10115_v61 = vld [vmem:[%s22502_s30 + $0xc0] sm:$0xff]  ;;  %12430 = vmatpush1.bf16.msra.mxu1 %v18016_v52  ;;  %v18024_v31 = vcombine.low %v10107_v42, %v10111_v5 }
0x10dc   : > { %v24037_v28 = vadd.f32 %v21685_v21, %v9977_v57  ;;  %v24052_v44 = vadd.f32 %v21687_v2, %v9979_v34  ;;  %v18019_v33 = vcombine.high %v10100_v16, %v10104_v17  ;;  %v10112_v38 = vld [vmem:[%s22502_s30 + $0xa8] sm:$0xff]  ;;  %v18018_v43 = vcombine.low %v10100_v16, %v10104_v17  ;;  %v10119_v8 = vld [vmem:[%s22502_s30 + $0xe0] sm:$0xff] }
0x10dd   : > { %v24043_v1 = vadd.f32 %v21686_v35, %v9978_v30  ;;  %v18027_v63 = vcombine.high %v10108_v25, %v10112_v38  ;;  %v10116_v57 = vld [vmem:[%s22502_s30 + $0xc8] sm:$0xff]  ;;  %12431 = vmatprep.subr.bf16.mxu1 %v18025_v40  ;;  %v18026_v21 = vcombine.low %v10108_v25, %v10112_v38  ;;  %v18033_v30 = vcombine.high %v10115_v61, %v10119_v8  ;;  %v10127_v35 = vld [vmem:[%s22502_s30 + $0x120] sm:$0xff] }
0x10de   : > { %v9988_v13 = vadd.f32 %v24037_v28, %v24035_v19  ;;  %12552 = vmatprep.subr.bf16.mxu0 %v18019_v33  ;;  %v10120_v54 = vld [vmem:[%s22502_s30 + $0xe8] sm:$0xff]  ;;  %v10155_v17 = vld [vmem:[%s22502_s30 + $0x200] sm:$0xff]  ;;  %v18064_v25 = vcombine.low %v10147_v51, %v10151_v60 }
0x10df   : > { %12553 = vmatpush1.bf16.msra.mxu0 %v18018_v43  ;;  %v18035_v32 = vcombine.high %v10116_v57, %v10120_v54  ;;  %v10124_v34 = vld [vmem:[%s22502_s30 + $0x108] sm:$0xff]  ;;  %12432 = vmatpush1.bf16.msra.mxu1 %v18024_v31  ;;  %v10159_v42 = vld [vmem:[%s22502_s30 + $0x220] sm:$0xff] }
0x10e0   : > { %v9989_v53 = vadd.f32 %v9988_v13, %v24043_v1  ;;  %12554 = vmatprep.subr.bf16.mxu0 %v18027_v63  ;;  %v10123_v13 = vld [vmem:[%s22502_s30 + $0x100] sm:$0xff]  ;;  %12433 = vmatprep.subr.bf16.mxu1 %v18033_v30  ;;  %v10136_v2 = vld [vmem:[%s22502_s30 + $0x168] sm:$0xff]  ;;  %v18073_v52 = vcombine.high %v10155_v17, %v10159_v42 }
0x10e1   : > { %v10148_v62 = vld [vmem:[%s22502_s30 + $0x1c8] sm:$0xff]  ;;  %v10163_v40 = vld [vmem:[%s22502_s30 + $0x240] sm:$0xff] }
0x10e2   : > { %v9990_v20 = vadd.f32 %v9989_v53, %v24052_v44  ;;  %v10131_v53 = vld [vmem:[%s22502_s30 + $0x140] sm:$0xff]  ;;  %v10152_v15 = vld [vmem:[%s22502_s30 + $0x1e8] sm:$0xff] }
0x10e3   : > { %12555 = vmatpush1.bf16.msra.mxu0 %v18026_v21  ;;  %v18067_v16 = vcombine.high %v10148_v62, %v10152_v15  ;;  %v10156_v33 = vld [vmem:[%s22502_s30 + $0x208] sm:$0xff]  ;;  %v18066_v38 = vcombine.low %v10148_v62, %v10152_v15  ;;  %v10167_v63 = vld [vmem:[%s22502_s30 + $0x260] sm:$0xff] }
0x10e4   : > { %12556 = vmatprep.subr.bf16.mxu0 %v18035_v32  ;;  %v10160_v5 = vld [vmem:[%s22502_s30 + $0x228] sm:$0xff]  ;;  %v18081_v31 = vcombine.high %v10163_v40, %v10167_v63  ;;  %v10171_v30 = vld [vmem:[%s22502_s30 + $0x280] sm:$0xff] }
0x10e5   : > { %v18075_v43 = vcombine.high %v10156_v33, %v10160_v5  ;;  %v10175_v32 = vld [vmem:[%s22502_s30 + $0x2a0] sm:$0xff]  ;;  %v10184_v60 = vld [vmem:[%s22502_s30 + $0x2e8] sm:$0xff] }
0x1106   : > { %v9939_v55 = vpop.f32.mrb[76].mxu0 }
0x1107   : > { %v9950_v58 = vadd.f32 %v9939_v55, %v23923_v18  ;;  %v9941_v37 = vpop.f32.mrb[77].mxu0  ;;  %v18032_v55 = vcombine.low %v10115_v61, %v10119_v8  ;;  %v10164_v61 = vld [vmem:[%s22502_s30 + $0x248] sm:$0xff] }
0x1108   : > { %v9951_v36 = vadd.f32 %v9941_v37, %v23926_v26  ;;  %v9943_v49 = vpop.f32.mrb[78].mxu0  ;;  %v10168_v8 = vld [vmem:[%s22502_s30 + $0x268] sm:$0xff] }
0x1109   : > { %v9980_v47 = vadd.f32 %v9971_v22, %v9950_v58  ;;  %v9944_v12 = vpop.f32.mrb[79].mxu0  ;;  %v10128_v22 = vld [vmem:[%s22502_s30 + $0x128] sm:$0xff]  ;;  %v18041_v58 = vcombine.high %v10123_v13, %v10127_v35  ;;  %12434 = vmatpush1.bf16.msra.mxu1 %v18032_v55  ;;  %v18083_v21 = vcombine.high %v10164_v61, %v10168_v8  ;;  %v18089_v55 = vcombine.high %v10171_v30, %v10175_v32 }
0x110a   : > { %v9981_v48 = vadd.f32 %v9975_v3, %v9951_v36  ;;  %v18034_v3 = vcombine.low %v10116_v57, %v10120_v54  ;;  %v18043_v37 = vcombine.high %v10124_v34, %v10128_v22  ;;  %v10135_v36 = vld [vmem:[%s22502_s30 + $0x160] sm:$0xff]  ;;  %v10132_v49 = vld [vmem:[%s22502_s30 + $0x148] sm:$0xff]  ;;  %v18042_v12 = vcombine.low %v10124_v34, %v10128_v22 }
0x110b   : > { %v24054_v18 = vadd.f32 %v21688_v4, %v9980_v47  ;;  %v18040_v47 = vcombine.low %v10123_v13, %v10127_v35  ;;  %12435 = vmatprep.subr.bf16.mxu1 %v18041_v58  ;;  %v18051_v4 = vcombine.high %v10132_v49, %v10136_v2  ;;  %v18048_v56 = vcombine.low %v10131_v53, %v10135_v36  ;;  %v10172_v13 = vld [vmem:[%s22502_s30 + $0x288] sm:$0xff] }
0x110c   : > { %v24057_v26 = vadd.f32 %v21689_v10, %v9981_v48  ;;  %12557 = vmatpush1.bf16.msra.mxu0 %v18034_v3  ;;  %v18049_v48 = vcombine.high %v10131_v53, %v10135_v36  ;;  %v10143_v10 = vld [vmem:[%s22502_s30 + $0x1a0] sm:$0xff]  ;;  %v18050_v45 = vcombine.low %v10132_v49, %v10136_v2  ;;  %v18072_v57 = vcombine.low %v10155_v17, %v10159_v42  ;;  %v10176_v35 = vld [vmem:[%s22502_s30 + $0x2a8] sm:$0xff] }
0x110d   : > { %v9991_v27 = vadd.f32 %v9990_v20, %v24054_v18  ;;  %12558 = vmatprep.subr.bf16.mxu0 %v18043_v37  ;;  %v10139_v20 = vld [vmem:[%s22502_s30 + $0x180] sm:$0xff]  ;;  %12436 = vmatpush1.bf16.msra.mxu1 %v18040_v47  ;;  %v18074_v54 = vcombine.low %v10156_v33, %v10160_v5  ;;  %v18080_v34 = vcombine.low %v10163_v40, %v10167_v63  ;;  %v10192_v33 = vld [vmem:[%s22502_s30 + $0x328] sm:$0xff] }
0x110e   : > { %12437 = vmatprep.subr.bf16.mxu1 %v18049_v48  ;;  %v18057_v6 = vcombine.high %v10139_v20, %v10143_v10  ;;  %v18056_v24 = vcombine.low %v10139_v20, %v10143_v10  ;;  %v18082_v22 = vcombine.low %v10164_v61, %v10168_v8  ;;  %v18091_v3 = vcombine.high %v10172_v13, %v10176_v35  ;;  %v10195_v5 = vld [vmem:[%s22502_s30 + $0x340] sm:$0xff]  ;;  %v10196_v40 = vld [vmem:[%s22502_s30 + $0x348] sm:$0xff] }
0x110f   : > { %v9992_v14 = vadd.f32 %v9991_v27, %v24057_v26  ;;  %v10140_v27 = vld [vmem:[%s22502_s30 + $0x188] sm:$0xff]  ;;  %v18088_v58 = vcombine.low %v10171_v30, %v10175_v32  ;;  %v18090_v37 = vcombine.low %v10172_v13, %v10176_v35  ;;  %v10203_v8 = vld [vmem:[%s22502_s30 + $0x380] sm:$0xff] }
0x1110   : > { %12559 = vmatpush1.bf16.msra.mxu0 %v18042_v12  ;;  %v10200_v63 = vld [vmem:[%s22502_s30 + $0x368] sm:$0xff]  ;;  %v10211_v35 = vld [vmem:[%s22502_s30 + $0x3c0] sm:$0xff] }
0x1111   : > { %9993 = vadd.xlane.f32.xlu1 %v9992_v14  ;;  %v10144_v14 = vld [vmem:[%s22502_s30 + $0x1a8] sm:$0xff]  ;;  %12560 = vmatprep.subr.bf16.mxu0 %v18051_v4  ;;  %v18115_v61 = vcombine.high %v10196_v40, %v10200_v63  ;;  %v18114_v30 = vcombine.low %v10196_v40, %v10200_v63 }
0x1112   : > { %v18059_v41 = vcombine.high %v10140_v27, %v10144_v14  ;;  %12438 = vmatpush1.bf16.msra.mxu1 %v18048_v56  ;;  %v18058_v29 = vcombine.low %v10140_v27, %v10144_v14 }
0x1113   : > { %12439 = vmatprep.subr.bf16.mxu1 %v18057_v6  ;;  %v10179_v6 = vld [vmem:[%s22502_s30 + $0x2c0] sm:$0xff] }
0x1114   : > { %12561 = vmatpush1.bf16.msra.mxu0 %v18050_v45 }
0x1115   : > { %12562 = vmatprep.subr.bf16.mxu0 %v18059_v41  ;;  %v10180_v41 = vld [vmem:[%s22502_s30 + $0x2c8] sm:$0xff] }
0x1116   : > { %12440 = vmatpush1.bf16.msra.mxu1 %v18056_v24  ;;  %v18098_v15 = vcombine.low %v10180_v41, %v10184_v60  ;;  %v18099_v24 = vcombine.high %v10180_v41, %v10184_v60  ;;  %v24179_v41 = vsub.s32 5, %v23212_v46 }
0x1117   : > { %12441 = vmatprep.subr.bf16.mxu1 %v18065_v11  ;;  %v10191_v11 = vld [vmem:[%s22502_s30 + $0x320] sm:$0xff] }
0x1118   : > { %12563 = vmatpush1.bf16.msra.mxu0 %v18058_v29  ;;  %v10187_v29 = vld [vmem:[%s22502_s30 + $0x300] sm:$0xff] }
0x1119   : > { %12564 = vmatprep.subr.bf16.mxu0 %v18067_v16  ;;  %v10188_v16 = vld [vmem:[%s22502_s30 + $0x308] sm:$0xff]  ;;  %v18104_v17 = vcombine.low %v10187_v29, %v10191_v11  ;;  %v18105_v42 = vcombine.high %v10187_v29, %v10191_v11  ;;  %v10062_v11 = vrot.slane %v24026_v0, %v24179_v41 }
0x111a   : > { %12442 = vmatpush1.bf16.msra.mxu1 %v18064_v25  ;;  %v10199_v25 = vld [vmem:[%s22502_s30 + $0x360] sm:$0xff] }
0x111b   : > { %12443 = vmatprep.subr.bf16.mxu1 %v18073_v52  ;;  %v18107_v52 = vcombine.high %v10188_v16, %v10192_v33 }
0x111c   : > { %12565 = vmatpush1.bf16.msra.mxu0 %v18066_v38  ;;  %v18106_v38 = vcombine.low %v10188_v16, %v10192_v33  ;;  %v10058_v16 = vrot.slane %v24021_v23, %v24179_v41 }
0x111d   : > { %12566 = vmatprep.subr.bf16.mxu0 %v18075_v43  ;;  %v18113_v43 = vcombine.high %v10195_v5, %v10199_v25 }
0x111e   : > { %12444 = vmatpush1.bf16.msra.mxu1 %v18072_v57  ;;  %v10207_v57 = vld [vmem:[%s22502_s30 + $0x3a0] sm:$0xff] }
0x111f   : > { %12445 = vmatprep.subr.bf16.mxu1 %v18081_v31  ;;  %v10208_v31 = vld [vmem:[%s22502_s30 + $0x3a8] sm:$0xff]  ;;  %v18121_v32 = vcombine.high %v10203_v8, %v10207_v57 }
0x1120   : > { %12567 = vmatpush1.bf16.msra.mxu0 %v18074_v54  ;;  %v10204_v54 = vld [vmem:[%s22502_s30 + $0x388] sm:$0xff] }
0x1121   : > { %12568 = vmatprep.subr.bf16.mxu0 %v18083_v21  ;;  %v18112_v21 = vcombine.low %v10195_v5, %v10199_v25  ;;  %v18123_v13 = vcombine.high %v10204_v54, %v10208_v31 }
0x1122   : > { %12446 = vmatpush1.bf16.msra.mxu1 %v18080_v34  ;;  %v10215_v34 = vld [vmem:[%s22502_s30 + $0x3e0] sm:$0xff] }
0x1123   : > { %12447 = vmatprep.subr.bf16.mxu1 %v18089_v55  ;;  %v10216_v55 = vld [vmem:[%s22502_s30 + $0x3e8] sm:$0xff] }
0x1124   : > { %12569 = vmatpush1.bf16.msra.mxu0 %v18082_v22  ;;  %v10212_v22 = vld [vmem:[%s22502_s30 + $0x3c8] sm:$0xff] }
0x1125   : > { %12570 = vmatprep.subr.bf16.mxu0 %v18091_v3  ;;  %v18120_v3 = vcombine.low %v10203_v8, %v10207_v57 }
0x1126   : > { %12448 = vmatpush1.bf16.msra.mxu1 %v18088_v58  ;;  %v18122_v58 = vcombine.low %v10204_v54, %v10208_v31 }
0x1128   : > { %12571 = vmatpush1.bf16.msra.mxu0 %v18090_v37  ;;  %v18129_v37 = vcombine.high %v10211_v35, %v10215_v34 }
0x1129   : > { %12572 = vmatprep.subr.bf16.mxu0 %v18099_v24 }
0x112c   : > { %12573 = vmatpush1.bf16.msra.mxu0 %v18098_v15 }
0x112d   : > { %12574 = vmatprep.subr.bf16.mxu0 %v18107_v52 }
0x1130   : > { %12575 = vmatpush1.bf16.msra.mxu0 %v18106_v38 }
0x1131   : > { %12576 = vmatprep.subr.bf16.mxu0 %v18115_v61 }
0x1134   : > { %12577 = vmatpush1.bf16.msra.mxu0 %v18114_v30  ;;  %v10228_v30 = vld [vmem:[%s22502_s30 + $0x448] sm:$0xff] }
0x1135   : > { %12578 = vmatprep.subr.bf16.mxu0 %v18123_v13 }
0x1138   : > { %12579 = vmatpush1.bf16.msra.mxu0 %v18122_v58 }
0x119e   : > { %v9994_v53 = vpop.xlane.xlu1 %9993 }
0x119f   : > { %v9996_v36 = vmul.f32 0.0013020834, %v9994_v53  ;;  %v18131_v53 = vcombine.high %v10212_v22, %v10216_v55 }
0x11a1   : > { %v24106_v49 = vsub.f32 %v24035_v19, %v9996_v36  ;;  %v24109_v2 = vsub.f32 %v24037_v28, %v9996_v36  ;;  %v24112_v47 = vsub.f32 %v24043_v1, %v9996_v36  ;;  %v24115_v12 = vsub.f32 %v24052_v44, %v9996_v36  ;;  %12580 = vmatprep.subr.bf16.mxu0 %v18131_v53  ;;  %v10236_v53 = vld [vmem:[%s22502_s30 + $0x488] sm:$0xff] }
0x11a2   : > { %v24122_v19 = vsub.f32 %v24054_v18, %v9996_v36  ;;  %v24127_v20 = vsub.f32 %v24057_v26, %v9996_v36  ;;  %v10183_v26 = vld [vmem:[%s22502_s30 + $0x2e0] sm:$0xff]  ;;  %v18128_v36 = vcombine.low %v10211_v35, %v10215_v34 }
0x11a3   : > { %v10003_v48 = vmul.f32 %v24106_v49, %v24106_v49  ;;  %v10004_v4 = vmul.f32 %v24109_v2, %v24109_v2  ;;  %v10005_v28 = vmul.f32 %v24112_v47, %v24112_v47  ;;  %v10006_v44 = vmul.f32 %v24115_v12, %v24115_v12 }
0x11a4   : > { %v10007_v27 = vmul.f32 %v24122_v19, %v24122_v19  ;;  %v10008_v18 = vmul.f32 %v24127_v20, %v24127_v20  ;;  %v18097_v51 = vcombine.high %v10179_v6, %v10183_v26  ;;  %v18096_v62 = vcombine.low %v10179_v6, %v10183_v26 }
0x11a5   : > { %v10009_v1 = vadd.f32 %v10004_v4, %v10003_v48  ;;  %v18130_v48 = vcombine.low %v10212_v22, %v10216_v55  ;;  %v24156_v4 = vld [vmem:[%s22502_s30 + $0x400] sm:$0xff]  ;;  %v24176_v26 = vsub.s32 4, %v23212_v46 }
0x11a6   : > { %12449 = vmatprep.subr.bf16.mxu1 %v18097_v51  ;;  %v10235_v22 = vld [vmem:[%s22502_s30 + $0x480] sm:$0xff] }
0x11a7   : > { %v10010_v10 = vadd.f32 %v10009_v1, %v10005_v28  ;;  %12450 = vmatpush1.bf16.msra.mxu1 %v18096_v62  ;;  %v24159_v28 = vld [vmem:[%s22502_s30 + $0x420] sm:$0xff]  ;;  %v24162_v1 = vld [vmem:[%s22502_s30 + $0x408] sm:$0xff]  ;;  %12581 = vmatpush1.bf16.msra.mxu0 %v18130_v48  ;;  %25436 = vst [vmem:[#allocation31_spill] sm:$0xff] %v24176_v26  ;;  %v10032_v51 = vrot.slane %v24026_v0, %v24176_v26  ;;  %v21690_v62 = vld [vmem:[%s22510_s15 + $0x18] sm:$0xff] }
0x11a8   : > { %12451 = vmatprep.subr.bf16.mxu1 %v18105_v42  ;;  %v10028_v60 = vrot.slane %v24021_v23, %v24176_v26  ;;  %v10040_v15 = vrot.slane %v21690_v62, %v24176_v26  ;;  %v10036_v24 = vrot.slane %v24031_v7, %v24176_v26  ;;  %v21691_v42 = vld [vmem:[%s22510_s15 + $0x28] sm:$0xff]  ;;  %v10070_v0 = vrot.slane %v21690_v62, %v24179_v41  ;;  %v10251_v62 = vld [vmem:[%s22502_s30 + $0x500] sm:$0xff] }
0x11a9   : > { %v10011_v14 = vadd.f32 %v10010_v10, %v10006_v44  ;;  %v18137_v44 = vcombine.high %v24156_v4, %v24159_v28  ;;  %v24167_v10 = vld [vmem:[%s22502_s30 + $0x428] sm:$0xff]  ;;  %v10048_v33 = vrot.slane %v21691_v42, %v24176_v26 }
0x11ab   : > { %v10012_v56 = vadd.f32 %v10011_v14, %v10007_v27  ;;  %12452 = vmatpush1.bf16.msra.mxu1 %v18104_v17  ;;  %v18136_v27 = vcombine.low %v24156_v4, %v24159_v28  ;;  %v18138_v14 = vcombine.low %v24162_v1, %v24167_v10  ;;  %v10066_v17 = vrot.slane %v24031_v7, %v24179_v41 }
0x11ac   : > { %12453 = vmatprep.subr.bf16.mxu1 %v18113_v43  ;;  %v10078_v7 = vrot.slane %v21691_v42, %v24179_v41 }
0x11ad   : > { %v10013_v45 = vadd.f32 %v10012_v56, %v10008_v18  ;;  %v18139_v18 = vcombine.high %v24162_v1, %v24167_v10 }
0x11af   : > { %10014 = vadd.xlane.f32.xlu0 %v10013_v45  ;;  %12454 = vmatpush1.bf16.msra.mxu1 %v18112_v21  ;;  %v10231_v21 = vld [vmem:[%s22502_s30 + $0x460] sm:$0xff] }
0x11b0   : > { %12455 = vmatprep.subr.bf16.mxu1 %v18121_v32  ;;  %12591 = vmatprep.subr.bf16.mxu0 %v18139_v18  ;;  %v10232_v32 = vld [vmem:[%s22502_s30 + $0x468] sm:$0xff]  ;;  %v10243_v18 = vld [vmem:[%s22502_s30 + $0x4c0] sm:$0xff] }
0x11b1   : > { %v18147_v58 = vcombine.high %v10228_v30, %v10232_v32  ;;  %v18146_v1 = vcombine.low %v10228_v30, %v10232_v32  ;;  %v10276_v30 = vld [vmem:[%s22502_s30 + $0x5c8] sm:$0xff] }
0x11b2   : > { %v10280_v32 = vld [vmem:[%s22502_s30 + $0x5e8] sm:$0xff] }
0x11b3   : > { %12456 = vmatpush1.bf16.msra.mxu1 %v18120_v3 }
0x11b4   : > { %12457 = vmatprep.subr.bf16.mxu1 %v18129_v37  ;;  %v10239_v37 = vld [vmem:[%s22502_s30 + $0x4a0] sm:$0xff] }
0x11b7   : > { %12458 = vmatpush1.bf16.msra.mxu1 %v18128_v36  ;;  %v10240_v36 = vld [vmem:[%s22502_s30 + $0x4a8] sm:$0xff] }
0x11b8   : > { %12468 = vmatprep.subr.bf16.mxu1 %v18137_v44  ;;  %v18153_v44 = vcombine.high %v10235_v22, %v10239_v37  ;;  %v18155_v10 = vcombine.high %v10236_v53, %v10240_v36 }
0x123c   : > { %v10015_v56 = vpop.xlane.xlu0 %10014 }
0x123d   : > { %v10016_v45 = vmul.f32 0.0013020834, %v10015_v56  ;;  %v10247_v56 = vld [vmem:[%s22502_s30 + $0x4e0] sm:$0xff] }
0x123f   : > { %v10017_v6 = vadd.f32 1e-05, %v10016_v45  ;;  %v10244_v45 = vld [vmem:[%s22502_s30 + $0x4c8] sm:$0xff] }
0x1241   : > { %21675 = vrsqrt.f32 %v10017_v6  ;;  %v10248_v6 = vld [vmem:[%s22502_s30 + $0x4e8] sm:$0xff] }
0x124b   : > { %v21676_v29 = vpop.eup %21675 }
0x124c   : > { %v10020_v5 = vmul.f32 %v21676_v29, %v24109_v2  ;;  %v10019_v25 = vmul.f32 %v21676_v29, %v24106_v49  ;;  %v10022_v38 = vmul.f32 %v21676_v29, %v24115_v12  ;;  %v10021_v52 = vmul.f32 %v21676_v29, %v24112_v47  ;;  %v21692_v12 = vld [vmem:[%s22510_s15 + $0x20] sm:$0xff] }
0x124d   : > { %v10024_v23 = vmul.f32 %v21676_v29, %v24127_v20  ;;  %v10023_v49 = vmul.f32 %v21676_v29, %v24122_v19  ;;  %v10044_v47 = vrot.slane %v21692_v12, %v24176_v26  ;;  %v10227_v20 = vld [vmem:[%s22502_s30 + $0x440] sm:$0xff]  ;;  %v10074_v19 = vrot.slane %v21692_v12, %v24179_v41  ;;  %v10256_v29 = vld [vmem:[%s22502_s30 + $0x528] sm:$0xff] }
0x124e   : > { %v10050_v43 = vmul.f32 %v10032_v51, %v10020_v5  ;;  %v10049_v40 = vmul.f32 %v10028_v60, %v10019_v25  ;;  %v10052_v63 = vmul.f32 %v10040_v15, %v10022_v38  ;;  %v10051_v2 = vmul.f32 %v10036_v24, %v10021_v52  ;;  %v10255_v15 = vld [vmem:[%s22502_s30 + $0x520] sm:$0xff]  ;;  %v10252_v24 = vld [vmem:[%s22502_s30 + $0x508] sm:$0xff] }
0x124f   : > { %v10054_v61 = vmul.f32 %v10048_v33, %v10024_v23  ;;  %v10053_v55 = vmul.f32 %v10044_v47, %v10023_v49  ;;  %v18145_v3 = vcombine.high %v10227_v20, %v10231_v21  ;;  %v18144_v28 = vcombine.low %v10227_v20, %v10231_v21  ;;  %v10259_v33 = vld [vmem:[%s22502_s30 + $0x540] sm:$0xff]  ;;  %v10260_v25 = vld [vmem:[%s22502_s30 + $0x548] sm:$0xff] }
0x1250   : > { %v24207_v8 = vadd.f32 %v10062_v11, %v10050_v43  ;;  %v24209_v57 = vadd.f32 %v10058_v16, %v10049_v40  ;;  %v24212_v54 = vadd.f32 %v10066_v17, %v10051_v2  ;;  %v24214_v31 = vadd.f32 %v10070_v0, %v10052_v63  ;;  %v10263_v5 = vld [vmem:[%s22502_s30 + $0x560] sm:$0xff]  ;;  %v10264_v38 = vld [vmem:[%s22502_s30 + $0x568] sm:$0xff] }
0x1251   : > { %v24219_v13 = vadd.f32 %v10078_v7, %v10054_v61  ;;  %v24242_v4 = vadd.f32 %v10074_v19, %v10053_v55  ;;  %v18161_v51 = vcombine.high %v10243_v18, %v10247_v56  ;;  %v18163_v60 = vcombine.high %v10244_v45, %v10248_v6  ;;  %v10267_v43 = vld [vmem:[%s22502_s30 + $0x580] sm:$0xff]  ;;  %v10268_v63 = vld [vmem:[%s22502_s30 + $0x588] sm:$0xff] }
0x1252   : > { %v24224_v35 = vpack.c.bf16 %v24207_v8, %v24207_v8  ;;  %v24228_v34 = vpack.c.bf16 %v24209_v57, %v24209_v57  ;;  %v24240_v48 = vpack.c.bf16 %v24214_v31, %v24214_v31  ;;  %v18160_v11 = vcombine.low %v10243_v18, %v10247_v56  ;;  %v10271_v40 = vld [vmem:[%s22502_s30 + $0x5a0] sm:$0xff]  ;;  %v10272_v2 = vld [vmem:[%s22502_s30 + $0x5a8] sm:$0xff] }
0x1253   : > { %v18162_v16 = vcombine.low %v10244_v45, %v10248_v6  ;;  %v18169_v17 = vcombine.high %v10251_v62, %v10255_v15  ;;  %v18171_v42 = vcombine.high %v10252_v24, %v10256_v29  ;;  %v18168_v52 = vcombine.low %v10251_v62, %v10255_v15  ;;  %v10275_v20 = vld [vmem:[%s22502_s30 + $0x5c0] sm:$0xff]  ;;  %v10292_v45 = vld [vmem:[%s22502_s30 + $0x648] sm:$0xff] }
0x1254   : > { %12459 = vmatprep.mubr.bf16.mxu1 %v24224_v35  ;;  %12582 = vmatprep.mubr.bf16.mxu0 %v24224_v35  ;;  %v18170_v0 = vcombine.low %v10252_v24, %v10256_v29  ;;  %v18177_v23 = vcombine.high %v10259_v33, %v10263_v5  ;;  %v18179_v7 = vcombine.high %v10260_v25, %v10264_v38  ;;  %v10279_v21 = vld [vmem:[%s22502_s30 + $0x5e0] sm:$0xff]  ;;  %v10296_v6 = vld [vmem:[%s22502_s30 + $0x668] sm:$0xff] }
0x1255   : > { %12460 = vmatmul.mubr.bf16.vlgmr.msra.gmra.mrb[92].mxu1 %v24228_v34  ;;  %12583 = vmatmul.mubr.bf16.vlgmr.msra.gmra.mrb[80].mxu0 %v24228_v34  ;;  %v18176_v61 = vcombine.low %v10259_v33, %v10263_v5  ;;  %v18178_v49 = vcombine.low %v10260_v25, %v10264_v38  ;;  %v18185_v12 = vcombine.high %v10267_v43, %v10271_v40  ;;  %v10291_v18 = vld [vmem:[%s22502_s30 + $0x640] sm:$0xff]  ;;  %v10300_v24 = vld [vmem:[%s22502_s30 + $0x688] sm:$0xff] }
0x1256   : > { %12469 = vmatpush1.bf16.msra.mxu1 %v18136_v27  ;;  %12592 = vmatpush1.bf16.msra.mxu0 %v18138_v14  ;;  %v18152_v27 = vcombine.low %v10235_v22, %v10239_v37  ;;  %v18154_v14 = vcombine.low %v10236_v53, %v10240_v36  ;;  %v18187_v47 = vcombine.high %v10268_v63, %v10272_v2  ;;  %v10287_v37 = vld [vmem:[%s22502_s30 + $0x620] sm:$0xff]  ;;  %v10284_v53 = vld [vmem:[%s22502_s30 + $0x608] sm:$0xff] }
0x1257   : > { %12500 = vmatprep.mubr.bf16.mxu1 %v24240_v48  ;;  %12623 = vmatprep.mubr.bf16.mxu0 %v24240_v48  ;;  %v18184_v19 = vcombine.low %v10267_v43, %v10271_v40  ;;  %v18186_v22 = vcombine.low %v10268_v63, %v10272_v2  ;;  %v18193_v55 = vcombine.high %v10275_v20, %v10279_v21  ;;  %v10288_v36 = vld [vmem:[%s22502_s30 + $0x628] sm:$0xff]  ;;  %v10295_v56 = vld [vmem:[%s22502_s30 + $0x660] sm:$0xff] }
0x1258   : > { %12470 = vmatprep.subr.bf16.mxu1 %v18145_v3  ;;  %12593 = vmatprep.subr.bf16.mxu0 %v18147_v58  ;;  %v18195_v3 = vcombine.high %v10276_v30, %v10280_v32  ;;  %v10283_v58 = vld [vmem:[%s22502_s30 + $0x600] sm:$0xff]  ;;  %v10304_v29 = vld [vmem:[%s22502_s30 + $0x6a8] sm:$0xff] }
0x1259   : > { %v10299_v62 = vld [vmem:[%s22502_s30 + $0x680] sm:$0xff]  ;;  %v10308_v25 = vld [vmem:[%s22502_s30 + $0x6c8] sm:$0xff] }
0x125a   : > { %12471 = vmatpush1.bf16.msra.mxu1 %v18144_v28  ;;  %12594 = vmatpush1.bf16.msra.mxu0 %v18146_v1  ;;  %v18192_v28 = vcombine.low %v10275_v20, %v10279_v21  ;;  %v18194_v1 = vcombine.low %v10276_v30, %v10280_v32  ;;  %v10303_v15 = vld [vmem:[%s22502_s30 + $0x6a0] sm:$0xff]  ;;  %v10312_v38 = vld [vmem:[%s22502_s30 + $0x6e8] sm:$0xff] }
0x125b   : > { %12472 = vmatprep.subr.bf16.mxu1 %v18153_v44  ;;  %12595 = vmatprep.subr.bf16.mxu0 %v18155_v10  ;;  %v18201_v44 = vcombine.high %v10283_v58, %v10287_v37  ;;  %v18203_v10 = vcombine.high %v10284_v53, %v10288_v36  ;;  %v10307_v33 = vld [vmem:[%s22502_s30 + $0x6c0] sm:$0xff]  ;;  %v10316_v63 = vld [vmem:[%s22502_s30 + $0x708] sm:$0xff] }
0x125c   : > { %v10311_v5 = vld [vmem:[%s22502_s30 + $0x6e0] sm:$0xff]  ;;  %v10320_v2 = vld [vmem:[%s22502_s30 + $0x728] sm:$0xff] }
0x125d   : > { %v10315_v43 = vld [vmem:[%s22502_s30 + $0x700] sm:$0xff]  ;;  %v10324_v30 = vld [vmem:[%s22502_s30 + $0x748] sm:$0xff] }
0x125e   : > { %12473 = vmatpush1.bf16.msra.mxu1 %v18152_v27  ;;  %12596 = vmatpush1.bf16.msra.mxu0 %v18154_v14  ;;  %v18200_v27 = vcombine.low %v10283_v58, %v10287_v37  ;;  %v18202_v14 = vcombine.low %v10284_v53, %v10288_v36  ;;  %v10319_v40 = vld [vmem:[%s22502_s30 + $0x720] sm:$0xff]  ;;  %v10328_v32 = vld [vmem:[%s22502_s30 + $0x768] sm:$0xff] }
0x125f   : > { %12474 = vmatprep.subr.bf16.mxu1 %v18161_v51  ;;  %12597 = vmatprep.subr.bf16.mxu0 %v18163_v60  ;;  %v18209_v51 = vcombine.high %v10291_v18, %v10295_v56  ;;  %v18211_v60 = vcombine.high %v10292_v45, %v10296_v6  ;;  %v10323_v20 = vld [vmem:[%s22502_s30 + $0x740] sm:$0xff]  ;;  %v10332_v53 = vld [vmem:[%s22502_s30 + $0x788] sm:$0xff] }
0x1260   : > { %v10327_v21 = vld [vmem:[%s22502_s30 + $0x760] sm:$0xff]  ;;  %v10336_v36 = vld [vmem:[%s22502_s30 + $0x7a8] sm:$0xff] }
0x1261   : > { %v10331_v58 = vld [vmem:[%s22502_s30 + $0x780] sm:$0xff] }
0x1262   : > { %12475 = vmatpush1.bf16.msra.mxu1 %v18160_v11  ;;  %12598 = vmatpush1.bf16.msra.mxu0 %v18162_v16  ;;  %v18208_v11 = vcombine.low %v10291_v18, %v10295_v56  ;;  %v18210_v16 = vcombine.low %v10292_v45, %v10296_v6  ;;  %v10335_v37 = vld [vmem:[%s22502_s30 + $0x7a0] sm:$0xff]  ;;  %v10340_v45 = vld [vmem:[%s22502_s30 + $0x7c8] sm:$0xff] }
0x1263   : > { %12476 = vmatprep.subr.bf16.mxu1 %v18169_v17  ;;  %12599 = vmatprep.subr.bf16.mxu0 %v18171_v42  ;;  %v18217_v17 = vcombine.high %v10299_v62, %v10303_v15  ;;  %v18219_v42 = vcombine.high %v10300_v24, %v10304_v29  ;;  %v10339_v18 = vld [vmem:[%s22502_s30 + $0x7c0] sm:$0xff]  ;;  %v10344_v6 = vld [vmem:[%s22502_s30 + $0x7e8] sm:$0xff] }
0x1264   : > { %v10343_v56 = vld [vmem:[%s22502_s30 + $0x7e0] sm:$0xff] }
0x1266   : > { %12477 = vmatpush1.bf16.msra.mxu1 %v18168_v52  ;;  %12600 = vmatpush1.bf16.msra.mxu0 %v18170_v0  ;;  %v18216_v52 = vcombine.low %v10299_v62, %v10303_v15  ;;  %v18218_v0 = vcombine.low %v10300_v24, %v10304_v29  ;;  %v10347_v62 = vld [vmem:[%s22502_s30 + $0x800] sm:$0xff]  ;;  %v10348_v24 = vld [vmem:[%s22502_s30 + $0x808] sm:$0xff] }
0x1267   : > { %12478 = vmatprep.subr.bf16.mxu1 %v18177_v23  ;;  %12601 = vmatprep.subr.bf16.mxu0 %v18179_v7  ;;  %v18225_v23 = vcombine.high %v10307_v33, %v10311_v5  ;;  %v18227_v7 = vcombine.high %v10308_v25, %v10312_v38  ;;  %v10351_v15 = vld [vmem:[%s22502_s30 + $0x820] sm:$0xff]  ;;  %v10352_v29 = vld [vmem:[%s22502_s30 + $0x828] sm:$0xff] }
0x126a   : > { %12479 = vmatpush1.bf16.msra.mxu1 %v18176_v61  ;;  %12602 = vmatpush1.bf16.msra.mxu0 %v18178_v49  ;;  %v18224_v61 = vcombine.low %v10307_v33, %v10311_v5  ;;  %v18226_v49 = vcombine.low %v10308_v25, %v10312_v38  ;;  %v10355_v33 = vld [vmem:[%s22502_s30 + $0x840] sm:$0xff]  ;;  %v10356_v25 = vld [vmem:[%s22502_s30 + $0x848] sm:$0xff] }
0x126b   : > { %12480 = vmatprep.subr.bf16.mxu1 %v18185_v12  ;;  %12603 = vmatprep.subr.bf16.mxu0 %v18187_v47  ;;  %v18233_v12 = vcombine.high %v10315_v43, %v10319_v40  ;;  %v18235_v47 = vcombine.high %v10316_v63, %v10320_v2  ;;  %v10359_v5 = vld [vmem:[%s22502_s30 + $0x860] sm:$0xff]  ;;  %v10360_v38 = vld [vmem:[%s22502_s30 + $0x868] sm:$0xff] }
0x126e   : > { %12481 = vmatpush1.bf16.msra.mxu1 %v18184_v19  ;;  %12604 = vmatpush1.bf16.msra.mxu0 %v18186_v22  ;;  %v18232_v19 = vcombine.low %v10315_v43, %v10319_v40  ;;  %v18234_v22 = vcombine.low %v10316_v63, %v10320_v2  ;;  %v18273_v43 = vcombine.high %v10355_v33, %v10359_v5  ;;  %v10363_v63 = vld [vmem:[%s22502_s30 + $0x880] sm:$0xff] }
0x126f   : > { %12482 = vmatprep.subr.bf16.mxu1 %v18193_v55  ;;  %12605 = vmatprep.subr.bf16.mxu0 %v18195_v3  ;;  %v18241_v55 = vcombine.high %v10323_v20, %v10327_v21  ;;  %v18243_v3 = vcombine.high %v10324_v30, %v10328_v32  ;;  %v18275_v40 = vcombine.high %v10356_v25, %v10360_v38  ;;  %v10367_v2 = vld [vmem:[%s22502_s30 + $0x8a0] sm:$0xff] }
0x1272   : > { %12483 = vmatpush1.bf16.msra.mxu1 %v18192_v28  ;;  %12606 = vmatpush1.bf16.msra.mxu0 %v18194_v1  ;;  %v18240_v28 = vcombine.low %v10323_v20, %v10327_v21  ;;  %v18242_v1 = vcombine.low %v10324_v30, %v10328_v32  ;;  %v18281_v20 = vcombine.high %v10363_v63, %v10367_v2  ;;  %v10371_v30 = vld [vmem:[%s22502_s30 + $0x8c0] sm:$0xff] }
0x1273   : > { %12484 = vmatprep.subr.bf16.mxu1 %v18201_v44  ;;  %12607 = vmatprep.subr.bf16.mxu0 %v18203_v10  ;;  %v18249_v44 = vcombine.high %v10331_v58, %v10335_v37  ;;  %v18251_v10 = vcombine.high %v10332_v53, %v10336_v36  ;;  %v10375_v32 = vld [vmem:[%s22502_s30 + $0x8e0] sm:$0xff] }
0x1276   : > { %12485 = vmatpush1.bf16.msra.mxu1 %v18200_v27  ;;  %12608 = vmatpush1.bf16.msra.mxu0 %v18202_v14  ;;  %v18248_v27 = vcombine.low %v10331_v58, %v10335_v37  ;;  %v18250_v14 = vcombine.low %v10332_v53, %v10336_v36  ;;  %v18289_v58 = vcombine.high %v10371_v30, %v10375_v32  ;;  %v10379_v53 = vld [vmem:[%s22502_s30 + $0x900] sm:$0xff] }
0x1277   : > { %12486 = vmatprep.subr.bf16.mxu1 %v18209_v51  ;;  %12609 = vmatprep.subr.bf16.mxu0 %v18211_v60  ;;  %v18257_v51 = vcombine.high %v10339_v18, %v10343_v56  ;;  %v18259_v60 = vcombine.high %v10340_v45, %v10344_v6  ;;  %v10383_v36 = vld [vmem:[%s22502_s30 + $0x920] sm:$0xff] }
0x127a   : > { %12487 = vmatpush1.bf16.msra.mxu1 %v18208_v11  ;;  %12610 = vmatpush1.bf16.msra.mxu0 %v18210_v16  ;;  %v18256_v11 = vcombine.low %v10339_v18, %v10343_v56  ;;  %v18258_v16 = vcombine.low %v10340_v45, %v10344_v6  ;;  %v18297_v18 = vcombine.high %v10379_v53, %v10383_v36  ;;  %v10387_v45 = vld [vmem:[%s22502_s30 + $0x940] sm:$0xff] }
0x127b   : > { %12488 = vmatprep.subr.bf16.mxu1 %v18217_v17  ;;  %12611 = vmatprep.subr.bf16.mxu0 %v18219_v42  ;;  %v18265_v17 = vcombine.high %v10347_v62, %v10351_v15  ;;  %v18267_v42 = vcombine.high %v10348_v24, %v10352_v29  ;;  %v10391_v6 = vld [vmem:[%s22502_s30 + $0x960] sm:$0xff] }
0x127e   : > { %12489 = vmatpush1.bf16.msra.mxu1 %v18216_v52  ;;  %12612 = vmatpush1.bf16.msra.mxu0 %v18218_v0  ;;  %v18264_v52 = vcombine.low %v10347_v62, %v10351_v15  ;;  %v24308_v0 = vpack.c.bf16 %v24212_v54, %v24212_v54  ;;  %v18305_v62 = vcombine.high %v10387_v45, %v10391_v6 }
0x127f   : > { %12490 = vmatprep.subr.bf16.mxu1 %v18225_v23  ;;  %12613 = vmatprep.subr.bf16.mxu0 %v18227_v7  ;;  %v18266_v23 = vcombine.low %v10348_v24, %v10352_v29  ;;  %v24312_v7 = vpack.c.bf16 %v24219_v13, %v24219_v13  ;;  %v10395_v24 = vld [vmem:[%s22502_s30 + $0x980] sm:$0xff] }
0x1280   : > { %v10399_v29 = vld [vmem:[%s22502_s30 + $0x9a0] sm:$0xff] }
0x1282   : > { %12491 = vmatpush1.bf16.msra.mxu1 %v18224_v61  ;;  %12614 = vmatpush1.bf16.msra.mxu0 %v18226_v49  ;;  %v10364_v61 = vld [vmem:[%s22502_s30 + $0x888] sm:$0xff] }
0x1283   : > { %12492 = vmatprep.subr.bf16.mxu1 %v18233_v12  ;;  %12615 = vmatprep.subr.bf16.mxu0 %v18235_v47  ;;  %v10368_v49 = vld [vmem:[%s22502_s30 + $0x8a8] sm:$0xff]  ;;  %v18272_v12 = vcombine.low %v10355_v33, %v10359_v5  ;;  %v18274_v47 = vcombine.low %v10356_v25, %v10360_v38  ;;  %v18313_v33 = vcombine.high %v10395_v24, %v10399_v29  ;;  %v10403_v25 = vld [vmem:[%s22502_s30 + $0x9c0] sm:$0xff] }
0x1284   : > { %v18283_v21 = vcombine.high %v10364_v61, %v10368_v49  ;;  %v10407_v38 = vld [vmem:[%s22502_s30 + $0x9e0] sm:$0xff] }
0x1286   : > { %12493 = vmatpush1.bf16.msra.mxu1 %v18232_v19  ;;  %12616 = vmatpush1.bf16.msra.mxu0 %v18234_v22  ;;  %v10372_v19 = vld [vmem:[%s22502_s30 + $0x8c8] sm:$0xff] }
0x1287   : > { %12494 = vmatprep.subr.bf16.mxu1 %v18241_v55  ;;  %12617 = vmatprep.subr.bf16.mxu0 %v18243_v3  ;;  %v10376_v22 = vld [vmem:[%s22502_s30 + $0x8e8] sm:$0xff]  ;;  %v18280_v55 = vcombine.low %v10363_v63, %v10367_v2  ;;  %v18282_v3 = vcombine.low %v10364_v61, %v10368_v49  ;;  %v18321_v63 = vcombine.high %v10403_v25, %v10407_v38  ;;  %v10411_v61 = vld [vmem:[%s22502_s30 + $0xa00] sm:$0xff] }
0x1288   : > { %v18291_v37 = vcombine.high %v10372_v19, %v10376_v22  ;;  %v10415_v49 = vld [vmem:[%s22502_s30 + $0xa20] sm:$0xff] }
0x128a   : > { %12495 = vmatpush1.bf16.msra.mxu1 %v18240_v28  ;;  %12618 = vmatpush1.bf16.msra.mxu0 %v18242_v1  ;;  %v10380_v28 = vld [vmem:[%s22502_s30 + $0x908] sm:$0xff] }
0x128b   : > { %12496 = vmatprep.subr.bf16.mxu1 %v18249_v44  ;;  %12619 = vmatprep.subr.bf16.mxu0 %v18251_v10  ;;  %v10384_v1 = vld [vmem:[%s22502_s30 + $0x928] sm:$0xff]  ;;  %v18288_v44 = vcombine.low %v10371_v30, %v10375_v32  ;;  %v18290_v10 = vcombine.low %v10372_v19, %v10376_v22  ;;  %v18329_v30 = vcombine.high %v10411_v61, %v10415_v49  ;;  %v10419_v19 = vld [vmem:[%s22502_s30 + $0xa40] sm:$0xff] }
0x128c   : > { %v18299_v56 = vcombine.high %v10380_v28, %v10384_v1  ;;  %v10423_v22 = vld [vmem:[%s22502_s30 + $0xa60] sm:$0xff] }
0x128e   : > { %12497 = vmatpush1.bf16.msra.mxu1 %v18248_v27  ;;  %12620 = vmatpush1.bf16.msra.mxu0 %v18250_v14  ;;  %v10388_v27 = vld [vmem:[%s22502_s30 + $0x948] sm:$0xff] }
0x128f   : > { %12498 = vmatprep.subr.bf16.mxu1 %v18257_v51  ;;  %12621 = vmatprep.subr.bf16.mxu0 %v18259_v60  ;;  %v10392_v14 = vld [vmem:[%s22502_s30 + $0x968] sm:$0xff]  ;;  %v18296_v51 = vcombine.low %v10379_v53, %v10383_v36  ;;  %v18298_v60 = vcombine.low %v10380_v28, %v10384_v1  ;;  %v18337_v53 = vcombine.high %v10419_v19, %v10423_v22  ;;  %v10427_v28 = vld [vmem:[%s22502_s30 + $0xa80] sm:$0xff] }
0x1290   : > { %v18307_v15 = vcombine.high %v10388_v27, %v10392_v14  ;;  %v10431_v1 = vld [vmem:[%s22502_s30 + $0xaa0] sm:$0xff] }
0x1292   : > { %12499 = vmatpush1.bf16.msra.mxu1 %v18256_v11  ;;  %12622 = vmatpush1.bf16.msra.mxu0 %v18258_v16  ;;  %v10396_v11 = vld [vmem:[%s22502_s30 + $0x988] sm:$0xff] }
0x1293   : > { %12509 = vmatprep.subr.bf16.mxu1 %v18265_v17  ;;  %12632 = vmatprep.subr.bf16.mxu0 %v18267_v42  ;;  %v10400_v16 = vld [vmem:[%s22502_s30 + $0x9a8] sm:$0xff]  ;;  %v18304_v17 = vcombine.low %v10387_v45, %v10391_v6  ;;  %v18306_v42 = vcombine.low %v10388_v27, %v10392_v14  ;;  %v18345_v45 = vcombine.high %v10427_v28, %v10431_v1  ;;  %v10435_v27 = vld [vmem:[%s22502_s30 + $0xac0] sm:$0xff] }
0x1294   : > { %v18315_v5 = vcombine.high %v10396_v11, %v10400_v16  ;;  %v10439_v14 = vld [vmem:[%s22502_s30 + $0xae0] sm:$0xff] }
0x1295   : > { %12501 = vmatmul.mubr.bf16.vlgmr.msra.gmra.mrb[92].mxu1 %v24308_v0  ;;  %12624 = vmatmul.mubr.bf16.vlgmr.msra.gmra.mrb[80].mxu0 %v24308_v0 }
0x1296   : > { %12510 = vmatpush1.bf16.msra.mxu1 %v18264_v52  ;;  %12541 = vmatprep.mubr.bf16.mxu1 %v24312_v7  ;;  %v10404_v52 = vld [vmem:[%s22502_s30 + $0x9c8] sm:$0xff] }
0x1297   : > { %12633 = vmatpush1.bf16.msra.mxu0 %v18266_v23  ;;  %12664 = vmatprep.mubr.bf16.mxu0 %v24312_v7  ;;  %v10408_v23 = vld [vmem:[%s22502_s30 + $0x9e8] sm:$0xff] }
0x1298   : > { %12511 = vmatprep.subr.bf16.mxu1 %v18273_v43  ;;  %12634 = vmatprep.subr.bf16.mxu0 %v18275_v40  ;;  %v18312_v43 = vcombine.low %v10395_v24, %v10399_v29  ;;  %v18314_v40 = vcombine.low %v10396_v11, %v10400_v16  ;;  %v18323_v2 = vcombine.high %v10404_v52, %v10408_v23  ;;  %v10443_v11 = vld [vmem:[%s22502_s30 + $0xb00] sm:$0xff] }
0x1299   : > { %v18353_v24 = vcombine.high %v10435_v27, %v10439_v14  ;;  %v10447_v16 = vld [vmem:[%s22502_s30 + $0xb20] sm:$0xff] }
0x129a   : > { %12512 = vmatpush1.bf16.msra.mxu1 %v18272_v12  ;;  %v10412_v12 = vld [vmem:[%s22502_s30 + $0xa08] sm:$0xff] }
0x129b   : > { %12635 = vmatpush1.bf16.msra.mxu0 %v18274_v47  ;;  %12513 = vmatprep.subr.bf16.mxu1 %v18281_v20  ;;  %v10416_v47 = vld [vmem:[%s22502_s30 + $0xa28] sm:$0xff]  ;;  %v18320_v20 = vcombine.low %v10403_v25, %v10407_v38  ;;  %v18361_v25 = vcombine.high %v10443_v11, %v10447_v16 }
0x129c   : > { %12636 = vmatprep.subr.bf16.mxu0 %v18283_v21  ;;  %v18322_v21 = vcombine.low %v10404_v52, %v10408_v23  ;;  %v18331_v32 = vcombine.high %v10412_v12, %v10416_v47  ;;  %v10451_v52 = vld [vmem:[%s22502_s30 + $0xb40] sm:$0xff] }
0x129d   : > { %v10455_v23 = vld [vmem:[%s22502_s30 + $0xb60] sm:$0xff] }
0x129e   : > { %12514 = vmatpush1.bf16.msra.mxu1 %v18280_v55  ;;  %v10420_v55 = vld [vmem:[%s22502_s30 + $0xa48] sm:$0xff] }
0x129f   : > { %12637 = vmatpush1.bf16.msra.mxu0 %v18282_v3  ;;  %12515 = vmatprep.subr.bf16.mxu1 %v18289_v58  ;;  %v10424_v3 = vld [vmem:[%s22502_s30 + $0xa68] sm:$0xff]  ;;  %v18328_v58 = vcombine.low %v10411_v61, %v10415_v49  ;;  %v18369_v61 = vcombine.high %v10451_v52, %v10455_v23 }
0x12a0   : > { %12638 = vmatprep.subr.bf16.mxu0 %v18291_v37  ;;  %v18330_v37 = vcombine.low %v10412_v12, %v10416_v47  ;;  %v18339_v36 = vcombine.high %v10420_v55, %v10424_v3  ;;  %v10459_v12 = vld [vmem:[%s22502_s30 + $0xb80] sm:$0xff] }
0x12a1   : > { %v10463_v47 = vld [vmem:[%s22502_s30 + $0xba0] sm:$0xff] }
0x12a2   : > { %12516 = vmatpush1.bf16.msra.mxu1 %v18288_v44  ;;  %v10428_v44 = vld [vmem:[%s22502_s30 + $0xa88] sm:$0xff] }
0x12a3   : > { %12639 = vmatpush1.bf16.msra.mxu0 %v18290_v10  ;;  %12517 = vmatprep.subr.bf16.mxu1 %v18297_v18  ;;  %v10432_v10 = vld [vmem:[%s22502_s30 + $0xaa8] sm:$0xff]  ;;  %v18336_v18 = vcombine.low %v10419_v19, %v10423_v22  ;;  %v18377_v19 = vcombine.high %v10459_v12, %v10463_v47 }
0x12a4   : > { %12640 = vmatprep.subr.bf16.mxu0 %v18299_v56  ;;  %v18338_v56 = vcombine.low %v10420_v55, %v10424_v3  ;;  %v18347_v6 = vcombine.high %v10428_v44, %v10432_v10  ;;  %v10467_v55 = vld [vmem:[%s22502_s30 + $0xbc0] sm:$0xff] }
0x12a5   : > { %v10471_v3 = vld [vmem:[%s22502_s30 + $0xbe0] sm:$0xff] }
0x12a6   : > { %12518 = vmatpush1.bf16.msra.mxu1 %v18296_v51  ;;  %v10436_v51 = vld [vmem:[%s22502_s30 + $0xac8] sm:$0xff] }
0x12a7   : > { %12641 = vmatpush1.bf16.msra.mxu0 %v18298_v60  ;;  %12519 = vmatprep.subr.bf16.mxu1 %v18305_v62  ;;  %v10440_v60 = vld [vmem:[%s22502_s30 + $0xae8] sm:$0xff]  ;;  %v18344_v62 = vcombine.low %v10427_v28, %v10431_v1  ;;  %v18385_v28 = vcombine.high %v10467_v55, %v10471_v3 }
0x12a8   : > { %12642 = vmatprep.subr.bf16.mxu0 %v18307_v15  ;;  %v18346_v15 = vcombine.low %v10428_v44, %v10432_v10  ;;  %v18355_v29 = vcombine.high %v10436_v51, %v10440_v60  ;;  %v10093_v44 = vld [vmem:[%s22502_s30 + $0x10] sm:$0xff] }
0x12a9   : > { %v10097_v10 = vld [vmem:[%s22502_s30 + $0x30] sm:$0xff] }
0x12aa   : > { %12520 = vmatpush1.bf16.msra.mxu1 %v18304_v17  ;;  %v10444_v17 = vld [vmem:[%s22502_s30 + $0xb08] sm:$0xff] }
0x12ab   : > { %12643 = vmatpush1.bf16.msra.mxu0 %v18306_v42  ;;  %12521 = vmatprep.subr.bf16.mxu1 %v18313_v33  ;;  %v10448_v42 = vld [vmem:[%s22502_s30 + $0xb28] sm:$0xff]  ;;  %v18352_v33 = vcombine.low %v10435_v27, %v10439_v14  ;;  %v18013_v27 = vcombine.high %v10093_v44, %v10097_v10 }
0x12ac   : > { %12644 = vmatprep.subr.bf16.mxu0 %v18315_v5  ;;  %v18354_v5 = vcombine.low %v10436_v51, %v10440_v60  ;;  %v18363_v38 = vcombine.high %v10444_v17, %v10448_v42  ;;  %v10101_v51 = vld [vmem:[%s22502_s30 + $0x50] sm:$0xff] }
0x12ad   : > { %v10105_v60 = vld [vmem:[%s22502_s30 + $0x70] sm:$0xff] }
0x12ae   : > { %12522 = vmatpush1.bf16.msra.mxu1 %v18312_v43  ;;  %v10452_v43 = vld [vmem:[%s22502_s30 + $0xb48] sm:$0xff] }
0x12af   : > { %12645 = vmatpush1.bf16.msra.mxu0 %v18314_v40  ;;  %12523 = vmatprep.subr.bf16.mxu1 %v18321_v63  ;;  %v10456_v40 = vld [vmem:[%s22502_s30 + $0xb68] sm:$0xff]  ;;  %v18360_v63 = vcombine.low %v10443_v11, %v10447_v16  ;;  %v18021_v16 = vcombine.high %v10101_v51, %v10105_v60 }
0x12b0   : > { %12646 = vmatprep.subr.bf16.mxu0 %v18323_v2  ;;  %v18362_v2 = vcombine.low %v10444_v17, %v10448_v42  ;;  %v18371_v49 = vcombine.high %v10452_v43, %v10456_v40  ;;  %v10109_v17 = vld [vmem:[%s22502_s30 + $0x90] sm:$0xff] }
0x12b1   : > { %v10113_v42 = vld [vmem:[%s22502_s30 + $0xb0] sm:$0xff] }
0x12b2   : > { %12524 = vmatpush1.bf16.msra.mxu1 %v18320_v20  ;;  %v10460_v20 = vld [vmem:[%s22502_s30 + $0xb88] sm:$0xff] }
0x12b3   : > { %12647 = vmatpush1.bf16.msra.mxu0 %v18322_v21  ;;  %12525 = vmatprep.subr.bf16.mxu1 %v18329_v30  ;;  %v10464_v21 = vld [vmem:[%s22502_s30 + $0xba8] sm:$0xff]  ;;  %v18368_v30 = vcombine.low %v10451_v52, %v10455_v23  ;;  %v18029_v23 = vcombine.high %v10109_v17, %v10113_v42 }
0x12b4   : > { %12648 = vmatprep.subr.bf16.mxu0 %v18331_v32  ;;  %v18370_v32 = vcombine.low %v10452_v43, %v10456_v40  ;;  %v18379_v22 = vcombine.high %v10460_v20, %v10464_v21  ;;  %v10117_v40 = vld [vmem:[%s22502_s30 + $0xd0] sm:$0xff] }
0x12b6   : > { %12526 = vmatpush1.bf16.msra.mxu1 %v18328_v58  ;;  %v10468_v58 = vld [vmem:[%s22502_s30 + $0xbc8] sm:$0xff] }
0x12b7   : > { %12649 = vmatpush1.bf16.msra.mxu0 %v18330_v37  ;;  %12527 = vmatprep.subr.bf16.mxu1 %v18337_v53  ;;  %v10472_v37 = vld [vmem:[%s22502_s30 + $0xbe8] sm:$0xff]  ;;  %v18376_v53 = vcombine.low %v10459_v12, %v10463_v47 }
0x12b8   : > { %12650 = vmatprep.subr.bf16.mxu0 %v18339_v36  ;;  %v18378_v36 = vcombine.low %v10460_v20, %v10464_v21  ;;  %v18387_v1 = vcombine.high %v10468_v58, %v10472_v37  ;;  %v10125_v20 = vld [vmem:[%s22502_s30 + $0x110] sm:$0xff] }
0x12b9   : > { %v10129_v21 = vld [vmem:[%s22502_s30 + $0x130] sm:$0xff] }
0x12ba   : > { %12528 = vmatpush1.bf16.msra.mxu1 %v18336_v18  ;;  %v10094_v18 = vld [vmem:[%s22502_s30 + $0x18] sm:$0xff] }
0x12bb   : > { %12651 = vmatpush1.bf16.msra.mxu0 %v18338_v56  ;;  %12529 = vmatprep.subr.bf16.mxu1 %v18345_v45  ;;  %v10098_v56 = vld [vmem:[%s22502_s30 + $0x38] sm:$0xff]  ;;  %v18384_v45 = vcombine.low %v10467_v55, %v10471_v3  ;;  %v18045_v55 = vcombine.high %v10125_v20, %v10129_v21 }
0x12bc   : > { %12652 = vmatprep.subr.bf16.mxu0 %v18347_v6  ;;  %v18386_v6 = vcombine.low %v10468_v58, %v10472_v37  ;;  %v18015_v14 = vcombine.high %v10094_v18, %v10098_v56  ;;  %v18014_v11 = vcombine.low %v10094_v18, %v10098_v56  ;;  %v10133_v58 = vld [vmem:[%s22502_s30 + $0x150] sm:$0xff] }
0x12bd   : > { %v10137_v37 = vld [vmem:[%s22502_s30 + $0x170] sm:$0xff] }
0x12be   : > { %12530 = vmatpush1.bf16.msra.mxu1 %v18344_v62  ;;  %v18012_v62 = vcombine.low %v10093_v44, %v10097_v10  ;;  %v18053_v44 = vcombine.high %v10133_v58, %v10137_v37  ;;  %v10141_v18 = vld [vmem:[%s22502_s30 + $0x190] sm:$0xff] }
0x12bf   : > { %12653 = vmatpush1.bf16.msra.mxu0 %v18346_v15  ;;  %12531 = vmatprep.subr.bf16.mxu1 %v18353_v24  ;;  %v10102_v15 = vld [vmem:[%s22502_s30 + $0x58] sm:$0xff]  ;;  %v10145_v56 = vld [vmem:[%s22502_s30 + $0x1b0] sm:$0xff] }
0x12c0   : > { %12654 = vmatprep.subr.bf16.mxu0 %v18355_v29  ;;  %v10106_v24 = vld [vmem:[%s22502_s30 + $0x78] sm:$0xff]  ;;  %v24384_v29 = vpack.c.bf16 %v24242_v4, %v24242_v4 }
0x12c1   : > { %v18022_v52 = vcombine.low %v10102_v15, %v10106_v24 }
0x12c2   : > { %12532 = vmatpush1.bf16.msra.mxu1 %v18352_v33  ;;  %v18023_v33 = vcombine.high %v10102_v15, %v10106_v24  ;;  %v10153_v15 = vld [vmem:[%s22502_s30 + $0x1f0] sm:$0xff]  ;;  %v10150_v24 = vld [vmem:[%s22502_s30 + $0x1d8] sm:$0xff] }
0x12c3   : > { %12655 = vmatpush1.bf16.msra.mxu0 %v18354_v5  ;;  %12533 = vmatprep.subr.bf16.mxu1 %v18361_v25  ;;  %v10110_v5 = vld [vmem:[%s22502_s30 + $0x98] sm:$0xff] }
0x12c4   : > { %12656 = vmatprep.subr.bf16.mxu0 %v18363_v38  ;;  %v10114_v25 = vld [vmem:[%s22502_s30 + $0xb8] sm:$0xff]  ;;  %v18020_v38 = vcombine.low %v10101_v51, %v10105_v60  ;;  %v18061_v51 = vcombine.high %v10141_v18, %v10145_v56 }
0x12c5   : > { %v18031_v43 = vcombine.high %v10110_v5, %v10114_v25  ;;  %v18030_v12 = vcombine.low %v10110_v5, %v10114_v25  ;;  %v10157_v5 = vld [vmem:[%s22502_s30 + $0x210] sm:$0xff] }
0x12c6   : > { %12534 = vmatpush1.bf16.msra.mxu1 %v18360_v63  ;;  %v10121_v63 = vld [vmem:[%s22502_s30 + $0xf0] sm:$0xff] }
0x12c7   : > { %12657 = vmatpush1.bf16.msra.mxu0 %v18362_v2  ;;  %12535 = vmatprep.subr.bf16.mxu1 %v18369_v61  ;;  %v10118_v2 = vld [vmem:[%s22502_s30 + $0xd8] sm:$0xff]  ;;  %v18037_v47 = vcombine.high %v10117_v40, %v10121_v63  ;;  %v10161_v25 = vld [vmem:[%s22502_s30 + $0x230] sm:$0xff] }
0x12c8   : > { %12658 = vmatprep.subr.bf16.mxu0 %v18371_v49  ;;  %v10122_v61 = vld [vmem:[%s22502_s30 + $0xf8] sm:$0xff]  ;;  %v18028_v49 = vcombine.low %v10109_v17, %v10113_v42 }
0x12ca   : > { %12536 = vmatpush1.bf16.msra.mxu1 %v18368_v30  ;;  %v10126_v30 = vld [vmem:[%s22502_s30 + $0x118] sm:$0xff] }
0x12cb   : > { %12659 = vmatpush1.bf16.msra.mxu0 %v18370_v32  ;;  %12537 = vmatprep.subr.bf16.mxu1 %v18377_v19  ;;  %v10130_v32 = vld [vmem:[%s22502_s30 + $0x138] sm:$0xff]  ;;  %v18036_v19 = vcombine.low %v10117_v40, %v10121_v63  ;;  %v18077_v40 = vcombine.high %v10157_v5, %v10161_v25 }
0x12cc   : > { %12660 = vmatprep.subr.bf16.mxu0 %v18379_v22  ;;  %v18038_v22 = vcombine.low %v10118_v2, %v10122_v61  ;;  %v18047_v3 = vcombine.high %v10126_v30, %v10130_v32 }
0x12ce   : > { %12538 = vmatpush1.bf16.msra.mxu1 %v18376_v53  ;;  %v10134_v53 = vld [vmem:[%s22502_s30 + $0x158] sm:$0xff] }
0x12cf   : > { %12661 = vmatpush1.bf16.msra.mxu0 %v18378_v36  ;;  %12539 = vmatprep.subr.bf16.mxu1 %v18385_v28  ;;  %v10138_v36 = vld [vmem:[%s22502_s30 + $0x178] sm:$0xff]  ;;  %v18044_v28 = vcombine.low %v10125_v20, %v10129_v21 }
0x12d0   : > { %12662 = vmatprep.subr.bf16.mxu0 %v18387_v1  ;;  %v18046_v1 = vcombine.low %v10126_v30, %v10130_v32  ;;  %v18055_v10 = vcombine.high %v10134_v53, %v10138_v36  ;;  %v10173_v30 = vld [vmem:[%s22502_s30 + $0x290] sm:$0xff] }
0x12d1   : > { %v10177_v32 = vld [vmem:[%s22502_s30 + $0x2b0] sm:$0xff] }
0x12d2   : > { %12540 = vmatpush1.bf16.msra.mxu1 %v18384_v45  ;;  %v10142_v45 = vld [vmem:[%s22502_s30 + $0x198] sm:$0xff] }
0x12d3   : > { %12663 = vmatpush1.bf16.msra.mxu0 %v18386_v6  ;;  %12673 = vmatprep.subr.bf16.mxu1 %v18013_v27  ;;  %v10146_v6 = vld [vmem:[%s22502_s30 + $0x1b8] sm:$0xff]  ;;  %v18052_v27 = vcombine.low %v10133_v58, %v10137_v37  ;;  %v18093_v58 = vcombine.high %v10173_v30, %v10177_v32 }
0x12d4   : > { %12796 = vmatprep.subr.bf16.mxu0 %v18015_v14  ;;  %v18054_v14 = vcombine.low %v10134_v53, %v10138_v36  ;;  %v18063_v60 = vcombine.high %v10142_v45, %v10146_v6  ;;  %v18062_v17 = vcombine.low %v10142_v45, %v10146_v6  ;;  %v10181_v53 = vld [vmem:[%s22502_s30 + $0x2d0] sm:$0xff] }
0x12d5   : > { %12542 = vmatmul.mubr.bf16.vlgmr.msra.gmra.mrb[92].mxu1 %v24384_v29  ;;  %v10185_v36 = vld [vmem:[%s22502_s30 + $0x2f0] sm:$0xff] }
0x12d6   : > { %12665 = vmatmul.mubr.bf16.vlgmr.msra.gmra.mrb[80].mxu0 %v24384_v29  ;;  %12674 = vmatpush1.bf16.msra.mxu1 %v18012_v62  ;;  %v10149_v62 = vld [vmem:[%s22502_s30 + $0x1d0] sm:$0xff] }
0x12d7   : > { %12705 = vmatprep.mubr.bf16.mxu1 %v24224_v35  ;;  %12797 = vmatpush1.bf16.msra.mxu0 %v18014_v11  ;;  %v10154_v11 = vld [vmem:[%s22502_s30 + $0x1f8] sm:$0xff]  ;;  %v18069_v42 = vcombine.high %v10149_v62, %v10153_v15  ;;  %v10189_v45 = vld [vmem:[%s22502_s30 + $0x310] sm:$0xff] }
0x12d8   : > { %12828 = vmatprep.mubr.bf16.mxu0 %v24224_v35  ;;  %12675 = vmatprep.subr.bf16.mxu1 %v18021_v16  ;;  %v18039_v35 = vcombine.high %v10118_v2, %v10122_v61  ;;  %v18060_v16 = vcombine.low %v10141_v18, %v10145_v56  ;;  %v10165_v2 = vld [vmem:[%s22502_s30 + $0x250] sm:$0xff]  ;;  %v18101_v18 = vcombine.high %v10181_v53, %v10185_v36 }
0x12d9   : > { %12798 = vmatprep.subr.bf16.mxu0 %v18023_v33  ;;  %v18071_v33 = vcombine.high %v10150_v24, %v10154_v11  ;;  %v10169_v61 = vld [vmem:[%s22502_s30 + $0x270] sm:$0xff] }
0x12da   : > { %12676 = vmatpush1.bf16.msra.mxu1 %v18020_v38  ;;  %v10158_v38 = vld [vmem:[%s22502_s30 + $0x218] sm:$0xff]  ;;  %v18085_v20 = vcombine.high %v10165_v2, %v10169_v61  ;;  %v10193_v6 = vld [vmem:[%s22502_s30 + $0x330] sm:$0xff] }
0x12db   : > { %12799 = vmatpush1.bf16.msra.mxu0 %v18022_v52  ;;  %12677 = vmatprep.subr.bf16.mxu1 %v18029_v23  ;;  %v10162_v52 = vld [vmem:[%s22502_s30 + $0x238] sm:$0xff]  ;;  %v18068_v23 = vcombine.low %v10149_v62, %v10153_v15  ;;  %v18109_v62 = vcombine.high %v10189_v45, %v10193_v6 }
0x12dc   : > { %12800 = vmatprep.subr.bf16.mxu0 %v18031_v43  ;;  %v18070_v43 = vcombine.low %v10150_v24, %v10154_v11  ;;  %v18079_v63 = vcombine.high %v10158_v38, %v10162_v52  ;;  %v10197_v24 = vld [vmem:[%s22502_s30 + $0x350] sm:$0xff] }
0x12dd   : > { %v10201_v11 = vld [vmem:[%s22502_s30 + $0x370] sm:$0xff] }
0x12de   : > { %12678 = vmatpush1.bf16.msra.mxu1 %v18028_v49  ;;  %v10166_v49 = vld [vmem:[%s22502_s30 + $0x258] sm:$0xff] }
0x12df   : > { %12801 = vmatpush1.bf16.msra.mxu0 %v18030_v12  ;;  %12679 = vmatprep.subr.bf16.mxu1 %v18037_v47  ;;  %v10170_v12 = vld [vmem:[%s22502_s30 + $0x278] sm:$0xff]  ;;  %v18076_v47 = vcombine.low %v10157_v5, %v10161_v25  ;;  %v18117_v5 = vcombine.high %v10197_v24, %v10201_v11 }
0x12e0   : > { %12802 = vmatprep.subr.bf16.mxu0 %v18039_v35  ;;  %v18078_v35 = vcombine.low %v10158_v38, %v10162_v52  ;;  %v18087_v21 = vcombine.high %v10166_v49, %v10170_v12  ;;  %v10205_v38 = vld [vmem:[%s22502_s30 + $0x390] sm:$0xff] }
0x12e1   : > { %v10209_v52 = vld [vmem:[%s22502_s30 + $0x3b0] sm:$0xff] }
0x12e2   : > { %12680 = vmatpush1.bf16.msra.mxu1 %v18036_v19  ;;  %v10174_v19 = vld [vmem:[%s22502_s30 + $0x298] sm:$0xff] }
0x12e3   : > { %12803 = vmatpush1.bf16.msra.mxu0 %v18038_v22  ;;  %12681 = vmatprep.subr.bf16.mxu1 %v18045_v55  ;;  %v10178_v22 = vld [vmem:[%s22502_s30 + $0x2b8] sm:$0xff]  ;;  %v18084_v55 = vcombine.low %v10165_v2, %v10169_v61  ;;  %v18125_v2 = vcombine.high %v10205_v38, %v10209_v52 }
0x12e4   : > { %12804 = vmatprep.subr.bf16.mxu0 %v18047_v3  ;;  %v18086_v3 = vcombine.low %v10166_v49, %v10170_v12  ;;  %v18095_v37 = vcombine.high %v10174_v19, %v10178_v22  ;;  %v10213_v49 = vld [vmem:[%s22502_s30 + $0x3d0] sm:$0xff] }
0x12e5   : > { %v10217_v12 = vld [vmem:[%s22502_s30 + $0x3f0] sm:$0xff] }
0x12e6   : > { %12682 = vmatpush1.bf16.msra.mxu1 %v18044_v28  ;;  %v10182_v28 = vld [vmem:[%s22502_s30 + $0x2d8] sm:$0xff] }
0x12e7   : > { %12805 = vmatpush1.bf16.msra.mxu0 %v18046_v1  ;;  %12683 = vmatprep.subr.bf16.mxu1 %v18053_v44  ;;  %v10186_v1 = vld [vmem:[%s22502_s30 + $0x2f8] sm:$0xff]  ;;  %v18092_v44 = vcombine.low %v10173_v30, %v10177_v32  ;;  %v18133_v30 = vcombine.high %v10213_v49, %v10217_v12 }
0x12e8   : > { %12806 = vmatprep.subr.bf16.mxu0 %v18055_v10  ;;  %v18094_v10 = vcombine.low %v10174_v19, %v10178_v22  ;;  %v18103_v56 = vcombine.high %v10182_v28, %v10186_v1  ;;  %v10221_v19 = vld [vmem:[%s22502_s30 + $0x410] sm:$0xff] }
0x12e9   : > { %v10225_v22 = vld [vmem:[%s22502_s30 + $0x430] sm:$0xff] }
0x12ea   : > { %12684 = vmatpush1.bf16.msra.mxu1 %v18052_v27  ;;  %v10190_v27 = vld [vmem:[%s22502_s30 + $0x318] sm:$0xff] }
0x12eb   : > { %12807 = vmatpush1.bf16.msra.mxu0 %v18054_v14  ;;  %12685 = vmatprep.subr.bf16.mxu1 %v18061_v51  ;;  %v10194_v14 = vld [vmem:[%s22502_s30 + $0x338] sm:$0xff]  ;;  %v18100_v51 = vcombine.low %v10181_v53, %v10185_v36  ;;  %v18141_v53 = vcombine.high %v10221_v19, %v10225_v22 }
0x12ec   : > { %12808 = vmatprep.subr.bf16.mxu0 %v18063_v60  ;;  %v18102_v60 = vcombine.low %v10182_v28, %v10186_v1  ;;  %v18111_v15 = vcombine.high %v10190_v27, %v10194_v14  ;;  %v10229_v28 = vld [vmem:[%s22502_s30 + $0x450] sm:$0xff] }
0x12ed   : > { %v10233_v1 = vld [vmem:[%s22502_s30 + $0x470] sm:$0xff] }
0x12ee   : > { %12686 = vmatpush1.bf16.msra.mxu1 %v18060_v16  ;;  %v10198_v16 = vld [vmem:[%s22502_s30 + $0x358] sm:$0xff] }
0x12ef   : > { %12809 = vmatpush1.bf16.msra.mxu0 %v18062_v17  ;;  %12687 = vmatprep.subr.bf16.mxu1 %v18069_v42  ;;  %v10202_v17 = vld [vmem:[%s22502_s30 + $0x378] sm:$0xff]  ;;  %v18108_v42 = vcombine.low %v10189_v45, %v10193_v6  ;;  %v18149_v45 = vcombine.high %v10229_v28, %v10233_v1  ;;  %v10237_v6 = vld [vmem:[%s22502_s30 + $0x490] sm:$0xff] }
0x12f0   : > { %12810 = vmatprep.subr.bf16.mxu0 %v18071_v33  ;;  %v18110_v33 = vcombine.low %v10190_v27, %v10194_v14  ;;  %v18119_v25 = vcombine.high %v10198_v16, %v10202_v17  ;;  %v10241_v27 = vld [vmem:[%s22502_s30 + $0x4b0] sm:$0xff] }
0x12f2   : > { %12688 = vmatpush1.bf16.msra.mxu1 %v18068_v23  ;;  %v10206_v23 = vld [vmem:[%s22502_s30 + $0x398] sm:$0xff] }
0x12f3   : > { %12811 = vmatpush1.bf16.msra.mxu0 %v18070_v43  ;;  %12689 = vmatprep.subr.bf16.mxu1 %v18077_v40  ;;  %v10210_v43 = vld [vmem:[%s22502_s30 + $0x3b8] sm:$0xff]  ;;  %v18116_v40 = vcombine.low %v10197_v24, %v10201_v11  ;;  %v18157_v24 = vcombine.high %v10237_v6, %v10241_v27 }
0x12f4   : > { %12812 = vmatprep.subr.bf16.mxu0 %v18079_v63  ;;  %v18118_v63 = vcombine.low %v10198_v16, %v10202_v17  ;;  %v18127_v61 = vcombine.high %v10206_v23, %v10210_v43  ;;  %v10245_v16 = vld [vmem:[%s22502_s30 + $0x4d0] sm:$0xff] }
0x12f5   : > { %v10249_v17 = vld [vmem:[%s22502_s30 + $0x4f0] sm:$0xff] }
0x12f6   : > { %12690 = vmatpush1.bf16.msra.mxu1 %v18076_v47  ;;  %v10214_v47 = vld [vmem:[%s22502_s30 + $0x3d8] sm:$0xff] }
0x12f7   : > { %12813 = vmatpush1.bf16.msra.mxu0 %v18078_v35  ;;  %12691 = vmatprep.subr.bf16.mxu1 %v18085_v20  ;;  %v10218_v35 = vld [vmem:[%s22502_s30 + $0x3f8] sm:$0xff]  ;;  %v18124_v20 = vcombine.low %v10205_v38, %v10209_v52  ;;  %v10253_v38 = vld [vmem:[%s22502_s30 + $0x510] sm:$0xff] }
0x12f8   : > { %12814 = vmatprep.subr.bf16.mxu0 %v18087_v21  ;;  %v18126_v21 = vcombine.low %v10206_v23, %v10210_v43  ;;  %v18135_v32 = vcombine.high %v10214_v47, %v10218_v35  ;;  %v10257_v52 = vld [vmem:[%s22502_s30 + $0x530] sm:$0xff]  ;;  %v10254_v23 = vld [vmem:[%s22502_s30 + $0x518] sm:$0xff] }
0x12f9   : > { %v10258_v43 = vld [vmem:[%s22502_s30 + $0x538] sm:$0xff] }
0x12fa   : > { %12692 = vmatpush1.bf16.msra.mxu1 %v18084_v55  ;;  %v10222_v55 = vld [vmem:[%s22502_s30 + $0x418] sm:$0xff] }
0x12fb   : > { %12815 = vmatpush1.bf16.msra.mxu0 %v18086_v3  ;;  %12693 = vmatprep.subr.bf16.mxu1 %v18093_v58  ;;  %v10226_v3 = vld [vmem:[%s22502_s30 + $0x438] sm:$0xff]  ;;  %v18132_v58 = vcombine.low %v10213_v49, %v10217_v12  ;;  %v10261_v49 = vld [vmem:[%s22502_s30 + $0x550] sm:$0xff] }
0x12fc   : > { %12816 = vmatprep.subr.bf16.mxu0 %v18095_v37  ;;  %v18134_v37 = vcombine.low %v10214_v47, %v10218_v35  ;;  %v18143_v36 = vcombine.high %v10222_v55, %v10226_v3  ;;  %v10265_v12 = vld [vmem:[%s22502_s30 + $0x570] sm:$0xff]  ;;  %v10262_v47 = vld [vmem:[%s22502_s30 + $0x558] sm:$0xff] }
0x12fd   : > { %v10266_v35 = vld [vmem:[%s22502_s30 + $0x578] sm:$0xff] }
0x12fe   : > { %12694 = vmatpush1.bf16.msra.mxu1 %v18092_v44  ;;  %v18140_v44 = vcombine.low %v10221_v19, %v10225_v22  ;;  %v10269_v19 = vld [vmem:[%s22502_s30 + $0x590] sm:$0xff] }
0x12ff   : > { %12817 = vmatpush1.bf16.msra.mxu0 %v18094_v10  ;;  %12695 = vmatprep.subr.bf16.mxu1 %v18101_v18  ;;  %v10230_v10 = vld [vmem:[%s22502_s30 + $0x458] sm:$0xff]  ;;  %v10273_v22 = vld [vmem:[%s22502_s30 + $0x5b0] sm:$0xff] }
0x1300   : > { %12818 = vmatprep.subr.bf16.mxu0 %v18103_v56  ;;  %v10234_v18 = vld [vmem:[%s22502_s30 + $0x478] sm:$0xff]  ;;  %v18142_v56 = vcombine.low %v10222_v55, %v10226_v3 }
0x1301   : > { %v18151_v14 = vcombine.high %v10230_v10, %v10234_v18  ;;  %v10270_v55 = vld [vmem:[%s22502_s30 + $0x598] sm:$0xff] }
0x1302   : > { %12696 = vmatpush1.bf16.msra.mxu1 %v18100_v51  ;;  %v10238_v51 = vld [vmem:[%s22502_s30 + $0x498] sm:$0xff] }
0x1303   : > { %12819 = vmatpush1.bf16.msra.mxu0 %v18102_v60  ;;  %12697 = vmatprep.subr.bf16.mxu1 %v18109_v62  ;;  %v10242_v60 = vld [vmem:[%s22502_s30 + $0x4b8] sm:$0xff]  ;;  %v18148_v62 = vcombine.low %v10229_v28, %v10233_v1  ;;  %v10277_v28 = vld [vmem:[%s22502_s30 + $0x5d0] sm:$0xff] }
0x1304   : > { %12820 = vmatprep.subr.bf16.mxu0 %v18111_v15  ;;  %v18150_v15 = vcombine.low %v10230_v10, %v10234_v18  ;;  %v18159_v11 = vcombine.high %v10238_v51, %v10242_v60  ;;  %v10274_v3 = vld [vmem:[%s22502_s30 + $0x5b8] sm:$0xff]  ;;  %v10281_v1 = vld [vmem:[%s22502_s30 + $0x5f0] sm:$0xff]  ;;  %v18188_v18 = vcombine.low %v10269_v19, %v10273_v22 }
0x1305   : > { %v10282_v10 = vld [vmem:[%s22502_s30 + $0x5f8] sm:$0xff] }
0x1306   : > { %12698 = vmatpush1.bf16.msra.mxu1 %v18108_v42  ;;  %v10246_v42 = vld [vmem:[%s22502_s30 + $0x4d8] sm:$0xff] }
0x1307   : > { %12821 = vmatpush1.bf16.msra.mxu0 %v18110_v33  ;;  %12699 = vmatprep.subr.bf16.mxu1 %v18117_v5  ;;  %v18156_v33 = vcombine.low %v10237_v6, %v10241_v27  ;;  %v18158_v5 = vcombine.low %v10238_v51, %v10242_v60  ;;  %v10285_v27 = vld [vmem:[%s22502_s30 + $0x610] sm:$0xff]  ;;  %v10286_v51 = vld [vmem:[%s22502_s30 + $0x618] sm:$0xff] }
0x1308   : > { %12822 = vmatprep.subr.bf16.mxu0 %v18119_v25  ;;  %v18165_v25 = vcombine.high %v10245_v16, %v10249_v17  ;;  %v10290_v60 = vld [vmem:[%s22502_s30 + $0x638] sm:$0xff] }
0x130a   : > { %12700 = vmatpush1.bf16.msra.mxu1 %v18116_v40  ;;  %v18164_v40 = vcombine.low %v10245_v16, %v10249_v17  ;;  %v10293_v16 = vld [vmem:[%s22502_s30 + $0x650] sm:$0xff] }
0x130b   : > { %12823 = vmatpush1.bf16.msra.mxu0 %v18118_v63  ;;  %12701 = vmatprep.subr.bf16.mxu1 %v18125_v2  ;;  %v18173_v2 = vcombine.high %v10253_v38, %v10257_v52  ;;  %v10297_v17 = vld [vmem:[%s22502_s30 + $0x670] sm:$0xff] }
0x130c   : > { %12824 = vmatprep.subr.bf16.mxu0 %v18127_v61  ;;  %v18175_v61 = vcombine.high %v10254_v23, %v10258_v43 }
0x130e   : > { %12702 = vmatpush1.bf16.msra.mxu1 %v18124_v20  ;;  %v18172_v20 = vcombine.low %v10253_v38, %v10257_v52  ;;  %v10301_v38 = vld [vmem:[%s22502_s30 + $0x690] sm:$0xff] }
0x130f   : > { %12825 = vmatpush1.bf16.msra.mxu0 %v18126_v21  ;;  %12703 = vmatprep.subr.bf16.mxu1 %v18133_v30  ;;  %v18174_v21 = vcombine.low %v10254_v23, %v10258_v43  ;;  %v18181_v30 = vcombine.high %v10261_v49, %v10265_v12  ;;  %v10305_v52 = vld [vmem:[%s22502_s30 + $0x6b0] sm:$0xff]  ;;  %v10302_v23 = vld [vmem:[%s22502_s30 + $0x698] sm:$0xff] }
0x1310   : > { %12826 = vmatprep.subr.bf16.mxu0 %v18135_v32  ;;  %v18183_v32 = vcombine.high %v10262_v47, %v10266_v35  ;;  %v10306_v43 = vld [vmem:[%s22502_s30 + $0x6b8] sm:$0xff] }
0x1312   : > { %12704 = vmatpush1.bf16.msra.mxu1 %v18132_v58  ;;  %v18180_v58 = vcombine.low %v10261_v49, %v10265_v12  ;;  %v10309_v49 = vld [vmem:[%s22502_s30 + $0x6d0] sm:$0xff] }
0x1313   : > { %12827 = vmatpush1.bf16.msra.mxu0 %v18134_v37  ;;  %12714 = vmatprep.subr.bf16.mxu1 %v18141_v53  ;;  %v18182_v37 = vcombine.low %v10262_v47, %v10266_v35  ;;  %v18189_v53 = vcombine.high %v10269_v19, %v10273_v22  ;;  %v10313_v12 = vld [vmem:[%s22502_s30 + $0x6f0] sm:$0xff]  ;;  %v10310_v47 = vld [vmem:[%s22502_s30 + $0x6d8] sm:$0xff] }
0x1314   : > { %12837 = vmatprep.subr.bf16.mxu0 %v18143_v36  ;;  %v18191_v36 = vcombine.high %v10270_v55, %v10274_v3  ;;  %v10314_v35 = vld [vmem:[%s22502_s30 + $0x6f8] sm:$0xff]  ;;  %v10317_v19 = vld [vmem:[%s22502_s30 + $0x710] sm:$0xff] }
0x1315   : > { %12706 = vmatmul.mubr.bf16.vlgmr.msra.gmra.mrb[96].mxu1 %v24228_v34  ;;  %v10321_v22 = vld [vmem:[%s22502_s30 + $0x730] sm:$0xff] }
0x1316   : > { %12829 = vmatmul.mubr.bf16.vlgmr.msra.gmra.mrb[84].mxu0 %v24228_v34  ;;  %12715 = vmatpush1.bf16.msra.mxu1 %v18140_v44  ;;  %v10250_v34 = vld [vmem:[%s22502_s30 + $0x4f8] sm:$0xff] }
0x1317   : > { %12746 = vmatprep.mubr.bf16.mxu1 %v24240_v48  ;;  %12838 = vmatpush1.bf16.msra.mxu0 %v18142_v56  ;;  %v18166_v63 = vcombine.low %v10246_v42, %v10250_v34  ;;  %v10278_v44 = vld [vmem:[%s22502_s30 + $0x5d8] sm:$0xff]  ;;  %v18190_v56 = vcombine.low %v10270_v55, %v10274_v3 }
0x1318   : > { %12869 = vmatprep.mubr.bf16.mxu0 %v24240_v48  ;;  %12716 = vmatprep.subr.bf16.mxu1 %v18149_v45  ;;  %v18167_v48 = vcombine.high %v10246_v42, %v10250_v34  ;;  %v18197_v45 = vcombine.high %v10277_v28, %v10281_v1  ;;  %v18199_v6 = vcombine.high %v10278_v44, %v10282_v10  ;;  %v10294_v42 = vld [vmem:[%s22502_s30 + $0x658] sm:$0xff] }
0x1319   : > { %12839 = vmatprep.subr.bf16.mxu0 %v18151_v14  ;;  %v10289_v14 = vld [vmem:[%s22502_s30 + $0x630] sm:$0xff]  ;;  %v10298_v34 = vld [vmem:[%s22502_s30 + $0x678] sm:$0xff] }
0x131a   : > { %12717 = vmatpush1.bf16.msra.mxu1 %v18148_v62  ;;  %v18196_v62 = vcombine.low %v10277_v28, %v10281_v1  ;;  %v10318_v55 = vld [vmem:[%s22502_s30 + $0x718] sm:$0xff]  ;;  %v10325_v28 = vld [vmem:[%s22502_s30 + $0x750] sm:$0xff] }
0x131b   : > { %12840 = vmatpush1.bf16.msra.mxu0 %v18150_v15  ;;  %12718 = vmatprep.subr.bf16.mxu1 %v18157_v24  ;;  %v18198_v15 = vcombine.low %v10278_v44, %v10282_v10  ;;  %v18205_v24 = vcombine.high %v10285_v27, %v10289_v14  ;;  %v10322_v3 = vld [vmem:[%s22502_s30 + $0x738] sm:$0xff]  ;;  %v10329_v1 = vld [vmem:[%s22502_s30 + $0x770] sm:$0xff] }
0x131c   : > { %12841 = vmatprep.subr.bf16.mxu0 %v18159_v11  ;;  %v18207_v11 = vcombine.high %v10286_v51, %v10290_v60  ;;  %v10326_v44 = vld [vmem:[%s22502_s30 + $0x758] sm:$0xff] }
0x131d   : > { %v10330_v10 = vld [vmem:[%s22502_s30 + $0x778] sm:$0xff] }
0x131e   : > { %12719 = vmatpush1.bf16.msra.mxu1 %v18156_v33  ;;  %v18204_v33 = vcombine.low %v10285_v27, %v10289_v14  ;;  %v10333_v27 = vld [vmem:[%s22502_s30 + $0x790] sm:$0xff] }
0x131f   : > { %12842 = vmatpush1.bf16.msra.mxu0 %v18158_v5  ;;  %12720 = vmatprep.subr.bf16.mxu1 %v18165_v25  ;;  %v18206_v5 = vcombine.low %v10286_v51, %v10290_v60  ;;  %v18213_v25 = vcombine.high %v10293_v16, %v10297_v17  ;;  %v10337_v14 = vld [vmem:[%s22502_s30 + $0x7b0] sm:$0xff]  ;;  %v10334_v51 = vld [vmem:[%s22502_s30 + $0x798] sm:$0xff] }
0x1320   : > { %12843 = vmatprep.subr.bf16.mxu0 %v18167_v48  ;;  %v18215_v48 = vcombine.high %v10294_v42, %v10298_v34  ;;  %v10338_v60 = vld [vmem:[%s22502_s30 + $0x7b8] sm:$0xff] }
0x1322   : > { %12721 = vmatpush1.bf16.msra.mxu1 %v18164_v40  ;;  %v18212_v40 = vcombine.low %v10293_v16, %v10297_v17  ;;  %v10341_v16 = vld [vmem:[%s22502_s30 + $0x7d0] sm:$0xff] }
0x1323   : > { %12844 = vmatpush1.bf16.msra.mxu0 %v18166_v63  ;;  %12722 = vmatprep.subr.bf16.mxu1 %v18173_v2  ;;  %v18214_v63 = vcombine.low %v10294_v42, %v10298_v34  ;;  %v18221_v2 = vcombine.high %v10301_v38, %v10305_v52  ;;  %v10345_v17 = vld [vmem:[%s22502_s30 + $0x7f0] sm:$0xff]  ;;  %v10342_v42 = vld [vmem:[%s22502_s30 + $0x7d8] sm:$0xff] }
0x1324   : > { %12845 = vmatprep.subr.bf16.mxu0 %v18175_v61  ;;  %v18223_v61 = vcombine.high %v10302_v23, %v10306_v43  ;;  %v10346_v34 = vld [vmem:[%s22502_s30 + $0x7f8] sm:$0xff] }
0x1326   : > { %12723 = vmatpush1.bf16.msra.mxu1 %v18172_v20  ;;  %v18220_v20 = vcombine.low %v10301_v38, %v10305_v52  ;;  %v10349_v38 = vld [vmem:[%s22502_s30 + $0x810] sm:$0xff] }
0x1327   : > { %12846 = vmatpush1.bf16.msra.mxu0 %v18174_v21  ;;  %12724 = vmatprep.subr.bf16.mxu1 %v18181_v30  ;;  %v18222_v21 = vcombine.low %v10302_v23, %v10306_v43  ;;  %v18229_v30 = vcombine.high %v10309_v49, %v10313_v12  ;;  %v10353_v52 = vld [vmem:[%s22502_s30 + $0x830] sm:$0xff]  ;;  %v10350_v23 = vld [vmem:[%s22502_s30 + $0x818] sm:$0xff] }
0x1328   : > { %12847 = vmatprep.subr.bf16.mxu0 %v18183_v32  ;;  %v18231_v32 = vcombine.high %v10310_v47, %v10314_v35  ;;  %v10354_v43 = vld [vmem:[%s22502_s30 + $0x838] sm:$0xff] }
0x132a   : > { %12725 = vmatpush1.bf16.msra.mxu1 %v18180_v58  ;;  %v18228_v58 = vcombine.low %v10309_v49, %v10313_v12  ;;  %v10357_v49 = vld [vmem:[%s22502_s30 + $0x850] sm:$0xff] }
0x132b   : > { %12848 = vmatpush1.bf16.msra.mxu0 %v18182_v37  ;;  %12726 = vmatprep.subr.bf16.mxu1 %v18189_v53  ;;  %v18230_v37 = vcombine.low %v10310_v47, %v10314_v35  ;;  %v18237_v53 = vcombine.high %v10317_v19, %v10321_v22  ;;  %v10361_v12 = vld [vmem:[%s22502_s30 + $0x870] sm:$0xff]  ;;  %v18268_v47 = vcombine.low %v10349_v38, %v10353_v52  ;;  %v10358_v35 = vld [vmem:[%s22502_s30 + $0x858] sm:$0xff] }
0x132c   : > { %12849 = vmatprep.subr.bf16.mxu0 %v18191_v36  ;;  %v18239_v36 = vcombine.high %v10318_v55, %v10322_v3 }
0x132e   : > { %12727 = vmatpush1.bf16.msra.mxu1 %v18188_v18  ;;  %v18236_v18 = vcombine.low %v10317_v19, %v10321_v22  ;;  %v10369_v19 = vld [vmem:[%s22502_s30 + $0x8b0] sm:$0xff] }
0x132f   : > { %12850 = vmatpush1.bf16.msra.mxu0 %v18190_v56  ;;  %12728 = vmatprep.subr.bf16.mxu1 %v18197_v45  ;;  %v18238_v56 = vcombine.low %v10318_v55, %v10322_v3  ;;  %v18245_v45 = vcombine.high %v10325_v28, %v10329_v1  ;;  %v10366_v55 = vld [vmem:[%s22502_s30 + $0x898] sm:$0xff] }
0x1330   : > { %12851 = vmatprep.subr.bf16.mxu0 %v18199_v6  ;;  %v18247_v6 = vcombine.high %v10326_v44, %v10330_v10  ;;  %v10370_v3 = vld [vmem:[%s22502_s30 + $0x8b8] sm:$0xff] }
0x1332   : > { %12729 = vmatpush1.bf16.msra.mxu1 %v18196_v62  ;;  %v18244_v62 = vcombine.low %v10325_v28, %v10329_v1  ;;  %v10373_v28 = vld [vmem:[%s22502_s30 + $0x8d0] sm:$0xff] }
0x1333   : > { %12852 = vmatpush1.bf16.msra.mxu0 %v18198_v15  ;;  %12730 = vmatprep.subr.bf16.mxu1 %v18205_v24  ;;  %v18246_v15 = vcombine.low %v10326_v44, %v10330_v10  ;;  %v18253_v24 = vcombine.high %v10333_v27, %v10337_v14  ;;  %v10377_v1 = vld [vmem:[%s22502_s30 + $0x8f0] sm:$0xff]  ;;  %v10374_v44 = vld [vmem:[%s22502_s30 + $0x8d8] sm:$0xff] }
0x1334   : > { %12853 = vmatprep.subr.bf16.mxu0 %v18207_v11  ;;  %v18255_v11 = vcombine.high %v10334_v51, %v10338_v60 }
0x1336   : > { %12731 = vmatpush1.bf16.msra.mxu1 %v18204_v33  ;;  %v18252_v33 = vcombine.low %v10333_v27, %v10337_v14  ;;  %v10382_v27 = vld [vmem:[%s22502_s30 + $0x918] sm:$0xff] }
0x1337   : > { %12854 = vmatpush1.bf16.msra.mxu0 %v18206_v5  ;;  %12732 = vmatprep.subr.bf16.mxu1 %v18213_v25  ;;  %v18254_v5 = vcombine.low %v10334_v51, %v10338_v60  ;;  %v18261_v25 = vcombine.high %v10341_v16, %v10345_v17  ;;  %v10386_v14 = vld [vmem:[%s22502_s30 + $0x938] sm:$0xff]  ;;  %v18292_v51 = vcombine.low %v10373_v28, %v10377_v1 }
0x1338   : > { %12855 = vmatprep.subr.bf16.mxu0 %v18215_v48  ;;  %v18263_v48 = vcombine.high %v10342_v42, %v10346_v34 }
0x133a   : > { %12733 = vmatpush1.bf16.msra.mxu1 %v18212_v40  ;;  %v18260_v40 = vcombine.low %v10341_v16, %v10345_v17  ;;  %v10390_v16 = vld [vmem:[%s22502_s30 + $0x958] sm:$0xff] }
0x133b   : > { %12856 = vmatpush1.bf16.msra.mxu0 %v18214_v63  ;;  %12734 = vmatprep.subr.bf16.mxu1 %v18221_v2  ;;  %v18262_v63 = vcombine.low %v10342_v42, %v10346_v34  ;;  %v18269_v2 = vcombine.high %v10349_v38, %v10353_v52  ;;  %v10394_v17 = vld [vmem:[%s22502_s30 + $0x978] sm:$0xff]  ;;  %v18302_v34 = vcombine.low %v10382_v27, %v10386_v14 }
0x133c   : > { %12857 = vmatprep.subr.bf16.mxu0 %v18223_v61  ;;  %v18271_v61 = vcombine.high %v10350_v23, %v10354_v43  ;;  %v10398_v38 = vld [vmem:[%s22502_s30 + $0x998] sm:$0xff] }
0x133d   : > { %v10402_v52 = vld [vmem:[%s22502_s30 + $0x9b8] sm:$0xff] }
0x133e   : > { %12735 = vmatpush1.bf16.msra.mxu1 %v18220_v20  ;;  %v10362_v20 = vld [vmem:[%s22502_s30 + $0x878] sm:$0xff] }
0x133f   : > { %12858 = vmatpush1.bf16.msra.mxu0 %v18222_v21  ;;  %12736 = vmatprep.subr.bf16.mxu1 %v18229_v30  ;;  %v18270_v21 = vcombine.low %v10350_v23, %v10354_v43  ;;  %v18277_v30 = vcombine.high %v10357_v49, %v10361_v12  ;;  %v18279_v22 = vcombine.high %v10358_v35, %v10362_v20 }
0x1340   : > { %12859 = vmatprep.subr.bf16.mxu0 %v18231_v32  ;;  %v10365_v32 = vld [vmem:[%s22502_s30 + $0x890] sm:$0xff]  ;;  %v18310_v43 = vcombine.low %v10390_v16, %v10394_v17 }
0x1341   : > { %v18284_v10 = vcombine.low %v10365_v32, %v10369_v19 }
0x1342   : > { %12737 = vmatpush1.bf16.msra.mxu1 %v18228_v58  ;;  %v18276_v58 = vcombine.low %v10357_v49, %v10361_v12  ;;  %v10406_v49 = vld [vmem:[%s22502_s30 + $0x9d8] sm:$0xff] }
0x1343   : > { %12860 = vmatpush1.bf16.msra.mxu0 %v18230_v37  ;;  %12738 = vmatprep.subr.bf16.mxu1 %v18237_v53  ;;  %v18278_v37 = vcombine.low %v10358_v35, %v10362_v20  ;;  %v18285_v53 = vcombine.high %v10365_v32, %v10369_v19  ;;  %v10410_v12 = vld [vmem:[%s22502_s30 + $0x9f8] sm:$0xff]  ;;  %v18318_v35 = vcombine.low %v10398_v38, %v10402_v52  ;;  %v10417_v32 = vld [vmem:[%s22502_s30 + $0xa30] sm:$0xff] }
0x1344   : > { %12861 = vmatprep.subr.bf16.mxu0 %v18239_v36  ;;  %v18287_v36 = vcombine.high %v10366_v55, %v10370_v3  ;;  %v10414_v19 = vld [vmem:[%s22502_s30 + $0xa18] sm:$0xff] }
0x1346   : > { %12739 = vmatpush1.bf16.msra.mxu1 %v18236_v18  ;;  %v18286_v18 = vcombine.low %v10366_v55, %v10370_v3  ;;  %v18326_v3 = vcombine.low %v10406_v49, %v10410_v12 }
0x1347   : > { %12862 = vmatpush1.bf16.msra.mxu0 %v18238_v56  ;;  %12740 = vmatprep.subr.bf16.mxu1 %v18245_v45  ;;  %v18293_v56 = vcombine.high %v10373_v28, %v10377_v1  ;;  %v10381_v45 = vld [vmem:[%s22502_s30 + $0x910] sm:$0xff]  ;;  %v10422_v28 = vld [vmem:[%s22502_s30 + $0xa58] sm:$0xff] }
0x1348   : > { %12863 = vmatprep.subr.bf16.mxu0 %v18247_v6  ;;  %v10385_v6 = vld [vmem:[%s22502_s30 + $0x930] sm:$0xff]  ;;  %v10426_v1 = vld [vmem:[%s22502_s30 + $0xa78] sm:$0xff] }
0x1349   : > { %v18300_v42 = vcombine.low %v10381_v45, %v10385_v6 }
0x134a   : > { %12741 = vmatpush1.bf16.msra.mxu1 %v18244_v62  ;;  %v18301_v62 = vcombine.high %v10381_v45, %v10385_v6  ;;  %v10430_v45 = vld [vmem:[%s22502_s30 + $0xa98] sm:$0xff] }
0x134b   : > { %12864 = vmatpush1.bf16.msra.mxu0 %v18246_v15  ;;  %12742 = vmatprep.subr.bf16.mxu1 %v18253_v24  ;;  %v18303_v15 = vcombine.high %v10382_v27, %v10386_v14  ;;  %v10389_v24 = vld [vmem:[%s22502_s30 + $0x950] sm:$0xff]  ;;  %v10434_v6 = vld [vmem:[%s22502_s30 + $0xab8] sm:$0xff]  ;;  %v18342_v14 = vcombine.low %v10422_v28, %v10426_v1 }
0x134c   : > { %12865 = vmatprep.subr.bf16.mxu0 %v18255_v11  ;;  %v10393_v11 = vld [vmem:[%s22502_s30 + $0x970] sm:$0xff] }
0x134d   : > { %v18308_v23 = vcombine.low %v10389_v24, %v10393_v11 }
0x134e   : > { %12743 = vmatpush1.bf16.msra.mxu1 %v18252_v33  ;;  %v18309_v33 = vcombine.high %v10389_v24, %v10393_v11  ;;  %v10438_v24 = vld [vmem:[%s22502_s30 + $0xad8] sm:$0xff] }
0x134f   : > { %12866 = vmatpush1.bf16.msra.mxu0 %v18254_v5  ;;  %12744 = vmatprep.subr.bf16.mxu1 %v18261_v25  ;;  %v18311_v5 = vcombine.high %v10390_v16, %v10394_v17  ;;  %v10397_v25 = vld [vmem:[%s22502_s30 + $0x990] sm:$0xff]  ;;  %v10442_v11 = vld [vmem:[%s22502_s30 + $0xaf8] sm:$0xff]  ;;  %v18350_v17 = vcombine.low %v10430_v45, %v10434_v6 }
0x1350   : > { %12867 = vmatprep.subr.bf16.mxu0 %v18263_v48  ;;  %v10401_v48 = vld [vmem:[%s22502_s30 + $0x9b0] sm:$0xff] }
0x1352   : > { %12745 = vmatpush1.bf16.msra.mxu1 %v18260_v40  ;;  %v18317_v40 = vcombine.high %v10397_v25, %v10401_v48 }
0x1353   : > { %12868 = vmatpush1.bf16.msra.mxu0 %v18262_v63  ;;  %12755 = vmatprep.subr.bf16.mxu1 %v18269_v2  ;;  %v18319_v63 = vcombine.high %v10398_v38, %v10402_v52  ;;  %v10405_v2 = vld [vmem:[%s22502_s30 + $0x9d0] sm:$0xff]  ;;  %v18358_v52 = vcombine.low %v10438_v24, %v10442_v11 }
0x1354   : > { %12878 = vmatprep.subr.bf16.mxu0 %v18271_v61  ;;  %v10409_v61 = vld [vmem:[%s22502_s30 + $0x9f0] sm:$0xff] }
0x1355   : > { %12747 = vmatmul.mubr.bf16.vlgmr.msra.gmra.mrb[96].mxu1 %v24308_v0  ;;  %v18325_v20 = vcombine.high %v10405_v2, %v10409_v61  ;;  %v18324_v55 = vcombine.low %v10405_v2, %v10409_v61  ;;  %v10454_v2 = vld [vmem:[%s22502_s30 + $0xb58] sm:$0xff] }
0x1356   : > { %12870 = vmatmul.mubr.bf16.vlgmr.msra.gmra.mrb[84].mxu0 %v24308_v0  ;;  %12756 = vmatpush1.bf16.msra.mxu1 %v18268_v47  ;;  %v10378_v0 = vld [vmem:[%s22502_s30 + $0x8f8] sm:$0xff]  ;;  %v18316_v47 = vcombine.low %v10397_v25, %v10401_v48 }
0x1357   : > { %12787 = vmatprep.mubr.bf16.mxu1 %v24312_v7  ;;  %12879 = vmatpush1.bf16.msra.mxu0 %v18270_v21  ;;  %v18294_v60 = vcombine.low %v10374_v44, %v10378_v0  ;;  %v18327_v21 = vcombine.high %v10406_v49, %v10410_v12  ;;  %v10446_v25 = vld [vmem:[%s22502_s30 + $0xb18] sm:$0xff] }
0x1358   : > { %12910 = vmatprep.mubr.bf16.mxu0 %v24312_v7  ;;  %12757 = vmatprep.subr.bf16.mxu1 %v18277_v30  ;;  %v18295_v7 = vcombine.high %v10374_v44, %v10378_v0  ;;  %v10413_v30 = vld [vmem:[%s22502_s30 + $0xa10] sm:$0xff]  ;;  %v10450_v48 = vld [vmem:[%s22502_s30 + $0xb38] sm:$0xff] }
0x1359   : > { %12880 = vmatprep.subr.bf16.mxu0 %v18279_v22  ;;  %v10418_v22 = vld [vmem:[%s22502_s30 + $0xa38] sm:$0xff]  ;;  %v18332_v44 = vcombine.low %v10413_v30, %v10417_v32  ;;  %v18366_v12 = vcombine.low %v10446_v25, %v10450_v48 }
0x135a   : > { %12758 = vmatpush1.bf16.msra.mxu1 %v18276_v58  ;;  %v18333_v58 = vcombine.high %v10413_v30, %v10417_v32  ;;  %v18334_v0 = vcombine.low %v10414_v19, %v10418_v22  ;;  %v10458_v61 = vld [vmem:[%s22502_s30 + $0xb78] sm:$0xff] }
0x135b   : > { %12881 = vmatpush1.bf16.msra.mxu0 %v18278_v37  ;;  %12759 = vmatprep.subr.bf16.mxu1 %v18285_v53  ;;  %v18335_v37 = vcombine.high %v10414_v19, %v10418_v22  ;;  %v10421_v53 = vld [vmem:[%s22502_s30 + $0xa50] sm:$0xff]  ;;  %v10462_v30 = vld [vmem:[%s22502_s30 + $0xb98] sm:$0xff]  ;;  %v18374_v22 = vcombine.low %v10454_v2, %v10458_v61 }
0x135c   : > { %12882 = vmatprep.subr.bf16.mxu0 %v18287_v36  ;;  %v10425_v36 = vld [vmem:[%s22502_s30 + $0xa70] sm:$0xff]  ;;  %v10466_v32 = vld [vmem:[%s22502_s30 + $0xbb8] sm:$0xff] }
0x135d   : > { %v18340_v27 = vcombine.low %v10421_v53, %v10425_v36 }
0x135e   : > { %12760 = vmatpush1.bf16.msra.mxu1 %v18284_v10  ;;  %v18341_v10 = vcombine.high %v10421_v53, %v10425_v36  ;;  %v10470_v53 = vld [vmem:[%s22502_s30 + $0xbd8] sm:$0xff] }
0x135f   : > { %12883 = vmatpush1.bf16.msra.mxu0 %v18286_v18  ;;  %12761 = vmatprep.subr.bf16.mxu1 %v18293_v56  ;;  %v18343_v18 = vcombine.high %v10422_v28, %v10426_v1  ;;  %v10429_v56 = vld [vmem:[%s22502_s30 + $0xa90] sm:$0xff]  ;;  %v10474_v36 = vld [vmem:[%s22502_s30 + $0xbf8] sm:$0xff]  ;;  %v18382_v1 = vcombine.low %v10462_v30, %v10466_v32 }
0x1360   : > { %12884 = vmatprep.subr.bf16.mxu0 %v18295_v7  ;;  %v10433_v7 = vld [vmem:[%s22502_s30 + $0xab0] sm:$0xff] }
0x1361   : > { %v18348_v16 = vcombine.low %v10429_v56, %v10433_v7 }
0x1362   : > { %12762 = vmatpush1.bf16.msra.mxu1 %v18292_v51  ;;  %v18349_v51 = vcombine.high %v10429_v56, %v10433_v7  ;;  %v21085_v56 = vld [vmem:[%s22508_s12 + $0x4] ss:$24 sps:$4 sm:$0xff]  }
0x1363   : > { %12885 = vmatpush1.bf16.msra.mxu0 %v18294_v60  ;;  %12763 = vmatprep.subr.bf16.mxu1 %v18301_v62  ;;  %v18351_v60 = vcombine.high %v10430_v45, %v10434_v6  ;;  %v10437_v62 = vld [vmem:[%s22502_s30 + $0xad0] sm:$0xff]  ;;  %v21088_v7 = vld [vmem:[%s22508_s12 + $0x304] ss:$24 sps:$4 sm:$0xff]   ;;  %v21083_v45 = vld [vmem:[%s22508_s12] ss:$24 sps:$4 sm:$0xff]  }
0x1364   : > { %12886 = vmatprep.subr.bf16.mxu0 %v18303_v15  ;;  %v10441_v15 = vld [vmem:[%s22502_s30 + $0xaf0] sm:$0xff]  ;;  %v21086_v6 = vld [vmem:[%s22508_s12 + $0x300] ss:$24 sps:$4 sm:$0xff]  }
0x1365   : > { %v18356_v38 = vcombine.low %v10437_v62, %v10441_v15 }
0x1366   : > { %12764 = vmatpush1.bf16.msra.mxu1 %v18300_v42  ;;  %v18357_v42 = vcombine.high %v10437_v62, %v10441_v15  ;;  %v21097_v62 = vld [vmem:[%s22508_s12 + $0x64] ss:$24 sps:$4 sm:$0xff]  }
0x1367   : > { %12887 = vmatpush1.bf16.msra.mxu0 %v18302_v34  ;;  %12765 = vmatprep.subr.bf16.mxu1 %v18309_v33  ;;  %v18359_v34 = vcombine.high %v10438_v24, %v10442_v11  ;;  %v10445_v33 = vld [vmem:[%s22502_s30 + $0xb10] sm:$0xff]  ;;  %v21100_v15 = vld [vmem:[%s22508_s12 + $0x364] ss:$24 sps:$4 sm:$0xff]   ;;  %v21095_v24 = vld [vmem:[%s22508_s12 + $0x60] ss:$24 sps:$4 sm:$0xff]  }
0x1368   : > { %12888 = vmatprep.subr.bf16.mxu0 %v18311_v5  ;;  %v10449_v5 = vld [vmem:[%s22502_s30 + $0xb30] sm:$0xff]  ;;  %v21098_v11 = vld [vmem:[%s22508_s12 + $0x360] ss:$24 sps:$4 sm:$0xff]  }
0x1369   : > { %v18364_v49 = vcombine.low %v10445_v33, %v10449_v5 }
0x136a   : > { %12766 = vmatpush1.bf16.msra.mxu1 %v18308_v23  ;;  %v18365_v23 = vcombine.high %v10445_v33, %v10449_v5  ;;  %v21112_v33 = vld [vmem:[%s22508_s12 + $0x3c4] ss:$24 sps:$4 sm:$0xff]   ;;  %v21107_v5 = vld [vmem:[%s22508_s12 + $0xc0] ss:$24 sps:$4 sm:$0xff]  }
0x136b   : > { %12889 = vmatpush1.bf16.msra.mxu0 %v18310_v43  ;;  %12767 = vmatprep.subr.bf16.mxu1 %v18317_v40  ;;  %v18367_v43 = vcombine.high %v10446_v25, %v10450_v48  ;;  %v10453_v40 = vld [vmem:[%s22502_s30 + $0xb50] sm:$0xff]  ;;  %v21110_v25 = vld [vmem:[%s22508_s12 + $0x3c0] ss:$24 sps:$4 sm:$0xff]   ;;  %v24605_v48 = vld [vmem:[%s22510_s15 + $0x48] sm:$0xff] }
0x136c   : > { %12890 = vmatprep.subr.bf16.mxu0 %v18319_v63  ;;  %v10457_v63 = vld [vmem:[%s22502_s30 + $0xb70] sm:$0xff] }
0x136d   : > { %v18372_v19 = vcombine.low %v10453_v40, %v10457_v63 }
0x136e   : > { %12768 = vmatpush1.bf16.msra.mxu1 %v18316_v47  ;;  %v18373_v47 = vcombine.high %v10453_v40, %v10457_v63  ;;  %v21113_v40 = vld [vmem:[%s22508_s12 + $0xf0] ss:$24 sps:$4 sm:$0xff]  }
0x136f   : > { %12891 = vmatpush1.bf16.msra.mxu0 %v18318_v35  ;;  %12769 = vmatprep.subr.bf16.mxu1 %v18325_v20  ;;  %v18375_v35 = vcombine.high %v10454_v2, %v10458_v61  ;;  %v10461_v20 = vld [vmem:[%s22502_s30 + $0xb90] sm:$0xff]  ;;  %v21121_v61 = vld [vmem:[%s22508_s12 + $0x124] ss:$24 sps:$4 sm:$0xff]  }
0x1370   : > { %12892 = vmatprep.subr.bf16.mxu0 %v18327_v21  ;;  %v10465_v21 = vld [vmem:[%s22502_s30 + $0xbb0] sm:$0xff] }
0x1371   : > { %v18380_v28 = vcombine.low %v10461_v20, %v10465_v21  ;;  %v21116_v2 = vld [vmem:[%s22508_s12 + $0x3f0] ss:$24 sps:$4 sm:$0xff]  }
0x1372   : > { %12770 = vmatpush1.bf16.msra.mxu1 %v18324_v55  ;;  %v18381_v55 = vcombine.high %v10461_v20, %v10465_v21 }
0x1373   : > { %12893 = vmatpush1.bf16.msra.mxu0 %v18326_v3  ;;  %12771 = vmatprep.subr.bf16.mxu1 %v18333_v58  ;;  %v18383_v3 = vcombine.high %v10462_v30, %v10466_v32  ;;  %v10469_v58 = vld [vmem:[%s22502_s30 + $0xbd0] sm:$0xff]  ;;  %v21119_v32 = vld [vmem:[%s22508_s12 + $0x120] ss:$24 sps:$4 sm:$0xff]  }
0x1374   : > { %12894 = vmatprep.subr.bf16.mxu0 %v18335_v37  ;;  %v10473_v37 = vld [vmem:[%s22502_s30 + $0xbf0] sm:$0xff] }
0x1376   : > { %12772 = vmatpush1.bf16.msra.mxu1 %v18332_v44  ;;  %v18389_v44 = vcombine.high %v10469_v58, %v10473_v37 }
0x1377   : > { %12895 = vmatpush1.bf16.msra.mxu0 %v18334_v0  ;;  %12773 = vmatprep.subr.bf16.mxu1 %v18341_v10  ;;  %v18391_v0 = vcombine.high %v10470_v53, %v10474_v36  ;;  %v18388_v10 = vcombine.low %v10469_v58, %v10473_v37  ;;  %v21127_v58 = vld [vmem:[%s22508_s12 + $0x154] ss:$24 sps:$4 sm:$0xff]  }
0x1378   : > { %12896 = vmatprep.subr.bf16.mxu0 %v18343_v18  ;;  %v18390_v18 = vcombine.low %v10470_v53, %v10474_v36  ;;  %v21130_v36 = vld [vmem:[%s22508_s12 + $0x454] ss:$24 sps:$4 sm:$0xff]  }
0x137a   : > { %12774 = vmatpush1.bf16.msra.mxu1 %v18340_v27  ;;  %v21091_v27 = vld [vmem:[%s22508_s12 + $0x34] ss:$24 sps:$4 sm:$0xff]  }
0x137b   : > { %12897 = vmatpush1.bf16.msra.mxu0 %v18342_v14  ;;  %12775 = vmatprep.subr.bf16.mxu1 %v18349_v51  ;;  %v21094_v14 = vld [vmem:[%s22508_s12 + $0x334] ss:$24 sps:$4 sm:$0xff]   ;;  %v21089_v51 = vld [vmem:[%s22508_s12 + $0x30] ss:$24 sps:$4 sm:$0xff]  }
0x137c   : > { %12898 = vmatprep.subr.bf16.mxu0 %v18351_v60  ;;  %v21092_v60 = vld [vmem:[%s22508_s12 + $0x330] ss:$24 sps:$4 sm:$0xff]  }
0x137e   : > { %12776 = vmatpush1.bf16.msra.mxu1 %v18348_v16  ;;  %v21106_v16 = vld [vmem:[%s22508_s12 + $0x394] ss:$24 sps:$4 sm:$0xff]  }
0x137f   : > { %12899 = vmatpush1.bf16.msra.mxu0 %v18350_v17  ;;  %12777 = vmatprep.subr.bf16.mxu1 %v18357_v42  ;;  %v21101_v17 = vld [vmem:[%s22508_s12 + $0x90] ss:$24 sps:$4 sm:$0xff]  }
0x1380   : > { %12900 = vmatprep.subr.bf16.mxu0 %v18359_v34  ;;  %v21104_v42 = vld [vmem:[%s22508_s12 + $0x390] ss:$24 sps:$4 sm:$0xff]   ;;  %v21109_v34 = vld [vmem:[%s22508_s12 + $0xc4] ss:$24 sps:$4 sm:$0xff]  }
0x1382   : > { %12778 = vmatpush1.bf16.msra.mxu1 %v18356_v38  ;;  %v21115_v38 = vld [vmem:[%s22508_s12 + $0xf4] ss:$24 sps:$4 sm:$0xff]  }
0x1383   : > { %12901 = vmatpush1.bf16.msra.mxu0 %v18358_v52  ;;  %12779 = vmatprep.subr.bf16.mxu1 %v18365_v23  ;;  %v616_v52 = vld [vmem:[%s22510_s15 + $0x58] sm:$0xff]  ;;  %v21118_v23 = vld [vmem:[%s22508_s12 + $0x3f4] ss:$24 sps:$4 sm:$0xff]  }
0x1384   : > { %12902 = vmatprep.subr.bf16.mxu0 %v18367_v43  ;;  %v10482_v43 = vrot.slane %v24605_v48, %v23217_v50  ;;  %v10490_v63 = vrot.slane %v616_v52, %v23217_v50  ;;  %v21166_v52 = vld [vmem:[%s22508_s12 + $0x574] ss:$24 sps:$4 sm:$0xff]  }
0x1386   : > { %12780 = vmatpush1.bf16.msra.mxu1 %v18364_v49 }
0x1387   : > { %12903 = vmatpush1.bf16.msra.mxu0 %v18366_v12  ;;  %12781 = vmatprep.subr.bf16.mxu1 %v18373_v47  ;;  %v21124_v12 = vld [vmem:[%s22508_s12 + $0x424] ss:$24 sps:$4 sm:$0xff]  }
0x1388   : > { %12904 = vmatprep.subr.bf16.mxu0 %v18375_v35 }
0x138a   : > { %12782 = vmatpush1.bf16.msra.mxu1 %v18372_v19 }
0x138b   : > { %12905 = vmatpush1.bf16.msra.mxu0 %v18374_v22  ;;  %12783 = vmatprep.subr.bf16.mxu1 %v18381_v55 }
0x138c   : > { %12906 = vmatprep.subr.bf16.mxu0 %v18383_v3  ;;  %v21122_v3 = vld [vmem:[%s22508_s12 + $0x420] ss:$24 sps:$4 sm:$0xff]  }
0x138e   : > { %12784 = vmatpush1.bf16.msra.mxu1 %v18380_v28 }
0x138f   : > { %12907 = vmatpush1.bf16.msra.mxu0 %v18382_v1  ;;  %12785 = vmatprep.subr.bf16.mxu1 %v18389_v44  ;;  %v21125_v44 = vld [vmem:[%s22508_s12 + $0x150] ss:$24 sps:$4 sm:$0xff]  }
0x1390   : > { %12908 = vmatprep.subr.bf16.mxu0 %v18391_v0 }
0x1392   : > { %12786 = vmatpush1.bf16.msra.mxu1 %v18388_v10  ;;  %v21128_v10 = vld [vmem:[%s22508_s12 + $0x450] ss:$24 sps:$4 sm:$0xff]  }
0x1393   : > { %12909 = vmatpush1.bf16.msra.mxu0 %v18390_v18  ;;  %15263 = vmatprep.subr.bf16.mxu1 %v21085_v56  ;;  %v21133_v18 = vld [vmem:[%s22508_s12 + $0x184] ss:$24 sps:$4 sm:$0xff]  }
0x1394   : > { %15304 = vmatprep.subr.bf16.mxu0 %v21088_v7  ;;  %v21136_v56 = vld [vmem:[%s22508_s12 + $0x484] ss:$24 sps:$4 sm:$0xff]   ;;  %v21131_v7 = vld [vmem:[%s22508_s12 + $0x180] ss:$24 sps:$4 sm:$0xff]  }
0x1395   : > { %12788 = vmatmul.mubr.bf16.vlgmr.msra.gmra.mrb[96].mxu1 %v24384_v29 }
0x1396   : > { %12911 = vmatmul.mubr.bf16.vlgmr.msra.gmra.mrb[84].mxu0 %v24384_v29  ;;  %15264 = vmatpush1.bf16.msra.mxu1 %v21083_v45  ;;  %v21103_v29 = vld [vmem:[%s22508_s12 + $0x94] ss:$24 sps:$4 sm:$0xff]   ;;  %v21134_v45 = vld [vmem:[%s22508_s12 + $0x480] ss:$24 sps:$4 sm:$0xff]  }
0x1397   : > { %15305 = vmatpush1.bf16.msra.mxu0 %v21086_v6  ;;  %15265 = vmatprep.subr.bf16.mxu1 %v21091_v27  ;;  %v21139_v6 = vld [vmem:[%s22508_s12 + $0x1b4] ss:$24 sps:$4 sm:$0xff]  }
0x1398   : > { %15306 = vmatprep.subr.bf16.mxu0 %v21094_v14  ;;  %v21142_v27 = vld [vmem:[%s22508_s12 + $0x4b4] ss:$24 sps:$4 sm:$0xff]   ;;  %v21137_v14 = vld [vmem:[%s22508_s12 + $0x1b0] ss:$24 sps:$4 sm:$0xff]  }
0x139a   : > { %15266 = vmatpush1.bf16.msra.mxu1 %v21089_v51  ;;  %v21140_v51 = vld [vmem:[%s22508_s12 + $0x4b0] ss:$24 sps:$4 sm:$0xff]  }
0x139b   : > { %15307 = vmatpush1.bf16.msra.mxu0 %v21092_v60  ;;  %15267 = vmatprep.subr.bf16.mxu1 %v21097_v62  ;;  %v21145_v60 = vld [vmem:[%s22508_s12 + $0x1e4] ss:$24 sps:$4 sm:$0xff]  }
0x139c   : > { %15308 = vmatprep.subr.bf16.mxu0 %v21100_v15  ;;  %v21148_v62 = vld [vmem:[%s22508_s12 + $0x4e4] ss:$24 sps:$4 sm:$0xff]   ;;  %v21143_v15 = vld [vmem:[%s22508_s12 + $0x1e0] ss:$24 sps:$4 sm:$0xff]  }
0x139e   : > { %15268 = vmatpush1.bf16.msra.mxu1 %v21095_v24  ;;  %v21146_v24 = vld [vmem:[%s22508_s12 + $0x4e0] ss:$24 sps:$4 sm:$0xff]  }
0x139f   : > { %15309 = vmatpush1.bf16.msra.mxu0 %v21098_v11  ;;  %15269 = vmatprep.subr.bf16.mxu1 %v21103_v29  ;;  %v21151_v11 = vld [vmem:[%s22508_s12 + $0x214] ss:$24 sps:$4 sm:$0xff]  }
0x13a0   : > { %15310 = vmatprep.subr.bf16.mxu0 %v21106_v16  ;;  %v21154_v29 = vld [vmem:[%s22508_s12 + $0x514] ss:$24 sps:$4 sm:$0xff]   ;;  %v21149_v16 = vld [vmem:[%s22508_s12 + $0x210] ss:$24 sps:$4 sm:$0xff]  }
0x13a2   : > { %15270 = vmatpush1.bf16.msra.mxu1 %v21101_v17  ;;  %v21152_v17 = vld [vmem:[%s22508_s12 + $0x510] ss:$24 sps:$4 sm:$0xff]  }
0x13a3   : > { %15311 = vmatpush1.bf16.msra.mxu0 %v21104_v42  ;;  %15271 = vmatprep.subr.bf16.mxu1 %v21109_v34  ;;  %v21157_v42 = vld [vmem:[%s22508_s12 + $0x244] ss:$24 sps:$4 sm:$0xff]  }
0x13a4   : > { %15312 = vmatprep.subr.bf16.mxu0 %v21112_v33  ;;  %v21160_v34 = vld [vmem:[%s22508_s12 + $0x544] ss:$24 sps:$4 sm:$0xff]   ;;  %v21155_v33 = vld [vmem:[%s22508_s12 + $0x240] ss:$24 sps:$4 sm:$0xff]  }
0x13a6   : > { %15272 = vmatpush1.bf16.msra.mxu1 %v21107_v5  ;;  %v21158_v5 = vld [vmem:[%s22508_s12 + $0x540] ss:$24 sps:$4 sm:$0xff]  }
0x13a7   : > { %15313 = vmatpush1.bf16.msra.mxu0 %v21110_v25  ;;  %15273 = vmatprep.subr.bf16.mxu1 %v21115_v38  ;;  %v21163_v25 = vld [vmem:[%s22508_s12 + $0x274] ss:$24 sps:$4 sm:$0xff]   ;;  %v24655_v38 = vld [vmem:[%s22510_s15 + $0x40] sm:$0xff] }
0x13a8   : > { %v24616_v49 = vpop.f32.mrb[92].mxu1  ;;  %15314 = vmatprep.subr.bf16.mxu0 %v21118_v23  ;;  %v615_v23 = vld [vmem:[%s22510_s15 + $0x50] sm:$0xff] }
0x13a9   : > { %v24619_v47 = vpop.f32.mrb[80].mxu0  ;;  %v12545_v35 = vpop.f32.mrb[93].mxu1 }
0x13aa   : > { %v19183_v20 = vadd.f32 %v12545_v35, %v10482_v43  ;;  %v12668_v21 = vpop.f32.mrb[81].mxu0  ;;  %v12547_v30 = vpop.f32.mrb[94].mxu1  ;;  %15274 = vmatpush1.bf16.msra.mxu1 %v21113_v40  ;;  %v21161_v43 = vld [vmem:[%s22508_s12 + $0x270] ss:$24 sps:$4 sm:$0xff]   ;;  %v10478_v40 = vrot.slane %v24655_v38, %v23217_v50  ;;  %v21167_v35 = vld [vmem:[%s22508_s12 + $0x2a0] ss:$24 sps:$4 sm:$0xff]  }
0x13ab   : > { %v19185_v19 = vadd.f32 %v12668_v21, %v10490_v63  ;;  %v12670_v22 = vpop.f32.mrb[82].mxu0  ;;  %15315 = vmatpush1.bf16.msra.mxu0 %v21116_v2  ;;  %v12548_v55 = vpop.f32.mrb[95].mxu1  ;;  %15275 = vmatprep.subr.bf16.mxu1 %v21121_v61  ;;  %v21164_v63 = vld [vmem:[%s22508_s12 + $0x570] ss:$24 sps:$4 sm:$0xff]   ;;  %v21169_v2 = vld [vmem:[%s22508_s12 + $0x2a4] ss:$24 sps:$4 sm:$0xff]   ;;  %v10486_v61 = vrot.slane %v615_v23, %v23217_v50 }
0x13ac   : > { %v12920_v37 = vmax.f32 %v19183_v20, 0.0  ;;  %v12671_v53 = vpop.f32.mrb[83].mxu0  ;;  %15316 = vmatprep.subr.bf16.mxu0 %v21124_v12  ;;  %v21172_v12 = vld [vmem:[%s22508_s12 + $0x5a4] ss:$24 sps:$4 sm:$0xff]   ;;  %v19182_v20 = vadd.f32 %v24616_v49, %v10478_v40  ;;  %v21170_v21 = vld [vmem:[%s22508_s12 + $0x5a0] ss:$24 sps:$4 sm:$0xff]  }
0x13ad   : > { %v12922_v28 = vmax.f32 %v19185_v19, 0.0  ;;  %v21175_v30 = vld [vmem:[%s22508_s12 + $0x2d4] ss:$24 sps:$4 sm:$0xff]   ;;  %v21173_v22 = vld [vmem:[%s22508_s12 + $0x2d0] ss:$24 sps:$4 sm:$0xff]  }
0x13ae   : > { %v24625_v1 = vpack.c.bf16 %v12920_v37, %v12920_v37  ;;  %15276 = vmatpush1.bf16.msra.mxu1 %v21119_v32  ;;  %v19184_v32 = vadd.f32 %v24619_v47, %v10486_v61  ;;  %v21178_v19 = vld [vmem:[%s22508_s12 + $0x5d4] ss:$24 sps:$4 sm:$0xff]   ;;  %v12919_v55 = vmax.f32 %v19182_v20, 0.0  ;;  %v21181_v49 = vld [vmem:[%s22508_s12 + $0x604] ss:$24 sps:$4 sm:$0xff]  }
0x13af   : > { %v24628_v0 = vpack.c.bf16 %v12922_v28, %v12922_v28  ;;  %15317 = vmatpush1.bf16.msra.mxu0 %v21122_v3  ;;  %15277 = vmatprep.subr.bf16.mxu1 %v21127_v58  ;;  %v21176_v3 = vld [vmem:[%s22508_s12 + $0x5d0] ss:$24 sps:$4 sm:$0xff]   ;;  %v21184_v37 = vld [vmem:[%s22508_s12 + $0x904] ss:$24 sps:$4 sm:$0xff]   ;;  %v21179_v53 = vld [vmem:[%s22508_s12 + $0x600] ss:$24 sps:$4 sm:$0xff]  }
0x13b0   : > { %15295 = vmatprep.mubr.bf16.mxu1 %v24625_v1  ;;  %15318 = vmatprep.subr.bf16.mxu0 %v21130_v36  ;;  %v12921_v58 = vmax.f32 %v19184_v32, 0.0  ;;  %v24677_v47 = vpack.c.bf16 %v12919_v55, %v12919_v55  ;;  %v21182_v36 = vld [vmem:[%s22508_s12 + $0x900] ss:$24 sps:$4 sm:$0xff]   ;;  %v21187_v28 = vld [vmem:[%s22508_s12 + $0x634] ss:$24 sps:$4 sm:$0xff]  }
0x13b1   : > { %15336 = vmatprep.mubr.bf16.mxu0 %v24628_v0  ;;  %v21223_v23 = vld [vmem:[%s22508_s12 + $0x754] ss:$24 sps:$4 sm:$0xff]   ;;  %v21221_v40 = vld [vmem:[%s22508_s12 + $0x750] ss:$24 sps:$4 sm:$0xff]   ;;  %v21232_v61 = vld [vmem:[%s22508_s12 + $0xa84] ss:$24 sps:$4 sm:$0xff]  }
0x13b2   : > { %15278 = vmatpush1.bf16.msra.mxu1 %v21125_v44  ;;  %v24681_v44 = vpack.c.bf16 %v12921_v58, %v12921_v58  ;;  %v21235_v20 = vld [vmem:[%s22508_s12 + $0x7b4] ss:$24 sps:$4 sm:$0xff]   ;;  %v21236_v32 = vld [vmem:[%s22508_s12 + $0xab0] ss:$24 sps:$4 sm:$0xff]   ;;  %v21239_v55 = vld [vmem:[%s22508_s12 + $0x7e0] ss:$24 sps:$4 sm:$0xff]  }
0x13b3   : > { %15319 = vmatpush1.bf16.msra.mxu0 %v21128_v10  ;;  %15279 = vmatprep.subr.bf16.mxu1 %v21133_v18  ;;  %v21190_v10 = vld [vmem:[%s22508_s12 + $0x934] ss:$24 sps:$4 sm:$0xff]   ;;  %v21185_v18 = vld [vmem:[%s22508_s12 + $0x630] ss:$24 sps:$4 sm:$0xff]  }
0x13b4   : > { %15320 = vmatprep.subr.bf16.mxu0 %v21136_v56  ;;  %v21188_v56 = vld [vmem:[%s22508_s12 + $0x930] ss:$24 sps:$4 sm:$0xff]   ;;  %v21250_v58 = vld [vmem:[%s22508_s12 + $0xb14] ss:$24 sps:$4 sm:$0xff]  }
0x13b6   : > { %15280 = vmatpush1.bf16.msra.mxu1 %v21131_v7  ;;  %v21193_v7 = vld [vmem:[%s22508_s12 + $0x664] ss:$24 sps:$4 sm:$0xff]  }
0x13b7   : > { %15321 = vmatpush1.bf16.msra.mxu0 %v21134_v45  ;;  %15281 = vmatprep.subr.bf16.mxu1 %v21139_v6  ;;  %v21196_v45 = vld [vmem:[%s22508_s12 + $0x964] ss:$24 sps:$4 sm:$0xff]   ;;  %v21191_v6 = vld [vmem:[%s22508_s12 + $0x660] ss:$24 sps:$4 sm:$0xff]  }
0x13b8   : > { %15322 = vmatprep.subr.bf16.mxu0 %v21142_v27  ;;  %v21194_v27 = vld [vmem:[%s22508_s12 + $0x960] ss:$24 sps:$4 sm:$0xff]  }
0x13ba   : > { %15282 = vmatpush1.bf16.msra.mxu1 %v21137_v14  ;;  %v21199_v14 = vld [vmem:[%s22508_s12 + $0x694] ss:$24 sps:$4 sm:$0xff]  }
0x13bb   : > { %15323 = vmatpush1.bf16.msra.mxu0 %v21140_v51  ;;  %15283 = vmatprep.subr.bf16.mxu1 %v21145_v60  ;;  %v21202_v51 = vld [vmem:[%s22508_s12 + $0x994] ss:$24 sps:$4 sm:$0xff]   ;;  %v21197_v60 = vld [vmem:[%s22508_s12 + $0x690] ss:$24 sps:$4 sm:$0xff]  }
0x13bc   : > { %15324 = vmatprep.subr.bf16.mxu0 %v21148_v62  ;;  %v21200_v62 = vld [vmem:[%s22508_s12 + $0x990] ss:$24 sps:$4 sm:$0xff]  }
0x13be   : > { %15284 = vmatpush1.bf16.msra.mxu1 %v21143_v15  ;;  %v21205_v15 = vld [vmem:[%s22508_s12 + $0x6c4] ss:$24 sps:$4 sm:$0xff]  }
0x13bf   : > { %15325 = vmatpush1.bf16.msra.mxu0 %v21146_v24  ;;  %15285 = vmatprep.subr.bf16.mxu1 %v21151_v11  ;;  %v21208_v24 = vld [vmem:[%s22508_s12 + $0x9c4] ss:$24 sps:$4 sm:$0xff]   ;;  %v21203_v11 = vld [vmem:[%s22508_s12 + $0x6c0] ss:$24 sps:$4 sm:$0xff]  }
0x13c0   : > { %15326 = vmatprep.subr.bf16.mxu0 %v21154_v29  ;;  %v21206_v29 = vld [vmem:[%s22508_s12 + $0x9c0] ss:$24 sps:$4 sm:$0xff]  }
0x13c2   : > { %15286 = vmatpush1.bf16.msra.mxu1 %v21149_v16  ;;  %v21211_v16 = vld [vmem:[%s22508_s12 + $0x6f4] ss:$24 sps:$4 sm:$0xff]  }
0x13c3   : > { %15327 = vmatpush1.bf16.msra.mxu0 %v21152_v17  ;;  %15287 = vmatprep.subr.bf16.mxu1 %v21157_v42  ;;  %v21214_v17 = vld [vmem:[%s22508_s12 + $0x9f4] ss:$24 sps:$4 sm:$0xff]   ;;  %v21209_v42 = vld [vmem:[%s22508_s12 + $0x6f0] ss:$24 sps:$4 sm:$0xff]  }
0x13c4   : > { %15328 = vmatprep.subr.bf16.mxu0 %v21160_v34  ;;  %v21212_v34 = vld [vmem:[%s22508_s12 + $0x9f0] ss:$24 sps:$4 sm:$0xff]  }
0x13c6   : > { %15288 = vmatpush1.bf16.msra.mxu1 %v21155_v33  ;;  %v21217_v33 = vld [vmem:[%s22508_s12 + $0x724] ss:$24 sps:$4 sm:$0xff]  }
0x13c7   : > { %15329 = vmatpush1.bf16.msra.mxu0 %v21158_v5  ;;  %15289 = vmatprep.subr.bf16.mxu1 %v21163_v25  ;;  %v21220_v5 = vld [vmem:[%s22508_s12 + $0xa24] ss:$24 sps:$4 sm:$0xff]   ;;  %v21215_v25 = vld [vmem:[%s22508_s12 + $0x720] ss:$24 sps:$4 sm:$0xff]  }
0x13c8   : > { %15330 = vmatprep.subr.bf16.mxu0 %v21166_v52  ;;  %v21218_v52 = vld [vmem:[%s22508_s12 + $0xa20] ss:$24 sps:$4 sm:$0xff]  }
0x13ca   : > { %15290 = vmatpush1.bf16.msra.mxu1 %v21161_v43  ;;  %v21226_v43 = vld [vmem:[%s22508_s12 + $0xa54] ss:$24 sps:$4 sm:$0xff]  }
0x13cb   : > { %15331 = vmatpush1.bf16.msra.mxu0 %v21164_v63  ;;  %15291 = vmatprep.subr.bf16.mxu1 %v21169_v2  ;;  %v21224_v63 = vld [vmem:[%s22508_s12 + $0xa50] ss:$24 sps:$4 sm:$0xff]   ;;  %v21229_v2 = vld [vmem:[%s22508_s12 + $0x784] ss:$24 sps:$4 sm:$0xff]  }
0x13cc   : > { %15332 = vmatprep.subr.bf16.mxu0 %v21172_v12  ;;  %v21227_v12 = vld [vmem:[%s22508_s12 + $0x780] ss:$24 sps:$4 sm:$0xff]  }
0x13ce   : > { %15292 = vmatpush1.bf16.msra.mxu1 %v21167_v35  ;;  %v21230_v35 = vld [vmem:[%s22508_s12 + $0xa80] ss:$24 sps:$4 sm:$0xff]  }
0x13cf   : > { %15333 = vmatpush1.bf16.msra.mxu0 %v21170_v21  ;;  %15293 = vmatprep.subr.bf16.mxu1 %v21175_v30  ;;  %v21238_v21 = vld [vmem:[%s22508_s12 + $0xab4] ss:$24 sps:$4 sm:$0xff]   ;;  %v21233_v30 = vld [vmem:[%s22508_s12 + $0x7b0] ss:$24 sps:$4 sm:$0xff]  }
0x13d0   : > { %15334 = vmatprep.subr.bf16.mxu0 %v21178_v19  ;;  %v21241_v19 = vld [vmem:[%s22508_s12 + $0x7e4] ss:$24 sps:$4 sm:$0xff]  }
0x13d2   : > { %15294 = vmatpush1.bf16.msra.mxu1 %v21173_v22  ;;  %v21244_v22 = vld [vmem:[%s22508_s12 + $0xae4] ss:$24 sps:$4 sm:$0xff]  }
0x13d3   : > { %15335 = vmatpush1.bf16.msra.mxu0 %v21176_v3  ;;  %15345 = vmatprep.subr.bf16.mxu1 %v21181_v49  ;;  %v21242_v3 = vld [vmem:[%s22508_s12 + $0xae0] ss:$24 sps:$4 sm:$0xff]   ;;  %v21247_v49 = vld [vmem:[%s22508_s12 + $0x814] ss:$24 sps:$4 sm:$0xff]  }
0x13d4   : > { %15386 = vmatprep.subr.bf16.mxu0 %v21184_v37  ;;  %v21245_v37 = vld [vmem:[%s22508_s12 + $0x810] ss:$24 sps:$4 sm:$0xff]  }
0x13d5   : > { %15296 = vmatmul.mubr.bf16.vlgmr.msra.gmra.mrb[100].mxu1 %v24677_v47 }
0x13d6   : > { %15337 = vmatmul.mubr.bf16.vlgmr.msra.gmra.mrb[88].mxu0 %v24681_v44  ;;  %15346 = vmatpush1.bf16.msra.mxu1 %v21179_v53  ;;  %v21248_v53 = vld [vmem:[%s22508_s12 + $0xb10] ss:$24 sps:$4 sm:$0xff]  }
0x13d7   : > { %15387 = vmatpush1.bf16.msra.mxu0 %v21182_v36  ;;  %15347 = vmatprep.subr.bf16.mxu1 %v21187_v28  ;;  %v21253_v36 = vld [vmem:[%s22508_s12 + $0x844] ss:$24 sps:$4 sm:$0xff]  }
0x13d8   : > { %15388 = vmatprep.subr.bf16.mxu0 %v21190_v10  ;;  %v21256_v28 = vld [vmem:[%s22508_s12 + $0xb44] ss:$24 sps:$4 sm:$0xff]   ;;  %v21251_v10 = vld [vmem:[%s22508_s12 + $0x840] ss:$24 sps:$4 sm:$0xff]  }
0x13da   : > { %15348 = vmatpush1.bf16.msra.mxu1 %v21185_v18  ;;  %v21254_v18 = vld [vmem:[%s22508_s12 + $0xb40] ss:$24 sps:$4 sm:$0xff]  }
0x13db   : > { %15389 = vmatpush1.bf16.msra.mxu0 %v21188_v56  ;;  %15349 = vmatprep.subr.bf16.mxu1 %v21193_v7  ;;  %v21259_v56 = vld [vmem:[%s22508_s12 + $0x874] ss:$24 sps:$4 sm:$0xff]  }
0x13dc   : > { %15390 = vmatprep.subr.bf16.mxu0 %v21196_v45  ;;  %v21262_v7 = vld [vmem:[%s22508_s12 + $0xb74] ss:$24 sps:$4 sm:$0xff]   ;;  %v21257_v45 = vld [vmem:[%s22508_s12 + $0x870] ss:$24 sps:$4 sm:$0xff]  }
0x13de   : > { %15350 = vmatpush1.bf16.msra.mxu1 %v21191_v6  ;;  %v21260_v6 = vld [vmem:[%s22508_s12 + $0xb70] ss:$24 sps:$4 sm:$0xff]  }
0x13df   : > { %15391 = vmatpush1.bf16.msra.mxu0 %v21194_v27  ;;  %15351 = vmatprep.subr.bf16.mxu1 %v21199_v14  ;;  %v21265_v27 = vld [vmem:[%s22508_s12 + $0x8a4] ss:$24 sps:$4 sm:$0xff]  }
0x13e0   : > { %15392 = vmatprep.subr.bf16.mxu0 %v21202_v51  ;;  %v21268_v14 = vld [vmem:[%s22508_s12 + $0xba4] ss:$24 sps:$4 sm:$0xff]   ;;  %v21263_v51 = vld [vmem:[%s22508_s12 + $0x8a0] ss:$24 sps:$4 sm:$0xff]  }
0x13e2   : > { %15352 = vmatpush1.bf16.msra.mxu1 %v21197_v60  ;;  %v21266_v60 = vld [vmem:[%s22508_s12 + $0xba0] ss:$24 sps:$4 sm:$0xff]  }
0x13e3   : > { %15393 = vmatpush1.bf16.msra.mxu0 %v21200_v62  ;;  %15353 = vmatprep.subr.bf16.mxu1 %v21205_v15  ;;  %v21271_v62 = vld [vmem:[%s22508_s12 + $0x8d4] ss:$24 sps:$4 sm:$0xff]  }
0x13e4   : > { %15394 = vmatprep.subr.bf16.mxu0 %v21208_v24  ;;  %v21274_v15 = vld [vmem:[%s22508_s12 + $0xbd4] ss:$24 sps:$4 sm:$0xff]   ;;  %v21269_v24 = vld [vmem:[%s22508_s12 + $0x8d0] ss:$24 sps:$4 sm:$0xff]  }
0x13e6   : > { %15354 = vmatpush1.bf16.msra.mxu1 %v21203_v11  ;;  %v21272_v11 = vld [vmem:[%s22508_s12 + $0xbd0] ss:$24 sps:$4 sm:$0xff]  }
0x13e7   : > { %15395 = vmatpush1.bf16.msra.mxu0 %v21206_v29  ;;  %15355 = vmatprep.subr.bf16.mxu1 %v21211_v16  ;;  %v21277_v29 = vld [vmem:[%s22508_s12 + $0xc] ss:$24 sps:$4 sm:$0xff]  }
0x13e8   : > { %15396 = vmatprep.subr.bf16.mxu0 %v21214_v17  ;;  %v21280_v16 = vld [vmem:[%s22508_s12 + $0x30c] ss:$24 sps:$4 sm:$0xff]  }
0x13e9   : > { %v617_v17 = vld [vmem:[%s22510_s15 + $0x60] sm:$0xff] }
0x13ea   : > { %15356 = vmatpush1.bf16.msra.mxu1 %v21209_v42  ;;  %v619_v42 = vld [vmem:[%s22510_s15 + $0x70] sm:$0xff] }
0x13eb   : > { %15397 = vmatpush1.bf16.msra.mxu0 %v21212_v34  ;;  %15357 = vmatprep.subr.bf16.mxu1 %v21217_v33  ;;  %v618_v34 = vld [vmem:[%s22510_s15 + $0x68] sm:$0xff]  ;;  %v620_v33 = vld [vmem:[%s22510_s15 + $0x78] sm:$0xff] }
0x13ec   : > { %15398 = vmatprep.subr.bf16.mxu0 %v21220_v5  ;;  %v10494_v5 = vrot.slane %v617_v17, %v23217_v50  ;;  %v21302_v17 = vld [vmem:[%s22508_s12 + $0x3c8] ss:$24 sps:$4 sm:$0xff]  }
0x13ee   : > { %15358 = vmatpush1.bf16.msra.mxu1 %v21215_v25  ;;  %v10502_v25 = vrot.slane %v619_v42, %v23217_v50  ;;  %v21307_v42 = vld [vmem:[%s22508_s12 + $0xfc] ss:$24 sps:$4 sm:$0xff]  }
0x13ef   : > { %15399 = vmatpush1.bf16.msra.mxu0 %v21218_v52  ;;  %15359 = vmatprep.subr.bf16.mxu1 %v21223_v23  ;;  %v10498_v52 = vrot.slane %v618_v34, %v23217_v50  ;;  %v10506_v23 = vrot.slane %v620_v33, %v23217_v50  ;;  %v21310_v34 = vld [vmem:[%s22508_s12 + $0x3fc] ss:$24 sps:$4 sm:$0xff]   ;;  %v21305_v33 = vld [vmem:[%s22508_s12 + $0xf8] ss:$24 sps:$4 sm:$0xff]  }
0x13f0   : > { %15400 = vmatprep.subr.bf16.mxu0 %v21226_v43 }
0x13f2   : > { %15360 = vmatpush1.bf16.msra.mxu1 %v21221_v40 }
0x13f3   : > { %15401 = vmatpush1.bf16.msra.mxu0 %v21224_v63  ;;  %15361 = vmatprep.subr.bf16.mxu1 %v21229_v2 }
0x13f4   : > { %15402 = vmatprep.subr.bf16.mxu0 %v21232_v61 }
0x13f6   : > { %15362 = vmatpush1.bf16.msra.mxu1 %v21227_v12 }
0x13f7   : > { %15403 = vmatpush1.bf16.msra.mxu0 %v21230_v35  ;;  %15363 = vmatprep.subr.bf16.mxu1 %v21235_v20 }
0x13f8   : > { %15404 = vmatprep.subr.bf16.mxu0 %v21238_v21 }
0x13fa   : > { %15364 = vmatpush1.bf16.msra.mxu1 %v21233_v30 }
0x13fb   : > { %15405 = vmatpush1.bf16.msra.mxu0 %v21236_v32  ;;  %15365 = vmatprep.subr.bf16.mxu1 %v21241_v19 }
0x13fc   : > { %15406 = vmatprep.subr.bf16.mxu0 %v21244_v22 }
0x13fe   : > { %15366 = vmatpush1.bf16.msra.mxu1 %v21239_v55 }
0x13ff   : > { %15407 = vmatpush1.bf16.msra.mxu0 %v21242_v3  ;;  %15367 = vmatprep.subr.bf16.mxu1 %v21247_v49 }
0x1400   : > { %15408 = vmatprep.subr.bf16.mxu0 %v21250_v58 }
0x1402   : > { %15368 = vmatpush1.bf16.msra.mxu1 %v21245_v37  ;;  %v21275_v37 = vld [vmem:[%s22508_s12 + $0x8] ss:$24 sps:$4 sm:$0xff]  }
0x1403   : > { %15409 = vmatpush1.bf16.msra.mxu0 %v21248_v53  ;;  %15369 = vmatprep.subr.bf16.mxu1 %v21253_v36 }
0x1404   : > { %15410 = vmatprep.subr.bf16.mxu0 %v21256_v28  ;;  %v21278_v28 = vld [vmem:[%s22508_s12 + $0x308] ss:$24 sps:$4 sm:$0xff]  }
0x1406   : > { %15370 = vmatpush1.bf16.msra.mxu1 %v21251_v10 }
0x1407   : > { %15411 = vmatpush1.bf16.msra.mxu0 %v21254_v18  ;;  %15371 = vmatprep.subr.bf16.mxu1 %v21259_v56  ;;  %v21283_v18 = vld [vmem:[%s22508_s12 + $0x3c] ss:$24 sps:$4 sm:$0xff]  }
0x1408   : > { %15412 = vmatprep.subr.bf16.mxu0 %v21262_v7  ;;  %v21286_v56 = vld [vmem:[%s22508_s12 + $0x33c] ss:$24 sps:$4 sm:$0xff]   ;;  %v21281_v7 = vld [vmem:[%s22508_s12 + $0x38] ss:$24 sps:$4 sm:$0xff]  }
0x140a   : > { %15372 = vmatpush1.bf16.msra.mxu1 %v21257_v45  ;;  %v21284_v45 = vld [vmem:[%s22508_s12 + $0x338] ss:$24 sps:$4 sm:$0xff]  }
0x140b   : > { %15413 = vmatpush1.bf16.msra.mxu0 %v21260_v6  ;;  %15373 = vmatprep.subr.bf16.mxu1 %v21265_v27  ;;  %v21289_v6 = vld [vmem:[%s22508_s12 + $0x6c] ss:$24 sps:$4 sm:$0xff]  }
0x140c   : > { %15414 = vmatprep.subr.bf16.mxu0 %v21268_v14  ;;  %v21292_v27 = vld [vmem:[%s22508_s12 + $0x36c] ss:$24 sps:$4 sm:$0xff]   ;;  %v21287_v14 = vld [vmem:[%s22508_s12 + $0x68] ss:$24 sps:$4 sm:$0xff]  }
0x140e   : > { %15374 = vmatpush1.bf16.msra.mxu1 %v21263_v51  ;;  %v21290_v51 = vld [vmem:[%s22508_s12 + $0x368] ss:$24 sps:$4 sm:$0xff]  }
0x140f   : > { %15415 = vmatpush1.bf16.msra.mxu0 %v21266_v60  ;;  %15375 = vmatprep.subr.bf16.mxu1 %v21271_v62  ;;  %v21295_v60 = vld [vmem:[%s22508_s12 + $0x9c] ss:$24 sps:$4 sm:$0xff]  }
0x1410   : > { %15416 = vmatprep.subr.bf16.mxu0 %v21274_v15  ;;  %v21298_v62 = vld [vmem:[%s22508_s12 + $0x39c] ss:$24 sps:$4 sm:$0xff]   ;;  %v21293_v15 = vld [vmem:[%s22508_s12 + $0x98] ss:$24 sps:$4 sm:$0xff]  }
0x1412   : > { %15376 = vmatpush1.bf16.msra.mxu1 %v21269_v24  ;;  %v21296_v24 = vld [vmem:[%s22508_s12 + $0x398] ss:$24 sps:$4 sm:$0xff]  }
0x1413   : > { %15417 = vmatpush1.bf16.msra.mxu0 %v21272_v11  ;;  %15427 = vmatprep.subr.bf16.mxu1 %v21277_v29  ;;  %v21301_v11 = vld [vmem:[%s22508_s12 + $0xcc] ss:$24 sps:$4 sm:$0xff]  }
0x1414   : > { %15468 = vmatprep.subr.bf16.mxu0 %v21280_v16  ;;  %v21304_v29 = vld [vmem:[%s22508_s12 + $0x3cc] ss:$24 sps:$4 sm:$0xff]   ;;  %v21299_v16 = vld [vmem:[%s22508_s12 + $0xc8] ss:$24 sps:$4 sm:$0xff]  }
0x1468   : > { %v12789_v43 = vpop.f32.mrb[96].mxu1 }
0x1469   : > { %v19186_v40 = vadd.f32 %v12789_v43, %v10494_v5  ;;  %v12912_v63 = vpop.f32.mrb[84].mxu0  ;;  %v12791_v2 = vpop.f32.mrb[97].mxu1  ;;  %v21308_v5 = vld [vmem:[%s22508_s12 + $0x3f8] ss:$24 sps:$4 sm:$0xff]   ;;  %v21314_v43 = vld [vmem:[%s22508_s12 + $0x428] ss:$24 sps:$4 sm:$0xff]  }
0x146a   : > { %v19188_v61 = vadd.f32 %v12912_v63, %v10502_v25  ;;  %v19187_v12 = vadd.f32 %v12791_v2, %v10498_v52  ;;  %v12914_v35 = vpop.f32.mrb[85].mxu0  ;;  %v12793_v20 = vpop.f32.mrb[98].mxu1  ;;  %v21313_v25 = vld [vmem:[%s22508_s12 + $0x12c] ss:$24 sps:$4 sm:$0xff]   ;;  %v21322_v63 = vld [vmem:[%s22508_s12 + $0x45c] ss:$24 sps:$4 sm:$0xff]  }
0x146b   : > { %v12923_v21 = vmax.f32 %v19186_v40, 0.0  ;;  %v19189_v30 = vadd.f32 %v12914_v35, %v10506_v23  ;;  %v12916_v32 = vpop.f32.mrb[86].mxu0  ;;  %v12794_v19 = vpop.f32.mrb[99].mxu1  ;;  %v21316_v52 = vld [vmem:[%s22508_s12 + $0x42c] ss:$24 sps:$4 sm:$0xff]  }
0x146c   : > { %v12925_v22 = vmax.f32 %v19188_v61, 0.0  ;;  %v12924_v55 = vmax.f32 %v19187_v12, 0.0  ;;  %v12917_v3 = vpop.f32.mrb[87].mxu0  ;;  %v21311_v23 = vld [vmem:[%s22508_s12 + $0x128] ss:$24 sps:$4 sm:$0xff]  }
0x146d   : > { %v12926_v49 = vmax.f32 %v19189_v30, 0.0  ;;  %v24757_v53 = vpack.c.bf16 %v12923_v21, %v12923_v21  ;;  %v21319_v40 = vld [vmem:[%s22508_s12 + $0x15c] ss:$24 sps:$4 sm:$0xff]   ;;  %v21317_v2 = vld [vmem:[%s22508_s12 + $0x158] ss:$24 sps:$4 sm:$0xff]  }
0x146e   : > { %v24754_v58 = vpack.c.bf16 %v12924_v55, %v12924_v55  ;;  %v24762_v10 = vpack.c.bf16 %v12925_v22, %v12925_v22  ;;  %v21320_v61 = vld [vmem:[%s22508_s12 + $0x458] ss:$24 sps:$4 sm:$0xff]   ;;  %v21325_v12 = vld [vmem:[%s22508_s12 + $0x18c] ss:$24 sps:$4 sm:$0xff]   ;;  %v21323_v20 = vld [vmem:[%s22508_s12 + $0x188] ss:$24 sps:$4 sm:$0xff]  }
0x146f   : > { %v24759_v36 = vpack.c.bf16 %v12926_v49, %v12926_v49  ;;  %v21328_v35 = vld [vmem:[%s22508_s12 + $0x48c] ss:$24 sps:$4 sm:$0xff]   ;;  %v21326_v21 = vld [vmem:[%s22508_s12 + $0x488] ss:$24 sps:$4 sm:$0xff]   ;;  %v21331_v30 = vld [vmem:[%s22508_s12 + $0x1bc] ss:$24 sps:$4 sm:$0xff]  }
0x1470   : > { %15377 = vmatprep.mubr.bf16.mxu1 %v24754_v58  ;;  %v21334_v32 = vld [vmem:[%s22508_s12 + $0x4bc] ss:$24 sps:$4 sm:$0xff]   ;;  %v21329_v19 = vld [vmem:[%s22508_s12 + $0x1b8] ss:$24 sps:$4 sm:$0xff]   ;;  %v21337_v55 = vld [vmem:[%s22508_s12 + $0x1ec] ss:$24 sps:$4 sm:$0xff]  }
0x1471   : > { %15418 = vmatprep.mubr.bf16.mxu0 %v24759_v36  ;;  %15378 = vmatmul.mubr.bf16.vlgmr.msra.gmra.mrb[104].mxu1 %v24757_v53  ;;  %v21332_v22 = vld [vmem:[%s22508_s12 + $0x4b8] ss:$24 sps:$4 sm:$0xff]   ;;  %v21340_v3 = vld [vmem:[%s22508_s12 + $0x4ec] ss:$24 sps:$4 sm:$0xff]   ;;  %v21335_v49 = vld [vmem:[%s22508_s12 + $0x1e8] ss:$24 sps:$4 sm:$0xff]  }
0x1472   : > { %15419 = vmatmul.mubr.bf16.vlgmr.msra.gmra.mrb[92].mxu0 %v24762_v10  ;;  %15428 = vmatpush1.bf16.msra.mxu1 %v21275_v37  ;;  %v21338_v37 = vld [vmem:[%s22508_s12 + $0x4e8] ss:$24 sps:$4 sm:$0xff]  }
0x1473   : > { %15469 = vmatpush1.bf16.msra.mxu0 %v21278_v28  ;;  %15459 = vmatprep.mubr.bf16.mxu1 %v24625_v1  ;;  %v21343_v28 = vld [vmem:[%s22508_s12 + $0x21c] ss:$24 sps:$4 sm:$0xff]  }
0x1474   : > { %15500 = vmatprep.mubr.bf16.mxu0 %v24628_v0  ;;  %15429 = vmatprep.subr.bf16.mxu1 %v21283_v18  ;;  %v21346_v18 = vld [vmem:[%s22508_s12 + $0x51c] ss:$24 sps:$4 sm:$0xff]  }
0x1475   : > { %15470 = vmatprep.subr.bf16.mxu0 %v21286_v56  ;;  %v21341_v56 = vld [vmem:[%s22508_s12 + $0x218] ss:$24 sps:$4 sm:$0xff]  }
0x1476   : > { %15430 = vmatpush1.bf16.msra.mxu1 %v21281_v7  ;;  %v21344_v7 = vld [vmem:[%s22508_s12 + $0x518] ss:$24 sps:$4 sm:$0xff]  }
0x1477   : > { %15471 = vmatpush1.bf16.msra.mxu0 %v21284_v45  ;;  %15431 = vmatprep.subr.bf16.mxu1 %v21289_v6  ;;  %v21349_v45 = vld [vmem:[%s22508_s12 + $0x24c] ss:$24 sps:$4 sm:$0xff]  }
0x1478   : > { %15472 = vmatprep.subr.bf16.mxu0 %v21292_v27  ;;  %v21352_v6 = vld [vmem:[%s22508_s12 + $0x54c] ss:$24 sps:$4 sm:$0xff]   ;;  %v21347_v27 = vld [vmem:[%s22508_s12 + $0x248] ss:$24 sps:$4 sm:$0xff]  }
0x147a   : > { %15432 = vmatpush1.bf16.msra.mxu1 %v21287_v14  ;;  %v21350_v14 = vld [vmem:[%s22508_s12 + $0x548] ss:$24 sps:$4 sm:$0xff]  }
0x147b   : > { %15473 = vmatpush1.bf16.msra.mxu0 %v21290_v51  ;;  %15433 = vmatprep.subr.bf16.mxu1 %v21295_v60  ;;  %v21355_v51 = vld [vmem:[%s22508_s12 + $0x27c] ss:$24 sps:$4 sm:$0xff]  }
0x147c   : > { %15474 = vmatprep.subr.bf16.mxu0 %v21298_v62  ;;  %v21358_v60 = vld [vmem:[%s22508_s12 + $0x57c] ss:$24 sps:$4 sm:$0xff]   ;;  %v21353_v62 = vld [vmem:[%s22508_s12 + $0x278] ss:$24 sps:$4 sm:$0xff]  }
0x147e   : > { %15434 = vmatpush1.bf16.msra.mxu1 %v21293_v15  ;;  %v21356_v15 = vld [vmem:[%s22508_s12 + $0x578] ss:$24 sps:$4 sm:$0xff]  }
0x147f   : > { %15475 = vmatpush1.bf16.msra.mxu0 %v21296_v24  ;;  %15435 = vmatprep.subr.bf16.mxu1 %v21301_v11  ;;  %v21361_v24 = vld [vmem:[%s22508_s12 + $0x2ac] ss:$24 sps:$4 sm:$0xff]  }
0x1480   : > { %15476 = vmatprep.subr.bf16.mxu0 %v21304_v29  ;;  %v21364_v11 = vld [vmem:[%s22508_s12 + $0x5ac] ss:$24 sps:$4 sm:$0xff]   ;;  %v13322_v29 = vrot.slane %v24655_v38, %v23378_v9 }
0x1482   : > { %15436 = vmatpush1.bf16.msra.mxu1 %v21299_v16  ;;  %v21359_v16 = vld [vmem:[%s22508_s12 + $0x2a8] ss:$24 sps:$4 sm:$0xff]  }
0x1483   : > { %15477 = vmatpush1.bf16.msra.mxu0 %v21302_v17  ;;  %15437 = vmatprep.subr.bf16.mxu1 %v21307_v42  ;;  %v13326_v17 = vrot.slane %v24605_v48, %v23378_v9  ;;  %v21362_v42 = vld [vmem:[%s22508_s12 + $0x5a8] ss:$24 sps:$4 sm:$0xff]  }
0x1484   : > { %15478 = vmatprep.subr.bf16.mxu0 %v21310_v34  ;;  %v21367_v34 = vld [vmem:[%s22508_s12 + $0x2dc] ss:$24 sps:$4 sm:$0xff]  }
0x1486   : > { %15438 = vmatpush1.bf16.msra.mxu1 %v21305_v33 }
0x1487   : > { %15479 = vmatpush1.bf16.msra.mxu0 %v21308_v5  ;;  %15439 = vmatprep.subr.bf16.mxu1 %v21313_v25  ;;  %v21370_v5 = vld [vmem:[%s22508_s12 + $0x5dc] ss:$24 sps:$4 sm:$0xff]  }
0x1488   : > { %15480 = vmatprep.subr.bf16.mxu0 %v21316_v52 }
0x148a   : > { %15440 = vmatpush1.bf16.msra.mxu1 %v21311_v23 }
0x148b   : > { %15481 = vmatpush1.bf16.msra.mxu0 %v21314_v43  ;;  %15441 = vmatprep.subr.bf16.mxu1 %v21319_v40 }
0x148c   : > { %15482 = vmatprep.subr.bf16.mxu0 %v21322_v63  ;;  %v21365_v63 = vld [vmem:[%s22508_s12 + $0x2d8] ss:$24 sps:$4 sm:$0xff]  }
0x148e   : > { %15442 = vmatpush1.bf16.msra.mxu1 %v21317_v2 }
0x148f   : > { %15483 = vmatpush1.bf16.msra.mxu0 %v21320_v61  ;;  %15443 = vmatprep.subr.bf16.mxu1 %v21325_v12  ;;  %v21368_v12 = vld [vmem:[%s22508_s12 + $0x5d8] ss:$24 sps:$4 sm:$0xff]  }
0x1490   : > { %15484 = vmatprep.subr.bf16.mxu0 %v21328_v35  ;;  %v21373_v35 = vld [vmem:[%s22508_s12 + $0x60c] ss:$24 sps:$4 sm:$0xff]  }
0x1492   : > { %15444 = vmatpush1.bf16.msra.mxu1 %v21323_v20 }
0x1493   : > { %15485 = vmatpush1.bf16.msra.mxu0 %v21326_v21  ;;  %15445 = vmatprep.subr.bf16.mxu1 %v21331_v30  ;;  %v21376_v30 = vld [vmem:[%s22508_s12 + $0x90c] ss:$24 sps:$4 sm:$0xff]  }
0x1494   : > { %15486 = vmatprep.subr.bf16.mxu0 %v21334_v32  ;;  %v21371_v32 = vld [vmem:[%s22508_s12 + $0x608] ss:$24 sps:$4 sm:$0xff]  }
0x1496   : > { %15446 = vmatpush1.bf16.msra.mxu1 %v21329_v19  ;;  %v21374_v19 = vld [vmem:[%s22508_s12 + $0x908] ss:$24 sps:$4 sm:$0xff]  }
0x1497   : > { %15487 = vmatpush1.bf16.msra.mxu0 %v21332_v22  ;;  %15447 = vmatprep.subr.bf16.mxu1 %v21337_v55  ;;  %v21379_v22 = vld [vmem:[%s22508_s12 + $0x63c] ss:$24 sps:$4 sm:$0xff]  }
0x1498   : > { %15488 = vmatprep.subr.bf16.mxu0 %v21340_v3  ;;  %v21382_v55 = vld [vmem:[%s22508_s12 + $0x93c] ss:$24 sps:$4 sm:$0xff]   ;;  %v21377_v3 = vld [vmem:[%s22508_s12 + $0x638] ss:$24 sps:$4 sm:$0xff]  }
0x149a   : > { %15448 = vmatpush1.bf16.msra.mxu1 %v21335_v49  ;;  %v21380_v49 = vld [vmem:[%s22508_s12 + $0x938] ss:$24 sps:$4 sm:$0xff]  }
0x149b   : > { %15489 = vmatpush1.bf16.msra.mxu0 %v21338_v37  ;;  %15449 = vmatprep.subr.bf16.mxu1 %v21343_v28  ;;  %v21385_v37 = vld [vmem:[%s22508_s12 + $0x66c] ss:$24 sps:$4 sm:$0xff]  }
0x149c   : > { %15490 = vmatprep.subr.bf16.mxu0 %v21346_v18  ;;  %v21388_v28 = vld [vmem:[%s22508_s12 + $0x96c] ss:$24 sps:$4 sm:$0xff]   ;;  %v21383_v18 = vld [vmem:[%s22508_s12 + $0x668] ss:$24 sps:$4 sm:$0xff]  }
0x149e   : > { %15450 = vmatpush1.bf16.msra.mxu1 %v21341_v56  ;;  %v21386_v56 = vld [vmem:[%s22508_s12 + $0x968] ss:$24 sps:$4 sm:$0xff]  }
0x149f   : > { %15491 = vmatpush1.bf16.msra.mxu0 %v21344_v7  ;;  %15451 = vmatprep.subr.bf16.mxu1 %v21349_v45  ;;  %v21391_v7 = vld [vmem:[%s22508_s12 + $0x69c] ss:$24 sps:$4 sm:$0xff]  }
0x14a0   : > { %15492 = vmatprep.subr.bf16.mxu0 %v21352_v6  ;;  %v21394_v45 = vld [vmem:[%s22508_s12 + $0x99c] ss:$24 sps:$4 sm:$0xff]   ;;  %v21389_v6 = vld [vmem:[%s22508_s12 + $0x698] ss:$24 sps:$4 sm:$0xff]  }
0x14a2   : > { %15452 = vmatpush1.bf16.msra.mxu1 %v21347_v27  ;;  %v21392_v27 = vld [vmem:[%s22508_s12 + $0x998] ss:$24 sps:$4 sm:$0xff]  }
0x14a3   : > { %15493 = vmatpush1.bf16.msra.mxu0 %v21350_v14  ;;  %15453 = vmatprep.subr.bf16.mxu1 %v21355_v51  ;;  %v21397_v14 = vld [vmem:[%s22508_s12 + $0x6cc] ss:$24 sps:$4 sm:$0xff]  }
0x14a4   : > { %15494 = vmatprep.subr.bf16.mxu0 %v21358_v60  ;;  %v21400_v51 = vld [vmem:[%s22508_s12 + $0x9cc] ss:$24 sps:$4 sm:$0xff]   ;;  %v21395_v60 = vld [vmem:[%s22508_s12 + $0x6c8] ss:$24 sps:$4 sm:$0xff]  }
0x14a6   : > { %15454 = vmatpush1.bf16.msra.mxu1 %v21353_v62  ;;  %v21398_v62 = vld [vmem:[%s22508_s12 + $0x9c8] ss:$24 sps:$4 sm:$0xff]  }
0x14a7   : > { %15495 = vmatpush1.bf16.msra.mxu0 %v21356_v15  ;;  %15455 = vmatprep.subr.bf16.mxu1 %v21361_v24  ;;  %v21403_v15 = vld [vmem:[%s22508_s12 + $0x6fc] ss:$24 sps:$4 sm:$0xff]  }
0x14a8   : > { %v15297_v33 = vpop.f32.mrb[100].mxu1  ;;  %15496 = vmatprep.subr.bf16.mxu0 %v21364_v11  ;;  %v21406_v24 = vld [vmem:[%s22508_s12 + $0x9fc] ss:$24 sps:$4 sm:$0xff]   ;;  %v21401_v11 = vld [vmem:[%s22508_s12 + $0x6f8] ss:$24 sps:$4 sm:$0xff]  }
0x14a9   : > { %v15298_v25 = vadd.f32 %v15297_v33, %v13322_v29  ;;  %v15338_v52 = vpop.f32.mrb[88].mxu0  ;;  %v15299_v23 = vpop.f32.mrb[101].mxu1  ;;  %v21404_v29 = vld [vmem:[%s22508_s12 + $0x9f8] ss:$24 sps:$4 sm:$0xff]   ;;  %v21415_v33 = vld [vmem:[%s22508_s12 + $0x75c] ss:$24 sps:$4 sm:$0xff]  }
0x14aa   : > { %v15300_v38 = vadd.f32 %v15299_v23, %v13326_v17  ;;  %v15340_v43 = vpop.f32.mrb[89].mxu0  ;;  %15456 = vmatpush1.bf16.msra.mxu1 %v21359_v16  ;;  %v15301_v40 = vpop.f32.mrb[102].mxu1  ;;  %v21409_v16 = vld [vmem:[%s22508_s12 + $0x72c] ss:$24 sps:$4 sm:$0xff]  }
0x14ab   : > { %v24833_v48 = vadd.f32 %v15338_v52, %v15298_v25  ;;  %15497 = vmatpush1.bf16.msra.mxu0 %v21362_v42  ;;  %v15342_v2 = vpop.f32.mrb[90].mxu0  ;;  %v15302_v61 = vpop.f32.mrb[103].mxu1  ;;  %15457 = vmatprep.subr.bf16.mxu1 %v21367_v34  ;;  %v21412_v17 = vld [vmem:[%s22508_s12 + $0xa2c] ss:$24 sps:$4 sm:$0xff]   ;;  %v21407_v42 = vld [vmem:[%s22508_s12 + $0x728] ss:$24 sps:$4 sm:$0xff]  }
0x14ac   : > { %v24837_v20 = vadd.f32 %v15340_v43, %v15300_v38  ;;  %v15343_v21 = vpop.f32.mrb[91].mxu0  ;;  %15498 = vmatprep.subr.bf16.mxu0 %v21370_v5  ;;  %v21410_v34 = vld [vmem:[%s22508_s12 + $0xa28] ss:$24 sps:$4 sm:$0xff]   ;;  %v21418_v5 = vld [vmem:[%s22508_s12 + $0xa5c] ss:$24 sps:$4 sm:$0xff]  }
0x14ad   : > { %v21413_v25 = vld [vmem:[%s22508_s12 + $0x758] ss:$24 sps:$4 sm:$0xff]   ;;  %v21421_v23 = vld [vmem:[%s22508_s12 + $0x78c] ss:$24 sps:$4 sm:$0xff]   ;;  %v21419_v43 = vld [vmem:[%s22508_s12 + $0x788] ss:$24 sps:$4 sm:$0xff]  }
0x14ae   : > { %15458 = vmatpush1.bf16.msra.mxu1 %v21365_v63  ;;  %v21416_v52 = vld [vmem:[%s22508_s12 + $0xa58] ss:$24 sps:$4 sm:$0xff]   ;;  %v21424_v38 = vld [vmem:[%s22508_s12 + $0xa8c] ss:$24 sps:$4 sm:$0xff]   ;;  %v21422_v40 = vld [vmem:[%s22508_s12 + $0xa88] ss:$24 sps:$4 sm:$0xff]  }
0x14af   : > { %15499 = vmatpush1.bf16.msra.mxu0 %v21368_v12  ;;  %15509 = vmatprep.subr.bf16.mxu1 %v21373_v35  ;;  %v21427_v63 = vld [vmem:[%s22508_s12 + $0x7bc] ss:$24 sps:$4 sm:$0xff]   ;;  %v21425_v61 = vld [vmem:[%s22508_s12 + $0x7b8] ss:$24 sps:$4 sm:$0xff]   ;;  %v21433_v35 = vld [vmem:[%s22508_s12 + $0x7ec] ss:$24 sps:$4 sm:$0xff]  }
0x14b0   : > { %15550 = vmatprep.subr.bf16.mxu0 %v21376_v30  ;;  %v21430_v2 = vld [vmem:[%s22508_s12 + $0xabc] ss:$24 sps:$4 sm:$0xff]   ;;  %v21428_v12 = vld [vmem:[%s22508_s12 + $0xab8] ss:$24 sps:$4 sm:$0xff]   ;;  %v21436_v21 = vld [vmem:[%s22508_s12 + $0xaec] ss:$24 sps:$4 sm:$0xff]  }
0x14b1   : > { %15460 = vmatmul.mubr.bf16.vlgmr.msra.gmra.mrb[108].mxu1 %v24677_v47  ;;  %v21431_v30 = vld [vmem:[%s22508_s12 + $0x7e8] ss:$24 sps:$4 sm:$0xff]  }
0x14b2   : > { %15501 = vmatmul.mubr.bf16.vlgmr.msra.gmra.mrb[96].mxu0 %v24681_v44  ;;  %15510 = vmatpush1.bf16.msra.mxu1 %v21371_v32  ;;  %v21434_v32 = vld [vmem:[%s22508_s12 + $0xae8] ss:$24 sps:$4 sm:$0xff]  }
0x14b3   : > { %15541 = vmatprep.mubr.bf16.mxu1 %v24754_v58  ;;  %15551 = vmatpush1.bf16.msra.mxu0 %v21374_v19  ;;  %v21439_v19 = vld [vmem:[%s22508_s12 + $0x81c] ss:$24 sps:$4 sm:$0xff]  }
0x14b4   : > { %15582 = vmatprep.mubr.bf16.mxu0 %v24759_v36  ;;  %15511 = vmatprep.subr.bf16.mxu1 %v21379_v22  ;;  %v21442_v22 = vld [vmem:[%s22508_s12 + $0xb1c] ss:$24 sps:$4 sm:$0xff]  }
0x14b5   : > { %15552 = vmatprep.subr.bf16.mxu0 %v21382_v55  ;;  %v21437_v55 = vld [vmem:[%s22508_s12 + $0x818] ss:$24 sps:$4 sm:$0xff]  }
0x14b6   : > { %15512 = vmatpush1.bf16.msra.mxu1 %v21377_v3  ;;  %v21440_v3 = vld [vmem:[%s22508_s12 + $0xb18] ss:$24 sps:$4 sm:$0xff]  }
0x14b7   : > { %15553 = vmatpush1.bf16.msra.mxu0 %v21380_v49  ;;  %15513 = vmatprep.subr.bf16.mxu1 %v21385_v37  ;;  %v21445_v49 = vld [vmem:[%s22508_s12 + $0x84c] ss:$24 sps:$4 sm:$0xff]  }
0x14b8   : > { %15554 = vmatprep.subr.bf16.mxu0 %v21388_v28  ;;  %v21448_v37 = vld [vmem:[%s22508_s12 + $0xb4c] ss:$24 sps:$4 sm:$0xff]   ;;  %v21443_v28 = vld [vmem:[%s22508_s12 + $0x848] ss:$24 sps:$4 sm:$0xff]  }
0x14ba   : > { %15514 = vmatpush1.bf16.msra.mxu1 %v21383_v18  ;;  %v21446_v18 = vld [vmem:[%s22508_s12 + $0xb48] ss:$24 sps:$4 sm:$0xff]  }
0x14bb   : > { %15555 = vmatpush1.bf16.msra.mxu0 %v21386_v56  ;;  %15515 = vmatprep.subr.bf16.mxu1 %v21391_v7  ;;  %v21451_v56 = vld [vmem:[%s22508_s12 + $0x87c] ss:$24 sps:$4 sm:$0xff]  }
0x14bc   : > { %15556 = vmatprep.subr.bf16.mxu0 %v21394_v45  ;;  %v21454_v7 = vld [vmem:[%s22508_s12 + $0xb7c] ss:$24 sps:$4 sm:$0xff]   ;;  %v21449_v45 = vld [vmem:[%s22508_s12 + $0x878] ss:$24 sps:$4 sm:$0xff]  }
0x14be   : > { %15516 = vmatpush1.bf16.msra.mxu1 %v21389_v6  ;;  %v21452_v6 = vld [vmem:[%s22508_s12 + $0xb78] ss:$24 sps:$4 sm:$0xff]  }
0x14bf   : > { %15557 = vmatpush1.bf16.msra.mxu0 %v21392_v27  ;;  %15517 = vmatprep.subr.bf16.mxu1 %v21397_v14  ;;  %v21457_v27 = vld [vmem:[%s22508_s12 + $0x8ac] ss:$24 sps:$4 sm:$0xff]  }
0x14c0   : > { %15558 = vmatprep.subr.bf16.mxu0 %v21400_v51  ;;  %v21460_v14 = vld [vmem:[%s22508_s12 + $0xbac] ss:$24 sps:$4 sm:$0xff]   ;;  %v21455_v51 = vld [vmem:[%s22508_s12 + $0x8a8] ss:$24 sps:$4 sm:$0xff]  }
0x14c2   : > { %15518 = vmatpush1.bf16.msra.mxu1 %v21395_v60  ;;  %v21458_v60 = vld [vmem:[%s22508_s12 + $0xba8] ss:$24 sps:$4 sm:$0xff]  }
0x14c3   : > { %15559 = vmatpush1.bf16.msra.mxu0 %v21398_v62  ;;  %15519 = vmatprep.subr.bf16.mxu1 %v21403_v15  ;;  %v21463_v62 = vld [vmem:[%s22508_s12 + $0x8dc] ss:$24 sps:$4 sm:$0xff]  }
0x14c4   : > { %15560 = vmatprep.subr.bf16.mxu0 %v21406_v24  ;;  %v21466_v15 = vld [vmem:[%s22508_s12 + $0xbdc] ss:$24 sps:$4 sm:$0xff]   ;;  %v21461_v24 = vld [vmem:[%s22508_s12 + $0x8d8] ss:$24 sps:$4 sm:$0xff]  }
0x14c6   : > { %15520 = vmatpush1.bf16.msra.mxu1 %v21401_v11  ;;  %v21464_v11 = vld [vmem:[%s22508_s12 + $0xbd8] ss:$24 sps:$4 sm:$0xff]  }
0x14c7   : > { %15561 = vmatpush1.bf16.msra.mxu0 %v21404_v29  ;;  %15521 = vmatprep.subr.bf16.mxu1 %v21409_v16  ;;  %v21469_v29 = vld [vmem:[%s22508_s12 + $0x14] ss:$24 sps:$4 sm:$0xff]  }
0x14c8   : > { %15562 = vmatprep.subr.bf16.mxu0 %v21412_v17  ;;  %v21472_v16 = vld [vmem:[%s22508_s12 + $0x314] ss:$24 sps:$4 sm:$0xff]   ;;  %v21467_v17 = vld [vmem:[%s22508_s12 + $0x10] ss:$24 sps:$4 sm:$0xff]  }
0x14ca   : > { %15522 = vmatpush1.bf16.msra.mxu1 %v21407_v42  ;;  %v21470_v42 = vld [vmem:[%s22508_s12 + $0x310] ss:$24 sps:$4 sm:$0xff]  }
0x14cb   : > { %15563 = vmatpush1.bf16.msra.mxu0 %v21410_v34  ;;  %15523 = vmatprep.subr.bf16.mxu1 %v21415_v33  ;;  %v21475_v34 = vld [vmem:[%s22508_s12 + $0x44] ss:$24 sps:$4 sm:$0xff]  }
0x14cc   : > { %15564 = vmatprep.subr.bf16.mxu0 %v21418_v5  ;;  %v21478_v33 = vld [vmem:[%s22508_s12 + $0x344] ss:$24 sps:$4 sm:$0xff]   ;;  %v21473_v5 = vld [vmem:[%s22508_s12 + $0x40] ss:$24 sps:$4 sm:$0xff]  }
0x14ce   : > { %15524 = vmatpush1.bf16.msra.mxu1 %v21413_v25  ;;  %v21476_v25 = vld [vmem:[%s22508_s12 + $0x340] ss:$24 sps:$4 sm:$0xff]  }
0x14cf   : > { %15565 = vmatpush1.bf16.msra.mxu0 %v21416_v52  ;;  %15525 = vmatprep.subr.bf16.mxu1 %v21421_v23  ;;  %v21481_v52 = vld [vmem:[%s22508_s12 + $0x74] ss:$24 sps:$4 sm:$0xff]  }
0x14d0   : > { %15566 = vmatprep.subr.bf16.mxu0 %v21424_v38  ;;  %v21484_v23 = vld [vmem:[%s22508_s12 + $0x374] ss:$24 sps:$4 sm:$0xff]   ;;  %v21479_v38 = vld [vmem:[%s22508_s12 + $0x70] ss:$24 sps:$4 sm:$0xff]  }
0x14d2   : > { %15526 = vmatpush1.bf16.msra.mxu1 %v21419_v43  ;;  %v21482_v43 = vld [vmem:[%s22508_s12 + $0x370] ss:$24 sps:$4 sm:$0xff]  }
0x14d3   : > { %15567 = vmatpush1.bf16.msra.mxu0 %v21422_v40  ;;  %15527 = vmatprep.subr.bf16.mxu1 %v21427_v63  ;;  %v21490_v40 = vld [vmem:[%s22508_s12 + $0x3a4] ss:$24 sps:$4 sm:$0xff]   ;;  %v21488_v63 = vld [vmem:[%s22508_s12 + $0x3a0] ss:$24 sps:$4 sm:$0xff]  }
0x14d4   : > { %15568 = vmatprep.subr.bf16.mxu0 %v21430_v2  ;;  %v21493_v2 = vld [vmem:[%s22508_s12 + $0xd4] ss:$24 sps:$4 sm:$0xff]  }
0x14d6   : > { %15528 = vmatpush1.bf16.msra.mxu1 %v21425_v61  ;;  %v21496_v61 = vld [vmem:[%s22508_s12 + $0x3d4] ss:$24 sps:$4 sm:$0xff]  }
0x14d7   : > { %15569 = vmatpush1.bf16.msra.mxu0 %v21428_v12  ;;  %15529 = vmatprep.subr.bf16.mxu1 %v21433_v35  ;;  %v21491_v12 = vld [vmem:[%s22508_s12 + $0xd0] ss:$24 sps:$4 sm:$0xff]  }
0x14d8   : > { %15570 = vmatprep.subr.bf16.mxu0 %v21436_v21  ;;  %v21494_v35 = vld [vmem:[%s22508_s12 + $0x3d0] ss:$24 sps:$4 sm:$0xff]   ;;  %v21499_v21 = vld [vmem:[%s22508_s12 + $0x104] ss:$24 sps:$4 sm:$0xff]  }
0x14da   : > { %15530 = vmatpush1.bf16.msra.mxu1 %v21431_v30  ;;  %v21502_v30 = vld [vmem:[%s22508_s12 + $0x404] ss:$24 sps:$4 sm:$0xff]  }
0x14db   : > { %15571 = vmatpush1.bf16.msra.mxu0 %v21434_v32  ;;  %15531 = vmatprep.subr.bf16.mxu1 %v21439_v19  ;;  %v21497_v32 = vld [vmem:[%s22508_s12 + $0x100] ss:$24 sps:$4 sm:$0xff]  }
0x14dc   : > { %15572 = vmatprep.subr.bf16.mxu0 %v21442_v22  ;;  %v21500_v19 = vld [vmem:[%s22508_s12 + $0x400] ss:$24 sps:$4 sm:$0xff]   ;;  %v21505_v22 = vld [vmem:[%s22508_s12 + $0x134] ss:$24 sps:$4 sm:$0xff]  }
0x14de   : > { %15532 = vmatpush1.bf16.msra.mxu1 %v21437_v55  ;;  %v21508_v55 = vld [vmem:[%s22508_s12 + $0x434] ss:$24 sps:$4 sm:$0xff]  }
0x14df   : > { %15573 = vmatpush1.bf16.msra.mxu0 %v21440_v3  ;;  %15533 = vmatprep.subr.bf16.mxu1 %v21445_v49  ;;  %v21503_v3 = vld [vmem:[%s22508_s12 + $0x130] ss:$24 sps:$4 sm:$0xff]  }
0x14e0   : > { %15574 = vmatprep.subr.bf16.mxu0 %v21448_v37  ;;  %v21506_v49 = vld [vmem:[%s22508_s12 + $0x430] ss:$24 sps:$4 sm:$0xff]   ;;  %v21511_v37 = vld [vmem:[%s22508_s12 + $0x164] ss:$24 sps:$4 sm:$0xff]  }
0x14e2   : > { %15534 = vmatpush1.bf16.msra.mxu1 %v21443_v28  ;;  %v21514_v28 = vld [vmem:[%s22508_s12 + $0x464] ss:$24 sps:$4 sm:$0xff]  }
0x14e3   : > { %15575 = vmatpush1.bf16.msra.mxu0 %v21446_v18  ;;  %15535 = vmatprep.subr.bf16.mxu1 %v21451_v56  ;;  %v21509_v18 = vld [vmem:[%s22508_s12 + $0x160] ss:$24 sps:$4 sm:$0xff]  }
0x14e4   : > { %15576 = vmatprep.subr.bf16.mxu0 %v21454_v7  ;;  %v21512_v56 = vld [vmem:[%s22508_s12 + $0x460] ss:$24 sps:$4 sm:$0xff]   ;;  %v21517_v7 = vld [vmem:[%s22508_s12 + $0x194] ss:$24 sps:$4 sm:$0xff]  }
0x14e6   : > { %15536 = vmatpush1.bf16.msra.mxu1 %v21449_v45  ;;  %v21520_v45 = vld [vmem:[%s22508_s12 + $0x494] ss:$24 sps:$4 sm:$0xff]  }
0x14e7   : > { %15577 = vmatpush1.bf16.msra.mxu0 %v21452_v6  ;;  %15537 = vmatprep.subr.bf16.mxu1 %v21457_v27  ;;  %v21515_v6 = vld [vmem:[%s22508_s12 + $0x190] ss:$24 sps:$4 sm:$0xff]  }
0x14e8   : > { %15578 = vmatprep.subr.bf16.mxu0 %v21460_v14  ;;  %v21518_v27 = vld [vmem:[%s22508_s12 + $0x490] ss:$24 sps:$4 sm:$0xff]   ;;  %v21523_v14 = vld [vmem:[%s22508_s12 + $0x1c4] ss:$24 sps:$4 sm:$0xff]  }
0x14ea   : > { %15538 = vmatpush1.bf16.msra.mxu1 %v21455_v51  ;;  %v21526_v51 = vld [vmem:[%s22508_s12 + $0x4c4] ss:$24 sps:$4 sm:$0xff]  }
0x14eb   : > { %15579 = vmatpush1.bf16.msra.mxu0 %v21458_v60  ;;  %15539 = vmatprep.subr.bf16.mxu1 %v21463_v62  ;;  %v21521_v60 = vld [vmem:[%s22508_s12 + $0x1c0] ss:$24 sps:$4 sm:$0xff]  }
0x14ec   : > { %15580 = vmatprep.subr.bf16.mxu0 %v21466_v15  ;;  %v21524_v62 = vld [vmem:[%s22508_s12 + $0x4c0] ss:$24 sps:$4 sm:$0xff]   ;;  %v21529_v15 = vld [vmem:[%s22508_s12 + $0x1f4] ss:$24 sps:$4 sm:$0xff]  }
0x14ee   : > { %15540 = vmatpush1.bf16.msra.mxu1 %v21461_v24  ;;  %v21532_v24 = vld [vmem:[%s22508_s12 + $0x4f4] ss:$24 sps:$4 sm:$0xff]  }
0x14ef   : > { %15581 = vmatpush1.bf16.msra.mxu0 %v21464_v11  ;;  %15591 = vmatprep.subr.bf16.mxu1 %v21469_v29  ;;  %v21527_v11 = vld [vmem:[%s22508_s12 + $0x1f0] ss:$24 sps:$4 sm:$0xff]  }
0x14f0   : > { %15632 = vmatprep.subr.bf16.mxu0 %v21472_v16  ;;  %v21530_v29 = vld [vmem:[%s22508_s12 + $0x4f0] ss:$24 sps:$4 sm:$0xff]   ;;  %v21535_v16 = vld [vmem:[%s22508_s12 + $0x224] ss:$24 sps:$4 sm:$0xff]  }
0x14f1   : > { %15542 = vmatmul.mubr.bf16.vlgmr.msra.gmra.mrb[112].mxu1 %v24757_v53 }
0x14f2   : > { %15583 = vmatmul.mubr.bf16.vlgmr.msra.gmra.mrb[100].mxu0 %v24762_v10  ;;  %15592 = vmatpush1.bf16.msra.mxu1 %v21467_v17  ;;  %v21538_v17 = vld [vmem:[%s22508_s12 + $0x524] ss:$24 sps:$4 sm:$0xff]  }
0x14f3   : > { %15623 = vmatprep.mubr.bf16.mxu1 %v24625_v1  ;;  %15633 = vmatpush1.bf16.msra.mxu0 %v21470_v42  ;;  %v21487_v1 = vld [vmem:[%s22508_s12 + $0xa4] ss:$24 sps:$4 sm:$0xff]   ;;  %v21533_v42 = vld [vmem:[%s22508_s12 + $0x220] ss:$24 sps:$4 sm:$0xff]  }
0x14f4   : > { %15664 = vmatprep.mubr.bf16.mxu0 %v24628_v0  ;;  %15593 = vmatprep.subr.bf16.mxu1 %v21475_v34  ;;  %v21485_v0 = vld [vmem:[%s22508_s12 + $0xa0] ss:$24 sps:$4 sm:$0xff]  }
0x14f5   : > { %15634 = vmatprep.subr.bf16.mxu0 %v21478_v33  ;;  %v21536_v34 = vld [vmem:[%s22508_s12 + $0x520] ss:$24 sps:$4 sm:$0xff]   ;;  %v21541_v33 = vld [vmem:[%s22508_s12 + $0x254] ss:$24 sps:$4 sm:$0xff]  }
0x14f6   : > { %15594 = vmatpush1.bf16.msra.mxu1 %v21473_v5  ;;  %v21544_v5 = vld [vmem:[%s22508_s12 + $0x554] ss:$24 sps:$4 sm:$0xff]  }
0x14f7   : > { %15635 = vmatpush1.bf16.msra.mxu0 %v21476_v25  ;;  %15595 = vmatprep.subr.bf16.mxu1 %v21481_v52  ;;  %v21539_v25 = vld [vmem:[%s22508_s12 + $0x250] ss:$24 sps:$4 sm:$0xff]  }
0x14f8   : > { %15636 = vmatprep.subr.bf16.mxu0 %v21484_v23  ;;  %v21542_v52 = vld [vmem:[%s22508_s12 + $0x550] ss:$24 sps:$4 sm:$0xff]   ;;  %v21547_v23 = vld [vmem:[%s22508_s12 + $0x284] ss:$24 sps:$4 sm:$0xff]  }
0x14fa   : > { %15596 = vmatpush1.bf16.msra.mxu1 %v21479_v38  ;;  %v21550_v38 = vld [vmem:[%s22508_s12 + $0x584] ss:$24 sps:$4 sm:$0xff]  }
0x14fb   : > { %15637 = vmatpush1.bf16.msra.mxu0 %v21482_v43  ;;  %15597 = vmatprep.subr.bf16.mxu1 %v21487_v1  ;;  %v21545_v43 = vld [vmem:[%s22508_s12 + $0x280] ss:$24 sps:$4 sm:$0xff]  }
0x14fc   : > { %15638 = vmatprep.subr.bf16.mxu0 %v21490_v40  ;;  %v21548_v1 = vld [vmem:[%s22508_s12 + $0x580] ss:$24 sps:$4 sm:$0xff]   ;;  %v21553_v40 = vld [vmem:[%s22508_s12 + $0x2b4] ss:$24 sps:$4 sm:$0xff]  }
0x14fe   : > { %15598 = vmatpush1.bf16.msra.mxu1 %v21485_v0  ;;  %v21556_v0 = vld [vmem:[%s22508_s12 + $0x5b4] ss:$24 sps:$4 sm:$0xff]  }
0x14ff   : > { %15639 = vmatpush1.bf16.msra.mxu0 %v21488_v63  ;;  %15599 = vmatprep.subr.bf16.mxu1 %v21493_v2  ;;  %v21551_v63 = vld [vmem:[%s22508_s12 + $0x2b0] ss:$24 sps:$4 sm:$0xff]  }
0x1500   : > { %15640 = vmatprep.subr.bf16.mxu0 %v21496_v61  ;;  %v21554_v2 = vld [vmem:[%s22508_s12 + $0x5b0] ss:$24 sps:$4 sm:$0xff]   ;;  %v21559_v61 = vld [vmem:[%s22508_s12 + $0x2e4] ss:$24 sps:$4 sm:$0xff]  }
0x1502   : > { %15600 = vmatpush1.bf16.msra.mxu1 %v21491_v12  ;;  %v21562_v12 = vld [vmem:[%s22508_s12 + $0x5e4] ss:$24 sps:$4 sm:$0xff]  }
0x1503   : > { %15641 = vmatpush1.bf16.msra.mxu0 %v21494_v35  ;;  %15601 = vmatprep.subr.bf16.mxu1 %v21499_v21  ;;  %v21557_v35 = vld [vmem:[%s22508_s12 + $0x2e0] ss:$24 sps:$4 sm:$0xff]  }
0x1504   : > { %15642 = vmatprep.subr.bf16.mxu0 %v21502_v30  ;;  %v21560_v21 = vld [vmem:[%s22508_s12 + $0x5e0] ss:$24 sps:$4 sm:$0xff]   ;;  %v21565_v30 = vld [vmem:[%s22508_s12 + $0x614] ss:$24 sps:$4 sm:$0xff]  }
0x1506   : > { %15602 = vmatpush1.bf16.msra.mxu1 %v21497_v32  ;;  %v21568_v32 = vld [vmem:[%s22508_s12 + $0x914] ss:$24 sps:$4 sm:$0xff]  }
0x1507   : > { %15643 = vmatpush1.bf16.msra.mxu0 %v21500_v19  ;;  %15603 = vmatprep.subr.bf16.mxu1 %v21505_v22  ;;  %v21563_v19 = vld [vmem:[%s22508_s12 + $0x610] ss:$24 sps:$4 sm:$0xff]  }
0x1508   : > { %15644 = vmatprep.subr.bf16.mxu0 %v21508_v55  ;;  %v21566_v22 = vld [vmem:[%s22508_s12 + $0x910] ss:$24 sps:$4 sm:$0xff]   ;;  %v21571_v55 = vld [vmem:[%s22508_s12 + $0x644] ss:$24 sps:$4 sm:$0xff]  }
0x150a   : > { %15604 = vmatpush1.bf16.msra.mxu1 %v21503_v3  ;;  %v21574_v3 = vld [vmem:[%s22508_s12 + $0x944] ss:$24 sps:$4 sm:$0xff]  }
0x150b   : > { %15645 = vmatpush1.bf16.msra.mxu0 %v21506_v49  ;;  %15605 = vmatprep.subr.bf16.mxu1 %v21511_v37  ;;  %v21569_v49 = vld [vmem:[%s22508_s12 + $0x640] ss:$24 sps:$4 sm:$0xff]  }
0x150c   : > { %15646 = vmatprep.subr.bf16.mxu0 %v21514_v28  ;;  %v21572_v37 = vld [vmem:[%s22508_s12 + $0x940] ss:$24 sps:$4 sm:$0xff]   ;;  %v21577_v28 = vld [vmem:[%s22508_s12 + $0x674] ss:$24 sps:$4 sm:$0xff]  }
0x150e   : > { %15606 = vmatpush1.bf16.msra.mxu1 %v21509_v18  ;;  %v21578_v18 = vld [vmem:[%s22508_s12 + $0x970] ss:$24 sps:$4 sm:$0xff]  }
0x150f   : > { %15647 = vmatpush1.bf16.msra.mxu0 %v21512_v56  ;;  %15607 = vmatprep.subr.bf16.mxu1 %v21517_v7  ;;  %v21586_v56 = vld [vmem:[%s22508_s12 + $0x9a4] ss:$24 sps:$4 sm:$0xff]   ;;  %v21584_v7 = vld [vmem:[%s22508_s12 + $0x9a0] ss:$24 sps:$4 sm:$0xff]  }
0x1510   : > { %15648 = vmatprep.subr.bf16.mxu0 %v21520_v45  ;;  %v21589_v45 = vld [vmem:[%s22508_s12 + $0x6d4] ss:$24 sps:$4 sm:$0xff]  }
0x1512   : > { %15608 = vmatpush1.bf16.msra.mxu1 %v21515_v6  ;;  %v21592_v6 = vld [vmem:[%s22508_s12 + $0x9d4] ss:$24 sps:$4 sm:$0xff]  }
0x1513   : > { %15649 = vmatpush1.bf16.msra.mxu0 %v21518_v27  ;;  %15609 = vmatprep.subr.bf16.mxu1 %v21523_v14  ;;  %v21587_v27 = vld [vmem:[%s22508_s12 + $0x6d0] ss:$24 sps:$4 sm:$0xff]  }
0x1514   : > { %15650 = vmatprep.subr.bf16.mxu0 %v21526_v51  ;;  %v21590_v14 = vld [vmem:[%s22508_s12 + $0x9d0] ss:$24 sps:$4 sm:$0xff]   ;;  %v21595_v51 = vld [vmem:[%s22508_s12 + $0x704] ss:$24 sps:$4 sm:$0xff]  }
0x1516   : > { %15610 = vmatpush1.bf16.msra.mxu1 %v21521_v60  ;;  %v21598_v60 = vld [vmem:[%s22508_s12 + $0xa04] ss:$24 sps:$4 sm:$0xff]  }
0x1517   : > { %15651 = vmatpush1.bf16.msra.mxu0 %v21524_v62  ;;  %15611 = vmatprep.subr.bf16.mxu1 %v21529_v15  ;;  %v21593_v62 = vld [vmem:[%s22508_s12 + $0x700] ss:$24 sps:$4 sm:$0xff]  }
0x1518   : > { %15652 = vmatprep.subr.bf16.mxu0 %v21532_v24  ;;  %v21596_v15 = vld [vmem:[%s22508_s12 + $0xa00] ss:$24 sps:$4 sm:$0xff]   ;;  %v21601_v24 = vld [vmem:[%s22508_s12 + $0x734] ss:$24 sps:$4 sm:$0xff]  }
0x151a   : > { %15612 = vmatpush1.bf16.msra.mxu1 %v21527_v11 }
0x151b   : > { %15653 = vmatpush1.bf16.msra.mxu0 %v21530_v29  ;;  %15613 = vmatprep.subr.bf16.mxu1 %v21535_v16  ;;  %v21604_v29 = vld [vmem:[%s22508_s12 + $0xa34] ss:$24 sps:$4 sm:$0xff]  }
0x151c   : > { %15654 = vmatprep.subr.bf16.mxu0 %v21538_v17 }
0x151e   : > { %15614 = vmatpush1.bf16.msra.mxu1 %v21533_v42 }
0x151f   : > { %15655 = vmatpush1.bf16.msra.mxu0 %v21536_v34  ;;  %15615 = vmatprep.subr.bf16.mxu1 %v21541_v33 }
0x1520   : > { %15656 = vmatprep.subr.bf16.mxu0 %v21544_v5 }
0x1522   : > { %15616 = vmatpush1.bf16.msra.mxu1 %v21539_v25  ;;  %v21599_v25 = vld [vmem:[%s22508_s12 + $0x730] ss:$24 sps:$4 sm:$0xff]  }
0x1523   : > { %15657 = vmatpush1.bf16.msra.mxu0 %v21542_v52  ;;  %15617 = vmatprep.subr.bf16.mxu1 %v21547_v23 }
0x1524   : > { %15658 = vmatprep.subr.bf16.mxu0 %v21550_v38 }
0x1526   : > { %15618 = vmatpush1.bf16.msra.mxu1 %v21545_v43  ;;  %v21607_v43 = vld [vmem:[%s22508_s12 + $0x764] ss:$24 sps:$4 sm:$0xff]  }
0x1527   : > { %15659 = vmatpush1.bf16.msra.mxu0 %v21548_v1  ;;  %15619 = vmatprep.subr.bf16.mxu1 %v21553_v40  ;;  %v21610_v40 = vld [vmem:[%s22508_s12 + $0xa64] ss:$24 sps:$4 sm:$0xff]  }
0x1528   : > { %15660 = vmatprep.subr.bf16.mxu0 %v21556_v0  ;;  %v21605_v0 = vld [vmem:[%s22508_s12 + $0x760] ss:$24 sps:$4 sm:$0xff]  }
0x152a   : > { %15620 = vmatpush1.bf16.msra.mxu1 %v21551_v63  ;;  %v21608_v63 = vld [vmem:[%s22508_s12 + $0xa60] ss:$24 sps:$4 sm:$0xff]  }
0x152b   : > { %15661 = vmatpush1.bf16.msra.mxu0 %v21554_v2  ;;  %15621 = vmatprep.subr.bf16.mxu1 %v21559_v61  ;;  %v21613_v2 = vld [vmem:[%s22508_s12 + $0x794] ss:$24 sps:$4 sm:$0xff]  }
0x152c   : > { %15662 = vmatprep.subr.bf16.mxu0 %v21562_v12  ;;  %v21616_v61 = vld [vmem:[%s22508_s12 + $0xa94] ss:$24 sps:$4 sm:$0xff]   ;;  %v21611_v12 = vld [vmem:[%s22508_s12 + $0x790] ss:$24 sps:$4 sm:$0xff]  }
0x152e   : > { %15622 = vmatpush1.bf16.msra.mxu1 %v21557_v35  ;;  %v21614_v35 = vld [vmem:[%s22508_s12 + $0xa90] ss:$24 sps:$4 sm:$0xff]  }
0x152f   : > { %15663 = vmatpush1.bf16.msra.mxu0 %v21560_v21  ;;  %15673 = vmatprep.subr.bf16.mxu1 %v21565_v30  ;;  %v21619_v21 = vld [vmem:[%s22508_s12 + $0x7c4] ss:$24 sps:$4 sm:$0xff]  }
0x1530   : > { %15714 = vmatprep.subr.bf16.mxu0 %v21568_v32  ;;  %v21622_v30 = vld [vmem:[%s22508_s12 + $0xac4] ss:$24 sps:$4 sm:$0xff]   ;;  %v21617_v32 = vld [vmem:[%s22508_s12 + $0x7c0] ss:$24 sps:$4 sm:$0xff]  }
0x1531   : > { %15624 = vmatmul.mubr.bf16.vlgmr.msra.gmra.mrb[116].mxu1 %v24677_v47  ;;  %v21580_v47 = vld [vmem:[%s22508_s12 + $0x974] ss:$24 sps:$4 sm:$0xff]  }
0x1532   : > { %15665 = vmatmul.mubr.bf16.vlgmr.msra.gmra.mrb[104].mxu0 %v24681_v44  ;;  %15674 = vmatpush1.bf16.msra.mxu1 %v21563_v19  ;;  %v21575_v44 = vld [vmem:[%s22508_s12 + $0x670] ss:$24 sps:$4 sm:$0xff]   ;;  %v21620_v19 = vld [vmem:[%s22508_s12 + $0xac0] ss:$24 sps:$4 sm:$0xff]  }
0x1533   : > { %15705 = vmatprep.mubr.bf16.mxu1 %v24754_v58  ;;  %15715 = vmatpush1.bf16.msra.mxu0 %v21566_v22  ;;  %v21583_v58 = vld [vmem:[%s22508_s12 + $0x6a4] ss:$24 sps:$4 sm:$0xff]   ;;  %v21625_v22 = vld [vmem:[%s22508_s12 + $0x7f4] ss:$24 sps:$4 sm:$0xff]  }
0x1534   : > { %15746 = vmatprep.mubr.bf16.mxu0 %v24759_v36  ;;  %15675 = vmatprep.subr.bf16.mxu1 %v21571_v55  ;;  %v21581_v36 = vld [vmem:[%s22508_s12 + $0x6a0] ss:$24 sps:$4 sm:$0xff]   ;;  %v21628_v55 = vld [vmem:[%s22508_s12 + $0xaf4] ss:$24 sps:$4 sm:$0xff]  }
0x1535   : > { %15716 = vmatprep.subr.bf16.mxu0 %v21574_v3  ;;  %v21623_v3 = vld [vmem:[%s22508_s12 + $0x7f0] ss:$24 sps:$4 sm:$0xff]  }
0x1536   : > { %15676 = vmatpush1.bf16.msra.mxu1 %v21569_v49  ;;  %v21626_v49 = vld [vmem:[%s22508_s12 + $0xaf0] ss:$24 sps:$4 sm:$0xff]  }
0x1537   : > { %15717 = vmatpush1.bf16.msra.mxu0 %v21572_v37  ;;  %15677 = vmatprep.subr.bf16.mxu1 %v21577_v28  ;;  %v21631_v37 = vld [vmem:[%s22508_s12 + $0x824] ss:$24 sps:$4 sm:$0xff]  }
0x1538   : > { %15718 = vmatprep.subr.bf16.mxu0 %v21580_v47  ;;  %v21634_v28 = vld [vmem:[%s22508_s12 + $0xb24] ss:$24 sps:$4 sm:$0xff]   ;;  %v21629_v47 = vld [vmem:[%s22508_s12 + $0x820] ss:$24 sps:$4 sm:$0xff]  }
0x153a   : > { %15678 = vmatpush1.bf16.msra.mxu1 %v21575_v44  ;;  %v21632_v44 = vld [vmem:[%s22508_s12 + $0xb20] ss:$24 sps:$4 sm:$0xff]  }
0x153b   : > { %15719 = vmatpush1.bf16.msra.mxu0 %v21578_v18  ;;  %15679 = vmatprep.subr.bf16.mxu1 %v21583_v58  ;;  %v21637_v18 = vld [vmem:[%s22508_s12 + $0x854] ss:$24 sps:$4 sm:$0xff]  }
0x153c   : > { %15720 = vmatprep.subr.bf16.mxu0 %v21586_v56  ;;  %v21640_v58 = vld [vmem:[%s22508_s12 + $0xb54] ss:$24 sps:$4 sm:$0xff]   ;;  %v21635_v56 = vld [vmem:[%s22508_s12 + $0x850] ss:$24 sps:$4 sm:$0xff]  }
0x153e   : > { %15680 = vmatpush1.bf16.msra.mxu1 %v21581_v36  ;;  %v21638_v36 = vld [vmem:[%s22508_s12 + $0xb50] ss:$24 sps:$4 sm:$0xff]  }
0x153f   : > { %15721 = vmatpush1.bf16.msra.mxu0 %v21584_v7  ;;  %15681 = vmatprep.subr.bf16.mxu1 %v21589_v45  ;;  %v21643_v7 = vld [vmem:[%s22508_s12 + $0x884] ss:$24 sps:$4 sm:$0xff]  }
0x1540   : > { %15722 = vmatprep.subr.bf16.mxu0 %v21592_v6  ;;  %v21646_v45 = vld [vmem:[%s22508_s12 + $0xb84] ss:$24 sps:$4 sm:$0xff]   ;;  %v21641_v6 = vld [vmem:[%s22508_s12 + $0x880] ss:$24 sps:$4 sm:$0xff]  }
0x1542   : > { %15682 = vmatpush1.bf16.msra.mxu1 %v21587_v27  ;;  %v21644_v27 = vld [vmem:[%s22508_s12 + $0xb80] ss:$24 sps:$4 sm:$0xff]  }
0x1543   : > { %15723 = vmatpush1.bf16.msra.mxu0 %v21590_v14  ;;  %15683 = vmatprep.subr.bf16.mxu1 %v21595_v51  ;;  %v21649_v14 = vld [vmem:[%s22508_s12 + $0x8b4] ss:$24 sps:$4 sm:$0xff]  }
0x1544   : > { %v15379_v11 = vpop.f32.mrb[104].mxu1  ;;  %15724 = vmatprep.subr.bf16.mxu0 %v21598_v60  ;;  %v21652_v51 = vld [vmem:[%s22508_s12 + $0xbb4] ss:$24 sps:$4 sm:$0xff]   ;;  %v21647_v60 = vld [vmem:[%s22508_s12 + $0x8b0] ss:$24 sps:$4 sm:$0xff]  }
0x1545   : > { %v15380_v16 = vadd.f32 %v15379_v11, %v24833_v48  ;;  %v15420_v17 = vpop.f32.mrb[92].mxu0  ;;  %v15381_v42 = vpop.f32.mrb[105].mxu1  ;;  %v21602_v48 = vld [vmem:[%s22508_s12 + $0xa30] ss:$24 sps:$4 sm:$0xff]   ;;  %v21653_v11 = vld [vmem:[%s22508_s12 + $0x8e0] ss:$24 sps:$4 sm:$0xff]  }
0x1546   : > { %v15382_v34 = vadd.f32 %v15381_v42, %v24837_v20  ;;  %v15422_v33 = vpop.f32.mrb[93].mxu0  ;;  %15684 = vmatpush1.bf16.msra.mxu1 %v21593_v62  ;;  %v15383_v5 = vpop.f32.mrb[106].mxu1  ;;  %v21650_v62 = vld [vmem:[%s22508_s12 + $0xbb0] ss:$24 sps:$4 sm:$0xff]   ;;  %v21694_v42 = vld [vmem:[%s22510_s15 + $0x58] sm:$0xff] }
0x1547   : > { %v25007_v52 = vadd.f32 %v15420_v17, %v15380_v16  ;;  %15725 = vmatpush1.bf16.msra.mxu0 %v21596_v15  ;;  %v15424_v23 = vpop.f32.mrb[94].mxu0  ;;  %v15384_v38 = vpop.f32.mrb[107].mxu1  ;;  %15685 = vmatprep.subr.bf16.mxu1 %v21601_v24  ;;  %v21655_v15 = vld [vmem:[%s22508_s12 + $0x8e4] ss:$24 sps:$4 sm:$0xff]   ;;  %v21693_v16 = vld [vmem:[%s22510_s15 + $0x50] sm:$0xff] }
0x1548   : > { %v25011_v1 = vadd.f32 %v15422_v33, %v15382_v34  ;;  %v15425_v20 = vpop.f32.mrb[95].mxu0  ;;  %15726 = vmatprep.subr.bf16.mxu0 %v21604_v29  ;;  %v21658_v24 = vld [vmem:[%s22508_s12 + $0xbe4] ss:$24 sps:$4 sm:$0xff]   ;;  %v21656_v29 = vld [vmem:[%s22508_s12 + $0xbe0] ss:$24 sps:$4 sm:$0xff]   ;;  %v13330_v17 = vrot.slane %v21693_v16, %v23378_v9  ;;  %v13334_v34 = vrot.slane %v21694_v42, %v23378_v9 }
0x154a   : > { %15686 = vmatpush1.bf16.msra.mxu1 %v21599_v25 }
0x154b   : > { %15727 = vmatpush1.bf16.msra.mxu0 %v21602_v48  ;;  %15687 = vmatprep.subr.bf16.mxu1 %v21607_v43 }
0x154c   : > { %15728 = vmatprep.subr.bf16.mxu0 %v21610_v40 }
0x154e   : > { %15688 = vmatpush1.bf16.msra.mxu1 %v21605_v0 }
0x154f   : > { %15729 = vmatpush1.bf16.msra.mxu0 %v21608_v63  ;;  %15689 = vmatprep.subr.bf16.mxu1 %v21613_v2 }
0x1550   : > { %15730 = vmatprep.subr.bf16.mxu0 %v21616_v61 }
0x1552   : > { %15690 = vmatpush1.bf16.msra.mxu1 %v21611_v12 }
0x1553   : > { %15731 = vmatpush1.bf16.msra.mxu0 %v21614_v35  ;;  %15691 = vmatprep.subr.bf16.mxu1 %v21619_v21 }
0x1554   : > { %15732 = vmatprep.subr.bf16.mxu0 %v21622_v30 }
0x1556   : > { %15692 = vmatpush1.bf16.msra.mxu1 %v21617_v32 }
0x1557   : > { %15733 = vmatpush1.bf16.msra.mxu0 %v21620_v19  ;;  %15693 = vmatprep.subr.bf16.mxu1 %v21625_v22 }
0x1558   : > { %15734 = vmatprep.subr.bf16.mxu0 %v21628_v55 }
0x155a   : > { %15694 = vmatpush1.bf16.msra.mxu1 %v21623_v3 }
0x155b   : > { %15735 = vmatpush1.bf16.msra.mxu0 %v21626_v49  ;;  %15695 = vmatprep.subr.bf16.mxu1 %v21631_v37  ;;  %v21695_v49 = vld [vmem:[%s22510_s15 + $0x60] sm:$0xff] }
0x155c   : > { %15736 = vmatprep.subr.bf16.mxu0 %v21634_v28  ;;  %v13338_v37 = vrot.slane %v21695_v49, %v23378_v9  ;;  %v21696_v28 = vld [vmem:[%s22510_s15 + $0x68] sm:$0xff] }
0x155e   : > { %15696 = vmatpush1.bf16.msra.mxu1 %v21629_v47  ;;  %v13342_v47 = vrot.slane %v21696_v28, %v23378_v9 }
0x155f   : > { %15737 = vmatpush1.bf16.msra.mxu0 %v21632_v44  ;;  %15697 = vmatprep.subr.bf16.mxu1 %v21637_v18 }
0x1560   : > { %15738 = vmatprep.subr.bf16.mxu0 %v21640_v58 }
0x1562   : > { %15698 = vmatpush1.bf16.msra.mxu1 %v21635_v56 }
0x1563   : > { %15739 = vmatpush1.bf16.msra.mxu0 %v21638_v36  ;;  %15699 = vmatprep.subr.bf16.mxu1 %v21643_v7 }
0x1564   : > { %15740 = vmatprep.subr.bf16.mxu0 %v21646_v45 }
0x1566   : > { %15700 = vmatpush1.bf16.msra.mxu1 %v21641_v6 }
0x1567   : > { %15741 = vmatpush1.bf16.msra.mxu0 %v21644_v27  ;;  %15701 = vmatprep.subr.bf16.mxu1 %v21649_v14 }
0x1568   : > { %15742 = vmatprep.subr.bf16.mxu0 %v21652_v51 }
0x156a   : > { %15702 = vmatpush1.bf16.msra.mxu1 %v21647_v60 }
0x156b   : > { %15743 = vmatpush1.bf16.msra.mxu0 %v21650_v62  ;;  %15703 = vmatprep.subr.bf16.mxu1 %v21655_v15  ;;  %v15755_v62 = vadd.f32 %v25007_v52, %v24209_v57  ;;  %v15756_v15 = vadd.f32 %v25011_v1, %v24207_v8 }
0x156c   : > { %15744 = vmatprep.subr.bf16.mxu0 %v21658_v24 }
0x156e   : > { %15704 = vmatpush1.bf16.msra.mxu1 %v21653_v11  ;;  %v15761_v11 = vadd.f32 %v15756_v15, %v15755_v62 }
0x156f   : > { %15745 = vmatpush1.bf16.msra.mxu0 %v21656_v29 }
0x1571   : > { %15706 = vmatmul.mubr.bf16.vlgmr.msra.gmra.mrb[120].mxu1 %v24757_v53 }
0x1572   : > { %15747 = vmatmul.mubr.bf16.vlgmr.msra.gmra.mrb[108].mxu0 %v24762_v10 }
0x1584   : > { %v15461_v33 = vpop.f32.mrb[108].mxu1 }
0x1585   : > { %v15462_v5 = vadd.f32 %v15461_v33, %v13330_v17  ;;  %v15502_v25 = vpop.f32.mrb[96].mxu0  ;;  %v15463_v23 = vpop.f32.mrb[109].mxu1 }
0x1586   : > { %v15464_v38 = vadd.f32 %v15463_v23, %v13334_v34  ;;  %v15504_v48 = vpop.f32.mrb[97].mxu0  ;;  %v15465_v43 = vpop.f32.mrb[110].mxu1 }
0x1587   : > { %v15503_v20 = vadd.f32 %v15502_v25, %v15462_v5  ;;  %v15506_v40 = vpop.f32.mrb[98].mxu0  ;;  %v15466_v0 = vpop.f32.mrb[111].mxu1 }
0x1588   : > { %v15505_v53 = vadd.f32 %v15504_v48, %v15464_v38  ;;  %v15507_v10 = vpop.f32.mrb[99].mxu0 }
0x15c4   : > { %v15543_v63 = vpop.f32.mrb[112].mxu1 }
0x15c5   : > { %v15544_v2 = vadd.f32 %v15543_v63, %v15503_v20  ;;  %v15584_v61 = vpop.f32.mrb[100].mxu0  ;;  %v15545_v12 = vpop.f32.mrb[113].mxu1 }
0x15c6   : > { %v15546_v35 = vadd.f32 %v15545_v12, %v15505_v53  ;;  %v15586_v21 = vpop.f32.mrb[101].mxu0  ;;  %v15547_v30 = vpop.f32.mrb[114].mxu1 }
0x15c7   : > { %v15585_v32 = vadd.f32 %v15584_v61, %v15544_v2  ;;  %v15588_v19 = vpop.f32.mrb[102].mxu0  ;;  %v15548_v22 = vpop.f32.mrb[115].mxu1 }
0x15c8   : > { %v15587_v55 = vadd.f32 %v15586_v21, %v15546_v35  ;;  %v15589_v3 = vpop.f32.mrb[103].mxu0 }
0x15c9   : > { %v15757_v24 = vadd.f32 %v15585_v32, %v24212_v54 }
0x15ca   : > { %v15758_v17 = vadd.f32 %v15587_v55, %v24214_v31 }
0x15cb   : > { %v15762_v16 = vadd.f32 %v15761_v11, %v15757_v24 }
0x15cd   : > { %v15763_v20 = vadd.f32 %v15762_v16, %v15758_v17 }
0x1604   : > { %v15625_v44 = vpop.f32.mrb[116].mxu1 }
0x1605   : > { %v15626_v18 = vadd.f32 %v15625_v44, %v13338_v37  ;;  %v15666_v58 = vpop.f32.mrb[104].mxu0  ;;  %v15627_v56 = vpop.f32.mrb[117].mxu1  ;;  %v25067_v44 = vsub.s32 6, %v23212_v46 }
0x1606   : > { %v15628_v36 = vadd.f32 %v15627_v56, %v13342_v47  ;;  %v15668_v7 = vpop.f32.mrb[105].mxu0  ;;  %v15629_v45 = vpop.f32.mrb[118].mxu1 }
0x1607   : > { %v15667_v6 = vadd.f32 %v15666_v58, %v15626_v18  ;;  %v15670_v27 = vpop.f32.mrb[106].mxu0  ;;  %v15630_v14 = vpop.f32.mrb[119].mxu1  ;;  %v25070_v18 = vsub.s32 7, %v23212_v46  ;;  %v21697_v58 = vld [vmem:[%s22510_s15] sm:$0xff] }
0x1608   : > { %v15669_v51 = vadd.f32 %v15668_v7, %v15628_v36  ;;  %v15671_v60 = vpop.f32.mrb[107].mxu0  ;;  %v15800_v56 = vrot.slane %v21697_v58, %v25067_v44  ;;  %v21698_v7 = vld [vmem:[%s22510_s15 + $0x8] sm:$0xff]  ;;  %v21699_v27 = vld [vmem:[%s22510_s15 + $0x10] sm:$0xff] }
0x1609   : > { %v15830_v36 = vrot.slane %v21697_v58, %v25070_v18  ;;  %v15804_v45 = vrot.slane %v21698_v7, %v25067_v44  ;;  %v15808_v14 = vrot.slane %v21699_v27, %v25067_v44  ;;  %v15838_v46 = vrot.slane %v21699_v27, %v25070_v18 }
0x1644   : > { %v15707_v29 = vpop.f32.mrb[120].mxu1 }
0x1645   : > { %v15708_v42 = vadd.f32 %v15707_v29, %v15667_v6  ;;  %v15748_v34 = vpop.f32.mrb[108].mxu0  ;;  %v15709_v33 = vpop.f32.mrb[121].mxu1  ;;  %v15834_v6 = vrot.slane %v21698_v7, %v25070_v18  ;;  %v21702_v29 = vld [vmem:[%s22510_s15 + $0x28] sm:$0xff] }
0x1646   : > { %v15710_v5 = vadd.f32 %v15709_v33, %v15669_v51  ;;  %v15750_v25 = vpop.f32.mrb[109].mxu0  ;;  %v15711_v23 = vpop.f32.mrb[122].mxu1  ;;  %v21700_v51 = vld [vmem:[%s22510_s15 + $0x18] sm:$0xff]  ;;  %v15820_v16 = vrot.slane %v21702_v29, %v25067_v44 }
0x1647   : > { %v15749_v38 = vadd.f32 %v15748_v34, %v15708_v42  ;;  %v15752_v48 = vpop.f32.mrb[110].mxu0  ;;  %v15712_v43 = vpop.f32.mrb[123].mxu1  ;;  %v15812_v60 = vrot.slane %v21700_v51, %v25067_v44 }
0x1648   : > { %v15751_v57 = vadd.f32 %v15750_v25, %v15710_v5  ;;  %v15753_v52 = vpop.f32.mrb[111].mxu0  ;;  %v15850_v25 = vrot.slane %v21702_v29, %v25070_v18 }
0x1649   : > { %v15759_v8 = vadd.f32 %v15749_v38, %v24242_v4 }
0x164a   : > { %v15760_v54 = vadd.f32 %v15751_v57, %v24219_v13 }
0x164b   : > { %v15764_v1 = vadd.f32 %v15763_v20, %v15759_v8 }
0x164d   : > { %v15765_v40 = vadd.f32 %v15764_v1, %v15760_v54 }
0x164f   : > { %15766 = vadd.xlane.f32.xlu1 %v15765_v40 }
0x16dc   : > { %v15767_v31 = vpop.xlane.xlu1 %15766 }
0x16dd   : > { %v15768_v0 = vmul.f32 0.0013020834, %v15767_v31 }
0x16df   : > { %v15769_v53 = vsub.f32 %v15755_v62, %v15768_v0  ;;  %v15770_v10 = vsub.f32 %v15756_v15, %v15768_v0  ;;  %v15771_v63 = vsub.f32 %v15757_v24, %v15768_v0  ;;  %v15772_v2 = vsub.f32 %v15758_v17, %v15768_v0  ;;  %v21701_v24 = vld [vmem:[%s22510_s15 + $0x20] sm:$0xff] }
0x16e0   : > { %v15773_v35 = vsub.f32 %v15759_v8, %v15768_v0  ;;  %v15774_v32 = vsub.f32 %v15760_v54, %v15768_v0  ;;  %v15842_v15 = vrot.slane %v21700_v51, %v25070_v18  ;;  %v15816_v11 = vrot.slane %v21701_v24, %v25067_v44 }
0x16e1   : > { %v15775_v61 = vmul.f32 %v15769_v53, %v15769_v53  ;;  %v15776_v12 = vmul.f32 %v15770_v10, %v15770_v10  ;;  %v15777_v21 = vmul.f32 %v15771_v63, %v15771_v63  ;;  %v15778_v19 = vmul.f32 %v15772_v2, %v15772_v2 }
0x16e2   : > { %v15779_v13 = vmul.f32 %v15773_v35, %v15773_v35  ;;  %v15780_v55 = vmul.f32 %v15774_v32, %v15774_v32  ;;  %v15846_v5 = vrot.slane %v21701_v24, %v25070_v18 }
0x16e3   : > { %v15781_v30 = vadd.f32 %v15776_v12, %v15775_v61 }
0x16e5   : > { %v15782_v4 = vadd.f32 %v15781_v30, %v15777_v21 }
0x16e7   : > { %v15783_v22 = vadd.f32 %v15782_v4, %v15778_v19 }
0x16e9   : > { %v15784_v3 = vadd.f32 %v15783_v22, %v15779_v13 }
0x16eb   : > { %v15785_v49 = vadd.f32 %v15784_v3, %v15780_v55 }
0x16ed   : > { %15786 = vadd.xlane.f32.xlu1 %v15785_v49 }
0x177a   : > { %v15787_v37 = vpop.xlane.xlu1 %15786 }
0x177b   : > { %v15788_v28 = vmul.f32 0.0013020834, %v15787_v37 }
0x177d   : > { %v15789_v47 = vadd.f32 1e-05, %v15788_v28 }
0x177f   : > { %21677 = vrsqrt.f32 %v15789_v47 }
0x1789   : > { %v21678_v62 = vpop.eup %21677 }
0x178a   : > { %v15791_v17 = vmul.f32 %v21678_v62, %v15769_v53  ;;  %v15792_v42 = vmul.f32 %v21678_v62, %v15770_v10  ;;  %v15793_v34 = vmul.f32 %v21678_v62, %v15771_v63  ;;  %v15794_v33 = vmul.f32 %v21678_v62, %v15772_v2 }
0x178b   : > { %v15795_v23 = vmul.f32 %v21678_v62, %v15773_v35  ;;  %v15796_v38 = vmul.f32 %v21678_v62, %v15774_v32 }
0x178c   : > { %v15821_v48 = vmul.f32 %v15800_v56, %v15791_v17  ;;  %v15822_v43 = vmul.f32 %v15804_v45, %v15792_v42  ;;  %v15823_v57 = vmul.f32 %v15808_v14, %v15793_v34  ;;  %v15824_v52 = vmul.f32 %v15812_v60, %v15794_v33  ;;  %15866 = sbr.rel (%p18776_p8) target bundleno = 6812 (0x1a9c), region = 108 }
0x178d   : > { %v15825_v20 = vmul.f32 %v15816_v11, %v15795_v23  ;;  %v15826_v8 = vmul.f32 %v15820_v16, %v15796_v38 }
0x178e   : > { %v15851_v54 = vadd.f32 %v15830_v36, %v15821_v48  ;;  %v15852_v1 = vadd.f32 %v15834_v6, %v15822_v43  ;;  %v15853_v40 = vadd.f32 %v15838_v46, %v15823_v57  ;;  %v15854_v31 = vadd.f32 %v15842_v15, %v15824_v52 }
0x178f   : > { %v15855_v0 = vadd.f32 %v15846_v5, %v15825_v20  ;;  %v15856_v53 = vadd.f32 %v15850_v25, %v15826_v8 }
0x1790   : > { %15857 = vst [vmem:[#allocation2] sm:$0xff] %v15851_v54  ;;  %15858 = vst [vmem:[#allocation2 + $0x8] sm:$0xff] %v15852_v1 }
0x1791   : > { %15859 = vst [vmem:[#allocation2 + $0x10] sm:$0xff] %v15853_v40  ;;  %15860 = vst [vmem:[#allocation2 + $0x18] sm:$0xff] %v15854_v31 }
0x1792   : > { %15861 = vst [vmem:[#allocation2 + $0x20] sm:$0xff] %v15855_v0  ;;  %15862 = vst [vmem:[#allocation2 + $0x28] sm:$0xff] %v15856_v53 }
0x1793   : > { %v15869_v10 = vadd.f32 %v15852_v1, %v15851_v54  ;;  %v16086_v6 = vld [vmem:[#allocation14 + $0x80] sm:$0xff]  ;;  %v16087_v27 = vld [vmem:[#allocation14 + $0x88] sm:$0xff]  ;;  %v16088_v17 = vld [vmem:[#allocation14 + $0x90] sm:$0xff]  ;;  %vm16619_vm2 = vcmask 1040384   ;;  %vm16626_vm3 = vcmask 0   ;;  %s25459_s28 = sld [smem:[#allocation45_spill]] }
0x1794   : > { %v25115_v14 = vpack.c.bf16 %v16087_v27, %v16086_v6  ;;  %v16070_v51 = vld [vmem:[#allocation14] sm:$0xff]  ;;  %v16071_v60 = vld [vmem:[#allocation14 + $0x8] sm:$0xff]  ;;  %v16089_v42 = vld [vmem:[#allocation14 + $0x98] sm:$0xff] }
0x1795   : > { %v15870_v63 = vadd.f32 %v15869_v10, %v15853_v40  ;;  %v16118_v62 = vld [vmem:[#allocation14 + $0x180] sm:$0xff]  ;;  %v25117_v46 = vpack.c.bf16 %v16071_v60, %v16070_v51  ;;  %v16119_v15 = vld [vmem:[#allocation14 + $0x188] sm:$0xff]  ;;  %v16072_v34 = vld [vmem:[#allocation14 + $0x10] sm:$0xff]  ;;  %v25125_v33 = vpack.c.bf16 %v16089_v42, %v16088_v17 }
0x1796   : > { %v16102_v24 = vld [vmem:[#allocation14 + $0x100] sm:$0xff]  ;;  %v16103_v11 = vld [vmem:[#allocation14 + $0x108] sm:$0xff]  ;;  %18991 = vmatprep.subr.bf16.mxu0 %v25115_v14  ;;  %v25120_v29 = vpack.c.bf16 %v16119_v15, %v16118_v62  ;;  %v16073_v5 = vld [vmem:[#allocation14 + $0x18] sm:$0xff] }
0x1797   : > { %v15871_v2 = vadd.f32 %v15870_v63, %v15854_v31  ;;  %v25122_v16 = vpack.c.bf16 %v16103_v11, %v16102_v24  ;;  %18993 = vmatpush3.bf16.msra.mxu0 %v25117_v46  ;;  %v16120_v25 = vld [vmem:[#allocation14 + $0x190] sm:$0xff]  ;;  %v16121_v23 = vld [vmem:[#allocation14 + $0x198] sm:$0xff]  ;;  %v25128_v38 = vpack.c.bf16 %v16073_v5, %v16072_v34  ;;  %v16090_v52 = vld [vmem:[#allocation14 + $0xa0] sm:$0xff] }
0x1798   : > { %19023 = vmatprep.subr.bf16.mxu1 %v25120_v29  ;;  %v25130_v48 = vpack.c.bf16 %v16121_v23, %v16120_v25  ;;  %v16104_v43 = vld [vmem:[#allocation14 + $0x110] sm:$0xff]  ;;  %v16105_v57 = vld [vmem:[#allocation14 + $0x118] sm:$0xff]  ;;  %18995 = vmatprep.subr.bf16.mxu0 %v25125_v33  ;;  %v16091_v8 = vld [vmem:[#allocation14 + $0xa8] sm:$0xff] }
0x1799   : > { %v15872_v61 = vadd.f32 %v15871_v2, %v15855_v0  ;;  %19025 = vmatpush3.bf16.msra.mxu1 %v25122_v16  ;;  %v25134_v20 = vpack.c.bf16 %v16105_v57, %v16104_v43  ;;  %v16107_v2 = vld [vmem:[#allocation14 + $0x128] sm:$0xff]  ;;  %v16078_v51 = vld [vmem:[#allocation14 + $0x40] sm:$0xff]  ;;  %v16096_v15 = vld [vmem:[#allocation14 + $0xd0] sm:$0xff] }
0x179a   : > { %19027 = vmatprep.subr.bf16.mxu1 %v25130_v48  ;;  %v16127_v6 = vld [vmem:[#allocation14 + $0x1c8] sm:$0xff]  ;;  %v16097_v24 = vld [vmem:[#allocation14 + $0xd8] sm:$0xff]  ;;  %v16110_v17 = vld [vmem:[#allocation14 + $0x140] sm:$0xff] }
0x179b   : > { %v15873_v12 = vadd.f32 %v15872_v61, %v15856_v53  ;;  %18997 = vmatpush3.bf16.msra.mxu0 %v25128_v38  ;;  %v16092_v61 = vld [vmem:[#allocation14 + $0xb0] sm:$0xff]  ;;  %v16079_v60 = vld [vmem:[#allocation14 + $0x48] sm:$0xff]  ;;  %v16129_v25 = vld [vmem:[#allocation14 + $0x1d8] sm:$0xff]  ;;  %v25169_v23 = vpack.c.bf16 %v16097_v24, %v16096_v15 }
0x179c   : > { %v16111_v42 = vld [vmem:[#allocation14 + $0x148] sm:$0xff]  ;;  %v25166_v34 = vpack.c.bf16 %v16079_v60, %v16078_v51  ;;  %v16128_v5 = vld [vmem:[#allocation14 + $0x1d0] sm:$0xff]  ;;  %v16081_v57 = vld [vmem:[#allocation14 + $0x58] sm:$0xff] }
0x179d   : > { %15874 = vadd.xlane.f32.xlu0 %v15873_v12  ;;  %v16093_v12 = vld [vmem:[#allocation14 + $0xb8] sm:$0xff]  ;;  %19029 = vmatpush3.bf16.msra.mxu1 %v25134_v20  ;;  %v16080_v43 = vld [vmem:[#allocation14 + $0x50] sm:$0xff] }
0x179e   : > { %v16133_v51 = vld [vmem:[#allocation14 + $0x1f8] sm:$0xff]  ;;  %v16084_v15 = vld [vmem:[#allocation14 + $0x70] sm:$0xff] }
0x179f   : > { %v16085_v24 = vld [vmem:[#allocation14 + $0x78] sm:$0xff] }
0x182a   : > { %v15875_v35 = vpop.xlane.xlu0 %15874 }
0x182b   : > { %v15876_v21 = vmul.f32 0.0013020834, %v15875_v35  ;;  %v25145_v35 = vpack.c.bf16 %v16093_v12, %v16092_v61  ;;  %v16131_v61 = vld [vmem:[#allocation14 + $0x1e8] sm:$0xff] }
0x182d   : > { %v25091_v30 = vsub.f32 %v15851_v54, %v15876_v21  ;;  %v25093_v32 = vsub.f32 %v15852_v1, %v15876_v21  ;;  %v25095_v19 = vsub.f32 %v15853_v40, %v15876_v21  ;;  %v25097_v4 = vsub.f32 %v15854_v31, %v15876_v21  ;;  %v16074_v54 = vld [vmem:[#allocation14 + $0x20] sm:$0xff]  ;;  %v16075_v1 = vld [vmem:[#allocation14 + $0x28] sm:$0xff] }
0x182e   : > { %v25103_v55 = vsub.f32 %v15855_v0, %v15876_v21  ;;  %v25107_v37 = vsub.f32 %v15856_v53, %v15876_v21  ;;  %v25137_v40 = vpack.c.bf16 %v16091_v8, %v16090_v52  ;;  %v16122_v31 = vld [vmem:[#allocation14 + $0x1a0] sm:$0xff]  ;;  %v16123_v0 = vld [vmem:[#allocation14 + $0x1a8] sm:$0xff]  ;;  %v25140_v10 = vpack.c.bf16 %v16075_v1, %v16074_v54  ;;  %v16076_v21 = vld [vmem:[#allocation14 + $0x30] sm:$0xff] }
0x182f   : > { %v15883_v13 = vmul.f32 %v25091_v30, %v25091_v30  ;;  %v15884_v22 = vmul.f32 %v25093_v32, %v25093_v32  ;;  %v15885_v3 = vmul.f32 %v25095_v19, %v25095_v19  ;;  %v15886_v28 = vmul.f32 %v25097_v4, %v25097_v4  ;;  %v16106_v53 = vld [vmem:[#allocation14 + $0x120] sm:$0xff]  ;;  %v16099_v54 = vld [vmem:[#allocation14 + $0xe8] sm:$0xff] }
0x1830   : > { %v15887_v58 = vmul.f32 %v25103_v55, %v25103_v55  ;;  %v15888_v36 = vmul.f32 %v25107_v37, %v25107_v37  ;;  %v25142_v63 = vpack.c.bf16 %v16123_v0, %v16122_v31  ;;  %18999 = vmatprep.subr.bf16.mxu0 %v25137_v40  ;;  %v25172_v52 = vpack.c.bf16 %v16111_v42, %v16110_v17  ;;  %v16098_v8 = vld [vmem:[#allocation14 + $0xe0] sm:$0xff]  ;;  %v16112_v31 = vld [vmem:[#allocation14 + $0x150] sm:$0xff]  ;;  %v16113_v0 = vld [vmem:[#allocation14 + $0x158] sm:$0xff] }
0x1831   : > { %v15889_v49 = vadd.f32 %v15884_v22, %v15883_v13  ;;  %v16077_v13 = vld [vmem:[#allocation14 + $0x38] sm:$0xff]  ;;  %v16124_v22 = vld [vmem:[#allocation14 + $0x1b0] sm:$0xff]  ;;  %19001 = vmatpush3.bf16.msra.mxu0 %v25140_v10  ;;  %v25175_v1 = vpack.c.bf16 %v16129_v25, %v16128_v5  ;;  %v25181_v12 = vpack.c.bf16 %v16099_v54, %v16098_v8  ;;  %v16150_v8 = vld [vmem:[#allocation14 + $0x280] sm:$0xff] }
0x1832   : > { %19031 = vmatprep.subr.bf16.mxu1 %v25142_v63  ;;  %19003 = vmatprep.subr.bf16.mxu0 %v25145_v35  ;;  %25440 = vst [vmem:[#allocation35_spill] sm:$0xff] %v25172_v52  ;;  %v16116_v5 = vld [vmem:[#allocation14 + $0x170] sm:$0xff]  ;;  %v16117_v25 = vld [vmem:[#allocation14 + $0x178] sm:$0xff]  ;;  %v16151_v54 = vld [vmem:[#allocation14 + $0x288] sm:$0xff] }
0x1833   : > { %v15890_v47 = vadd.f32 %v15889_v49, %v15885_v3  ;;  %v25148_v3 = vpack.c.bf16 %v16107_v2, %v16106_v53  ;;  %v16125_v49 = vld [vmem:[#allocation14 + $0x1b8] sm:$0xff]  ;;  %25441 = vst [vmem:[#allocation36_spill] sm:$0xff] %v25175_v1  ;;  %v25178_v53 = vpack.c.bf16 %v16081_v57, %v16080_v43  ;;  %v16130_v2 = vld [vmem:[#allocation14 + $0x1e0] sm:$0xff]  ;;  %v25202_v43 = vpack.c.bf16 %v16085_v24, %v16084_v15 }
0x1834   : > { %v25206_v57 = vpack.c.bf16 %v16117_v25, %v16116_v5 }
0x1835   : > { %v15891_v56 = vadd.f32 %v15890_v47, %v15886_v28  ;;  %v16108_v28 = vld [vmem:[#allocation14 + $0x130] sm:$0xff]  ;;  %v25151_v47 = vpack.c.bf16 %v16125_v49, %v16124_v22  ;;  %19033 = vmatpush3.bf16.msra.mxu1 %v25148_v3  ;;  %v25184_v22 = vpack.c.bf16 %v16113_v0, %v16112_v31  ;;  %v25210_v31 = vpack.c.bf16 %v16151_v54, %v16150_v8 }
0x1836   : > { %v16100_v49 = vld [vmem:[#allocation14 + $0xf0] sm:$0xff]  ;;  %25446 = vst [vmem:[#allocation41_spill] sm:$0xff] %v25206_v57 }
0x1837   : > { %v15892_v7 = vadd.f32 %v15891_v56, %v15887_v58  ;;  %25437 = vst [vmem:[#allocation32_spill] sm:$0xff] %v25151_v47  ;;  %v16109_v58 = vld [vmem:[#allocation14 + $0x138] sm:$0xff]  ;;  %v16094_v56 = vld [vmem:[#allocation14 + $0xc0] sm:$0xff]  ;;  %19035 = vmatprep.subr.bf16.mxu1 %v25151_v47  ;;  %25442 = vst [vmem:[#allocation37_spill] sm:$0xff] %v25184_v22 }
0x1838   : > { %v25160_v62 = vpack.c.bf16 %v16109_v58, %v16108_v28  ;;  %v16101_v28 = vld [vmem:[#allocation14 + $0xf8] sm:$0xff]  ;;  %v25187_v58 = vpack.c.bf16 %v16131_v61, %v16130_v2 }
0x1839   : > { %v15893_v45 = vadd.f32 %v15892_v7, %v15888_v36  ;;  %v16095_v36 = vld [vmem:[#allocation14 + $0xc8] sm:$0xff]  ;;  %v25154_v7 = vpack.c.bf16 %v16077_v13, %v16076_v21  ;;  %v16082_v21 = vld [vmem:[#allocation14 + $0x60] sm:$0xff]  ;;  %v25193_v60 = vpack.c.bf16 %v16101_v28, %v16100_v49 }
0x183a   : > { %v25157_v27 = vpack.c.bf16 %v16095_v36, %v16094_v56  ;;  %25438 = vst [vmem:[#allocation33_spill] sm:$0xff] %v25160_v62  ;;  %19037 = vmatpush3.bf16.msra.mxu1 %v25160_v62  ;;  %v16083_v13 = vld [vmem:[#allocation14 + $0x68] sm:$0xff]  ;;  %25443 = vst [vmem:[#allocation38_spill] sm:$0xff] %v25187_v58  ;;  %v16114_v56 = vld [vmem:[#allocation14 + $0x160] sm:$0xff] }
0x183b   : > { %15894 = vadd.xlane.f32.xlu0 %v15893_v45  ;;  %v16126_v45 = vld [vmem:[#allocation14 + $0x1c0] sm:$0xff]  ;;  %19005 = vmatpush3.bf16.msra.mxu0 %v25154_v7  ;;  %v16115_v36 = vld [vmem:[#allocation14 + $0x168] sm:$0xff] }
0x183c   : > { %v25163_v11 = vpack.c.bf16 %v16127_v6, %v16126_v45  ;;  %19007 = vmatprep.subr.bf16.mxu0 %v25157_v27  ;;  %v25190_v45 = vpack.c.bf16 %v16083_v13, %v16082_v21  ;;  %v16132_v6 = vld [vmem:[#allocation14 + $0x1f0] sm:$0xff]  ;;  %v25196_v17 = vpack.c.bf16 %v16115_v36, %v16114_v56  ;;  %v25215_v13 = vld [vmem:[#allocation13 + $0x8] sm:$0xf] }
0x183d   : > { %v25199_v42 = vpack.c.bf16 %v16133_v51, %v16132_v6  ;;  %v15867_v21 = vld [vmem:[#allocation13] sm:$0xff]  ;;  %v15930_v24 = vrot.slane %v25215_v13, %v23558_v39  ;;  %v15990_v25 = vrot.slane %v25215_v13, %v24018_v59 }
0x183e   : > { %25439 = vst [vmem:[#allocation34_spill] sm:$0xff] %v25163_v11  ;;  %19039 = vmatprep.subr.bf16.mxu1 %v25163_v11  ;;  %25444 = vst [vmem:[#allocation39_spill] sm:$0xff] %v25196_v17  ;;  %v15914_v49 = vrot.slane %v15867_v21, %v23558_v39  ;;  %v15974_v28 = vrot.slane %v15867_v21, %v24018_v59  ;;  %v15922_v56 = vrot.slane %v15867_v21, %v25067_v44 }
0x183f   : > { %19009 = vmatpush3.bf16.msra.mxu0 %v25166_v34  ;;  %19041 = vmatpush3.bf16.msra.mxu1 %v25172_v52  ;;  %25445 = vst [vmem:[#allocation40_spill] sm:$0xff] %v25199_v42  ;;  %v15910_v36 = vrot.slane %v15867_v21, %v23378_v9  ;;  %v15918_v6 = vrot.slane %v15867_v21, %v24176_v26 }
0x1840   : > { %19011 = vmatprep.subr.bf16.mxu0 %v25169_v23  ;;  %19043 = vmatprep.subr.bf16.mxu1 %v25175_v1  ;;  %v15982_v51 = vrot.slane %v15867_v21, %v25070_v18  ;;  %v15978_v15 = vrot.slane %v15867_v21, %v24179_v41  ;;  %v15944_v5 = vrot.slane %v15914_v49, %v23378_v9 }
0x1841   : > { %v16004_v44 = vrot.slane %v15974_v28, %v23217_v50  ;;  %v15952_v8 = vrot.slane %v15922_v56, %v23378_v9  ;;  %v15940_v54 = vrot.slane %v15910_v36, %v23378_v9  ;;  %v15948_v18 = vrot.slane %v15918_v6, %v23378_v9 }
0x1842   : > { %v15960_v49 = vrot.slane %v15930_v24, %v23378_v9  ;;  %v16020_v6 = vrot.slane %v15990_v25, %v23217_v50 }
0x1843   : > { %19013 = vmatpush3.bf16.msra.mxu0 %v25178_v53  ;;  %19045 = vmatpush3.bf16.msra.mxu1 %v25184_v22 }
0x1844   : > { %19015 = vmatprep.subr.bf16.mxu0 %v25181_v12  ;;  %19047 = vmatprep.subr.bf16.mxu1 %v25187_v58 }
0x1847   : > { %19017 = vmatpush3.bf16.msra.mxu0 %v25190_v45  ;;  %19049 = vmatpush3.bf16.msra.mxu1 %v25196_v17 }
0x1848   : > { %19019 = vmatprep.subr.bf16.mxu0 %v25193_v60  ;;  %19051 = vmatprep.subr.bf16.mxu1 %v25199_v42 }
0x184b   : > { %19021 = vmatpush3.bf16.msra.mxu0 %v25202_v43  ;;  %19053 = vmatpush3.bf16.msra.mxu1 %v25206_v57 }
0x184c   : > { %19055 = vmatprep.subr.bf16.mxu0 %v25210_v31  ;;  %19087 = vmatprep.subr.bf16.mxu1 %v25115_v14  ;;  %v15970_v14 = vrot.slane %v15867_v21, %v23217_v50  ;;  %v16008_v21 = vrot.slane %v15978_v15, %v23217_v50 }
0x18c8   : > { %v15895_v0 = vpop.xlane.xlu0 %15894 }
0x18c9   : > { %v15896_v2 = vmul.f32 0.0013020834, %v15895_v0 }
0x18cb   : > { %v15897_v61 = vadd.f32 1e-05, %v15896_v2  ;;  %v16012_v2 = vrot.slane %v15982_v51, %v23217_v50 }
0x18cd   : > { %21703 = vrsqrt.f32 %v15897_v61  ;;  %v16000_v61 = vrot.slane %v15970_v14, %v23217_v50 }
0x18d7   : > { %v21704_v0 = vpop.eup %21703 }
0x18d8   : > { %v15900_v26 = vmul.f32 %v21704_v0, %v25093_v32  ;;  %v15902_v57 = vmul.f32 %v21704_v0, %v25097_v4  ;;  %v15899_v28 = vmul.f32 %v21704_v0, %v25091_v30  ;;  %v15901_v56 = vmul.f32 %v21704_v0, %v25095_v19 }
0x18d9   : > { %v15904_v36 = vmul.f32 %v21704_v0, %v25107_v37 }
0x18da   : > { %v15962_v39 = vmul.f32 %v15944_v5, %v15900_v26  ;;  %v15964_v51 = vmul.f32 %v15952_v8, %v15902_v57  ;;  %v15961_v42 = vmul.f32 %v15940_v54, %v15899_v28  ;;  %v15963_v14 = vmul.f32 %v15948_v18, %v15901_v56 }
0x18db   : > { %v15966_v17 = vmul.f32 %v15960_v49, %v15904_v36  ;;  %v15903_v49 = vmul.f32 %v21704_v0, %v25103_v55  ;;  %v15986_v56 = vrot.slane %v25215_v13, %v23217_v50 }
0x18dc   : > { %v16022_v15 = vadd.f32 %v16004_v44, %v15962_v39  ;;  %v16024_v58 = vadd.f32 %v16012_v2, %v15964_v51  ;;  %v16021_v24 = vadd.f32 %v16000_v61, %v15961_v42  ;;  %v16023_v22 = vadd.f32 %v16008_v21, %v15963_v14  ;;  %v16153_v14 = vld [vmem:[#allocation14 + $0x298] sm:$0xff] }
0x18dd   : > { %v16026_v32 = vadd.f32 %v16020_v6, %v15966_v17  ;;  %v15926_v39 = vrot.slane %v25215_v13, %v23378_v9 }
0x18de   : > { %v16033_v1 = vrot.slane %v16022_v15, 4  ;;  %v16045_v4 = vrot.slane %v16024_v58, 4  ;;  %v16027_v52 = vrot.slane %v16021_v24, 4  ;;  %v16039_v30 = vrot.slane %v16023_v22, 4 }
0x18df   : > { %v16057_v11 = vrot.slane %v16026_v32, 4  ;;  %v15956_v28 = vrot.slane %v15926_v39, %v23378_v9 }
0x18e0   : > { %v16034_v19 = vadd.f32 %v16033_v1, %v16022_v15  ;;  %v16046_v62 = vadd.f32 %v16045_v4, %v16024_v58  ;;  %v16028_v37 = vadd.f32 %v16027_v52, %v16021_v24  ;;  %v16040_v47 = vadd.f32 %v16039_v30, %v16023_v22  ;;  %v16134_v52 = vld [vmem:[#allocation14 + $0x200] sm:$0xff]  ;;  %v16135_v22 = vld [vmem:[#allocation14 + $0x208] sm:$0xff] }
0x18e1   : > { %v16058_v25 = vadd.f32 %v16057_v11, %v16026_v32  ;;  %v25250_v15 = vpack.c.bf16 %v16135_v22, %v16134_v52  ;;  %v25252_v32 = vld [vmem:[#allocation17] sm:$0x3f]  ;;  %v15965_v13 = vmul.f32 %v15956_v28, %v15903_v49  ;;  %v16143_v49 = vld [vmem:[#allocation14 + $0x248] sm:$0xff] }
0x18e2   : > { %v16035_v26 = vrot.slane %v16034_v19, 2  ;;  %v16047_v57 = vrot.slane %v16046_v62, 2  ;;  %v16029_v5 = vrot.slane %v16028_v37, 2  ;;  %v16041_v8 = vrot.slane %v16040_v47, 2  ;;  %v16158_v52 = vld [vmem:[#allocation14 + $0x2c0] sm:$0xff] }
0x18e3   : > { %v16059_v54 = vrot.slane %v16058_v25, 2 }
0x18e4   : > { %v16036_v42 = vadd.f32 %v16035_v26, %v16034_v19  ;;  %v16048_v17 = vadd.f32 %v16047_v57, %v16046_v62  ;;  %v16030_v44 = vadd.f32 %v16029_v5, %v16028_v37  ;;  %v16042_v18 = vadd.f32 %v16041_v8, %v16040_v47  ;;  %v16152_v47 = vld [vmem:[#allocation14 + $0x290] sm:$0xff]  ;;  %v16154_v5 = vld [vmem:[#allocation14 + $0x2a0] sm:$0xff]  ;;  %v16155_v8 = vld [vmem:[#allocation14 + $0x2a8] sm:$0xff] }
0x18e5   : > { %v16060_v2 = vadd.f32 %v16059_v54, %v16058_v25  ;;  %v25254_v0 = vpack.c.bf16 %v16153_v14, %v16152_v47  ;;  %v16136_v37 = vld [vmem:[#allocation14 + $0x210] sm:$0xff]  ;;  %v16137_v25 = vld [vmem:[#allocation14 + $0x218] sm:$0xff]  ;;  %v16016_v26 = vrot.slane %v15986_v56, %v23217_v50  ;;  %v16386_v54 = vrot.slane %v25252_v32, %v23217_v50  ;;  %v16162_v47 = vld [vmem:[#allocation14 + $0x2e0] sm:$0xff] }
0x18e6   : > { %v16037_v61 = vrot.slane %v16036_v42, 1  ;;  %v16049_v21 = vrot.slane %v16048_v17, 1  ;;  %v16031_v1 = vrot.slane %v16030_v44, 1  ;;  %v16043_v58 = vrot.slane %v16042_v18, 1  ;;  %v16157_v50 = vld [vmem:[#allocation14 + $0x2b8] sm:$0xff]  ;;  %v16160_v56 = vld [vmem:[#allocation14 + $0x2d0] sm:$0xff] }
0x18e7   : > { %v16061_v11 = vrot.slane %v16060_v2, 1  ;;  %v25260_v39 = vpack.c.bf16 %v16137_v25, %v16136_v37  ;;  %v16163_v14 = vld [vmem:[#allocation14 + $0x2e8] sm:$0xff]  ;;  %v16148_v25 = vld [vmem:[#allocation14 + $0x270] sm:$0xff] }
0x18e8   : > { %v16038_v36 = vadd.f32 %v16037_v61, %v16036_v42  ;;  %v16050_v6 = vadd.f32 %v16049_v21, %v16048_v17  ;;  %v16032_v62 = vadd.f32 %v16031_v1, %v16030_v44  ;;  %v16044_v51 = vadd.f32 %v16043_v58, %v16042_v18  ;;  %v16138_v17 = vld [vmem:[#allocation14 + $0x220] sm:$0xff]  ;;  %v16139_v44 = vld [vmem:[#allocation14 + $0x228] sm:$0xff]  ;;  %v16140_v21 = vld [vmem:[#allocation14 + $0x230] sm:$0xff] }
0x18e9   : > { %v16062_v24 = vadd.f32 %v16061_v11, %v16060_v2  ;;  %v25264_v42 = vpack.c.bf16 %v16155_v8, %v16154_v5  ;;  %v16025_v18 = vadd.f32 %v16016_v26, %v15965_v13  ;;  %v16156_v2 = vld [vmem:[#allocation14 + $0x2b0] sm:$0xff]  ;;  %v25268_v61 = vpack.c.bf16 %v16139_v44, %v16138_v17  ;;  %v16141_v1 = vld [vmem:[#allocation14 + $0x238] sm:$0xff]  ;;  %v16142_v11 = vld [vmem:[#allocation14 + $0x240] sm:$0xff] }
0x18ea   : > { %v16065_v4 = vmul.f32 0.125, %v16038_v36  ;;  %v16067_v30 = vmul.f32 0.125, %v16050_v6  ;;  %v16064_v19 = vmul.f32 0.125, %v16032_v62  ;;  %v16066_v55 = vmul.f32 0.125, %v16044_v51  ;;  %v16161_v36 = vld [vmem:[#allocation14 + $0x2d8] sm:$0xff]  ;;  %v16144_v6 = vld [vmem:[#allocation14 + $0x250] sm:$0xff] }
0x18eb   : > { %v16069_v57 = vmul.f32 0.125, %v16062_v24  ;;  %v16051_v58 = vrot.slane %v16025_v18, 4  ;;  %v25276_v22 = vpack.c.bf16 %v16141_v1, %v16140_v21  ;;  %v16145_v62 = vld [vmem:[#allocation14 + $0x258] sm:$0xff]  ;;  %v19078_v24 = vpack.c.bf16 %v16163_v14, %v16162_v47 }
0x18ec   : > { %16231 = vmatprep.mubr.f32.mxu0 %v16065_v4  ;;  %16301 = vmatprep.mubr.f32.mxu1 %v16067_v30  ;;  %v16147_v4 = vld [vmem:[#allocation14 + $0x268] sm:$0xff]  ;;  %v16149_v13 = vld [vmem:[#allocation14 + $0x278] sm:$0xff] }
0x18ed   : > { %16232 = vmatmul.mubr.f32.vlgmr.msra.gmra.mrb[0].mxu0 %v16064_v19  ;;  %16302 = vmatmul.mubr.f32.vlgmr.msra.gmra.mrb[0].mxu1 %v16066_v55  ;;  %v16052_v28 = vadd.f32 %v16051_v58, %v16025_v18  ;;  %v16164_v19 = vld [vmem:[#allocation14 + $0x2f0] sm:$0xff]  ;;  %v16165_v55 = vld [vmem:[#allocation14 + $0x2f8] sm:$0xff] }
0x18ee   : > { %19057 = vmatpush3.bf16.msra.mxu0 %v25250_v15  ;;  %16371 = vmatprep.mubr.f32.mxu0 %v16069_v57 }
0x18ef   : > { %19089 = vmatpush3.bf16.msra.mxu1 %v25117_v46  ;;  %19059 = vmatprep.subr.bf16.mxu0 %v25254_v0  ;;  %v25272_v46 = vpack.c.bf16 %v16157_v50, %v16156_v2  ;;  %v16053_v51 = vrot.slane %v16052_v28, 2 }
0x18f0   : > { %19091 = vmatprep.subr.bf16.mxu1 %v25125_v33  ;;  %16473 = vmatprep.mubr.f32.mxu1 %v16386_v54  ;;  %v16159_v33 = vld [vmem:[#allocation14 + $0x2c8] sm:$0xff]  ;;  %v16166_v54 = vld [vmem:[#allocation16] sm:$0x1] }
0x18f1   : > { %v16054_v30 = vadd.f32 %v16053_v51, %v16052_v28 }
0x18f2   : > { %19061 = vmatpush3.bf16.msra.mxu0 %v25260_v39 }
0x18f3   : > { %19093 = vmatpush3.bf16.msra.mxu1 %v25128_v38  ;;  %19063 = vmatprep.subr.bf16.mxu0 %v25264_v42  ;;  %v25280_v38 = vpack.c.bf16 %v16159_v33, %v16158_v52  ;;  %v16055_v26 = vrot.slane %v16054_v30, 1 }
0x18f4   : > { %19095 = vmatprep.subr.bf16.mxu1 %v25137_v40  ;;  %v25284_v40 = vpack.c.bf16 %v16143_v49, %v16142_v11 }
0x18f5   : > { %v16056_v57 = vadd.f32 %v16055_v26, %v16054_v30 }
0x18f6   : > { %19065 = vmatpush3.bf16.msra.mxu0 %v25268_v61 }
0x18f7   : > { %19097 = vmatpush3.bf16.msra.mxu1 %v25140_v10  ;;  %19067 = vmatprep.subr.bf16.mxu0 %v25272_v46  ;;  %v25288_v10 = vpack.c.bf16 %v16161_v36, %v16160_v56 }
0x18f8   : > { %19099 = vmatprep.subr.bf16.mxu1 %v25145_v35  ;;  %v19076_v35 = vpack.c.bf16 %v16145_v62, %v16144_v6 }
0x18fa   : > { %19069 = vmatpush3.bf16.msra.mxu0 %v25276_v22 }
0x18fb   : > { %19101 = vmatpush3.bf16.msra.mxu1 %v25154_v7  ;;  %19071 = vmatprep.subr.bf16.mxu0 %v25280_v38  ;;  %v16146_v7 = vld [vmem:[#allocation14 + $0x260] sm:$0xff] }
0x18fc   : > { %19103 = vmatprep.subr.bf16.mxu1 %v25157_v27  ;;  %v19080_v37 = vpack.c.bf16 %v16147_v4, %v16146_v7  ;;  %v19082_v27 = vpack.c.bf16 %v16165_v55, %v16164_v19 }
0x18fe   : > { %19073 = vmatpush3.bf16.msra.mxu0 %v25284_v40 }
0x18ff   : > { %19105 = vmatpush3.bf16.msra.mxu1 %v25166_v34  ;;  %19075 = vmatprep.subr.bf16.mxu0 %v25288_v10  ;;  %v19084_v34 = vpack.c.bf16 %v16149_v13, %v16148_v25 }
0x1900   : > { %19107 = vmatprep.subr.bf16.mxu1 %v25169_v23  ;;  %v16382_v23 = vrot.slane %v25252_v32, %v23378_v9  ;;  %v25447_v9 = vld [vmem:[#allocation32_spill] sm:$0xff] }
0x1902   : > { %19077 = vmatpush3.bf16.msra.mxu0 %v19076_v35 }
0x1903   : > { %19109 = vmatpush3.bf16.msra.mxu1 %v25178_v53  ;;  %19079 = vmatprep.subr.bf16.mxu0 %v19078_v24  ;;  %v16068_v53 = vmul.f32 0.125, %v16056_v57 }
0x1904   : > { %19111 = vmatprep.subr.bf16.mxu1 %v25181_v12  ;;  %v16394_v12 = vrot.slane %v25252_v32, %v24018_v59  ;;  %v25448_v59 = vld [vmem:[#allocation33_spill] sm:$0xff] }
0x1906   : > { %19081 = vmatpush3.bf16.msra.mxu0 %v19080_v37 }
0x1907   : > { %19113 = vmatpush3.bf16.msra.mxu1 %v25190_v45  ;;  %19083 = vmatprep.subr.bf16.mxu0 %v19082_v27  ;;  %v16402_v45 = vrot.slane %v25252_v32, %v24179_v41  ;;  %v25449_v41 = vld [vmem:[#allocation34_spill] sm:$0xff] }
0x1908   : > { %19115 = vmatprep.subr.bf16.mxu1 %v25193_v60  ;;  %v25456_v60 = vld [vmem:[#allocation30_spill] sm:$0xff] }
0x190a   : > { %19085 = vmatpush3.bf16.msra.mxu0 %v19084_v34 }
0x190b   : > { %19117 = vmatpush3.bf16.msra.mxu1 %v25202_v43  ;;  %19119 = vmatprep.subr.bf16.mxu0 %v25120_v29  ;;  %v25450_v29 = vld [vmem:[#allocation35_spill] sm:$0xff]  ;;  %v16390_v43 = vrot.slane %v25252_v32, %v25456_v60 }
0x190c   : > { %19151 = vmatprep.subr.bf16.mxu1 %v25210_v31  ;;  %v25457_v31 = vld [vmem:[#allocation41_spill] sm:$0xff] }
0x190d   : > { %16372 = vmatmul.mubr.f32.vlgmr.msra.gmra.mrb[2].mxu0 %v16068_v53 }
0x190e   : > { %19121 = vmatpush3.bf16.msra.mxu0 %v25122_v16  ;;  %16474 = vmatmul.mubr.f32.vlgmr.msra.gmra.mrb[2].mxu1 %v16382_v23  ;;  %v25451_v16 = vld [vmem:[#allocation36_spill] sm:$0xff] }
0x190f   : > { %19153 = vmatpush3.bf16.msra.mxu1 %v25250_v15  ;;  %19123 = vmatprep.subr.bf16.mxu0 %v25130_v48  ;;  %v25452_v48 = vld [vmem:[#allocation37_spill] sm:$0xff]  ;;  %v25458_v15 = vld [vmem:[#allocation31_spill] sm:$0xff] }
0x1910   : > { %19155 = vmatprep.subr.bf16.mxu1 %v25254_v0  ;;  %16543 = vmatprep.mubr.f32.mxu0 %v16394_v12  ;;  %v16398_v0 = vrot.slane %v25252_v32, %v25458_v15 }
0x1911   : > { %16613 = vmatprep.mubr.f32.mxu1 %v16402_v45 }
0x1912   : > { %19125 = vmatpush3.bf16.msra.mxu0 %v25134_v20  ;;  %v25453_v20 = vld [vmem:[#allocation38_spill] sm:$0xff] }
0x1913   : > { %19157 = vmatpush3.bf16.msra.mxu1 %v25260_v39  ;;  %19127 = vmatprep.subr.bf16.mxu0 %v25142_v63  ;;  %v25454_v63 = vld [vmem:[#allocation39_spill] sm:$0xff] }
0x1914   : > { %19159 = vmatprep.subr.bf16.mxu1 %v25264_v42 }
0x1916   : > { %19129 = vmatpush3.bf16.msra.mxu0 %v25148_v3  ;;  %v25455_v3 = vld [vmem:[#allocation40_spill] sm:$0xff] }
0x1917   : > { %19161 = vmatpush3.bf16.msra.mxu1 %v25268_v61  ;;  %19131 = vmatprep.subr.bf16.mxu0 %v25447_v9 }
0x1918   : > { %19163 = vmatprep.subr.bf16.mxu1 %v25272_v46 }
0x191a   : > { %19133 = vmatpush3.bf16.msra.mxu0 %v25448_v59 }
0x191b   : > { %19165 = vmatpush3.bf16.msra.mxu1 %v25276_v22  ;;  %19135 = vmatprep.subr.bf16.mxu0 %v25449_v41 }
0x191c   : > { %19167 = vmatprep.subr.bf16.mxu1 %v25280_v38 }
0x191e   : > { %19137 = vmatpush3.bf16.msra.mxu0 %v25450_v29 }
0x191f   : > { %19169 = vmatpush3.bf16.msra.mxu1 %v25284_v40  ;;  %19139 = vmatprep.subr.bf16.mxu0 %v25451_v16 }
0x1920   : > { %19171 = vmatprep.subr.bf16.mxu1 %v25288_v10 }
0x1922   : > { %19141 = vmatpush3.bf16.msra.mxu0 %v25452_v48 }
0x1923   : > { %19173 = vmatpush3.bf16.msra.mxu1 %v19076_v35  ;;  %19143 = vmatprep.subr.bf16.mxu0 %v25453_v20 }
0x1924   : > { %19175 = vmatprep.subr.bf16.mxu1 %v19078_v24 }
0x1926   : > { %19145 = vmatpush3.bf16.msra.mxu0 %v25454_v63 }
0x1927   : > { %19177 = vmatpush3.bf16.msra.mxu1 %v19080_v37  ;;  %19147 = vmatprep.subr.bf16.mxu0 %v25455_v3 }
0x1928   : > { %19179 = vmatprep.subr.bf16.mxu1 %v19082_v27 }
0x192a   : > { %19149 = vmatpush3.bf16.msra.mxu0 %v25457_v31 }
0x192b   : > { %19181 = vmatpush3.bf16.msra.mxu1 %v19084_v34 }
0x192d   : > { %16544 = vmatmul.mubr.f32.vlgmr.msra.gmra.mrb[4].mxu0 %v16390_v43 }
0x192e   : > { %16614 = vmatmul.mubr.f32.vlgmr.msra.gmra.mrb[4].mxu1 %v16398_v0 }
0x19c0   : > { %v18812_v5 = vpop.f32.mrb[0].mxu0  ;;  %v18847_v8 = vpop.f32.mrb[0].mxu1 }
0x19c1   : > { %v18813_v39 = vpop.f32.mrb[1].mxu0  ;;  %v18848_v42 = vpop.f32.mrb[1].mxu1 }
0x19c2   : > { %v18814_v17 = vadd.f32 %v18813_v39, %v18812_v5  ;;  %v18849_v44 = vadd.f32 %v18848_v42, %v18847_v8 }
0x19c4   : > { %v16234_v18 = vadd.f32 %v18814_v17, %v16166_v54 }
0x19c6   : > { %v16304_v2 = vadd.f32 %v18849_v44, %v16234_v18 }
0x19e0   : > { %v18882_v50 = vpop.f32.mrb[2].mxu0 }
0x19e1   : > { %v18883_v61 = vpop.f32.mrb[3].mxu0  ;;  %v18917_v46 = vpop.f32.mrb[2].mxu1 }
0x19e2   : > { %v18884_v21 = vadd.f32 %v18883_v61, %v18882_v50  ;;  %v18918_v1 = vpop.f32.mrb[3].mxu1 }
0x19e3   : > { %v18919_v58 = vadd.f32 %v18918_v1, %v18917_v46 }
0x19e4   : > { %v16374_v32 = vadd.f32 %v18884_v21, %v16304_v2 }
0x19e5   : > { %v16476_v11 = vadd.f32 %v18919_v58, %v16166_v54 }
0x19e6   : > { %v16620_v52 = vsel %vm16619_vm2, %v16374_v32, 0.0 }
0x19e7   : > { %16621 = vadd.xlane.f32.xlu1 %v16620_v52 }
0x1a00   : > { %v18952_v33 = vpop.f32.mrb[4].mxu0 }
0x1a01   : > { %v18953_v22 = vpop.f32.mrb[5].mxu0  ;;  %v18987_v38 = vpop.f32.mrb[4].mxu1 }
0x1a02   : > { %v18954_v49 = vadd.f32 %v18953_v22, %v18952_v33  ;;  %v18988_v28 = vpop.f32.mrb[5].mxu1 }
0x1a03   : > { %v18989_v56 = vadd.f32 %v18988_v28, %v18987_v38 }
0x1a04   : > { %v16546_v36 = vadd.f32 %v18954_v49, %v16476_v11 }
0x1a06   : > { %v16616_v40 = vadd.f32 %v18989_v56, %v16546_v36 }
0x1a08   : > { %v16628_v10 = vsel %vm16619_vm2, %v16616_v40, 0.0 }
0x1a09   : > { %16629 = vadd.xlane.f32.xlu1 %v16628_v10 }
0x1a74   : > { %v16622_v6 = vpop.xlane.xlu1 %16621 }
0x1a75   : > { %v16624_v62 = vmul.f32 0.0078125, %v16622_v6 }
0x1a77   : > { %v16625_v51 = vmax.f32 %v16624_v62, 0.0 }
0x1a79   : > { %16627 = vst.msk [vmem:[%s25459_s28] sm:$0x1] %vm16626_vm3, %v16625_v51 }
0x1a96   : > { %v16630_v47 = vpop.xlane.xlu1 %16629 }
0x1a97   : > { %v16631_v14 = vmul.f32 0.0078125, %v16630_v47 }
0x1a99   : > { %v16632_v35 = vmax.f32 %v16631_v14, 0.0 }
0x1a9b   : > { %16633 = vst.msk [vmem:[%s25459_s28 + $0x1] sm:$0x1] %vm16626_vm3, %v16632_v35 }
0x1a9c PF: > { %s25460_s16 = sld [smem:[#allocation28_spill]]  ;;  %s25461_s18 = sld [smem:[#allocation26_spill]] }
0x1a9d   : > { %s25462_s15 = sld [smem:[#allocation29_spill]]  ;;  %s25463_s13 = smov %s22045_s14 }
0x1aa2   : > { %p29_p9 = scmp.ge.s32.totalorder %s25460_s16, 5   ;;  %s25464_s14 = smov %s25461_s18 }
0x1aa4   :  { %31 = sbr.rel (!%p29_p9) target bundleno = 15 (0xf), region = 173 }
0x1aab   :  { %16645 = vsyncpa [#allocation4], 1 }
0x1aac   :  { %16647 = vsyncpa [#allocation4 + $0x1], 1 }
0x1aad   :  { %16648 = vsyncpa [#allocation6], 1 }
0x1aae   :  { %16650 = vsyncpa [#allocation6 + $0x1], 1 }
0x1aaf   :  { %16651 = vsyncpa [#allocation9], 1 }
0x1ab0   :  { %16653 = vsyncpa [#allocation9 + $0x1], 1 }
0x1ab1   :  { %16654 = vsyncpa [#allocation12], 1 }
0x1ab2   :  { %16656 = vsyncpa [#allocation12 + $0x1], 1 }
0x1ab3   :  { %16657 = vsyncpa [#allocation15], 1 }
0x1ab4   :  { %16658 = vsyncpa [#allocation18], 1 }

</bundles_post_ra>
